<compile_context>
chip_gen: v7x
topology: tpu7x:2x2x1
jax: 0.10.0
libtpu: 0.0.40
codegen_flags: <defaults>
</compile_context>

<pallas_src>
import jax
import jax.numpy as jnp
from jax.experimental import pallas as pl
from jax.experimental.pallas import tpu as pltpu

EPS = 1e-5            # PyTorch LayerNorm default eps
BF16 = jnp.bfloat16

_PARAM_ORDER = ("w1", "bb1", "gs", "ws", "wsb", "w2", "bb2", "wf")


def _normalize(x):
    """LayerNorm statistics only (affine folded into downstream weights).
    Single-pass: var = E[x^2] - mean^2, so the two cross-lane reductions are
    independent (can overlap on the XLU). f32 throughout."""
    mu = jnp.mean(x, axis=-1, keepdims=True)
    ms = jnp.mean(x * x, axis=-1, keepdims=True)
    return (x - mu) * jax.lax.rsqrt((ms - mu * mu) + EPS)


def gmlp_kernel(x_ref,
                w1_ref, bb1_ref,     # proj1 (D, F) bf16 (LN1 gamma folded), bias (1, F) f32
                gs_ref,              # SGU LN gamma (1, F/2) f32 (applied post spatial matmul)
                ws_ref, wsb_ref,     # SGU spatial weight (N, N) bf16, fused bias (N, F/2) f32
                w2_ref, bb2_ref,     # proj2 (F/2, D) bf16, bias (1, D) f32
                wf_ref,              # final fc (D, F) bf16, no bias
                o_ref):
    bblk, n, d = x_ref.shape
    # Fold the batch block into the matmul M dimension: (Bblk, N, D) -> (Bblk*N, D).
    x = x_ref[...].reshape(bblk * n, d)            # f32
    shortcut = x

    # --- GMLPBlock ---
    xn = _normalize(x).astype(BF16)                # LN1 (affine folded into w1/bb1)

    # proj1: single 256-lane-wide dot; z1/z2 are static 128-aligned lane slices
    # (no relayout). On v5e a 2x128 split would also be fine — same math.
    h = jnp.dot(xn, w1_ref[...], preferred_element_type=jnp.float32) + bb1_ref[0]
    # tanh GELU -> EUP slot instead of a long erf VPU polynomial.
    h = jax.nn.gelu(h, approximate=True)
    half = h.shape[-1] // 2
    z1 = h[:, :half]
    z2 = _normalize(h[:, half:])                   # SGU LN (affine folded below)

    # Spatial gating unit: per-batch (N, N) @ (N, F/2) sequence mix, unrolled
    # over the small Bblk.  LN affine + SGU bias fused as  sp * gs + wsb_full.
    ws = ws_ref[...]
    gs = gs_ref[0]
    wsb = wsb_ref[...]
    gated_rows = []
    for b in range(bblk):
        zb = z2[b * n:(b + 1) * n, :].astype(BF16)     # static, tile-aligned slice
        sp = jnp.dot(ws, zb, preferred_element_type=jnp.float32)
        gated_rows.append(sp * gs + wsb)
    z2g = jnp.concatenate(gated_rows, axis=0)          # (Bblk*N, F/2)

    gated = (z1 * z2g).astype(BF16)
    y = jnp.dot(gated, w2_ref[...], preferred_element_type=jnp.float32) + bb2_ref[0]
    y = y + shortcut                                   # residual (f32)

    # --- gMLP.fc (flag_pool='none' -> no pooling), bias-free Linear ---
    out = jnp.dot(y.astype(BF16), wf_ref[...], preferred_element_type=jnp.float32)
    o_ref[...] = out.reshape(bblk, n, -1).astype(o_ref.dtype)


def _prep_params(params):
    """HBM-side fold / cast so the kernel sees MXU-friendly operands.
    All folds happen in f32 *before* the bf16 cast."""
    g1, b1 = params["g1"], params["b1"]          # LN1 affine (1, D)
    w1, bb1 = params["w1"], params["bb1"]        # (D, F), (1, F)
    gs, bs = params["gs"], params["bs"]          # SGU LN affine (1, F/2)
    ws, wsb = params["ws"], params["wsb"]        # (N, N), (1, N)

    w1_f = w1 * g1[0][:, None]                   # fold LN1 gamma into proj1 rows
    bb1_f = bb1 + b1 @ w1                        # fold LN1 beta into proj1 bias
    # ws @ (z*gs + bs) + wsb.T  ==  (ws @ z) * gs + (wsb.T + rowsum(ws) * bs)
    wsb_full = wsb.T + jnp.sum(ws, axis=1, keepdims=True) * bs     # (N, F/2)

    f32 = jnp.float32
    return {
        "w1":  w1_f.astype(BF16),
        "bb1": bb1_f.astype(f32),
        "gs":  gs.astype(f32),
        "ws":  ws.astype(BF16),
        "wsb": wsb_full.astype(f32),
        "w2":  params["w2"].astype(BF16),
        "bb2": params["bb2"].astype(f32),
        "wf":  params["wf"].astype(BF16),
    }


def _build_call(B, N, D, F, block_b, out_dtype, p, single_buffer_weights):
    def const_spec(arr):
        idx = (0,) * arr.ndim
        if single_buffer_weights:
            # Constant index_map -> block never changes; single-buffer so big
            # weights don't double their VMEM footprint at real model sizes.
            return pl.BlockSpec(arr.shape, lambda b: idx,
                                pipeline_mode=pl.Buffered(1))
        return pl.BlockSpec(arr.shape, lambda b: idx)

    in_specs = [pl.BlockSpec((block_b, N, D), lambda b: (b, 0, 0))]
    in_specs += [const_spec(p[k]) for k in _PARAM_ORDER]
    out_spec = pl.BlockSpec((block_b, N, F), lambda b: (b, 0, 0))

    half = F // 2
    flops = 2 * B * N * (D * F          # proj1
                         + N * half     # spatial gating matmul
                         + half * D     # proj2
                         + D * F)       # final fc
    bytes_accessed = (B * N * D * 4
                      + B * N * F * jnp.dtype(out_dtype).itemsize
                      + 2 * (D * F + N * N + half * D + D * F)      # bf16 weights
                      + 4 * (F + half + N * half + D))              # f32 biases

    return pl.pallas_call(
        gmlp_kernel,
        out_shape=jax.ShapeDtypeStruct((B, N, F), out_dtype),
        grid_spec=pltpu.PrefetchScalarGridSpec(
            num_scalar_prefetch=0,
            grid=(B // block_b,),
            in_specs=in_specs,
            out_specs=out_spec,
        ),
        compiler_params=pltpu.CompilerParams(
            dimension_semantics=("parallel",),
            # v7x scaling guard (64 MiB physical VMEM): activation blocks x2
            # buffers + weights x1 buffer must stay under this.
            vmem_limit_bytes=48 * 1024 * 1024,
        ),
        cost_estimate=pl.CostEstimate(
            flops=flops,
            transcendentals=B * N * F,      # tanh GELU
            bytes_accessed=bytes_accessed,
        ),
    )


def gmlp_forward(x, params, *, block_b=None, out_dtype=jnp.float32):
    B, N, D = x.shape
    F = params["w1"].shape[1]
    if block_b is None:
        # Two fat grid steps when B is even: amortizes the ~0.35 us per-step
        # overhead and splits evenly across the two v7x TensorCores.
        # (On 1-TC v5e/v6e a single step, block_b=B, is equally good.)
        block_b = B // 2 if B % 2 == 0 else B
    assert B % block_b == 0, (B, block_b)

    p = _prep_params(params)
    args = (x,) + tuple(p[k] for k in _PARAM_ORDER)
    try:
        return _build_call(B, N, D, F, block_b, out_dtype, p, True)(*args)
    except Exception:
        # Fallback for jax versions without BlockSpec(pipeline_mode=pl.Buffered(1)).
        return _build_call(B, N, D, F, block_b, out_dtype, p, False)(*args)


def gmlp_reference(x, params):
    """Pure-JAX mirror of the PyTorch forward (batch_first=True, flag_pool='none',
    gmlp_layers=1), with the same bf16-operand / f32-accumulation matmul policy
    as the kernel but exact (erf) GELU and unfolded LayerNorms."""
    def ln(v, g, b):
        mu = jnp.mean(v, -1, keepdims=True)
        var = jnp.mean(jnp.square(v - mu), -1, keepdims=True)
        return (v - mu) * jax.lax.rsqrt(var + EPS) * g + b

    bf = lambda a: a.astype(BF16)
    half = params["w1"].shape[1] // 2

    xs = jnp.transpose(x, (1, 0, 2))                     # (B,N,D) -> (N,B,D)
    shortcut = xs
    h = ln(xs, params["g1"][0], params["b1"][0])
    h = jnp.einsum("nbd,df->nbf", bf(h), bf(params["w1"]),
                   preferred_element_type=jnp.float32) + params["bb1"][0]
    h = jax.nn.gelu(h, approximate=False)                # PyTorch nn.GELU() (erf)
    z1, z2 = h[..., :half], h[..., half:]
    z2 = ln(z2, params["gs"][0], params["bs"][0])
    z2 = jnp.einsum("ij,jbd->ibd", bf(params["ws"]), bf(z2),
                    preferred_element_type=jnp.float32) + params["wsb"][0][:, None, None]
    h = z1 * z2
    h = jnp.einsum("nbd,df->nbf", bf(h), bf(params["w2"]),
                   preferred_element_type=jnp.float32) + params["bb2"][0]
    h = h + shortcut
    h = jnp.transpose(h, (1, 0, 2))                      # back to (B,N,D)
    return jnp.einsum("bnd,df->bnf", bf(h), bf(params["wf"]),
                      preferred_element_type=jnp.float32)


def init_params(key, d_model, d_ffn, seq_len):
    ks = jax.random.split(key, 4)
    d_half = d_ffn // 2
    f32 = jnp.float32
    return {
        "g1":  jnp.ones((1, d_model), f32),
        "b1":  jnp.zeros((1, d_model), f32),
        "w1":  (0.02 * jax.random.normal(ks[0], (d_model, d_ffn))).astype(f32),
        "bb1": jnp.zeros((1, d_ffn), f32),
        "gs":  jnp.ones((1, d_half), f32),
        "bs":  jnp.zeros((1, d_half), f32),
        "ws":  jax.random.uniform(ks[1], (seq_len, seq_len), f32, -0.01, 0.01),
        "wsb": jnp.ones((1, seq_len), f32),              # SGU bias init = 1.0
        "w2":  (0.02 * jax.random.normal(ks[2], (d_half, d_model))).astype(f32),
        "bb2": jnp.zeros((1, d_model), f32),
        "wf":  (0.02 * jax.random.normal(ks[3], (d_model, d_ffn))).astype(f32),
    }


if __name__ == "__main__":
    # Lane-dense demo sizes: d_model / d_ffn multiples of 128 so the MXU sees
    # full tiles and output stores are unmasked; batch folded into M so each of
    # the 2 "parallel" grid steps does a fat (256, ...) matmul chain.
    B, N, D, F = 4, 128, 128, 256     # batch, seq_len, d_model, d_ffn
    key = jax.random.PRNGKey(0)
    kx, kp = jax.random.split(key)
    x = jax.random.normal(kx, (B, N, D), dtype=jnp.float32)
    params = init_params(kp, D, F, N)

    out = jax.block_until_ready(gmlp_forward(x, params))
    assert out.shape == (B, N, F), out.shape

    ref = jax.block_until_ready(gmlp_reference(x, params))
    max_err = float(jnp.max(jnp.abs(out - ref)))
    assert jnp.allclose(out, ref, atol=1e-2, rtol=1e-2), max_err

    print("KERNEL_OK")
</pallas_src>

<mosaic_0001>
module attributes {stable_mosaic.version = 11 : i64} {
  func.func @gmlp_kernel(%arg0: i32, %arg1: memref<2x128x128xf32, #tpu.memory_space<vmem>>, %arg2: memref<128x256xbf16, #tpu.memory_space<vmem>>, %arg3: memref<1x256xf32, #tpu.memory_space<vmem>>, %arg4: memref<1x128xf32, #tpu.memory_space<vmem>>, %arg5: memref<128x128xbf16, #tpu.memory_space<vmem>>, %arg6: memref<128x128xf32, #tpu.memory_space<vmem>>, %arg7: memref<128x128xbf16, #tpu.memory_space<vmem>>, %arg8: memref<1x128xf32, #tpu.memory_space<vmem>>, %arg9: memref<128x256xbf16, #tpu.memory_space<vmem>>, %arg10: memref<2x128x256xf32, #tpu.memory_space<vmem>>) attributes {dimension_semantics = [#tpu.dimension_semantics<parallel>], iteration_bounds = array<i64: 2>, scalar_prefetch = 0 : i64, scratch_operands = 0 : i64, tpu.core_type = #tpu.core_type<tc>, window_params = [{transform_indices = @transform_0, window_bounds = array<i64: 2, 128, 128>}, {pipeline_mode = #tpu.pipeline_mode<synchronous>, transform_indices = @transform_1, window_bounds = array<i64: 128, 256>}, {pipeline_mode = #tpu.pipeline_mode<synchronous>, transform_indices = @transform_2, window_bounds = array<i64: 1, 256>}, {pipeline_mode = #tpu.pipeline_mode<synchronous>, transform_indices = @transform_3, window_bounds = array<i64: 1, 128>}, {pipeline_mode = #tpu.pipeline_mode<synchronous>, transform_indices = @transform_4, window_bounds = array<i64: 128, 128>}, {pipeline_mode = #tpu.pipeline_mode<synchronous>, transform_indices = @transform_5, window_bounds = array<i64: 128, 128>}, {pipeline_mode = #tpu.pipeline_mode<synchronous>, transform_indices = @transform_6, window_bounds = array<i64: 128, 128>}, {pipeline_mode = #tpu.pipeline_mode<synchronous>, transform_indices = @transform_7, window_bounds = array<i64: 1, 128>}, {pipeline_mode = #tpu.pipeline_mode<synchronous>, transform_indices = @transform_8, window_bounds = array<i64: 128, 256>}, {transform_indices = @transform_9, window_bounds = array<i64: 2, 128, 256>}]} {
    %c0 = arith.constant 0 : index
    %c0_0 = arith.constant 0 : index
    %c0_1 = arith.constant 0 : index
    %0 = vector.load %arg1[%c0, %c0_0, %c0_1] : memref<2x128x128xf32, #tpu.memory_space<vmem>>, vector<2x128x128xf32>
    %1 = vector.shape_cast %0 : vector<2x128x128xf32> to vector<256x128xf32>
    %cst = arith.constant dense<0.000000e+00> : vector<256xf32>
    %2 = vector.multi_reduction <add>, %1, %cst [1] : vector<256x128xf32> to vector<256xf32>
    %3 = vector.shape_cast %2 : vector<256xf32> to vector<256x1xf32>
    %cst_2 = arith.constant 1.280000e+02 : f32
    %4 = vector.broadcast %cst_2 : f32 to vector<256x1xf32>
    %5 = arith.divf %3, %4 : vector<256x1xf32>
    %6 = arith.mulf %1, %1 : vector<256x128xf32>
    %cst_3 = arith.constant dense<0.000000e+00> : vector<256xf32>
    %7 = vector.multi_reduction <add>, %6, %cst_3 [1] : vector<256x128xf32> to vector<256xf32>
    %8 = vector.shape_cast %7 : vector<256xf32> to vector<256x1xf32>
    %cst_4 = arith.constant 1.280000e+02 : f32
    %9 = vector.broadcast %cst_4 : f32 to vector<256x1xf32>
    %10 = arith.divf %8, %9 : vector<256x1xf32>
    %11 = vector.broadcast %5 : vector<256x1xf32> to vector<256x128xf32>
    %12 = arith.subf %1, %11 : vector<256x128xf32>
    %13 = arith.mulf %5, %5 : vector<256x1xf32>
    %14 = arith.subf %10, %13 : vector<256x1xf32>
    %cst_5 = arith.constant 9.99999974E-6 : f32
    %15 = vector.broadcast %cst_5 : f32 to vector<256x1xf32>
    %16 = arith.addf %14, %15 : vector<256x1xf32>
    %17 = math.rsqrt %16 : vector<256x1xf32>
    %18 = vector.broadcast %17 : vector<256x1xf32> to vector<256x128xf32>
    %19 = arith.mulf %12, %18 : vector<256x128xf32>
    %20 = arith.truncf %19 : vector<256x128xf32> to vector<256x128xbf16>
    %c0_6 = arith.constant 0 : index
    %c0_7 = arith.constant 0 : index
    %21 = vector.load %arg2[%c0_6, %c0_7] : memref<128x256xbf16, #tpu.memory_space<vmem>>, vector<128x256xbf16>
    %cst_8 = arith.constant dense<0.000000e+00> : vector<256x256xf32>
    %22 = tpu.matmul %20, %21, %cst_8 {dimension_numbers = #tpu.dot_dimension_numbers<[1], [0], [0], [1], [0, 0, 1, 1], [], []>} : vector<256x128xbf16>, vector<128x256xbf16>, vector<256x256xf32> -> vector<256x256xf32>
    %c0_9 = arith.constant 0 : index
    %c0_10 = arith.constant 0 : index
    %23 = vector.load %arg3[%c0_9, %c0_10] : memref<1x256xf32, #tpu.memory_space<vmem>>, vector<1x256xf32>
    %24 = vector.shape_cast %23 : vector<1x256xf32> to vector<256xf32>
    %25 = vector.shape_cast %24 : vector<256xf32> to vector<1x256xf32>
    %26 = vector.broadcast %25 : vector<1x256xf32> to vector<256x256xf32>
    %27 = arith.addf %22, %26 : vector<256x256xf32>
    %28 = arith.mulf %27, %27 : vector<256x256xf32>
    %29 = arith.mulf %27, %28 : vector<256x256xf32>
    %cst_11 = arith.constant 4.471500e-02 : f32
    %30 = vector.broadcast %cst_11 : f32 to vector<256x256xf32>
    %31 = arith.mulf %30, %29 : vector<256x256xf32>
    %32 = arith.addf %27, %31 : vector<256x256xf32>
    %cst_12 = arith.constant 0.797884583 : f32
    %33 = vector.broadcast %cst_12 : f32 to vector<256x256xf32>
    %34 = arith.mulf %33, %32 : vector<256x256xf32>
    %35 = math.tanh %34 : vector<256x256xf32>
    %cst_13 = arith.constant 1.000000e+00 : f32
    %36 = vector.broadcast %cst_13 : f32 to vector<256x256xf32>
    %37 = arith.addf %36, %35 : vector<256x256xf32>
    %cst_14 = arith.constant 5.000000e-01 : f32
    %38 = vector.broadcast %cst_14 : f32 to vector<256x256xf32>
    %39 = arith.mulf %38, %37 : vector<256x256xf32>
    %40 = arith.mulf %27, %39 : vector<256x256xf32>
    %41 = vector.extract_strided_slice %40 {offsets = [0, 0], sizes = [256, 128], strides = [1, 1]} : vector<256x256xf32> to vector<256x128xf32>
    %42 = vector.extract_strided_slice %40 {offsets = [0, 128], sizes = [256, 128], strides = [1, 1]} : vector<256x256xf32> to vector<256x128xf32>
    %cst_15 = arith.constant dense<0.000000e+00> : vector<256xf32>
    %43 = vector.multi_reduction <add>, %42, %cst_15 [1] : vector<256x128xf32> to vector<256xf32>
    %44 = vector.shape_cast %43 : vector<256xf32> to vector<256x1xf32>
    %cst_16 = arith.constant 1.280000e+02 : f32
    %45 = vector.broadcast %cst_16 : f32 to vector<256x1xf32>
    %46 = arith.divf %44, %45 : vector<256x1xf32>
    %47 = arith.mulf %42, %42 : vector<256x128xf32>
    %cst_17 = arith.constant dense<0.000000e+00> : vector<256xf32>
    %48 = vector.multi_reduction <add>, %47, %cst_17 [1] : vector<256x128xf32> to vector<256xf32>
    %49 = vector.shape_cast %48 : vector<256xf32> to vector<256x1xf32>
    %cst_18 = arith.constant 1.280000e+02 : f32
    %50 = vector.broadcast %cst_18 : f32 to vector<256x1xf32>
    %51 = arith.divf %49, %50 : vector<256x1xf32>
    %52 = vector.broadcast %46 : vector<256x1xf32> to vector<256x128xf32>
    %53 = arith.subf %42, %52 : vector<256x128xf32>
    %54 = arith.mulf %46, %46 : vector<256x1xf32>
    %55 = arith.subf %51, %54 : vector<256x1xf32>
    %cst_19 = arith.constant 9.99999974E-6 : f32
    %56 = vector.broadcast %cst_19 : f32 to vector<256x1xf32>
    %57 = arith.addf %55, %56 : vector<256x1xf32>
    %58 = math.rsqrt %57 : vector<256x1xf32>
    %59 = vector.broadcast %58 : vector<256x1xf32> to vector<256x128xf32>
    %60 = arith.mulf %53, %59 : vector<256x128xf32>
    %c0_20 = arith.constant 0 : index
    %c0_21 = arith.constant 0 : index
    %61 = vector.load %arg5[%c0_20, %c0_21] : memref<128x128xbf16, #tpu.memory_space<vmem>>, vector<128x128xbf16>
    %c0_22 = arith.constant 0 : index
    %c0_23 = arith.constant 0 : index
    %62 = vector.load %arg4[%c0_22, %c0_23] : memref<1x128xf32, #tpu.memory_space<vmem>>, vector<1x128xf32>
    %63 = vector.shape_cast %62 : vector<1x128xf32> to vector<128xf32>
    %c0_24 = arith.constant 0 : index
    %c0_25 = arith.constant 0 : index
    %64 = vector.load %arg6[%c0_24, %c0_25] : memref<128x128xf32, #tpu.memory_space<vmem>>, vector<128x128xf32>
    %65 = vector.extract_strided_slice %60 {offsets = [0, 0], sizes = [128, 128], strides = [1, 1]} : vector<256x128xf32> to vector<128x128xf32>
    %66 = arith.truncf %65 : vector<128x128xf32> to vector<128x128xbf16>
    %cst_26 = arith.constant dense<0.000000e+00> : vector<128x128xf32>
    %67 = tpu.matmul %61, %66, %cst_26 {dimension_numbers = #tpu.dot_dimension_numbers<[1], [0], [0], [1], [0, 0, 1, 1], [], []>} : vector<128x128xbf16>, vector<128x128xbf16>, vector<128x128xf32> -> vector<128x128xf32>
    %68 = vector.shape_cast %63 : vector<128xf32> to vector<1x128xf32>
    %69 = vector.broadcast %68 : vector<1x128xf32> to vector<128x128xf32>
    %70 = arith.mulf %67, %69 : vector<128x128xf32>
    %71 = arith.addf %70, %64 : vector<128x128xf32>
    %72 = vector.extract_strided_slice %60 {offsets = [128, 0], sizes = [128, 128], strides = [1, 1]} : vector<256x128xf32> to vector<128x128xf32>
    %73 = arith.truncf %72 : vector<128x128xf32> to vector<128x128xbf16>
    %cst_27 = arith.constant dense<0.000000e+00> : vector<128x128xf32>
    %74 = tpu.matmul %61, %73, %cst_27 {dimension_numbers = #tpu.dot_dimension_numbers<[1], [0], [0], [1], [0, 0, 1, 1], [], []>} : vector<128x128xbf16>, vector<128x128xbf16>, vector<128x128xf32> -> vector<128x128xf32>
    %75 = vector.shape_cast %63 : vector<128xf32> to vector<1x128xf32>
    %76 = vector.broadcast %75 : vector<1x128xf32> to vector<128x128xf32>
    %77 = arith.mulf %74, %76 : vector<128x128xf32>
    %78 = arith.addf %77, %64 : vector<128x128xf32>
    %79 = tpu.concatenate %71, %78 in 0 : vector<128x128xf32>, vector<128x128xf32> -> vector<256x128xf32>
    %80 = arith.mulf %41, %79 : vector<256x128xf32>
    %81 = arith.truncf %80 : vector<256x128xf32> to vector<256x128xbf16>
    %c0_28 = arith.constant 0 : index
    %c0_29 = arith.constant 0 : index
    %82 = vector.load %arg7[%c0_28, %c0_29] : memref<128x128xbf16, #tpu.memory_space<vmem>>, vector<128x128xbf16>
    %cst_30 = arith.constant dense<0.000000e+00> : vector<256x128xf32>
    %83 = tpu.matmul %81, %82, %cst_30 {dimension_numbers = #tpu.dot_dimension_numbers<[1], [0], [0], [1], [0, 0, 1, 1], [], []>} : vector<256x128xbf16>, vector<128x128xbf16>, vector<256x128xf32> -> vector<256x128xf32>
    %c0_31 = arith.constant 0 : index
    %c0_32 = arith.constant 0 : index
    %84 = vector.load %arg8[%c0_31, %c0_32] : memref<1x128xf32, #tpu.memory_space<vmem>>, vector<1x128xf32>
    %85 = vector.shape_cast %84 : vector<1x128xf32> to vector<128xf32>
    %86 = vector.shape_cast %85 : vector<128xf32> to vector<1x128xf32>
    %87 = vector.broadcast %86 : vector<1x128xf32> to vector<256x128xf32>
    %88 = arith.addf %83, %87 : vector<256x128xf32>
    %89 = arith.addf %88, %1 : vector<256x128xf32>
    %90 = arith.truncf %89 : vector<256x128xf32> to vector<256x128xbf16>
    %c0_33 = arith.constant 0 : index
    %c0_34 = arith.constant 0 : index
    %91 = vector.load %arg9[%c0_33, %c0_34] : memref<128x256xbf16, #tpu.memory_space<vmem>>, vector<128x256xbf16>
    %cst_35 = arith.constant dense<0.000000e+00> : vector<256x256xf32>
    %92 = tpu.matmul %90, %91, %cst_35 {dimension_numbers = #tpu.dot_dimension_numbers<[1], [0], [0], [1], [0, 0, 1, 1], [], []>} : vector<256x128xbf16>, vector<128x256xbf16>, vector<256x256xf32> -> vector<256x256xf32>
    %93 = vector.shape_cast %92 : vector<256x256xf32> to vector<2x128x256xf32>
    %c0_36 = arith.constant 0 : index
    %c0_37 = arith.constant 0 : index
    %c0_38 = arith.constant 0 : index
    %94 = vector.load %arg10[%c0_36, %c0_37, %c0_38] : memref<2x128x256xf32, #tpu.memory_space<vmem>>, vector<2x128x256xf32>
    tpu.vector_store %arg10[%c0_36, %c0_37, %c0_38], %93 {strides = array<i32>} : memref<2x128x256xf32, #tpu.memory_space<vmem>>, vector<2x128x256xf32>,
    return
  }
  func.func @transform_0(%arg0: i32) -> (i32, i32, i32) {
    %c0_i32 = arith.constant 0 : i32
    %c0_i32_0 = arith.constant 0 : i32
    %c0_i32_1 = arith.constant 0 : i32
    return %arg0, %c0_i32, %c0_i32_0 : i32, i32, i32
  }
  func.func @transform_1(%arg0: i32) -> (i32, i32) {
    %c0_i32 = arith.constant 0 : i32
    %c0_i32_0 = arith.constant 0 : i32
    %c0_i32_1 = arith.constant 0 : i32
    return %c0_i32, %c0_i32_0 : i32, i32
  }
  func.func @transform_2(%arg0: i32) -> (i32, i32) {
    %c0_i32 = arith.constant 0 : i32
    %c0_i32_0 = arith.constant 0 : i32
    %c0_i32_1 = arith.constant 0 : i32
    return %c0_i32, %c0_i32_0 : i32, i32
  }
  func.func @transform_3(%arg0: i32) -> (i32, i32) {
    %c0_i32 = arith.constant 0 : i32
    %c0_i32_0 = arith.constant 0 : i32
    %c0_i32_1 = arith.constant 0 : i32
    return %c0_i32, %c0_i32_0 : i32, i32
  }
  func.func @transform_4(%arg0: i32) -> (i32, i32) {
    %c0_i32 = arith.constant 0 : i32
    %c0_i32_0 = arith.constant 0 : i32
    %c0_i32_1 = arith.constant 0 : i32
    return %c0_i32, %c0_i32_0 : i32, i32
  }
  func.func @transform_5(%arg0: i32) -> (i32, i32) {
    %c0_i32 = arith.constant 0 : i32
    %c0_i32_0 = arith.constant 0 : i32
    %c0_i32_1 = arith.constant 0 : i32
    return %c0_i32, %c0_i32_0 : i32, i32
  }
  func.func @transform_6(%arg0: i32) -> (i32, i32) {
    %c0_i32 = arith.constant 0 : i32
    %c0_i32_0 = arith.constant 0 : i32
    %c0_i32_1 = arith.constant 0 : i32
    return %c0_i32, %c0_i32_0 : i32, i32
  }
  func.func @transform_7(%arg0: i32) -> (i32, i32) {
    %c0_i32 = arith.constant 0 : i32
    %c0_i32_0 = arith.constant 0 : i32
    %c0_i32_1 = arith.constant 0 : i32
    return %c0_i32, %c0_i32_0 : i32, i32
  }
  func.func @transform_8(%arg0: i32) -> (i32, i32) {
    %c0_i32 = arith.constant 0 : i32
    %c0_i32_0 = arith.constant 0 : i32
    %c0_i32_1 = arith.constant 0 : i32
    return %c0_i32, %c0_i32_0 : i32, i32
  }
  func.func @transform_9(%arg0: i32) -> (i32, i32, i32) {
    %c0_i32 = arith.constant 0 : i32
    %c0_i32_0 = arith.constant 0 : i32
    %c0_i32_1 = arith.constant 0 : i32
    return %arg0, %c0_i32, %c0_i32_0 : i32, i32, i32
  }
}

module attributes {stable_mosaic.version = 11 : i64} {
  func.func @gmlp_kernel(%arg0: i32, %arg1: memref<2x128x128xf32, #tpu.memory_space<vmem>>, %arg2: memref<128x256xbf16, #tpu.memory_space<vmem>>, %arg3: memref<1x256xf32, #tpu.memory_space<vmem>>, %arg4: memref<1x128xf32, #tpu.memory_space<vmem>>, %arg5: memref<128x128xbf16, #tpu.memory_space<vmem>>, %arg6: memref<128x128xf32, #tpu.memory_space<vmem>>, %arg7: memref<128x128xbf16, #tpu.memory_space<vmem>>, %arg8: memref<1x128xf32, #tpu.memory_space<vmem>>, %arg9: memref<128x256xbf16, #tpu.memory_space<vmem>>, %arg10: memref<2x128x256xf32, #tpu.memory_space<vmem>>) attributes {dimension_semantics = [#tpu.dimension_semantics<parallel>], iteration_bounds = array<i64: 2>, scalar_prefetch = 0 : i64, scratch_operands = 0 : i64, tpu.core_type = #tpu.core_type<tc>, window_params = [{transform_indices = @transform_0, window_bounds = array<i64: 2, 128, 128>}, {pipeline_mode = #tpu.pipeline_mode<synchronous>, transform_indices = @transform_1, window_bounds = array<i64: 128, 256>}, {pipeline_mode = #tpu.pipeline_mode<synchronous>, transform_indices = @transform_2, window_bounds = array<i64: 1, 256>}, {pipeline_mode = #tpu.pipeline_mode<synchronous>, transform_indices = @transform_3, window_bounds = array<i64: 1, 128>}, {pipeline_mode = #tpu.pipeline_mode<synchronous>, transform_indices = @transform_4, window_bounds = array<i64: 128, 128>}, {pipeline_mode = #tpu.pipeline_mode<synchronous>, transform_indices = @transform_5, window_bounds = array<i64: 128, 128>}, {pipeline_mode = #tpu.pipeline_mode<synchronous>, transform_indices = @transform_6, window_bounds = array<i64: 128, 128>}, {pipeline_mode = #tpu.pipeline_mode<synchronous>, transform_indices = @transform_7, window_bounds = array<i64: 1, 128>}, {pipeline_mode = #tpu.pipeline_mode<synchronous>, transform_indices = @transform_8, window_bounds = array<i64: 128, 256>}, {transform_indices = @transform_9, window_bounds = array<i64: 2, 128, 256>}]} {
    %c0 = arith.constant 0 : index
    %c0_0 = arith.constant 0 : index
    %c0_1 = arith.constant 0 : index
    %0 = vector.load %arg1[%c0, %c0_0, %c0_1] : memref<2x128x128xf32, #tpu.memory_space<vmem>>, vector<2x128x128xf32>
    %1 = vector.shape_cast %0 : vector<2x128x128xf32> to vector<256x128xf32>
    %cst = arith.constant dense<0.000000e+00> : vector<256xf32>
    %2 = vector.multi_reduction <add>, %1, %cst [1] : vector<256x128xf32> to vector<256xf32>
    %3 = vector.shape_cast %2 : vector<256xf32> to vector<256x1xf32>
    %cst_2 = arith.constant 1.280000e+02 : f32
    %4 = vector.broadcast %cst_2 : f32 to vector<256x1xf32>
    %5 = arith.divf %3, %4 : vector<256x1xf32>
    %6 = arith.mulf %1, %1 : vector<256x128xf32>
    %cst_3 = arith.constant dense<0.000000e+00> : vector<256xf32>
    %7 = vector.multi_reduction <add>, %6, %cst_3 [1] : vector<256x128xf32> to vector<256xf32>
    %8 = vector.shape_cast %7 : vector<256xf32> to vector<256x1xf32>
    %cst_4 = arith.constant 1.280000e+02 : f32
    %9 = vector.broadcast %cst_4 : f32 to vector<256x1xf32>
    %10 = arith.divf %8, %9 : vector<256x1xf32>
    %11 = vector.broadcast %5 : vector<256x1xf32> to vector<256x128xf32>
    %12 = arith.subf %1, %11 : vector<256x128xf32>
    %13 = arith.mulf %5, %5 : vector<256x1xf32>
    %14 = arith.subf %10, %13 : vector<256x1xf32>
    %cst_5 = arith.constant 9.99999974E-6 : f32
    %15 = vector.broadcast %cst_5 : f32 to vector<256x1xf32>
    %16 = arith.addf %14, %15 : vector<256x1xf32>
    %17 = math.rsqrt %16 : vector<256x1xf32>
    %18 = vector.broadcast %17 : vector<256x1xf32> to vector<256x128xf32>
    %19 = arith.mulf %12, %18 : vector<256x128xf32>
    %20 = arith.truncf %19 : vector<256x128xf32> to vector<256x128xbf16>
    %c0_6 = arith.constant 0 : index
    %c0_7 = arith.constant 0 : index
    %21 = vector.load %arg2[%c0_6, %c0_7] : memref<128x256xbf16, #tpu.memory_space<vmem>>, vector<128x256xbf16>
    %cst_8 = arith.constant dense<0.000000e+00> : vector<256x256xf32>
    %22 = tpu.matmul %20, %21, %cst_8 {dimension_numbers = #tpu.dot_dimension_numbers<[1], [0], [0], [1], [0, 0, 1, 1], [], []>} : vector<256x128xbf16>, vector<128x256xbf16>, vector<256x256xf32> -> vector<256x256xf32>
    %c0_9 = arith.constant 0 : index
    %c0_10 = arith.constant 0 : index
    %23 = vector.load %arg3[%c0_9, %c0_10] : memref<1x256xf32, #tpu.memory_space<vmem>>, vector<1x256xf32>
    %24 = vector.shape_cast %23 : vector<1x256xf32> to vector<256xf32>
    %25 = vector.shape_cast %24 : vector<256xf32> to vector<1x256xf32>
    %26 = vector.broadcast %25 : vector<1x256xf32> to vector<256x256xf32>
    %27 = arith.addf %22, %26 : vector<256x256xf32>
    %28 = arith.mulf %27, %27 : vector<256x256xf32>
    %29 = arith.mulf %27, %28 : vector<256x256xf32>
    %cst_11 = arith.constant 4.471500e-02 : f32
    %30 = vector.broadcast %cst_11 : f32 to vector<256x256xf32>
    %31 = arith.mulf %30, %29 : vector<256x256xf32>
    %32 = arith.addf %27, %31 : vector<256x256xf32>
    %cst_12 = arith.constant 0.797884583 : f32
    %33 = vector.broadcast %cst_12 : f32 to vector<256x256xf32>
    %34 = arith.mulf %33, %32 : vector<256x256xf32>
    %35 = math.tanh %34 : vector<256x256xf32>
    %cst_13 = arith.constant 1.000000e+00 : f32
    %36 = vector.broadcast %cst_13 : f32 to vector<256x256xf32>
    %37 = arith.addf %36, %35 : vector<256x256xf32>
    %cst_14 = arith.constant 5.000000e-01 : f32
    %38 = vector.broadcast %cst_14 : f32 to vector<256x256xf32>
    %39 = arith.mulf %38, %37 : vector<256x256xf32>
    %40 = arith.mulf %27, %39 : vector<256x256xf32>
    %41 = vector.extract_strided_slice %40 {offsets = [0, 0], sizes = [256, 128], strides = [1, 1]} : vector<256x256xf32> to vector<256x128xf32>
    %42 = vector.extract_strided_slice %40 {offsets = [0, 128], sizes = [256, 128], strides = [1, 1]} : vector<256x256xf32> to vector<256x128xf32>
    %cst_15 = arith.constant dense<0.000000e+00> : vector<256xf32>
    %43 = vector.multi_reduction <add>, %42, %cst_15 [1] : vector<256x128xf32> to vector<256xf32>
    %44 = vector.shape_cast %43 : vector<256xf32> to vector<256x1xf32>
    %cst_16 = arith.constant 1.280000e+02 : f32
    %45 = vector.broadcast %cst_16 : f32 to vector<256x1xf32>
    %46 = arith.divf %44, %45 : vector<256x1xf32>
    %47 = arith.mulf %42, %42 : vector<256x128xf32>
    %cst_17 = arith.constant dense<0.000000e+00> : vector<256xf32>
    %48 = vector.multi_reduction <add>, %47, %cst_17 [1] : vector<256x128xf32> to vector<256xf32>
    %49 = vector.shape_cast %48 : vector<256xf32> to vector<256x1xf32>
    %cst_18 = arith.constant 1.280000e+02 : f32
    %50 = vector.broadcast %cst_18 : f32 to vector<256x1xf32>
    %51 = arith.divf %49, %50 : vector<256x1xf32>
    %52 = vector.broadcast %46 : vector<256x1xf32> to vector<256x128xf32>
    %53 = arith.subf %42, %52 : vector<256x128xf32>
    %54 = arith.mulf %46, %46 : vector<256x1xf32>
    %55 = arith.subf %51, %54 : vector<256x1xf32>
    %cst_19 = arith.constant 9.99999974E-6 : f32
    %56 = vector.broadcast %cst_19 : f32 to vector<256x1xf32>
    %57 = arith.addf %55, %56 : vector<256x1xf32>
    %58 = math.rsqrt %57 : vector<256x1xf32>
    %59 = vector.broadcast %58 : vector<256x1xf32> to vector<256x128xf32>
    %60 = arith.mulf %53, %59 : vector<256x128xf32>
    %c0_20 = arith.constant 0 : index
    %c0_21 = arith.constant 0 : index
    %61 = vector.load %arg5[%c0_20, %c0_21] : memref<128x128xbf16, #tpu.memory_space<vmem>>, vector<128x128xbf16>
    %c0_22 = arith.constant 0 : index
    %c0_23 = arith.constant 0 : index
    %62 = vector.load %arg4[%c0_22, %c0_23] : memref<1x128xf32, #tpu.memory_space<vmem>>, vector<1x128xf32>
    %63 = vector.shape_cast %62 : vector<1x128xf32> to vector<128xf32>
    %c0_24 = arith.constant 0 : index
    %c0_25 = arith.constant 0 : index
    %64 = vector.load %arg6[%c0_24, %c0_25] : memref<128x128xf32, #tpu.memory_space<vmem>>, vector<128x128xf32>
    %65 = vector.extract_strided_slice %60 {offsets = [0, 0], sizes = [128, 128], strides = [1, 1]} : vector<256x128xf32> to vector<128x128xf32>
    %66 = arith.truncf %65 : vector<128x128xf32> to vector<128x128xbf16>
    %cst_26 = arith.constant dense<0.000000e+00> : vector<128x128xf32>
    %67 = tpu.matmul %61, %66, %cst_26 {dimension_numbers = #tpu.dot_dimension_numbers<[1], [0], [0], [1], [0, 0, 1, 1], [], []>} : vector<128x128xbf16>, vector<128x128xbf16>, vector<128x128xf32> -> vector<128x128xf32>
    %68 = vector.shape_cast %63 : vector<128xf32> to vector<1x128xf32>
    %69 = vector.broadcast %68 : vector<1x128xf32> to vector<128x128xf32>
    %70 = arith.mulf %67, %69 : vector<128x128xf32>
    %71 = arith.addf %70, %64 : vector<128x128xf32>
    %72 = vector.extract_strided_slice %60 {offsets = [128, 0], sizes = [128, 128], strides = [1, 1]} : vector<256x128xf32> to vector<128x128xf32>
    %73 = arith.truncf %72 : vector<128x128xf32> to vector<128x128xbf16>
    %cst_27 = arith.constant dense<0.000000e+00> : vector<128x128xf32>
    %74 = tpu.matmul %61, %73, %cst_27 {dimension_numbers = #tpu.dot_dimension_numbers<[1], [0], [0], [1], [0, 0, 1, 1], [], []>} : vector<128x128xbf16>, vector<128x128xbf16>, vector<128x128xf32> -> vector<128x128xf32>
    %75 = vector.shape_cast %63 : vector<128xf32> to vector<1x128xf32>
    %76 = vector.broadcast %75 : vector<1x128xf32> to vector<128x128xf32>
    %77 = arith.mulf %74, %76 : vector<128x128xf32>
    %78 = arith.addf %77, %64 : vector<128x128xf32>
    %79 = tpu.concatenate %71, %78 in 0 : vector<128x128xf32>, vector<128x128xf32> -> vector<256x128xf32>
    %80 = arith.mulf %41, %79 : vector<256x128xf32>
    %81 = arith.truncf %80 : vector<256x128xf32> to vector<256x128xbf16>
    %c0_28 = arith.constant 0 : index
    %c0_29 = arith.constant 0 : index
    %82 = vector.load %arg7[%c0_28, %c0_29] : memref<128x128xbf16, #tpu.memory_space<vmem>>, vector<128x128xbf16>
    %cst_30 = arith.constant dense<0.000000e+00> : vector<256x128xf32>
    %83 = tpu.matmul %81, %82, %cst_30 {dimension_numbers = #tpu.dot_dimension_numbers<[1], [0], [0], [1], [0, 0, 1, 1], [], []>} : vector<256x128xbf16>, vector<128x128xbf16>, vector<256x128xf32> -> vector<256x128xf32>
    %c0_31 = arith.constant 0 : index
    %c0_32 = arith.constant 0 : index
    %84 = vector.load %arg8[%c0_31, %c0_32] : memref<1x128xf32, #tpu.memory_space<vmem>>, vector<1x128xf32>
    %85 = vector.shape_cast %84 : vector<1x128xf32> to vector<128xf32>
    %86 = vector.shape_cast %85 : vector<128xf32> to vector<1x128xf32>
    %87 = vector.broadcast %86 : vector<1x128xf32> to vector<256x128xf32>
    %88 = arith.addf %83, %87 : vector<256x128xf32>
    %89 = arith.addf %88, %1 : vector<256x128xf32>
    %90 = arith.truncf %89 : vector<256x128xf32> to vector<256x128xbf16>
    %c0_33 = arith.constant 0 : index
    %c0_34 = arith.constant 0 : index
    %91 = vector.load %arg9[%c0_33, %c0_34] : memref<128x256xbf16, #tpu.memory_space<vmem>>, vector<128x256xbf16>
    %cst_35 = arith.constant dense<0.000000e+00> : vector<256x256xf32>
    %92 = tpu.matmul %90, %91, %cst_35 {dimension_numbers = #tpu.dot_dimension_numbers<[1], [0], [0], [1], [0, 0, 1, 1], [], []>} : vector<256x128xbf16>, vector<128x256xbf16>, vector<256x256xf32> -> vector<256x256xf32>
    %93 = vector.shape_cast %92 : vector<256x256xf32> to vector<2x128x256xf32>
    %c0_36 = arith.constant 0 : index
    %c0_37 = arith.constant 0 : index
    %c0_38 = arith.constant 0 : index
    %94 = vector.load %arg10[%c0_36, %c0_37, %c0_38] : memref<2x128x256xf32, #tpu.memory_space<vmem>>, vector<2x128x256xf32>
    tpu.vector_store %arg10[%c0_36, %c0_37, %c0_38], %93 {strides = array<i32>} : memref<2x128x256xf32, #tpu.memory_space<vmem>>, vector<2x128x256xf32>,
    return
  }
  func.func @transform_0(%arg0: i32) -> (i32, i32, i32) {
    %c0_i32 = arith.constant 0 : i32
    %c0_i32_0 = arith.constant 0 : i32
    %c0_i32_1 = arith.constant 0 : i32
    return %arg0, %c0_i32, %c0_i32_0 : i32, i32, i32
  }
  func.func @transform_1(%arg0: i32) -> (i32, i32) {
    %c0_i32 = arith.constant 0 : i32
    %c0_i32_0 = arith.constant 0 : i32
    %c0_i32_1 = arith.constant 0 : i32
    return %c0_i32, %c0_i32_0 : i32, i32
  }
  func.func @transform_2(%arg0: i32) -> (i32, i32) {
    %c0_i32 = arith.constant 0 : i32
    %c0_i32_0 = arith.constant 0 : i32
    %c0_i32_1 = arith.constant 0 : i32
    return %c0_i32, %c0_i32_0 : i32, i32
  }
  func.func @transform_3(%arg0: i32) -> (i32, i32) {
    %c0_i32 = arith.constant 0 : i32
    %c0_i32_0 = arith.constant 0 : i32
    %c0_i32_1 = arith.constant 0 : i32
    return %c0_i32, %c0_i32_0 : i32, i32
  }
  func.func @transform_4(%arg0: i32) -> (i32, i32) {
    %c0_i32 = arith.constant 0 : i32
    %c0_i32_0 = arith.constant 0 : i32
    %c0_i32_1 = arith.constant 0 : i32
    return %c0_i32, %c0_i32_0 : i32, i32
  }
  func.func @transform_5(%arg0: i32) -> (i32, i32) {
    %c0_i32 = arith.constant 0 : i32
    %c0_i32_0 = arith.constant 0 : i32
    %c0_i32_1 = arith.constant 0 : i32
    return %c0_i32, %c0_i32_0 : i32, i32
  }
  func.func @transform_6(%arg0: i32) -> (i32, i32) {
    %c0_i32 = arith.constant 0 : i32
    %c0_i32_0 = arith.constant 0 : i32
    %c0_i32_1 = arith.constant 0 : i32
    return %c0_i32, %c0_i32_0 : i32, i32
  }
  func.func @transform_7(%arg0: i32) -> (i32, i32) {
    %c0_i32 = arith.constant 0 : i32
    %c0_i32_0 = arith.constant 0 : i32
    %c0_i32_1 = arith.constant 0 : i32
    return %c0_i32, %c0_i32_0 : i32, i32
  }
  func.func @transform_8(%arg0: i32) -> (i32, i32) {
    %c0_i32 = arith.constant 0 : i32
    %c0_i32_0 = arith.constant 0 : i32
    %c0_i32_1 = arith.constant 0 : i32
    return %c0_i32, %c0_i32_0 : i32, i32
  }
  func.func @transform_9(%arg0: i32) -> (i32, i32, i32) {
    %c0_i32 = arith.constant 0 : i32
    %c0_i32_0 = arith.constant 0 : i32
    %c0_i32_1 = arith.constant 0 : i32
    return %arg0, %c0_i32, %c0_i32_0 : i32, i32, i32
  }
}

</mosaic_0001>

<bundles_post_ra>
// kernel: tpu_custom_call.1
= control target key start
LH: loop header
LB: loop body
LE: loop exit
PB: predicated region body
PF: predicated region fallthrough
CT: control target
= control target key end

     0   :  { %s6227_s0 = inlined_call_operand.hbm [shape: f32[4,128,128], index: 0, kind: input, shape index: {}]   ;;  %s6228_s1 = inlined_call_operand.hbm [shape: bf16[128,256], index: 1, kind: input, shape index: {}]   ;;  %s6229_s2 = inlined_call_operand.vmem [shape: f32[1,256], index: 2, kind: input, shape index: {}]   ;;  %s6230_s3 = inlined_call_operand.vmem [shape: f32[1,128], index: 3, kind: input, shape index: {}]   ;;  %s6231_s4 = inlined_call_operand.hbm [shape: bf16[128,128], index: 4, kind: input, shape index: {}]   ;;  %s6232_s5 = inlined_call_operand.hbm [shape: f32[128,128], index: 5, kind: input, shape index: {}]   ;;  %s6233_s6 = inlined_call_operand.hbm [shape: bf16[128,128], index: 6, kind: input, shape index: {}]   ;;  %s6234_s7 = inlined_call_operand.vmem [shape: f32[1,128], index: 7, kind: input, shape index: {}]   ;;  %s6235_s8 = inlined_call_operand.hbm [shape: bf16[128,256], index: 8, kind: input, shape index: {}]   ;;  %s6236_s9 = inlined_call_operand.hbm [shape: f32[4,128,256], index: 9, kind: output, shape index: {}]  }
   0x1   :  { %6247 = sst [smem:[#allocation45_spill]] %s6228_s1 }
   0x2   :  { %6248 = sst [smem:[#allocation46_spill]] %s6232_s5 }
   0x3   :  { %6249 = sst [smem:[#allocation47_spill]] %s6236_s9 }
   0x4   :  { %14 = vsyncpa [#allocation3], 0 }
   0x5   :  { %16 = vsyncpa [#allocation3 + $0x1], 0 }
   0x6   :  { %17 = vsyncpa [#allocation6], 0 }
   0x7   :  { %18 = vsyncpa [#allocation9], 0 }
   0x8   :  { %19 = vsyncpa [#allocation12], 0 }
   0x9   :  { %20 = vsyncpa [#allocation4], 0 }
   0xa   :  { %22 = vsyncpa [#allocation4 + $0x1], 0  ;;  %s4399_s30 = smov 0   ;;  %s4401_s10 = smov 0  }
   0xb   :  { %s4403_s11 = smov 0   ;;  %s4405_s12 = smov 0  }
   0xc LB: > { %s4335_s13 = smov [#allocation5]   ;;  %s4420_s15 = sadd.s32 4294967295, %s4333_s12   ;;  %s4333_s12 = sphi %s4405_s12, %s6329_s12   ;;  %s4329_s11 = sphi %s4403_s11, %s6328_s11   ;;  %s4325_s10 = sphi %s4401_s10, %s6327_s10   ;;  %s4321_s30 = sphi %s4399_s30, %s6326_s30  }
   0xd   : > { %s265_s14 = sshll.u32 %s4335_s13, 4  ;;  %p3365_p0 = scmp.ge.s32.totalorder %s4333_s12, 1  ;;  %s4425_s14 = int_to_ptr.vmem [resolvable:$true] %s265_s14 }
   0xe   : > { %p6242_p1 = scmp.eq.s32.totalorder %s4420_s15, 0  ;;  %p253_p2 = scmp.lt.s32.totalorder %s4333_s12, 3 }
   0xf   : > { %s4336_s17 = smov [#allocation8]   ;;  %s4337_s20 = smov [#allocation7]  }
  0x10   : > { %p4427_p3 = pnand %p3365_p0, %p253_p2  ;;  %s297_s18 = sshll.u32 %s4336_s17, 4  ;;  %s4440_s18 = int_to_ptr.vmem [resolvable:$true] %s297_s18 }
  0x11   : > { %s284_s21 = sshll.u32 %s4337_s20, 4  ;;  %s6252_s1 = sld [smem:[#allocation45_spill]]  ;;  %s4442_s21 = int_to_ptr.vmem [resolvable:$true] %s284_s21 }
  0x12   : > { %s6250_s16 = scalar_select %p4427_p3, 1, 0 }
  0x13   : > { %p3652_p5 = pneg %p4427_p3 }
  0x15   : > { %p4436_p6 = pnand %p3652_p5, %p6242_p1 }
  0x17   : > { %s4085_s24 = scalar_lea.hbm %s6252_s1, 2048  ;;  %p4452_p8 = pneg %p4436_p6 }
  0x18   : > { %p4086_p7 = scmp.ne.s32.totalorder %s6252_s1, %s4085_s24  ;;  %p4092_p11 = scmp.lt.u32.totalorder %s4085_s24, %s6252_s1 }
  0x1a   : > { %p4088_p9 = pnand %p4452_p8, %p4086_p7 }
  0x1c   : > { %p4089_p10 = pneg %p4088_p9 }
  0x1e   : > { %p4094_p12 = pnand %p4092_p11, %p4089_p10 }
  0x20   : > { %4097 = shalt.err (!%p4094_p12)
}
  0x21   : > { %s4098_s13 = scalar_lea.vmem %s4425_s14, 2048  ;;  %p4106_p5 = scmp.lt.s32.totalorder %s4425_s14, %s4425_s14 }
  0x22   : > { %p4099_p13 = scmp.ne.s32.totalorder %s4425_s14, %s4098_s13  ;;  %p4107_p4 = scmp.lt.s32.totalorder %s4098_s13, %s4098_s13 }
  0x24   : > { %p4101_p0 = pnand %p4099_p13, %p4452_p8  ;;  %p4108_p7 = por %p4107_p4, %p4106_p5 }
  0x26   : > { %p4102_p2 = pneg %p4101_p0 }
  0x28   : > { %p4109_p9 = pnand %p4108_p7, %p4102_p2 }
  0x2a   : > { %4112 = shalt.err (!%p4109_p9)
}
  0x2b   : > { %s6238_s17 = smov 128   ;;  %s6240_s20 = smov 8  }
  0x2c   : > { %3655 = dma.hbm_to_vmem [thread:$0]  (!%p4436_p6), %s6252_s1, 2048, %s4425_s14, [#allocation6], %s6238_s17, %s6238_s17, %s6240_s20  }
  0x2d   : > { %s6254_s5 = sld [smem:[#allocation46_spill]] }
  0x33   : > { %s4113_s26 = scalar_lea.hbm %s6254_s5, 2048 }
  0x34   : > { %p4114_p4 = scmp.ne.s32.totalorder %s6254_s5, %s4113_s26  ;;  %p4120_p12 = scmp.lt.u32.totalorder %s4113_s26, %s6254_s5 }
  0x36   : > { %p4116_p10 = pnand %p4114_p4, %p4452_p8 }
  0x38   : > { %p4117_p11 = pneg %p4116_p10 }
  0x3a   : > { %p4122_p13 = pnand %p4120_p12, %p4117_p11 }
  0x3c   : > { %4125 = shalt.err (!%p4122_p13)
}
  0x3d   : > { %s4126_s14 = scalar_lea.vmem %s4440_s18, 2048  ;;  %p4134_p7 = scmp.lt.s32.totalorder %s4440_s18, %s4440_s18 }
  0x3e   : > { %p4127_p0 = scmp.ne.s32.totalorder %s4440_s18, %s4126_s14  ;;  %p4135_p9 = scmp.lt.s32.totalorder %s4126_s14, %s4126_s14 }
  0x40   : > { %p4129_p2 = pnand %p4127_p0, %p4452_p8  ;;  %p4136_p4 = por %p4135_p9, %p4134_p7 }
  0x42   : > { %p4130_p5 = pneg %p4129_p2 }
  0x44   : > { %p4137_p10 = pnand %p4136_p4, %p4130_p5 }
  0x46   : > { %4140 = shalt.err (!%p4137_p10)
}
  0x47   : > { %3661 = dma.hbm_to_vmem [thread:$0]  (!%p4436_p6), %s6254_s5, 2048, %s4440_s18, [#allocation9], %s6238_s17, %s6238_s17, %s6240_s20  }
  0x48   : > { %s4141_s25 = scalar_lea.hbm %s6231_s4, 1024 }
  0x49   : > { %p4142_p11 = scmp.ne.s32.totalorder %s6231_s4, %s4141_s25  ;;  %p4148_p0 = scmp.lt.u32.totalorder %s4141_s25, %s6231_s4 }
  0x4b   : > { %p4144_p12 = pnand %p4142_p11, %p4452_p8 }
  0x4d   : > { %p4145_p13 = pneg %p4144_p12 }
  0x4f   : > { %p4150_p2 = pnand %p4148_p0, %p4145_p13 }
  0x51   : > { %4153 = shalt.err (!%p4150_p2)
}
  0x52   : > { %s4154_s18 = scalar_lea.vmem %s4442_s21, 1024  ;;  %p4162_p4 = scmp.lt.s32.totalorder %s4442_s21, %s4442_s21 }
  0x53   : > { %p4155_p5 = scmp.ne.s32.totalorder %s4442_s21, %s4154_s18  ;;  %p4163_p10 = scmp.lt.s32.totalorder %s4154_s18, %s4154_s18 }
  0x55   : > { %p4157_p7 = pnand %p4155_p5, %p4452_p8  ;;  %p4164_p11 = por %p4163_p10, %p4162_p4 }
  0x57   : > { %p4158_p9 = pneg %p4157_p7 }
  0x59   : > { %p4165_p12 = pnand %p4164_p11, %p4158_p9 }
  0x5b   : > { %4168 = shalt.err (!%p4165_p12)
}
  0x5c   : > { %s4340_s14 = smov 64   ;;  %s4341_s9 = smov 4  }
  0x5d   : > { %3658 = dma.hbm_to_vmem [thread:$0]  (!%p4436_p6), %s6231_s4, 1024, %s4442_s21, [#allocation6], %s4340_s14, %s4340_s14, %s4341_s9  }
  0x5e   : > { %s4342_s24 = smov [#allocation10]   ;;  %s4343_s26 = smov [#allocation11]  }
  0x5f   : > { %s310_s25 = sshll.u32 %s4342_s24, 4  ;;  %s326_s28 = sshll.u32 %s4343_s26, 4  ;;  %s311_s25 = int_to_ptr.vmem [resolvable:$true] %s310_s25  ;;  %s327_s28 = int_to_ptr.vmem [resolvable:$true] %s326_s28 }
  0x60   : > { %s4169_s18 = scalar_lea.hbm %s6233_s6, 1024 }
  0x61   : > { %p4170_p13 = scmp.ne.s32.totalorder %s6233_s6, %s4169_s18  ;;  %p4176_p5 = scmp.lt.u32.totalorder %s4169_s18, %s6233_s6 }
  0x63   : > { %p4172_p0 = pnand %p4170_p13, %p4452_p8 }
  0x65   : > { %p4173_p2 = pneg %p4172_p0 }
  0x67   : > { %p4178_p7 = pnand %p4176_p5, %p4173_p2 }
  0x69   : > { %4181 = shalt.err (!%p4178_p7)
}
  0x6a   : > { %s4182_s21 = scalar_lea.vmem %s311_s25, 1024  ;;  %p4190_p11 = scmp.lt.s32.totalorder %s311_s25, %s311_s25 }
  0x6b   : > { %p4183_p9 = scmp.ne.s32.totalorder %s311_s25, %s4182_s21  ;;  %p4191_p12 = scmp.lt.s32.totalorder %s4182_s21, %s4182_s21 }
  0x6d   : > { %p4185_p4 = pnand %p4183_p9, %p4452_p8  ;;  %p4192_p1 = por %p4191_p12, %p4190_p11 }
  0x6f   : > { %p4186_p10 = pneg %p4185_p4 }
  0x71   : > { %p4193_p3 = pnand %p4192_p1, %p4186_p10 }
  0x73   : > { %4196 = shalt.err (!%p4193_p3)
}
  0x74   : > { %3664 = dma.hbm_to_vmem [thread:$0]  (!%p4436_p6), %s6233_s6, 1024, %s311_s25, [#allocation9], %s4340_s14, %s4340_s14, %s4341_s9  }
  0x75   : > { %s4197_s22 = scalar_lea.hbm %s6235_s8, 2048 }
  0x76   : > { %p4198_p13 = scmp.ne.s32.totalorder %s6235_s8, %s4197_s22  ;;  %p4204_p3 = scmp.lt.u32.totalorder %s4197_s22, %s6235_s8 }
  0x78   : > { %p4200_p0 = pnand %p4198_p13, %p4452_p8 }
  0x7a   : > { %p4201_p1 = pneg %p4200_p0 }
  0x7c   : > { %p4206_p2 = pnand %p4204_p3, %p4201_p1 }
  0x7e   : > { %4209 = shalt.err (!%p4206_p2)
}
  0x7f   : > { %s4210_s13 = scalar_lea.vmem %s327_s28, 2048  ;;  %p4218_p4 = scmp.lt.s32.totalorder %s327_s28, %s327_s28 }
  0x80   : > { %p4211_p5 = scmp.ne.s32.totalorder %s327_s28, %s4210_s13  ;;  %p4219_p10 = scmp.lt.s32.totalorder %s4210_s13, %s4210_s13 }
  0x82   : > { %p4213_p7 = pnand %p4211_p5, %p4452_p8  ;;  %p4220_p11 = por %p4219_p10, %p4218_p4 }
  0x84   : > { %p4214_p9 = pneg %p4213_p7 }
  0x86   : > { %p4221_p12 = pnand %p4220_p11, %p4214_p9 }
  0x88   : > { %4224 = shalt.err (!%p4221_p12)
}
  0x89   : > { %s6255_s14 = smov 8   ;;  %s6256_s9 = smov 128  }
  0x8a   : > { %3667 = dma.hbm_to_vmem [thread:$0]  (!%p4436_p6), %s6235_s8, 2048, %s327_s28, [#allocation12], %s6256_s9, %s6256_s9, %s6255_s14  }
  0x8b   : > { %s3364_s19 = sadd.s32 4294967294, %s4333_s12   ;;  %s4566_s27 = sadd.s32 1, %s4333_s12  }
  0x8c   : > { %s35_s21 = sadd.s32 1, %s4329_s11  ;;  %s32_s17 = ssub.s32 %s4333_s12, %s4566_s27 }
  0x8d   : > { %p42_p8 = scmp.ne.s32.totalorder %s4329_s11, %s4325_s10  ;;  %p33_p13 = scmp.eq.s32.totalorder %s32_s17, 0 }
  0x8e   : > { %p43_p0 = scmp.eq.s32.totalorder %s4333_s12, 0  ;;  %p48_p1 = scmp.ne.s32.totalorder %s4325_s10, %s4321_s30 }
  0x8f   : > { %p240_p3 = scmp.eq.s32.totalorder %s4420_s15, 1  ;;  %p6257_p5 = scmp.eq.s32.totalorder %s4420_s15, 0 }
  0x90   : > { %s4578_s20 = scalar_select %p33_p13, %s4329_s11, %s35_s21  }
  0x91   : > { %p44_p2 = por %p43_p0, %p42_p8  ;;  %p4582_p7 = por %p6257_p5, %p48_p1 }
  0x92   : > { %p4586_p6 = por %p240_p3, %p42_p8  ;;  %p246_p9 = scmp.eq.s32.totalorder %s3364_s19, 1 }
  0x93   : > { %p3681_p4 = scmp.lt.s32.totalorder %s4333_s12, 2  ;;  %s340_s5 = sand.u32 1, %s4329_s11  }
  0x94   : > { %s6259_s28 = scalar_select %p4586_p6, 1, 0 }
  0x95   : > { %p4592_p10 = por %p246_p9, %p48_p1  ;;  %s3372_s23 = sshll.u32 %s340_s5, 8 }
  0x96   : > { %s3441_s24 = sshll.u32 %s4333_s12, 12  ;;  %s344_s25 = scalar_lea.vmem [#allocation2], %s3372_s23 }
  0x97   : > { %s6260_s22 = scalar_select %p4592_p10, 1, 0 }
  0x98   : > { %s4600_s13 = scalar_lea.hbm %s6227_s0, %s3441_s24  ;;  %s352_s18 = sshll.u32 %s344_s25, 4  ;;  %s4606_s18 = int_to_ptr.vmem [resolvable:$true] %s352_s18 }
  0x99   : > { %p4602_p11 = pnand %p3681_p4, %p44_p2  ;;  %s4608_s21 = scalar_lea.sflag [#allocation3], %s340_s5 }
  0x9a   : > { %s4225_s17 = scalar_lea.hbm %s4600_s13, 4096  ;;  %s4230_s26 = scalar_lea.hbm %s6227_s0, 8192 }
  0x9b   : > { %p4226_p12 = scmp.ne.s32.totalorder %s4600_s13, %s4225_s17  ;;  %p4227_p8 = pneg %p4602_p11 }
  0x9c   : > { %p4231_p1 = scmp.lt.u32.totalorder %s4600_s13, %s6227_s0  ;;  %p4232_p3 = scmp.lt.u32.totalorder %s4230_s26, %s4225_s17 }
  0x9d   : > { %p4228_p13 = pnand %p4227_p8, %p4226_p12  ;;  %p4234_p5 = scmp.lt.u32.totalorder %s4225_s17, %s4600_s13 }
  0x9e   : > { %p4233_p2 = por %p4232_p3, %p4231_p1 }
  0x9f   : > { %p4229_p0 = pneg %p4228_p13 }
  0xa0   : > { %p4235_p9 = por %p4234_p5, %p4233_p2 }
  0xa2   : > { %p4236_p4 = pnand %p4235_p9, %p4229_p0 }
  0xa4   : > { %4239 = shalt.err (!%p4236_p4)
}
  0xa5   : > { %s4240_s5 = scalar_lea.vmem %s4606_s18, 4096  ;;  %s4344_s23 = smov [#allocation2]  }
  0xa6   : > { %p4241_p12 = scmp.ne.s32.totalorder %s4606_s18, %s4240_s5  ;;  %s4245_s24 = sshll.u32 %s4344_s23, 4  ;;  %s4246_s24 = int_to_ptr.vmem [resolvable:$false] %s4245_s24 }
  0xa7   : > { %s4247_s29 = scalar_lea.vmem %s4246_s24, 8192  ;;  %p4248_p6 = scmp.lt.s32.totalorder %s4606_s18, %s4246_s24 }
  0xa8   : > { %p4243_p13 = pnand %p4241_p12, %p4227_p8  ;;  %p4249_p1 = scmp.lt.s32.totalorder %s4247_s29, %s4240_s5 }
  0xaa   : > { %p4244_p10 = pneg %p4243_p13  ;;  %p4250_p3 = por %p4249_p1, %p4248_p6 }
  0xac   : > { %p4251_p2 = pnand %p4250_p3, %p4244_p10 }
  0xae   : > { %4254 = shalt.err (!%p4251_p2)
}
  0xaf   : > { %3671 = dma.hbm_to_vmem [thread:$0]  (!%p4602_p11), %s4600_s13, 4096, %s4606_s18, %s4608_s21, %s6256_s9, %s6256_s9, %s6255_s14  }
  0xb0   : > { %p6262_p8 = scmp.ne.s32.totalorder %s6250_s16, 0 }
  0xb2   : > { %364 = sbr.rel (%p6262_p8) target bundleno = 1654 (0x676), region = 56 }
  0xb9   : > { %s4642_s17 = sand.u32 1, %s4325_s10  }
  0xba   : > { %s3377_s26 = sshll.u32 %s4642_s17, 8  ;;  %s367_s25 = scalar_lea.sflag [#allocation3], %s4642_s17 }
  0xbb   : > { %s4646_s5 = scalar_lea.vmem [#allocation2], %s3377_s26 }
  0xbc   : > { %4300 = dma.done.wait (%p4582_p7), %s367_s25, 4096  }
  0xbd   : > { %4302 = vsyncadd (%p4582_p7), %s367_s25, 4294963200  ;;  %p6263_p6 = scmp.eq.s32.totalorder %s4420_s15, 0 }
  0xbf   : > { %4304 = dma.done.wait (%p6263_p6), [#allocation6], 3072   ;;  %p6264_p10 = pmov %p6263_p6 }
  0xc0   : > { %p6265_p11 = pmov %p6263_p6 }
  0xc1   : > { %4306 = vsyncadd (%p6264_p10), [#allocation6], 4294964224 }
  0xc2   : > { %4308 = dma.done.wait (%p6265_p11), [#allocation9], 3072   ;;  %p6266_p0 = pmov %p6263_p6 }
  0xc4   : > { %4310 = vsyncadd (%p6266_p0), [#allocation9], 4294964224  ;;  %p6267_p5 = pmov %p6266_p0 }
  0xc5   : > { %p6268_p9 = pmov %p6266_p0 }
  0xc6   : > { %4312 = dma.done.wait (%p6267_p5), [#allocation12], 2048  }
  0xc7   : > { %4314 = vsyncadd (%p6268_p9), [#allocation12], 4294965248  ;;  %v4665_v0 = vld [vmem:[%s4646_s5] sm:$0xff]  ;;  %v4668_v1 = vld [vmem:[%s4646_s5 + $0x8] sm:$0xff]  ;;  %v6245_v39 = vmov 0   ;;  %s3383_s23 = sshll.u32 %s4642_s17, 9 }
  0xc8   : > { %460 = vadd.xlane.f32.xlu0 %v4665_v0  ;;  %v557_v2 = vmul.f32 %v4665_v0, %v4665_v0  ;;  %v558_v3 = vmul.f32 %v4668_v1, %v4668_v1  ;;  %v4677_v4 = vld [vmem:[%s4646_s5 + $0x10] sm:$0xff]  ;;  %v4680_v5 = vld [vmem:[%s4646_s5 + $0x18] sm:$0xff]  ;;  %v3732_v8 = vld [vmem:[#allocation5 + $0x4] ss:$8 sps:$4 sm:$0xff]   ;;  %1033 = vmatprep.mubr.bf16.mxu0 %v6245_v39  ;;  %s6110_s24 = scalar_lea.vmem [#allocation13], %s3383_s23  ;;  %s3443_s29 = sshll.u32 %s4420_s15, 13 }
  0xc9   : > { %v559_v6 = vmul.f32 %v4677_v4, %v4677_v4  ;;  %v560_v7 = vmul.f32 %v4680_v5, %v4680_v5  ;;  %v3734_v9 = vld [vmem:[#allocation5] ss:$8 sps:$4 sm:$0xff]   ;;  %v3735_v11 = vld [vmem:[#allocation5 + $0x14] ss:$8 sps:$4 sm:$0xff]   ;;  %1001 = vmatprep.subr.bf16.mxu0 %v3732_v8  ;;  %v3737_v12 = vld [vmem:[#allocation5 + $0x10] ss:$8 sps:$4 sm:$0xff]   ;;  %3612 = vmatprep.subr.bf16.mxu1 %v3732_v8 }
  0xca   : > { %589 = vadd.xlane.f32.xlu1 %v557_v2  ;;  %v4689_v10 = vld [vmem:[%s4646_s5 + $0x20] sm:$0xff]  ;;  %v4692_v13 = vld [vmem:[%s4646_s5 + $0x28] sm:$0xff]  ;;  %1002 = vmatpush1.bf16.msra.mxu0 %v3734_v9  ;;  %v4701_v18 = vld [vmem:[%s4646_s5 + $0x30] sm:$0xff]  ;;  %s3243_s26 = sshll.u32 %s6110_s24, 4  ;;  %s6322_s16 = sld [smem:[#allocation47_spill]]  ;;  %s6180_s26 = int_to_ptr.vmem [resolvable:$true] %s3243_s26 }
  0xcb   : > { %1003 = vmatprep.subr.bf16.mxu0 %v3735_v11  ;;  %v3738_v14 = vld [vmem:[#allocation5 + $0x24] ss:$8 sps:$4 sm:$0xff]   ;;  %3620 = vmatpush1.bf16.msra.mxu1 %v3734_v9  ;;  %v561_v15 = vmul.f32 %v4689_v10, %v4689_v10  ;;  %v3740_v16 = vld [vmem:[#allocation5 + $0x20] ss:$8 sps:$4 sm:$0xff]   ;;  %v562_v17 = vmul.f32 %v4692_v13, %v4692_v13  ;;  %v3741_v19 = vld [vmem:[#allocation5 + $0x34] ss:$8 sps:$4 sm:$0xff]   ;;  %v563_v23 = vmul.f32 %v4701_v18, %v4701_v18 }
  0xcc   : > { %462 = vadd.xlane.f32.xlu0 %v4668_v1  ;;  %3613 = vmatprep.subr.bf16.mxu1 %v3735_v11  ;;  %v3743_v20 = vld [vmem:[#allocation5 + $0x30] ss:$8 sps:$4 sm:$0xff]   ;;  %v3744_v22 = vld [vmem:[#allocation5 + $0x44] ss:$8 sps:$4 sm:$0xff]   ;;  %v3746_v24 = vld [vmem:[#allocation5 + $0x40] ss:$8 sps:$4 sm:$0xff]  }
  0xcd   : > { %v4704_v21 = vld [vmem:[%s4646_s5 + $0x38] sm:$0xff]  ;;  %v4713_v26 = vld [vmem:[%s4646_s5 + $0x40] sm:$0xff]  ;;  %v4716_v29 = vld [vmem:[%s4646_s5 + $0x48] sm:$0xff]  ;;  %1113 = vmatprep.mubr.bf16.mxu1 %v6245_v39  ;;  %s3229_s15 = scalar_lea.sflag [#allocation4], %s4642_s17  ;;  %s4255_s9 = scalar_lea.vmem %s6180_s26, 8192 }
  0xce   : > { %591 = vadd.xlane.f32.xlu1 %v558_v3  ;;  %1004 = vmatpush1.bf16.msra.mxu0 %v3737_v12  ;;  %v564_v25 = vmul.f32 %v4704_v21, %v4704_v21  ;;  %v3747_v27 = vld [vmem:[#allocation5 + $0x54] ss:$8 sps:$4 sm:$0xff]   ;;  %v3749_v28 = vld [vmem:[#allocation5 + $0x50] ss:$8 sps:$4 sm:$0xff]   ;;  %v565_v30 = vmul.f32 %v4713_v26, %v4713_v26  ;;  %v3750_v31 = vld [vmem:[#allocation5 + $0x64] ss:$8 sps:$4 sm:$0xff]   ;;  %v566_v33 = vmul.f32 %v4716_v29, %v4716_v29  ;;  %p4256_p7 = scmp.ne.s32.totalorder %s6180_s26, %s4255_s9 }
  0xcf   : > { %1005 = vmatprep.subr.bf16.mxu0 %v3738_v14  ;;  %3621 = vmatpush1.bf16.msra.mxu1 %v3737_v12  ;;  %v3752_v32 = vld [vmem:[#allocation5 + $0x60] ss:$8 sps:$4 sm:$0xff]   ;;  %v3753_v34 = vld [vmem:[#allocation5 + $0x74] ss:$8 sps:$4 sm:$0xff]   ;;  %v3755_v36 = vld [vmem:[#allocation5 + $0x70] ss:$8 sps:$4 sm:$0xff]  }
  0xd0   : > { %464 = vadd.xlane.f32.xlu0 %v4677_v4  ;;  %3614 = vmatprep.subr.bf16.mxu1 %v3738_v14  ;;  %v4725_v35 = vld [vmem:[%s4646_s5 + $0x50] sm:$0xff]  ;;  %v4728_v37 = vld [vmem:[%s4646_s5 + $0x58] sm:$0xff]  ;;  %v4739_v41 = vld [vmem:[%s4646_s5 + $0x60] sm:$0xff]  ;;  %s6178_s14 = scalar_lea.hbm %s6322_s16, %s3443_s29  ;;  %p6323_p4 = scmp.ne.s32.totalorder %s6259_s28, 0 }
  0xd1   : > { %v567_v38 = vmul.f32 %v4725_v35, %v4725_v35  ;;  %v568_v40 = vmul.f32 %v4728_v37, %v4728_v37  ;;  %v4742_v42 = vld [vmem:[%s4646_s5 + $0x68] sm:$0xff]  ;;  %v569_v43 = vmul.f32 %v4739_v41, %v4739_v41  ;;  %v4751_v45 = vld [vmem:[%s4646_s5 + $0x70] sm:$0xff]  ;;  %v4754_v46 = vld [vmem:[%s4646_s5 + $0x78] sm:$0xff]  ;;  %s4346_s1 = smov [#allocation13]  }
  0xd2   : > { %466 = vadd.xlane.f32.xlu1 %v4680_v5  ;;  %1006 = vmatpush1.bf16.msra.mxu0 %v3740_v16  ;;  %v570_v44 = vmul.f32 %v4742_v42, %v4742_v42  ;;  %v571_v47 = vmul.f32 %v4751_v45, %v4751_v45  ;;  %v572_v48 = vmul.f32 %v4754_v46, %v4754_v46  ;;  %v4763_v49 = vld [vmem:[%s4646_s5 + $0x80] sm:$0xff]  ;;  %v4766_v50 = vld [vmem:[%s4646_s5 + $0x88] sm:$0xff]  ;;  %v4775_v53 = vld [vmem:[%s4646_s5 + $0x90] sm:$0xff]  ;;  %p4257_p12 = pnand %p4256_p7, %p6323_p4  ;;  %s4259_s13 = sshll.u32 %s4346_s1, 4  ;;  %s4260_s13 = int_to_ptr.vmem [resolvable:$false] %s4259_s13 }
  0xd3   : > { %1007 = vmatprep.subr.bf16.mxu0 %v3741_v19  ;;  %3622 = vmatpush1.bf16.msra.mxu1 %v3740_v16  ;;  %v573_v51 = vmul.f32 %v4763_v49, %v4763_v49  ;;  %v574_v52 = vmul.f32 %v4766_v50, %v4766_v50  ;;  %v4778_v54 = vld [vmem:[%s4646_s5 + $0x98] sm:$0xff]  ;;  %v575_v55 = vmul.f32 %v4775_v53, %v4775_v53  ;;  %v4787_v57 = vld [vmem:[%s4646_s5 + $0xa0] sm:$0xff]  ;;  %v4790_v58 = vld [vmem:[%s4646_s5 + $0xa8] sm:$0xff]  ;;  %s4261_s18 = scalar_lea.vmem %s4260_s13, 16384  ;;  %p4262_p1 = scmp.lt.s32.totalorder %s6180_s26, %s4260_s13 }
  0xd4   : > { %593 = vadd.xlane.f32.xlu0 %v559_v6  ;;  %3615 = vmatprep.subr.bf16.mxu1 %v3741_v19  ;;  %v576_v56 = vmul.f32 %v4778_v54, %v4778_v54  ;;  %v577_v59 = vmul.f32 %v4787_v57, %v4787_v57  ;;  %v578_v60 = vmul.f32 %v4790_v58, %v4790_v58  ;;  %v4799_v61 = vld [vmem:[%s4646_s5 + $0xb0] sm:$0xff]  ;;  %v4802_v62 = vld [vmem:[%s4646_s5 + $0xb8] sm:$0xff]  ;;  %v4811_v3 = vld [vmem:[%s4646_s5 + $0xc0] sm:$0xff]  ;;  %p4258_p13 = pneg %p4257_p12  ;;  %p4263_p3 = scmp.lt.s32.totalorder %s4261_s18, %s4255_s9 }
  0xd5   : > { %v579_v63 = vmul.f32 %v4799_v61, %v4799_v61  ;;  %v580_v2 = vmul.f32 %v4802_v62, %v4802_v62  ;;  %v4814_v6 = vld [vmem:[%s4646_s5 + $0xc8] sm:$0xff]  ;;  %v4823_v9 = vld [vmem:[%s4646_s5 + $0xd0] sm:$0xff]  ;;  %v4826_v11 = vld [vmem:[%s4646_s5 + $0xd8] sm:$0xff] }
  0xd6   : > { %595 = vadd.xlane.f32.xlu1 %v560_v7  ;;  %1008 = vmatpush1.bf16.msra.mxu0 %v3743_v20  ;;  %v581_v7 = vmul.f32 %v4811_v3, %v4811_v3  ;;  %v582_v8 = vmul.f32 %v4814_v6, %v4814_v6  ;;  %v583_v12 = vmul.f32 %v4823_v9, %v4823_v9  ;;  %v4838_v16 = vld [vmem:[%s4646_s5 + $0xe8] sm:$0xff]  ;;  %p4264_p2 = por %p4263_p3, %p4262_p1 }
  0xd7   : > { %1009 = vmatprep.subr.bf16.mxu0 %v3744_v22  ;;  %3623 = vmatpush1.bf16.msra.mxu1 %v3743_v20  ;;  %v584_v14 = vmul.f32 %v4826_v11, %v4826_v11  ;;  %v586_v19 = vmul.f32 %v4838_v16, %v4838_v16  ;;  %v4847_v20 = vld [vmem:[%s4646_s5 + $0xf0] sm:$0xff] }
  0xd8   : > { %468 = vadd.xlane.f32.xlu0 %v4689_v10  ;;  %3616 = vmatprep.subr.bf16.mxu1 %v3744_v22  ;;  %v4850_v22 = vld [vmem:[%s4646_s5 + $0xf8] sm:$0xff]  ;;  %p4265_p8 = pnand %p4264_p2, %p4258_p13 }
  0xda   : > { %470 = vadd.xlane.f32.xlu1 %v4692_v13  ;;  %1010 = vmatpush1.bf16.msra.mxu0 %v3746_v24 }
  0xdb   : > { %1011 = vmatprep.subr.bf16.mxu0 %v3747_v27  ;;  %3624 = vmatpush1.bf16.msra.mxu1 %v3746_v24  ;;  %v588_v24 = vmul.f32 %v4850_v22, %v4850_v22 }
  0xdc   : > { %597 = vadd.xlane.f32.xlu0 %v561_v15  ;;  %3617 = vmatprep.subr.bf16.mxu1 %v3747_v27  ;;  %v4835_v15 = vld [vmem:[%s4646_s5 + $0xe0] sm:$0xff] }
  0xde   : > { %599 = vadd.xlane.f32.xlu1 %v562_v17  ;;  %1012 = vmatpush1.bf16.msra.mxu0 %v3749_v28  ;;  %v585_v17 = vmul.f32 %v4835_v15, %v4835_v15 }
  0xdf   : > { %1013 = vmatprep.subr.bf16.mxu0 %v3750_v31  ;;  %3625 = vmatpush1.bf16.msra.mxu1 %v3749_v28 }
  0xe0   : > { %472 = vadd.xlane.f32.xlu0 %v4701_v18  ;;  %3618 = vmatprep.subr.bf16.mxu1 %v3750_v31 }
  0xe2   : > { %474 = vadd.xlane.f32.xlu1 %v4704_v21  ;;  %1014 = vmatpush1.bf16.msra.mxu0 %v3752_v32 }
  0xe3   : > { %1015 = vmatprep.subr.bf16.mxu0 %v3753_v34  ;;  %3626 = vmatpush1.bf16.msra.mxu1 %v3752_v32 }
  0xe4   : > { %601 = vadd.xlane.f32.xlu0 %v563_v23  ;;  %3619 = vmatprep.subr.bf16.mxu1 %v3753_v34  ;;  %v587_v23 = vmul.f32 %v4847_v20, %v4847_v20 }
  0xe6   : > { %603 = vadd.xlane.f32.xlu1 %v564_v25  ;;  %1016 = vmatpush1.bf16.msra.mxu0 %v3755_v36 }
  0xe7   : > { %3627 = vmatpush1.bf16.msra.mxu1 %v3755_v36 }
  0xe8   : > { %476 = vadd.xlane.f32.xlu0 %v4713_v26 }
  0xea   : > { %478 = vadd.xlane.f32.xlu1 %v4716_v29 }
  0xec   : > { %605 = vadd.xlane.f32.xlu0 %v565_v30 }
  0xee   : > { %607 = vadd.xlane.f32.xlu1 %v566_v33 }
  0xf0   : > { %480 = vadd.xlane.f32.xlu0 %v4725_v35 }
  0xf2   : > { %482 = vadd.xlane.f32.xlu1 %v4728_v37 }
  0xf4   : > { %609 = vadd.xlane.f32.xlu0 %v567_v38 }
  0xf6   : > { %611 = vadd.xlane.f32.xlu1 %v568_v40 }
  0xf8   : > { %484 = vadd.xlane.f32.xlu0 %v4739_v41 }
  0xfa   : > { %486 = vadd.xlane.f32.xlu1 %v4742_v42 }
  0xfc   : > { %613 = vadd.xlane.f32.xlu0 %v569_v43 }
  0xfe   : > { %615 = vadd.xlane.f32.xlu1 %v570_v44 }
 0x100   : > { %488 = vadd.xlane.f32.xlu0 %v4751_v45 }
 0x102   : > { %490 = vadd.xlane.f32.xlu1 %v4754_v46 }
 0x104   : > { %617 = vadd.xlane.f32.xlu0 %v571_v47 }
 0x106   : > { %619 = vadd.xlane.f32.xlu1 %v572_v48 }
 0x108   : > { %492 = vadd.xlane.f32.xlu0 %v4763_v49 }
 0x10a   : > { %494 = vadd.xlane.f32.xlu1 %v4766_v50 }
 0x10c   : > { %621 = vadd.xlane.f32.xlu0 %v573_v51 }
 0x10e   : > { %623 = vadd.xlane.f32.xlu1 %v574_v52 }
 0x110   : > { %496 = vadd.xlane.f32.xlu0 %v4775_v53 }
 0x112   : > { %498 = vadd.xlane.f32.xlu1 %v4778_v54 }
 0x114   : > { %625 = vadd.xlane.f32.xlu0 %v575_v55 }
 0x116   : > { %627 = vadd.xlane.f32.xlu1 %v576_v56 }
 0x118   : > { %500 = vadd.xlane.f32.xlu0 %v4787_v57 }
 0x11a   : > { %502 = vadd.xlane.f32.xlu1 %v4790_v58 }
 0x11c   : > { %629 = vadd.xlane.f32.xlu0 %v577_v59 }
 0x11e   : > { %631 = vadd.xlane.f32.xlu1 %v578_v60 }
 0x120   : > { %504 = vadd.xlane.f32.xlu0 %v4799_v61 }
 0x122   : > { %506 = vadd.xlane.f32.xlu1 %v4802_v62 }
 0x124   : > { %633 = vadd.xlane.f32.xlu0 %v579_v63 }
 0x126   : > { %635 = vadd.xlane.f32.xlu1 %v580_v2 }
 0x128   : > { %508 = vadd.xlane.f32.xlu0 %v4811_v3 }
 0x12a   : > { %510 = vadd.xlane.f32.xlu1 %v4814_v6 }
 0x12c   : > { %637 = vadd.xlane.f32.xlu0 %v581_v7 }
 0x12e   : > { %639 = vadd.xlane.f32.xlu1 %v582_v8 }
 0x130   : > { %512 = vadd.xlane.f32.xlu0 %v4823_v9 }
 0x132   : > { %514 = vadd.xlane.f32.xlu1 %v4826_v11 }
 0x134   : > { %641 = vadd.xlane.f32.xlu0 %v583_v12 }
 0x136   : > { %643 = vadd.xlane.f32.xlu1 %v584_v14 }
 0x138   : > { %516 = vadd.xlane.f32.xlu0 %v4835_v15 }
 0x13a   : > { %518 = vadd.xlane.f32.xlu1 %v4838_v16 }
 0x13c   : > { %645 = vadd.xlane.f32.xlu0 %v585_v17 }
 0x13e   : > { %647 = vadd.xlane.f32.xlu1 %v586_v19 }
 0x140   : > { %520 = vadd.xlane.f32.xlu0 %v4847_v20 }
 0x142   : > { %522 = vadd.xlane.f32.xlu1 %v4850_v22 }
 0x144   : > { %649 = vadd.xlane.f32.xlu0 %v587_v23 }
 0x146   : > { %651 = vadd.xlane.f32.xlu1 %v588_v24 }
 0x155   : > { %v461_v25 = vpop.xlane.xlu0 %460 }
 0x156   : > { %v525_v27 = vmul.f32 0.0078125, %v461_v25 }
 0x157   : > { %v590_v28 = vpop.xlane.xlu1 %589 }
 0x158   : > { %v717_v30 = vmul.f32 %v525_v27, %v525_v27  ;;  %v653_v31 = vmul.f32 0.0078125, %v590_v28 }
 0x159   : > { %v463_v32 = vpop.xlane.xlu0 %462 }
 0x15a   : > { %v749_v33 = vsub.f32 %v653_v31, %v717_v30  ;;  %v526_v34 = vmul.f32 0.0078125, %v463_v32 }
 0x15b   : > { %v592_v36 = vpop.xlane.xlu1 %591 }
 0x15c   : > { %v781_v38 = vadd.f32 1e-05, %v749_v33  ;;  %v718_v40 = vmul.f32 %v526_v34, %v526_v34  ;;  %v654_v43 = vmul.f32 0.0078125, %v592_v36  ;;  %v685_v33 = vsub.f32 %v4665_v0, %v525_v27 }
 0x15d   : > { %v465_v44 = vpop.xlane.xlu0 %464  ;;  %v686_v36 = vsub.f32 %v4668_v1, %v526_v34 }
 0x15e   : > { %v750_v47 = vsub.f32 %v654_v43, %v718_v40  ;;  %v527_v48 = vmul.f32 0.0078125, %v465_v44  ;;  %3796 = vrsqrt.f32 %v781_v38 }
 0x15f   : > { %v467_v51 = vpop.xlane.xlu1 %466 }
 0x160   : > { %v782_v52 = vadd.f32 1e-05, %v750_v47  ;;  %v719_v55 = vmul.f32 %v527_v48, %v527_v48  ;;  %v528_v56 = vmul.f32 0.0078125, %v467_v51 }
 0x161   : > { %v594_v59 = vpop.xlane.xlu0 %593 }
 0x162   : > { %3798 = vrsqrt.f32 %v782_v52  ;;  %v655_v60 = vmul.f32 0.0078125, %v594_v59  ;;  %v720_v2 = vmul.f32 %v528_v56, %v528_v56 }
 0x163   : > { %v596_v63 = vpop.xlane.xlu1 %595 }
 0x164   : > { %v751_v7 = vsub.f32 %v655_v60, %v719_v55  ;;  %v656_v8 = vmul.f32 0.0078125, %v596_v63 }
 0x165   : > { %v469_v12 = vpop.xlane.xlu0 %468 }
 0x166   : > { %v783_v14 = vadd.f32 1e-05, %v751_v7  ;;  %v752_v17 = vsub.f32 %v656_v8, %v720_v2  ;;  %v4858_v19 = vmul.f32 0.0078125, %v469_v12 }
 0x167   : > { %v471_v23 = vpop.xlane.xlu1 %470 }
 0x168   : > { %3800 = vrsqrt.f32 %v783_v14  ;;  %v784_v24 = vadd.f32 1e-05, %v752_v17  ;;  %v721_v25 = vmul.f32 %v4858_v19, %v4858_v19  ;;  %v4862_v28 = vmul.f32 0.0078125, %v471_v23  ;;  %v3797_v31 = vpop.eup %3796 }
 0x169   : > { %v598_v30 = vpop.xlane.xlu0 %597  ;;  %v845_v52 = vmul.f32 %v3797_v31, %v685_v33  ;;  %v687_v14 = vsub.f32 %v4677_v4, %v527_v48  ;;  %v688_v17 = vsub.f32 %v4680_v5, %v528_v56 }
 0x16a   : > { %3802 = vrsqrt.f32 %v784_v24  ;;  %v657_v32 = vmul.f32 0.0078125, %v598_v30  ;;  %v722_v43 = vmul.f32 %v4862_v28, %v4862_v28 }
 0x16b   : > { %v600_v38 = vpop.xlane.xlu1 %599 }
 0x16c   : > { %v3799_v40 = vpop.eup %3798  ;;  %v753_v44 = vsub.f32 %v657_v32, %v721_v25  ;;  %v658_v47 = vmul.f32 0.0078125, %v600_v38 }
 0x16d   : > { %v473_v51 = vpop.xlane.xlu0 %472  ;;  %v846_v55 = vmul.f32 %v3799_v40, %v686_v36 }
 0x16e   : > { %v785_v59 = vadd.f32 1e-05, %v753_v44  ;;  %v754_v60 = vsub.f32 %v658_v47, %v722_v43  ;;  %v4868_v63 = vmul.f32 0.0078125, %v473_v51 }
 0x16f   : > { %v475_v2 = vpop.xlane.xlu1 %474  ;;  %v877_v7 = vpack.c.bf16 %v846_v55, %v845_v52  ;;  %v689_v55 = vsub.f32 %v4689_v10, %v4858_v19 }
 0x170   : > { %3804 = vrsqrt.f32 %v785_v59  ;;  %v786_v0 = vadd.f32 1e-05, %v754_v60  ;;  %v723_v1 = vmul.f32 %v4868_v63, %v4868_v63  ;;  %v4872_v27 = vmul.f32 0.0078125, %v475_v2 }
 0x171   : > { %v602_v34 = vpop.xlane.xlu0 %601  ;;  %1034 = vmatmul.mubr.bf16.vlgmr.msra.gmra.mrb[0].mxu0 %v877_v7  ;;  %v690_v59 = vsub.f32 %v4692_v13, %v4862_v28 }
 0x172   : > { %v3801_v8 = vpop.eup %3800  ;;  %3806 = vrsqrt.f32 %v786_v0  ;;  %v659_v12 = vmul.f32 0.0078125, %v602_v34  ;;  %1043 = vmatprep.mubr.bf16.mxu0 %v6245_v39  ;;  %v724_v25 = vmul.f32 %v4872_v27, %v4872_v27 }
 0x173   : > { %v604_v23 = vpop.xlane.xlu1 %603  ;;  %v847_v33 = vmul.f32 %v3801_v8, %v687_v14 }
 0x174   : > { %v3803_v24 = vpop.eup %3802  ;;  %v755_v30 = vsub.f32 %v659_v12, %v723_v1  ;;  %v660_v31 = vmul.f32 0.0078125, %v604_v23 }
 0x175   : > { %v477_v32 = vpop.xlane.xlu0 %476  ;;  %v848_v36 = vmul.f32 %v3803_v24, %v688_v17 }
 0x176   : > { %v787_v38 = vadd.f32 1e-05, %v755_v30  ;;  %v756_v40 = vsub.f32 %v660_v31, %v724_v25  ;;  %v4879_v43 = vmul.f32 0.0078125, %v477_v32  ;;  %v691_v32 = vsub.f32 %v4701_v18, %v4868_v63 }
 0x177   : > { %v479_v44 = vpop.xlane.xlu1 %478  ;;  %v878_v47 = vpack.c.bf16 %v848_v36, %v847_v33  ;;  %v692_v33 = vsub.f32 %v4704_v21, %v4872_v27 }
 0x178   : > { %3808 = vrsqrt.f32 %v787_v38  ;;  %v788_v4 = vadd.f32 1e-05, %v756_v40  ;;  %v725_v5 = vmul.f32 %v4879_v43, %v4879_v43  ;;  %v4883_v48 = vmul.f32 0.0078125, %v479_v44 }
 0x179   : > { %v606_v56 = vpop.xlane.xlu0 %605  ;;  %1044 = vmatmul.mubr.bf16.gmra.mrb[4].mxu0 %v878_v47 }
 0x17a   : > { %v3805_v51 = vpop.eup %3804  ;;  %3810 = vrsqrt.f32 %v788_v4  ;;  %v661_v52 = vmul.f32 0.0078125, %v606_v56  ;;  %1053 = vmatprep.mubr.bf16.mxu0 %v6245_v39  ;;  %v726_v7 = vmul.f32 %v4883_v48, %v4883_v48 }
 0x17b   : > { %v608_v60 = vpop.xlane.xlu1 %607  ;;  %v849_v8 = vmul.f32 %v3805_v51, %v689_v55 }
 0x17c   : > { %v3807_v2 = vpop.eup %3806  ;;  %v757_v0 = vsub.f32 %v661_v52, %v725_v5  ;;  %v662_v1 = vmul.f32 0.0078125, %v608_v60 }
 0x17d   : > { %v481_v34 = vpop.xlane.xlu0 %480  ;;  %v850_v12 = vmul.f32 %v3807_v2, %v690_v59 }
 0x17e   : > { %v789_v14 = vadd.f32 1e-05, %v757_v0  ;;  %v758_v17 = vsub.f32 %v662_v1, %v726_v7  ;;  %v4892_v23 = vmul.f32 0.0078125, %v481_v34  ;;  %v693_v0 = vsub.f32 %v4713_v26, %v4879_v43 }
 0x17f   : > { %v483_v24 = vpop.xlane.xlu1 %482  ;;  %v879_v25 = vpack.c.bf16 %v850_v12, %v849_v8  ;;  %v694_v1 = vsub.f32 %v4716_v29, %v4883_v48 }
 0x180   : > { %3812 = vrsqrt.f32 %v789_v14  ;;  %v790_v10 = vadd.f32 1e-05, %v758_v17  ;;  %v727_v13 = vmul.f32 %v4892_v23, %v4892_v23  ;;  %v4896_v19 = vmul.f32 0.0078125, %v483_v24 }
 0x181   : > { %v610_v28 = vpop.xlane.xlu0 %609  ;;  %1054 = vmatmul.mubr.bf16.gmra.mrb[8].mxu0 %v879_v25 }
 0x182   : > { %v3809_v30 = vpop.eup %3808  ;;  %3814 = vrsqrt.f32 %v790_v10  ;;  %v663_v31 = vmul.f32 0.0078125, %v610_v28  ;;  %1063 = vmatprep.mubr.bf16.mxu0 %v6245_v39  ;;  %v728_v40 = vmul.f32 %v4896_v19, %v4896_v19 }
 0x183   : > { %v612_v36 = vpop.xlane.xlu1 %611  ;;  %v851_v5 = vmul.f32 %v3809_v30, %v691_v32 }
 0x184   : > { %v3811_v38 = vpop.eup %3810  ;;  %v759_v44 = vsub.f32 %v663_v31, %v727_v13  ;;  %v664_v47 = vmul.f32 0.0078125, %v612_v36 }
 0x185   : > { %v485_v4 = vpop.xlane.xlu0 %484  ;;  %v852_v56 = vmul.f32 %v3811_v38, %v692_v33  ;;  %v695_v38 = vsub.f32 %v4725_v35, %v4892_v23 }
 0x186   : > { %v791_v51 = vadd.f32 1e-05, %v759_v44  ;;  %v760_v52 = vsub.f32 %v664_v47, %v728_v40  ;;  %v4905_v55 = vmul.f32 0.0078125, %v485_v4  ;;  %v696_v40 = vsub.f32 %v4728_v37, %v4896_v19 }
 0x187   : > { %v487_v59 = vpop.xlane.xlu1 %486  ;;  %v880_v60 = vpack.c.bf16 %v852_v56, %v851_v5 }
 0x188   : > { %3816 = vrsqrt.f32 %v791_v51  ;;  %v792_v18 = vadd.f32 1e-05, %v760_v52  ;;  %v729_v21 = vmul.f32 %v4905_v55, %v4905_v55  ;;  %v4909_v63 = vmul.f32 0.0078125, %v487_v59 }
 0x189   : > { %v614_v27 = vpop.xlane.xlu0 %613  ;;  %1064 = vmatmul.mubr.bf16.gmra.mrb[12].mxu0 %v880_v60 }
 0x18a   : > { %v3813_v2 = vpop.eup %3812  ;;  %3818 = vrsqrt.f32 %v792_v18  ;;  %v665_v7 = vmul.f32 0.0078125, %v614_v27  ;;  %1073 = vmatprep.mubr.bf16.mxu0 %v6245_v39  ;;  %v730_v12 = vmul.f32 %v4909_v63, %v4909_v63 }
 0x18b   : > { %v616_v34 = vpop.xlane.xlu1 %615  ;;  %v853_v25 = vmul.f32 %v3813_v2, %v693_v0 }
 0x18c   : > { %v3815_v8 = vpop.eup %3814  ;;  %v761_v14 = vsub.f32 %v665_v7, %v729_v21  ;;  %v666_v17 = vmul.f32 0.0078125, %v616_v34  ;;  %v698_v34 = vsub.f32 %v4742_v42, %v4909_v63 }
 0x18d   : > { %v489_v24 = vpop.xlane.xlu0 %488  ;;  %v854_v10 = vmul.f32 %v3815_v8, %v694_v1  ;;  %v697_v1 = vsub.f32 %v4739_v41, %v4905_v55 }
 0x18e   : > { %v793_v13 = vadd.f32 1e-05, %v761_v14  ;;  %v762_v28 = vsub.f32 %v666_v17, %v730_v12  ;;  %v4918_v30 = vmul.f32 0.0078125, %v489_v24 }
 0x18f   : > { %v491_v31 = vpop.xlane.xlu1 %490  ;;  %v881_v32 = vpack.c.bf16 %v854_v10, %v853_v25 }
 0x190   : > { %3820 = vrsqrt.f32 %v793_v13  ;;  %v794_v26 = vadd.f32 1e-05, %v762_v28  ;;  %v731_v29 = vmul.f32 %v4918_v30, %v4918_v30  ;;  %v4922_v43 = vmul.f32 0.0078125, %v491_v31 }
 0x191   : > { %v618_v48 = vpop.xlane.xlu0 %617  ;;  %1074 = vmatmul.mubr.bf16.gmra.mrb[16].mxu0 %v881_v32 }
 0x192   : > { %v3817_v33 = vpop.eup %3816  ;;  %3822 = vrsqrt.f32 %v794_v26  ;;  %v667_v36 = vmul.f32 0.0078125, %v618_v48  ;;  %1083 = vmatprep.mubr.bf16.mxu0 %v6245_v39  ;;  %v732_v4 = vmul.f32 %v4922_v43, %v4922_v43 }
 0x193   : > { %v620_v44 = vpop.xlane.xlu1 %619  ;;  %v855_v52 = vmul.f32 %v3817_v33, %v695_v38  ;;  %v700_v38 = vsub.f32 %v4754_v46, %v4922_v43 }
 0x194   : > { %v3819_v47 = vpop.eup %3818  ;;  %v763_v5 = vsub.f32 %v667_v36, %v731_v29  ;;  %v668_v56 = vmul.f32 0.0078125, %v620_v44  ;;  %v699_v36 = vsub.f32 %v4751_v45, %v4918_v30 }
 0x195   : > { %v493_v51 = vpop.xlane.xlu0 %492  ;;  %v856_v59 = vmul.f32 %v3819_v47, %v696_v40 }
 0x196   : > { %v795_v60 = vadd.f32 1e-05, %v763_v5  ;;  %v764_v18 = vsub.f32 %v668_v56, %v732_v4  ;;  %v4931_v21 = vmul.f32 0.0078125, %v493_v51 }
 0x197   : > { %v495_v27 = vpop.xlane.xlu1 %494  ;;  %v882_v2 = vpack.c.bf16 %v856_v59, %v855_v52 }
 0x198   : > { %3824 = vrsqrt.f32 %v795_v60  ;;  %v796_v35 = vadd.f32 1e-05, %v764_v18  ;;  %v733_v37 = vmul.f32 %v4931_v21, %v4931_v21  ;;  %v4935_v23 = vmul.f32 0.0078125, %v495_v27 }
 0x199   : > { %v622_v19 = vpop.xlane.xlu0 %621  ;;  %1084 = vmatmul.mubr.bf16.gmra.mrb[20].mxu0 %v882_v2 }
 0x19a   : > { %v3821_v7 = vpop.eup %3820  ;;  %3826 = vrsqrt.f32 %v796_v35  ;;  %v669_v0 = vmul.f32 0.0078125, %v622_v19  ;;  %1093 = vmatprep.mubr.bf16.mxu0 %v6245_v39  ;;  %v734_v14 = vmul.f32 %v4935_v23, %v4935_v23  ;;  %v701_v19 = vsub.f32 %v4763_v49, %v4931_v21 }
 0x19b   : > { %v624_v8 = vpop.xlane.xlu1 %623  ;;  %v857_v10 = vmul.f32 %v3821_v7, %v697_v1  ;;  %v702_v7 = vsub.f32 %v4766_v50, %v4935_v23 }
 0x19c   : > { %v3823_v12 = vpop.eup %3822  ;;  %v765_v17 = vsub.f32 %v669_v0, %v733_v37  ;;  %v670_v24 = vmul.f32 0.0078125, %v624_v8 }
 0x19d   : > { %v497_v25 = vpop.xlane.xlu0 %496  ;;  %v858_v13 = vmul.f32 %v3823_v12, %v698_v34 }
 0x19e   : > { %v797_v28 = vadd.f32 1e-05, %v765_v17  ;;  %v766_v31 = vsub.f32 %v670_v24, %v734_v14  ;;  %v4944_v32 = vmul.f32 0.0078125, %v497_v25 }
 0x19f   : > { %v499_v26 = vpop.xlane.xlu1 %498  ;;  %v883_v29 = vpack.c.bf16 %v858_v13, %v857_v10 }
 0x1a0   : > { %3828 = vrsqrt.f32 %v797_v28  ;;  %v798_v41 = vadd.f32 1e-05, %v766_v31  ;;  %v735_v42 = vmul.f32 %v4944_v32, %v4944_v32  ;;  %v4948_v55 = vmul.f32 0.0078125, %v499_v26 }
 0x1a1   : > { %v626_v63 = vpop.xlane.xlu0 %625  ;;  %1094 = vmatmul.mubr.bf16.gmra.mrb[24].mxu0 %v883_v29 }
 0x1a2   : > { %v3825_v48 = vpop.eup %3824  ;;  %3830 = vrsqrt.f32 %v798_v41  ;;  %v671_v33 = vmul.f32 0.0078125, %v626_v63  ;;  %1103 = vmatprep.mubr.bf16.mxu0 %v6245_v39  ;;  %v736_v47 = vmul.f32 %v4948_v55, %v4948_v55  ;;  %v703_v41 = vsub.f32 %v4775_v53, %v4944_v32 }
 0x1a3   : > { %v628_v40 = vpop.xlane.xlu1 %627  ;;  %v859_v51 = vmul.f32 %v3825_v48, %v699_v36 }
 0x1a4   : > { %v3827_v44 = vpop.eup %3826  ;;  %v767_v4 = vsub.f32 %v671_v33, %v735_v42  ;;  %v672_v5 = vmul.f32 0.0078125, %v628_v40  ;;  %v704_v42 = vsub.f32 %v4778_v54, %v4948_v55 }
 0x1a5   : > { %v501_v56 = vpop.xlane.xlu0 %500  ;;  %v860_v52 = vmul.f32 %v3827_v44, %v700_v38 }
 0x1a6   : > { %v799_v59 = vadd.f32 1e-05, %v767_v4  ;;  %v768_v60 = vsub.f32 %v672_v5, %v736_v47  ;;  %v4957_v18 = vmul.f32 0.0078125, %v501_v56 }
 0x1a7   : > { %v503_v27 = vpop.xlane.xlu1 %502  ;;  %v884_v2 = vpack.c.bf16 %v860_v52, %v859_v51 }
 0x1a8   : > { %3832 = vrsqrt.f32 %v799_v59  ;;  %v800_v45 = vadd.f32 1e-05, %v768_v60  ;;  %v737_v46 = vmul.f32 %v4957_v18, %v4957_v18  ;;  %v4961_v30 = vmul.f32 0.0078125, %v503_v27 }
 0x1a9   : > { %v630_v43 = vpop.xlane.xlu0 %629  ;;  %1104 = vmatmul.mubr.bf16.gmra.mrb[28].mxu0 %v884_v2  ;;  %v705_v27 = vsub.f32 %v4787_v57, %v4957_v18 }
 0x1aa   : > { %v3829_v35 = vpop.eup %3828  ;;  %3834 = vrsqrt.f32 %v800_v45  ;;  %v673_v37 = vmul.f32 0.0078125, %v630_v43  ;;  %3003 = vmatprep.mubr.bf16.mxu0 %v6245_v39  ;;  %v738_v34 = vmul.f32 %v4961_v30, %v4961_v30  ;;  %v706_v2 = vsub.f32 %v4790_v58, %v4961_v30 }
 0x1ab   : > { %v632_v0 = vpop.xlane.xlu1 %631  ;;  %v861_v17 = vmul.f32 %v3829_v35, %v701_v19 }
 0x1ac   : > { %v3831_v1 = vpop.eup %3830  ;;  %v769_v8 = vsub.f32 %v673_v37, %v737_v46  ;;  %v674_v12 = vmul.f32 0.0078125, %v632_v0 }
 0x1ad   : > { %v505_v14 = vpop.xlane.xlu0 %504  ;;  %v862_v24 = vmul.f32 %v3831_v1, %v702_v7 }
 0x1ae   : > { %v801_v25 = vadd.f32 1e-05, %v769_v8  ;;  %v770_v10 = vsub.f32 %v674_v12, %v738_v34  ;;  %v4970_v13 = vmul.f32 0.0078125, %v505_v14 }
 0x1af   : > { %v507_v28 = vpop.xlane.xlu1 %506  ;;  %v885_v31 = vpack.c.bf16 %v862_v24, %v861_v17 }
 0x1b0   : > { %3836 = vrsqrt.f32 %v801_v25  ;;  %v802_v49 = vadd.f32 1e-05, %v770_v10  ;;  %v739_v50 = vmul.f32 %v4970_v13, %v4970_v13  ;;  %v4974_v21 = vmul.f32 0.0078125, %v507_v28 }
 0x1b1   : > { %v634_v23 = vpop.xlane.xlu0 %633  ;;  %1114 = vmatmul.mubr.bf16.vlgmr.msra.gmra.mrb[0].mxu1 %v885_v31  ;;  %v707_v25 = vsub.f32 %v4799_v61, %v4970_v13 }
 0x1b2   : > { %v3833_v26 = vpop.eup %3832  ;;  %3838 = vrsqrt.f32 %v802_v49  ;;  %v675_v29 = vmul.f32 0.0078125, %v634_v23  ;;  %1123 = vmatprep.mubr.bf16.mxu1 %v6245_v39  ;;  %v740_v33 = vmul.f32 %v4974_v21, %v4974_v21  ;;  %v708_v10 = vsub.f32 %v4802_v62, %v4974_v21 }
 0x1b3   : > { %v636_v63 = vpop.xlane.xlu1 %635  ;;  %v863_v44 = vmul.f32 %v3833_v26, %v703_v41 }
 0x1b4   : > { %v3835_v48 = vpop.eup %3834  ;;  %v771_v36 = vsub.f32 %v675_v29, %v739_v50  ;;  %v676_v38 = vmul.f32 0.0078125, %v636_v63 }
 0x1b5   : > { %v509_v40 = vpop.xlane.xlu0 %508  ;;  %v864_v47 = vmul.f32 %v3835_v48, %v704_v42 }
 0x1b6   : > { %v803_v4 = vadd.f32 1e-05, %v771_v36  ;;  %v772_v5 = vsub.f32 %v676_v38, %v740_v33  ;;  %v4983_v56 = vmul.f32 0.0078125, %v509_v40 }
 0x1b7   : > { %v511_v51 = vpop.xlane.xlu1 %510  ;;  %v886_v52 = vpack.c.bf16 %v864_v47, %v863_v44 }
 0x1b8   : > { %3840 = vrsqrt.f32 %v803_v4  ;;  %v804_v53 = vadd.f32 1e-05, %v772_v5  ;;  %v741_v54 = vmul.f32 %v4983_v56, %v4983_v56  ;;  %v4987_v32 = vmul.f32 0.0078125, %v511_v51 }
 0x1b9   : > { %v638_v55 = vpop.xlane.xlu0 %637  ;;  %1124 = vmatmul.mubr.bf16.gmra.mrb[4].mxu1 %v886_v52  ;;  %v709_v44 = vsub.f32 %v4811_v3, %v4983_v56 }
 0x1ba   : > { %v3837_v59 = vpop.eup %3836  ;;  %3842 = vrsqrt.f32 %v804_v53  ;;  %v677_v60 = vmul.f32 0.0078125, %v638_v55  ;;  %1133 = vmatprep.mubr.bf16.mxu1 %v6245_v39  ;;  %v742_v43 = vmul.f32 %v4987_v32, %v4987_v32  ;;  %v710_v47 = vsub.f32 %v4814_v6, %v4987_v32 }
 0x1bb   : > { %v640_v45 = vpop.xlane.xlu1 %639  ;;  %v865_v7 = vmul.f32 %v3837_v59, %v705_v27 }
 0x1bc   : > { %v3839_v46 = vpop.eup %3838  ;;  %v773_v35 = vsub.f32 %v677_v60, %v741_v54  ;;  %v678_v37 = vmul.f32 0.0078125, %v640_v45 }
 0x1bd   : > { %v513_v19 = vpop.xlane.xlu0 %512  ;;  %v866_v0 = vmul.f32 %v3839_v46, %v706_v2 }
 0x1be   : > { %v805_v1 = vadd.f32 1e-05, %v773_v35  ;;  %v774_v34 = vsub.f32 %v678_v37, %v742_v43  ;;  %v4996_v8 = vmul.f32 0.0078125, %v513_v19 }
 0x1bf   : > { %v515_v12 = vpop.xlane.xlu1 %514  ;;  %v887_v14 = vpack.c.bf16 %v866_v0, %v865_v7 }
 0x1c0   : > { %3844 = vrsqrt.f32 %v805_v1  ;;  %v806_v57 = vadd.f32 1e-05, %v774_v34  ;;  %v743_v58 = vmul.f32 %v4996_v8, %v4996_v8  ;;  %v5000_v18 = vmul.f32 0.0078125, %v515_v12 }
 0x1c1   : > { %v642_v30 = vpop.xlane.xlu0 %641  ;;  %1134 = vmatmul.mubr.bf16.gmra.mrb[8].mxu1 %v887_v14  ;;  %v711_v37 = vsub.f32 %v4823_v9, %v4996_v8 }
 0x1c2   : > { %v3841_v17 = vpop.eup %3840  ;;  %3846 = vrsqrt.f32 %v806_v57  ;;  %v679_v24 = vmul.f32 0.0078125, %v642_v30  ;;  %1143 = vmatprep.mubr.bf16.mxu1 %v6245_v39  ;;  %v744_v49 = vmul.f32 %v5000_v18, %v5000_v18  ;;  %v712_v19 = vsub.f32 %v4826_v11, %v5000_v18 }
 0x1c3   : > { %v644_v28 = vpop.xlane.xlu1 %643  ;;  %v867_v29 = vmul.f32 %v3841_v17, %v707_v25 }
 0x1c4   : > { %v3843_v31 = vpop.eup %3842  ;;  %v775_v50 = vsub.f32 %v679_v24, %v743_v58  ;;  %v680_v23 = vmul.f32 0.0078125, %v644_v28 }
 0x1c5   : > { %v517_v26 = vpop.xlane.xlu0 %516  ;;  %v868_v41 = vmul.f32 %v3843_v31, %v708_v10 }
 0x1c6   : > { %v807_v42 = vadd.f32 1e-05, %v775_v50  ;;  %v776_v63 = vsub.f32 %v680_v23, %v744_v49  ;;  %v553_v48 = vmul.f32 0.0078125, %v517_v26 }
 0x1c7   : > { %v519_v33 = vpop.xlane.xlu1 %518  ;;  %v888_v36 = vpack.c.bf16 %v868_v41, %v867_v29 }
 0x1c8   : > { %3848 = vrsqrt.f32 %v807_v42  ;;  %v808_v61 = vadd.f32 1e-05, %v776_v63  ;;  %v745_v13 = vmul.f32 %v553_v48, %v553_v48  ;;  %v554_v38 = vmul.f32 0.0078125, %v519_v33  ;;  %v909_v63 = vld [vmem:[%s6229_s2] sm:$0x3] }
 0x1c9   : > { %v646_v62 = vpop.xlane.xlu0 %645  ;;  %1144 = vmatmul.mubr.bf16.gmra.mrb[12].mxu1 %v888_v36  ;;  %v713_v9 = vsub.f32 %v4835_v15, %v553_v48  ;;  %v911_v15 = vlaneseq }
 0x1ca   : > { %v3845_v21 = vpop.eup %3844  ;;  %3850 = vrsqrt.f32 %v808_v61  ;;  %v681_v40 = vmul.f32 0.0078125, %v646_v62  ;;  %1153 = vmatprep.mubr.bf16.mxu1 %v6245_v39  ;;  %v746_v51 = vmul.f32 %v554_v38, %v554_v38  ;;  %v714_v11 = vsub.f32 %v4838_v16, %v554_v38 }
 0x1cb   : > { %v648_v4 = vpop.xlane.xlu1 %647  ;;  %v869_v55 = vmul.f32 %v3845_v21, %v709_v44  ;;  %v5025_v42 = vshrl.u32 %v911_v15, 7 }
 0x1cc   : > { %v3847_v5 = vpop.eup %3846  ;;  %v777_v52 = vsub.f32 %v681_v40, %v745_v13  ;;  %v682_v53 = vmul.f32 0.0078125, %v648_v4 }
 0x1cd   : > { %v521_v54 = vpop.xlane.xlu0 %520  ;;  %v870_v59 = vmul.f32 %v3847_v5, %v710_v47  ;;  %v917_v16 = vsub.s32 1, %v5025_v42 }
 0x1ce   : > { %v809_v60 = vadd.f32 1e-05, %v777_v52  ;;  %v778_v27 = vsub.f32 %v682_v53, %v746_v51  ;;  %v555_v2 = vmul.f32 0.0078125, %v521_v54 }
 0x1cf   : > { %v523_v45 = vpop.xlane.xlu1 %522  ;;  %v889_v46 = vpack.c.bf16 %v870_v59, %v869_v55  ;;  %v5031_v48 = vrot.slane %v909_v63, %v917_v16 }
 0x1d0   : > { %3852 = vrsqrt.f32 %v809_v60  ;;  %v810_v43 = vadd.f32 1e-05, %v778_v27  ;;  %v747_v35 = vmul.f32 %v555_v2, %v555_v2  ;;  %v556_v3 = vmul.f32 0.0078125, %v523_v45 }
 0x1d1   : > { %v650_v56 = vpop.xlane.xlu0 %649  ;;  %1154 = vmatmul.mubr.bf16.gmra.mrb[16].mxu1 %v889_v46  ;;  %v715_v49 = vsub.f32 %v4847_v20, %v555_v2 }
 0x1d2   : > { %v3849_v6 = vpop.eup %3848  ;;  %3854 = vrsqrt.f32 %v810_v43  ;;  %v683_v32 = vmul.f32 0.0078125, %v650_v56  ;;  %1163 = vmatprep.mubr.bf16.mxu1 %v6245_v39  ;;  %v748_v1 = vmul.f32 %v556_v3, %v556_v3  ;;  %v716_v50 = vsub.f32 %v4850_v22, %v556_v3 }
 0x1d3   : > { %v652_v7 = vpop.xlane.xlu1 %651  ;;  %v871_v14 = vmul.f32 %v3849_v6, %v711_v37 }
 0x1d4   : > { %v3851_v0 = vpop.eup %3850  ;;  %v779_v34 = vsub.f32 %v683_v32, %v747_v35  ;;  %v684_v12 = vmul.f32 0.0078125, %v652_v7 }
 0x1d5   : > { %v872_v57 = vmul.f32 %v3851_v0, %v712_v19 }
 0x1d6   : > { %v811_v58 = vadd.f32 1e-05, %v779_v34  ;;  %v780_v30 = vsub.f32 %v684_v12, %v748_v1 }
 0x1d7   : > { %v890_v17 = vpack.c.bf16 %v872_v57, %v871_v14 }
 0x1d8   : > { %3856 = vrsqrt.f32 %v811_v58  ;;  %v812_v24 = vadd.f32 1e-05, %v780_v30 }
 0x1d9   : > { %1164 = vmatmul.mubr.bf16.gmra.mrb[20].mxu1 %v890_v17 }
 0x1da   : > { %v3853_v25 = vpop.eup %3852  ;;  %3858 = vrsqrt.f32 %v812_v24  ;;  %1173 = vmatprep.mubr.bf16.mxu1 %v6245_v39 }
 0x1db   : > { %v873_v18 = vmul.f32 %v3853_v25, %v713_v9 }
 0x1dc   : > { %v3855_v8 = vpop.eup %3854 }
 0x1dd   : > { %v874_v10 = vmul.f32 %v3855_v8, %v714_v11 }
 0x1df   : > { %v891_v28 = vpack.c.bf16 %v874_v10, %v873_v18 }
 0x1e1   : > { %1174 = vmatmul.mubr.bf16.gmra.mrb[24].mxu1 %v891_v28 }
 0x1e2   : > { %v3857_v31 = vpop.eup %3856  ;;  %1183 = vmatprep.mubr.bf16.mxu1 %v6245_v39 }
 0x1e3   : > { %v875_v26 = vmul.f32 %v3857_v31, %v715_v49 }
 0x1e4   : > { %v3859_v23 = vpop.eup %3858 }
 0x1e5   : > { %v876_v29 = vmul.f32 %v3859_v23, %v716_v50 }
 0x1e7   : > { %v892_v41 = vpack.c.bf16 %v876_v29, %v875_v26 }
 0x1e9   : > { %1184 = vmatmul.mubr.bf16.gmra.mrb[28].mxu1 %v892_v41 }
 0x244   : > { %v5033_v33 = vpop.f32.mrb[0].mxu0 }
 0x245   : > { %v1037_v20 = vpop.f32.mrb[1].mxu0 }
 0x246   : > { %v1038_v22 = vadd.f32 %v1037_v20, %v5031_v48  ;;  %v5036_v36 = vpop.f32.mrb[2].mxu0 }
 0x247   : > { %v1041_v61 = vpop.f32.mrb[3].mxu0 }
 0x248   : > { %v1195_v13 = vmul.f32 %v1038_v22, %v1038_v22  ;;  %v5039_v38 = vadd.f32 %v1041_v61, %v5031_v48 }
 0x24a   : > { %v1259_v62 = vmul.f32 %v1195_v13, %v1038_v22  ;;  %v1197_v21 = vmul.f32 %v5039_v38, %v5039_v38 }
 0x24c   : > { %v1323_v40 = vmul.f32 0.044715, %v1259_v62  ;;  %v1261_v44 = vmul.f32 %v1197_v21, %v5039_v38  ;;  %v5044_v47 = vpop.f32.mrb[4].mxu0 }
 0x24d   : > { %v1047_v4 = vpop.f32.mrb[5].mxu0 }
 0x24e   : > { %v1387_v5 = vadd.f32 %v1323_v40, %v1038_v22  ;;  %v1325_v51 = vmul.f32 0.044715, %v1261_v44  ;;  %v5047_v52 = vadd.f32 %v1047_v4, %v5031_v48  ;;  %v5049_v53 = vpop.f32.mrb[6].mxu0 }
 0x24f   : > { %v1051_v54 = vpop.f32.mrb[7].mxu0 }
 0x250   : > { %v1451_v55 = vmul.f32 0.7978846, %v1387_v5  ;;  %v1389_v59 = vadd.f32 %v1325_v51, %v5039_v38  ;;  %v1199_v60 = vmul.f32 %v5047_v52, %v5047_v52  ;;  %v5055_v27 = vadd.f32 %v1051_v54, %v5031_v48 }
 0x252   : > { %v1453_v2 = vmul.f32 0.7978846, %v1389_v59  ;;  %v1263_v45 = vmul.f32 %v1199_v60, %v5047_v52  ;;  %v1201_v46 = vmul.f32 %v5055_v27, %v5055_v27  ;;  %3860 = vtanh.f32 %v1451_v55 }
 0x254   : > { %v1327_v43 = vmul.f32 0.044715, %v1263_v45  ;;  %v1265_v35 = vmul.f32 %v1201_v46, %v5055_v27  ;;  %v5061_v3 = vpop.f32.mrb[8].mxu0  ;;  %3862 = vtanh.f32 %v1453_v2 }
 0x255   : > { %v1057_v56 = vpop.f32.mrb[9].mxu0 }
 0x256   : > { %v1391_v6 = vadd.f32 %v1327_v43, %v5047_v52  ;;  %v1329_v32 = vmul.f32 0.044715, %v1265_v35  ;;  %v5065_v37 = vadd.f32 %v1057_v56, %v5031_v48  ;;  %v5067_v19 = vpop.f32.mrb[10].mxu0 }
 0x257   : > { %6269 = vst [vmem:[#allocation19_spill] sm:$0xff] %v5067_v19  ;;  %v1061_v7 = vpop.f32.mrb[11].mxu0 }
 0x258   : > { %v1393_v0 = vadd.f32 %v1329_v32, %v5055_v27  ;;  %v1203_v1 = vmul.f32 %v5065_v37, %v5065_v37  ;;  %v5073_v34 = vadd.f32 %v1061_v7, %v5031_v48  ;;  %v1455_v12 = vmul.f32 0.7978846, %v1391_v6 }
 0x25a   : > { %v1267_v14 = vmul.f32 %v1203_v1, %v5065_v37  ;;  %v1205_v57 = vmul.f32 %v5073_v34, %v5073_v34  ;;  %v1457_v58 = vmul.f32 0.7978846, %v1393_v0  ;;  %3864 = vtanh.f32 %v1455_v12 }
 0x25c   : > { %v3861_v30 = vpop.eup %3860  ;;  %v1331_v17 = vmul.f32 0.044715, %v1267_v14  ;;  %v1269_v24 = vmul.f32 %v1205_v57, %v5073_v34  ;;  %v5079_v25 = vpop.f32.mrb[12].mxu0  ;;  %3866 = vtanh.f32 %v1457_v58 }
 0x25d   : > { %v1067_v9 = vpop.f32.mrb[13].mxu0  ;;  %v1579_v18 = vadd.f32 1.0, %v3861_v30 }
 0x25e   : > { %v5082_v11 = vadd.f32 %v1067_v9, %v5031_v48  ;;  %v5084_v8 = vpop.f32.mrb[14].mxu0  ;;  %v1395_v10 = vadd.f32 %v1331_v17, %v5065_v37  ;;  %v3863_v31 = vpop.eup %3862  ;;  %v1333_v49 = vmul.f32 0.044715, %v1269_v24 }
 0x25f   : > { %6270 = vst [vmem:[#allocation20_spill] sm:$0xff] %v5084_v8  ;;  %v1071_v28 = vpop.f32.mrb[15].mxu0  ;;  %v1643_v23 = vmul.f32 0.5, %v1579_v18  ;;  %v1581_v29 = vadd.f32 1.0, %v3863_v31 }
 0x260   : > { %v1207_v50 = vmul.f32 %v5082_v11, %v5082_v11  ;;  %v1459_v26 = vmul.f32 0.7978846, %v1395_v10  ;;  %v1397_v41 = vadd.f32 %v1333_v49, %v5073_v34  ;;  %v5091_v15 = vadd.f32 %v1071_v28, %v5031_v48 }
 0x261   : > { %v5093_v16 = vmul.f32 %v1643_v23, %v1038_v22  ;;  %v1645_v61 = vmul.f32 0.5, %v1581_v29 }
 0x262   : > { %v1271_v20 = vmul.f32 %v1207_v50, %v5082_v11  ;;  %3868 = vtanh.f32 %v1459_v26  ;;  %v1461_v4 = vmul.f32 0.7978846, %v1397_v41  ;;  %v1209_v5 = vmul.f32 %v5091_v15, %v5091_v15 }
 0x263   : > { %1770 = vadd.xlane.f32.xlu0 %v5093_v16  ;;  %v5102_v21 = vmul.f32 %v1645_v61, %v5039_v38  ;;  %v1866_v51 = vmul.f32 %v5093_v16, %v5093_v16 }
 0x264   : > { %v5095_v63 = vpop.f32.mrb[16].mxu0  ;;  %v3865_v22 = vpop.eup %3864  ;;  %v1335_v55 = vmul.f32 0.044715, %v1271_v20  ;;  %v1273_v45 = vmul.f32 %v1209_v5, %v5091_v15  ;;  %3870 = vtanh.f32 %v1461_v4 }
 0x265   : > { %6271 = vst [vmem:[#allocation21_spill] sm:$0xff] %v5095_v63  ;;  %v1077_v13 = vpop.f32.mrb[17].mxu0  ;;  %1772 = vadd.xlane.f32.xlu1 %v5102_v21  ;;  %v1867_v60 = vmul.f32 %v5102_v21, %v5102_v21  ;;  %v1583_v2 = vadd.f32 1.0, %v3865_v22 }
 0x266   : > { %v5099_v62 = vpop.f32.mrb[18].mxu0  ;;  %v5105_v40 = vadd.f32 %v1077_v13, %v5031_v48  ;;  %v3867_v54 = vpop.eup %3866  ;;  %v1399_v35 = vadd.f32 %v1335_v55, %v5082_v11  ;;  %v1337_v57 = vmul.f32 0.044715, %v1273_v45 }
 0x267   : > { %6272 = vst [vmem:[#allocation22_spill] sm:$0xff] %v5099_v62  ;;  %v1081_v44 = vpop.f32.mrb[19].mxu0  ;;  %1898 = vadd.xlane.f32.xlu0 %v1866_v51  ;;  %v1585_v43 = vadd.f32 1.0, %v3867_v54  ;;  %v1647_v56 = vmul.f32 0.5, %v1583_v2 }
 0x268   : > { %v1211_v38 = vmul.f32 %v5105_v40, %v5105_v40  ;;  %v5115_v59 = vadd.f32 %v1081_v44, %v5031_v48  ;;  %v1463_v17 = vmul.f32 0.7978846, %v1399_v35 }
 0x269   : > { %1900 = vadd.xlane.f32.xlu1 %v1867_v60  ;;  %v1649_v32 = vmul.f32 0.5, %v1585_v43  ;;  %v5129_v12 = vmul.f32 %v1647_v56, %v5047_v52  ;;  %v1401_v52 = vadd.f32 %v1337_v57, %v5091_v15 }
 0x26a   : > { %v1275_v0 = vmul.f32 %v1211_v38, %v5105_v40  ;;  %v1213_v1 = vmul.f32 %v5115_v59, %v5115_v59  ;;  %3872 = vtanh.f32 %v1463_v17 }
 0x26b   : > { %v5132_v58 = vmul.f32 %v1649_v32, %v5055_v27  ;;  %1774 = vadd.xlane.f32.xlu0 %v5129_v12  ;;  %v1868_v18 = vmul.f32 %v5129_v12, %v5129_v12  ;;  %v1465_v44 = vmul.f32 0.7978846, %v1401_v52 }
 0x26c   : > { %v5120_v46 = vpop.f32.mrb[20].mxu0  ;;  %v3869_v30 = vpop.eup %3868  ;;  %v1339_v24 = vmul.f32 0.044715, %v1275_v0  ;;  %v1277_v9 = vmul.f32 %v1213_v1, %v5115_v59 }
 0x26d   : > { %6273 = vst [vmem:[#allocation23_spill] sm:$0xff] %v5120_v46  ;;  %v1087_v6 = vpop.f32.mrb[21].mxu0  ;;  %1776 = vadd.xlane.f32.xlu1 %v5132_v58  ;;  %v1869_v10 = vmul.f32 %v5132_v58, %v5132_v58  ;;  %v1587_v28 = vadd.f32 1.0, %v3869_v30  ;;  %3874 = vtanh.f32 %v1465_v44 }
 0x26e   : > { %v5123_v7 = vpop.f32.mrb[22].mxu0  ;;  %v5145_v31 = vadd.f32 %v1087_v6, %v5031_v48  ;;  %v3871_v50 = vpop.eup %3870  ;;  %v1403_v29 = vadd.f32 %v1339_v24, %v5105_v40  ;;  %v1341_v41 = vmul.f32 0.044715, %v1277_v9 }
 0x26f   : > { %6274 = vst [vmem:[#allocation24_spill] sm:$0xff] %v5123_v7  ;;  %v1091_v14 = vpop.f32.mrb[23].mxu0  ;;  %1902 = vadd.xlane.f32.xlu0 %v1868_v18  ;;  %v1651_v23 = vmul.f32 0.5, %v1587_v28  ;;  %v1589_v61 = vadd.f32 1.0, %v3871_v50 }
 0x270   : > { %v5151_v20 = vadd.f32 %v1091_v14, %v5031_v48  ;;  %v1215_v4 = vmul.f32 %v5145_v31, %v5145_v31  ;;  %v1467_v51 = vmul.f32 0.7978846, %v1403_v29  ;;  %v1405_v54 = vadd.f32 %v1341_v41, %v5115_v59 }
 0x271   : > { %1904 = vadd.xlane.f32.xlu1 %v1869_v10  ;;  %v5154_v22 = vmul.f32 %v1651_v23, %v5065_v37  ;;  %v1653_v5 = vmul.f32 0.5, %v1589_v61 }
 0x272   : > { %v1217_v55 = vmul.f32 %v5151_v20, %v5151_v20  ;;  %v1279_v45 = vmul.f32 %v1215_v4, %v5145_v31  ;;  %v1469_v6 = vmul.f32 0.7978846, %v1405_v54  ;;  %3876 = vtanh.f32 %v1467_v51 }
 0x273   : > { %1778 = vadd.xlane.f32.xlu0 %v5154_v22  ;;  %v5163_v38 = vmul.f32 %v1653_v5, %v5073_v34  ;;  %v1870_v37 = vmul.f32 %v5154_v22, %v5154_v22 }
 0x274   : > { %v5142_v27 = vpop.f32.mrb[24].mxu0  ;;  %v3873_v56 = vpop.eup %3872  ;;  %v1281_v32 = vmul.f32 %v1217_v55, %v5151_v20  ;;  %v1343_v30 = vmul.f32 0.044715, %v1279_v45  ;;  %3878 = vtanh.f32 %v1469_v6 }
 0x275   : > { %6275 = vst [vmem:[#allocation25_spill] sm:$0xff] %v5142_v27  ;;  %v1097_v49 = vpop.f32.mrb[25].mxu0  ;;  %1780 = vadd.xlane.f32.xlu1 %v5163_v38  ;;  %v1871_v0 = vmul.f32 %v5163_v38, %v5163_v38  ;;  %v1591_v57 = vadd.f32 1.0, %v3873_v56 }
 0x276   : > { %v5147_v26 = vpop.f32.mrb[26].mxu0  ;;  %v5166_v60 = vadd.f32 %v1097_v49, %v5031_v48  ;;  %v1345_v9 = vmul.f32 0.044715, %v1281_v32  ;;  %v1407_v28 = vadd.f32 %v1343_v30, %v5145_v31 }
 0x277   : > { %6276 = vst [vmem:[#allocation26_spill] sm:$0xff] %v5147_v26  ;;  %v1101_v13 = vpop.f32.mrb[27].mxu0  ;;  %1906 = vadd.xlane.f32.xlu0 %v1870_v37  ;;  %v1655_v24 = vmul.f32 0.5, %v1591_v57  ;;  %v3875_v49 = vpop.eup %3874 }
 0x278   : > { %v5175_v35 = vadd.f32 %v1101_v13, %v5031_v48  ;;  %v1219_v14 = vmul.f32 %v5166_v60, %v5166_v60  ;;  %v1409_v29 = vadd.f32 %v1345_v9, %v5151_v20  ;;  %v1593_v41 = vadd.f32 1.0, %v3875_v49 }
 0x279   : > { %1908 = vadd.xlane.f32.xlu1 %v1871_v0  ;;  %v5188_v52 = vmul.f32 %v1655_v24, %v5082_v11  ;;  %v1471_v51 = vmul.f32 0.7978846, %v1407_v28 }
 0x27a   : > { %v1221_v17 = vmul.f32 %v5175_v35, %v5175_v35  ;;  %v1283_v18 = vmul.f32 %v1219_v14, %v5166_v60  ;;  %v1657_v54 = vmul.f32 0.5, %v1593_v41  ;;  %v1473_v45 = vmul.f32 0.7978846, %v1409_v29 }
 0x27b   : > { %1782 = vadd.xlane.f32.xlu0 %v5188_v52  ;;  %v1872_v44 = vmul.f32 %v5188_v52, %v5188_v52  ;;  %3880 = vtanh.f32 %v1471_v51 }
 0x27c   : > { %v5170_v2 = vpop.f32.mrb[28].mxu0  ;;  %v1285_v50 = vmul.f32 %v1221_v17, %v5175_v35  ;;  %v1347_v11 = vmul.f32 0.044715, %v1283_v18  ;;  %v3877_v5 = vpop.eup %3876  ;;  %v5204_v56 = vmul.f32 %v1657_v54, %v5091_v15  ;;  %3882 = vtanh.f32 %v1473_v45 }
 0x27d   : > { %6277 = vst [vmem:[#allocation27_spill] sm:$0xff] %v5170_v2  ;;  %v1107_v43 = vpop.f32.mrb[29].mxu0  ;;  %v1595_v37 = vadd.f32 1.0, %v3877_v5 }
 0x27e   : > { %v5177_v34 = vpop.f32.mrb[30].mxu0  ;;  %v5197_v61 = vadd.f32 %v1107_v43, %v5031_v48  ;;  %v1349_v55 = vmul.f32 0.044715, %v1285_v50  ;;  %v1411_v32 = vadd.f32 %v1347_v11, %v5166_v60  ;;  %v3879_v57 = vpop.eup %3878  ;;  %1784 = vadd.xlane.f32.xlu1 %v5204_v56  ;;  %v1873_v28 = vmul.f32 %v5204_v56, %v5204_v56 }
 0x27f   : > { %6278 = vst [vmem:[#allocation28_spill] sm:$0xff] %v5177_v34  ;;  %v1111_v1 = vpop.f32.mrb[31].mxu0  ;;  %1910 = vadd.xlane.f32.xlu0 %v1872_v44  ;;  %v1659_v0 = vmul.f32 0.5, %v1595_v37  ;;  %v1597_v24 = vadd.f32 1.0, %v3879_v57 }
 0x280   : > { %v1223_v43 = vmul.f32 %v5197_v61, %v5197_v61  ;;  %v5209_v6 = vadd.f32 %v1111_v1, %v5031_v48  ;;  %v1413_v17 = vadd.f32 %v1349_v55, %v5175_v35  ;;  %v1475_v50 = vmul.f32 0.7978846, %v1411_v32 }
 0x281   : > { %v5217_v15 = vmul.f32 %v1659_v0, %v5105_v40  ;;  %v1661_v29 = vmul.f32 0.5, %v1597_v24 }
 0x282   : > { %v1287_v1 = vmul.f32 %v1223_v43, %v5197_v61  ;;  %v1225_v18 = vmul.f32 %v5209_v6, %v5209_v6  ;;  %1912 = vadd.xlane.f32.xlu1 %v1873_v28  ;;  %v1477_v41 = vmul.f32 0.7978846, %v1413_v17  ;;  %3884 = vtanh.f32 %v1475_v50 }
 0x283   : > { %1786 = vadd.xlane.f32.xlu0 %v5217_v15  ;;  %v5231_v11 = vmul.f32 %v1661_v29, %v5115_v59  ;;  %v1874_v44 = vmul.f32 %v5217_v15, %v5217_v15 }
 0x284   : > { %v5190_v10 = vpop.f32.mrb[0].mxu1  ;;  %v1351_v51 = vmul.f32 0.044715, %v1287_v1  ;;  %v1289_v54 = vmul.f32 %v1225_v18, %v5209_v6  ;;  %3886 = vtanh.f32 %v1477_v41 }
 0x285   : > { %6279 = vst [vmem:[#allocation29_spill] sm:$0xff] %v5190_v10  ;;  %v1117_v23 = vpop.f32.mrb[1].mxu1  ;;  %v1875_v0 = vmul.f32 %v5231_v11, %v5231_v11 }
 0x286   : > { %v5199_v13 = vpop.f32.mrb[2].mxu1  ;;  %v5228_v40 = vadd.f32 %v1117_v23, %v5031_v48  ;;  %1788 = vadd.xlane.f32.xlu1 %v5231_v11  ;;  %v1415_v43 = vadd.f32 %v1351_v51, %v5197_v61  ;;  %v1353_v32 = vmul.f32 0.044715, %v1289_v54 }
 0x287   : > { %6280 = vst [vmem:[#allocation30_spill] sm:$0xff] %v5199_v13  ;;  %v1121_v4 = vpop.f32.mrb[3].mxu1  ;;  %1914 = vadd.xlane.f32.xlu0 %v1874_v44 }
 0x288   : > { %v5236_v5 = vadd.f32 %v1121_v4, %v5031_v48  ;;  %v1227_v55 = vmul.f32 %v5228_v40, %v5228_v40  ;;  %v3881_v4 = vpop.eup %3880  ;;  %v1479_v41 = vmul.f32 0.7978846, %v1415_v43  ;;  %v1417_v44 = vadd.f32 %v1353_v32, %v5209_v6 }
 0x289   : > { %v1599_v24 = vadd.f32 1.0, %v3881_v4  ;;  %v3883_v18 = vpop.eup %3882 }
 0x28a   : > { %v1229_v37 = vmul.f32 %v5236_v5, %v5236_v5  ;;  %v1291_v17 = vmul.f32 %v1227_v55, %v5228_v40  ;;  %1916 = vadd.xlane.f32.xlu1 %v1875_v0  ;;  %v1601_v29 = vadd.f32 1.0, %v3883_v18  ;;  %3888 = vtanh.f32 %v1479_v41 }
 0x28b   : > { %v1663_v50 = vmul.f32 0.5, %v1599_v24 }
 0x28c   : > { %v5212_v14 = vpop.f32.mrb[4].mxu1  ;;  %v1293_v28 = vmul.f32 %v1229_v37, %v5236_v5  ;;  %v1355_v51 = vmul.f32 0.044715, %v1291_v17  ;;  %v1665_v39 = vmul.f32 0.5, %v1601_v29  ;;  %v3885_v37 = vpop.eup %3884 }
 0x28d   : > { %6281 = vst [vmem:[#allocation31_spill] sm:$0xff] %v5212_v14  ;;  %v1127_v30 = vpop.f32.mrb[5].mxu1  ;;  %v5258_v54 = vmul.f32 %v1663_v50, %v5145_v31  ;;  %v1481_v31 = vmul.f32 0.7978846, %v1417_v44  ;;  %v1603_v17 = vadd.f32 1.0, %v3885_v37 }
 0x28e   : > { %v5219_v9 = vpop.f32.mrb[6].mxu1  ;;  %v5253_v1 = vadd.f32 %v1127_v30, %v5031_v48  ;;  %v1357_v24 = vmul.f32 0.044715, %v1293_v28  ;;  %v5269_v43 = vmul.f32 %v1665_v39, %v5151_v20  ;;  %v3887_v50 = vpop.eup %3886  ;;  %v1419_v29 = vadd.f32 %v1355_v51, %v5228_v40 }
 0x28f   : > { %6282 = vst [vmem:[#allocation32_spill] sm:$0xff] %v5219_v9  ;;  %v1131_v49 = vpop.f32.mrb[7].mxu1  ;;  %1790 = vadd.xlane.f32.xlu0 %v5258_v54  ;;  %v1876_v28 = vmul.f32 %v5258_v54, %v5258_v54  ;;  %v1667_v20 = vmul.f32 0.5, %v1603_v17  ;;  %3890 = vtanh.f32 %v1481_v31 }
 0x290   : > { %v1231_v55 = vmul.f32 %v5253_v1, %v5253_v1  ;;  %v5265_v30 = vadd.f32 %v1131_v49, %v5031_v48  ;;  %1792 = vadd.xlane.f32.xlu1 %v5269_v43  ;;  %v1421_v37 = vadd.f32 %v1357_v24, %v5236_v5  ;;  %v1877_v51 = vmul.f32 %v5269_v43, %v5269_v43 }
 0x291   : > { %v1483_v41 = vmul.f32 0.7978846, %v1419_v29 }
 0x292   : > { %v1295_v49 = vmul.f32 %v1231_v55, %v5253_v1  ;;  %v1233_v39 = vmul.f32 %v5265_v30, %v5265_v30  ;;  %v5287_v55 = vmul.f32 %v1667_v20, %v5166_v60  ;;  %v1485_v20 = vmul.f32 0.7978846, %v1421_v37 }
 0x293   : > { %1918 = vadd.xlane.f32.xlu0 %v1876_v28  ;;  %3892 = vtanh.f32 %v1483_v41 }
 0x294   : > { %v5241_v23 = vpop.f32.mrb[8].mxu1  ;;  %1920 = vadd.xlane.f32.xlu1 %v1877_v51  ;;  %3894 = vtanh.f32 %v1485_v20 }
 0x295   : > { %6283 = vst [vmem:[#allocation33_spill] sm:$0xff] %v5241_v23  ;;  %v1137_v59 = vpop.f32.mrb[9].mxu1 }
 0x296   : > { %v5246_v45 = vpop.f32.mrb[10].mxu1  ;;  %v5281_v44 = vadd.f32 %v1137_v59, %v5031_v48  ;;  %v1359_v59 = vmul.f32 0.044715, %v1295_v49 }
 0x297   : > { %6284 = vst [vmem:[#allocation34_spill] sm:$0xff] %v5246_v45  ;;  %v1141_v57 = vpop.f32.mrb[11].mxu1  ;;  %v1605_v45 = vadd.f32 1.0, %v3887_v50  ;;  %v1297_v50 = vmul.f32 %v1233_v39, %v5265_v30  ;;  %1794 = vadd.xlane.f32.xlu0 %v5287_v55  ;;  %v3889_v39 = vpop.eup %3888 }
 0x298   : > { %v5290_v23 = vadd.f32 %v1141_v57, %v5031_v48  ;;  %v1235_v28 = vmul.f32 %v5281_v44, %v5281_v44  ;;  %v1878_v57 = vmul.f32 %v5287_v55, %v5287_v55 }
 0x29a   : > { %v1237_v29 = vmul.f32 %v5290_v23, %v5290_v23  ;;  %v1299_v49 = vmul.f32 %v1235_v28, %v5281_v44 }
 0x29b   : > { %1922 = vadd.xlane.f32.xlu0 %v1878_v57 }
 0x29c   : > { %v5262_v4 = vpop.f32.mrb[12].mxu1  ;;  %v1363_v57 = vmul.f32 0.044715, %v1299_v49 }
 0x29d   : > { %6285 = vst [vmem:[#allocation35_spill] sm:$0xff] %v5262_v4  ;;  %v1147_v0 = vpop.f32.mrb[13].mxu1 }
 0x29e   : > { %v5271_v32 = vpop.f32.mrb[14].mxu1  ;;  %v5313_v51 = vadd.f32 %v1147_v0, %v5031_v48 }
 0x29f   : > { %6286 = vst [vmem:[#allocation36_spill] sm:$0xff] %v5271_v32  ;;  %v1151_v18 = vpop.f32.mrb[15].mxu1  ;;  %v1669_v32 = vmul.f32 0.5, %v1605_v45 }
 0x2a0   : > { %v5317_v4 = vadd.f32 %v1151_v18, %v5031_v48  ;;  %v1239_v0 = vmul.f32 %v5313_v51, %v5313_v51 }
 0x2a1   : > { %v5296_v24 = vmul.f32 %v1669_v32, %v5175_v35  ;;  %v1423_v35 = vadd.f32 %v1359_v59, %v5253_v1  ;;  %v1361_v32 = vmul.f32 0.044715, %v1297_v50  ;;  %v3891_v50 = vpop.eup %3890 }
 0x2a2   : > { %v1609_v14 = vadd.f32 1.0, %v3891_v50  ;;  %v1303_v49 = vmul.f32 %v1239_v0, %v5313_v51  ;;  %v3893_v50 = vpop.eup %3892 }
 0x2a3   : > { %1796 = vadd.xlane.f32.xlu1 %v5296_v24  ;;  %v1879_v37 = vmul.f32 %v5296_v24, %v5296_v24  ;;  %v1487_v41 = vmul.f32 0.7978846, %v1423_v35  ;;  %v1425_v28 = vadd.f32 %v1361_v32, %v5265_v30  ;;  %v1241_v35 = vmul.f32 %v5317_v4, %v5317_v4 }
 0x2a4   : > { %v5292_v17 = vpop.f32.mrb[16].mxu1  ;;  %v1427_v32 = vadd.f32 %v1363_v57, %v5281_v44 }
 0x2a5   : > { %6287 = vst [vmem:[#allocation37_spill] sm:$0xff] %v5292_v17  ;;  %v1157_v60 = vpop.f32.mrb[17].mxu1  ;;  %v1301_v17 = vmul.f32 %v1237_v29, %v5290_v23  ;;  %3896 = vtanh.f32 %v1487_v41  ;;  %v1611_v41 = vadd.f32 1.0, %v3893_v50 }
 0x2a6   : > { %v5301_v45 = vpop.f32.mrb[18].mxu1 }
 0x2a7   : > { %6288 = vst [vmem:[#allocation38_spill] sm:$0xff] %v5301_v45  ;;  %v1161_v31 = vpop.f32.mrb[19].mxu1  ;;  %v1607_v45 = vadd.f32 1.0, %v3889_v39  ;;  %1924 = vadd.xlane.f32.xlu1 %v1879_v37  ;;  %v1365_v39 = vmul.f32 0.044715, %v1301_v17  ;;  %v1673_v37 = vmul.f32 0.5, %v1609_v14  ;;  %v5340_v14 = vadd.f32 %v1157_v60, %v5031_v48 }
 0x2a8   : > { %v1367_v60 = vmul.f32 0.044715, %v1303_v49 }
 0x2a9   : > { %v1671_v9 = vmul.f32 0.5, %v1607_v45  ;;  %v5334_v45 = vmul.f32 %v1673_v37, %v5209_v6  ;;  %v1429_v17 = vadd.f32 %v1365_v39, %v5290_v23  ;;  %v1491_v6 = vmul.f32 0.7978846, %v1427_v32 }
 0x2aa   : > { %v5348_v37 = vadd.f32 %v1161_v31, %v5031_v48  ;;  %v1675_v39 = vmul.f32 0.5, %v1611_v41  ;;  %v1243_v32 = vmul.f32 %v5340_v14, %v5340_v14 }
 0x2ab   : > { %v5327_v29 = vmul.f32 %v1671_v9, %v5197_v61  ;;  %v3895_v9 = vpop.eup %3894  ;;  %1800 = vadd.xlane.f32.xlu1 %v5334_v45  ;;  %v1881_v10 = vmul.f32 %v5334_v45, %v5334_v45 }
 0x2ac   : > { %v5319_v59 = vpop.f32.mrb[20].mxu1  ;;  %v1613_v0 = vadd.f32 1.0, %v3895_v9  ;;  %v5363_v49 = vmul.f32 %v1675_v39, %v5228_v40 }
 0x2ad   : > { %6289 = vst [vmem:[#allocation39_spill] sm:$0xff] %v5319_v59  ;;  %v1167_v13 = vpop.f32.mrb[21].mxu1  ;;  %v1489_v59 = vmul.f32 0.7978846, %v1425_v28  ;;  %1798 = vadd.xlane.f32.xlu0 %v5327_v29  ;;  %v1880_v61 = vmul.f32 %v5327_v29, %v5327_v29  ;;  %v1305_v28 = vmul.f32 %v1241_v35, %v5317_v4 }
 0x2ae   : > { %v5324_v20 = vpop.f32.mrb[22].mxu1  ;;  %v5353_v34 = vadd.f32 %v1167_v13, %v5031_v48  ;;  %v1677_v50 = vmul.f32 0.5, %v1613_v0  ;;  %v1245_v13 = vmul.f32 %v5348_v37, %v5348_v37  ;;  %v1431_v0 = vadd.f32 %v1367_v60, %v5313_v51 }
 0x2af   : > { %6290 = vst [vmem:[#allocation40_spill] sm:$0xff] %v5324_v20  ;;  %v1171_v18 = vpop.f32.mrb[23].mxu1  ;;  %3898 = vtanh.f32 %v1489_v59  ;;  %v1493_v59 = vmul.f32 0.7978846, %v1429_v17  ;;  %v1369_v9 = vmul.f32 0.044715, %v1305_v28  ;;  %1928 = vadd.xlane.f32.xlu1 %v1881_v10  ;;  %v3897_v17 = vpop.eup %3896  ;;  %v1307_v10 = vmul.f32 %v1243_v32, %v5340_v14 }
 0x2b0   : > { %v5366_v41 = vmul.f32 %v1677_v50, %v5236_v5  ;;  %3900 = vtanh.f32 %v1491_v6  ;;  %v1882_v28 = vmul.f32 %v5363_v49, %v5363_v49  ;;  %v1615_v60 = vadd.f32 1.0, %v3897_v17 }
 0x2b1   : > { %1926 = vadd.xlane.f32.xlu0 %v1880_v61  ;;  %v5360_v61 = vadd.f32 %v1171_v18, %v5031_v48  ;;  %v1247_v18 = vmul.f32 %v5353_v34, %v5353_v34  ;;  %v1433_v5 = vadd.f32 %v1369_v9, %v5317_v4  ;;  %3902 = vtanh.f32 %v1493_v59 }
 0x2b2   : > { %v1309_v50 = vmul.f32 %v1245_v13, %v5348_v37  ;;  %v1495_v32 = vmul.f32 0.7978846, %v1431_v0  ;;  %v1679_v9 = vmul.f32 0.5, %v1615_v60  ;;  %v1371_v2 = vmul.f32 0.044715, %v1307_v10 }
 0x2b3   : > { %v1249_v40 = vmul.f32 %v5360_v61, %v5360_v61  ;;  %1804 = vadd.xlane.f32.xlu1 %v5366_v41  ;;  %v1497_v0 = vmul.f32 0.7978846, %v1433_v5 }
 0x2b4   : > { %v5345_v57 = vpop.f32.mrb[24].mxu1  ;;  %3904 = vtanh.f32 %v1495_v32 }
 0x2b5   : > { %6291 = vst [vmem:[#allocation41_spill] sm:$0xff] %v5345_v57  ;;  %v1177_v20 = vpop.f32.mrb[25].mxu1  ;;  %1802 = vadd.xlane.f32.xlu0 %v5363_v49  ;;  %v1311_v57 = vmul.f32 %v1247_v18, %v5353_v34  ;;  %v1313_v59 = vmul.f32 %v1249_v40, %v5360_v61  ;;  %3906 = vtanh.f32 %v1497_v0 }
 0x2b6   : > { %v5355_v35 = vpop.f32.mrb[26].mxu1  ;;  %v5385_v6 = vadd.f32 %v1177_v20, %v5031_v48 }
 0x2b7   : > { %6292 = vst [vmem:[#allocation42_spill] sm:$0xff] %v5355_v35  ;;  %v1181_v31 = vpop.f32.mrb[27].mxu1  ;;  %v1883_v35 = vmul.f32 %v5366_v41, %v5366_v41  ;;  %v1375_v62 = vmul.f32 0.044715, %v1311_v57 }
 0x2b8   : > { %v1251_v17 = vmul.f32 %v5385_v6, %v5385_v6  ;;  %v5394_v13 = vadd.f32 %v1181_v31, %v5031_v48  ;;  %v1435_v31 = vadd.f32 %v1371_v2, %v5340_v14 }
 0x2b9   : > { %1930 = vadd.xlane.f32.xlu0 %v1882_v28  ;;  %v3899_v27 = vpop.eup %3898  ;;  %1932 = vadd.xlane.f32.xlu1 %v1883_v35  ;;  %v5399_v28 = vmul.f32 %v1679_v9, %v5253_v1  ;;  %v1377_v35 = vmul.f32 0.044715, %v1313_v59  ;;  %v1439_v59 = vadd.f32 %v1375_v62, %v5353_v34 }
 0x2ba   : > { %v1617_v60 = vadd.f32 1.0, %v3899_v27  ;;  %v1253_v10 = vmul.f32 %v5394_v13, %v5394_v13  ;;  %v1315_v1 = vmul.f32 %v1251_v17, %v5385_v6  ;;  %v3901_v9 = vpop.eup %3900  ;;  %v1499_v17 = vmul.f32 0.7978846, %v1435_v31 }
 0x2bb   : > { %v1884_v5 = vmul.f32 %v5399_v28, %v5399_v28  ;;  %v1619_v32 = vadd.f32 1.0, %v3901_v9  ;;  %v3903_v2 = vpop.eup %3902  ;;  %v1503_v31 = vmul.f32 0.7978846, %v1439_v59 }
 0x2bc   : > { %v5381_v39 = vpop.f32.mrb[28].mxu1  ;;  %v1681_v40 = vmul.f32 0.5, %v1617_v60  ;;  %v1441_v60 = vadd.f32 %v1377_v35, %v5360_v61  ;;  %3908 = vtanh.f32 %v1499_v17 }
 0x2bd   : > { %6293 = vst [vmem:[#allocation43_spill] sm:$0xff] %v5381_v39  ;;  %v1187_v26 = vpop.f32.mrb[29].mxu1  ;;  %v1373_v39 = vmul.f32 0.044715, %v1309_v50  ;;  %1806 = vadd.xlane.f32.xlu0 %v5399_v28  ;;  %v1317_v50 = vmul.f32 %v1253_v10, %v5394_v13  ;;  %v1379_v10 = vmul.f32 0.044715, %v1315_v1 }
 0x2be   : > { %v5396_v20 = vpop.f32.mrb[30].mxu1  ;;  %v5409_v27 = vmul.f32 %v1681_v40, %v5265_v30  ;;  %v1683_v30 = vmul.f32 0.5, %v1619_v32  ;;  %v1621_v40 = vadd.f32 1.0, %v3903_v2 }
 0x2bf   : > { %6294 = vst [vmem:[#allocation44_spill] sm:$0xff] %v5396_v20  ;;  %v1191_v18 = vpop.f32.mrb[31].mxu1  ;;  %v5413_v20 = vadd.f32 %v1187_v26, %v5031_v48  ;;  %v1437_v57 = vadd.f32 %v1373_v39, %v5348_v37  ;;  %v1381_v26 = vmul.f32 0.044715, %v1317_v50  ;;  %v3905_v50 = vpop.eup %3904 }
 0x2c0   : > { %1808 = vadd.xlane.f32.xlu1 %v5409_v27  ;;  %v1885_v0 = vmul.f32 %v5409_v27, %v5409_v27  ;;  %v5424_v7 = vmul.f32 %v1683_v30, %v5281_v44  ;;  %v1685_v63 = vmul.f32 0.5, %v1621_v40  ;;  %v5427_v62 = vadd.f32 %v1191_v18, %v5031_v48 }
 0x2c1   : > { %1934 = vadd.xlane.f32.xlu0 %v1884_v5  ;;  %v1255_v39 = vmul.f32 %v5413_v20, %v5413_v20  ;;  %v1501_v9 = vmul.f32 0.7978846, %v1437_v57  ;;  %v1505_v5 = vmul.f32 0.7978846, %v1441_v60  ;;  %v1443_v57 = vadd.f32 %v1379_v10, %v5385_v6 }
 0x2c2   : > { %v5431_v35 = vmul.f32 %v1685_v63, %v5290_v23  ;;  %v1257_v1 = vmul.f32 %v5427_v62, %v5427_v62  ;;  %v1445_v44 = vadd.f32 %v1381_v26, %v5394_v13  ;;  %v1886_v48 = vmul.f32 %v5424_v7, %v5424_v7  ;;  %v3907_v63 = vpop.eup %3906 }
 0x2c3   : > { %v1319_v32 = vmul.f32 %v1255_v39, %v5413_v20  ;;  %v1623_v18 = vadd.f32 1.0, %v3905_v50  ;;  %3910 = vtanh.f32 %v1501_v9  ;;  %v1625_v59 = vadd.f32 1.0, %v3907_v63 }
 0x2c4   : > { %1936 = vadd.xlane.f32.xlu1 %v1885_v0  ;;  %v1321_v2 = vmul.f32 %v1257_v1, %v5427_v62  ;;  %3912 = vtanh.f32 %v1503_v31  ;;  %v1507_v60 = vmul.f32 0.7978846, %v1443_v57  ;;  %v1887_v30 = vmul.f32 %v5431_v35, %v5431_v35 }
 0x2c5   : > { %1810 = vadd.xlane.f32.xlu0 %v5424_v7  ;;  %v1687_v23 = vmul.f32 0.5, %v1623_v18  ;;  %3914 = vtanh.f32 %v1505_v5  ;;  %v1383_v17 = vmul.f32 0.044715, %v1319_v32  ;;  %v1509_v40 = vmul.f32 0.7978846, %v1445_v44 }
 0x2c6   : > { %v1689_v10 = vmul.f32 0.5, %v1625_v59  ;;  %v1385_v26 = vmul.f32 0.044715, %v1321_v2  ;;  %3916 = vtanh.f32 %v1507_v60  ;;  %v3909_v1 = vpop.eup %3908 }
 0x2c7   : > { %v5445_v0 = vmul.f32 %v1687_v23, %v5313_v51  ;;  %v1447_v9 = vadd.f32 %v1383_v17, %v5413_v20  ;;  %3918 = vtanh.f32 %v1509_v40  ;;  %v1627_v50 = vadd.f32 1.0, %v3909_v1 }
 0x2c8   : > { %1812 = vadd.xlane.f32.xlu1 %v5431_v35  ;;  %v5449_v39 = vmul.f32 %v1689_v10, %v5317_v4  ;;  %v1449_v5 = vadd.f32 %v1385_v26, %v5427_v62 }
 0x2c9   : > { %1938 = vadd.xlane.f32.xlu0 %v1886_v48  ;;  %v1888_v31 = vmul.f32 %v5445_v0, %v5445_v0  ;;  %v1511_v44 = vmul.f32 0.7978846, %v1447_v9  ;;  %v1691_v2 = vmul.f32 0.5, %v1627_v50 }
 0x2ca   : > { %v1889_v4 = vmul.f32 %v5449_v39, %v5449_v39  ;;  %v1513_v18 = vmul.f32 0.7978846, %v1449_v5 }
 0x2cb   : > { %v5459_v60 = vmul.f32 %v1691_v2, %v5340_v14  ;;  %3920 = vtanh.f32 %v1511_v44 }
 0x2cc   : > { %1940 = vadd.xlane.f32.xlu1 %v1887_v30  ;;  %3922 = vtanh.f32 %v1513_v18 }
 0x2cd   : > { %1814 = vadd.xlane.f32.xlu0 %v5445_v0  ;;  %v3911_v51 = vpop.eup %3910  ;;  %v1890_v9 = vmul.f32 %v5459_v60, %v5459_v60 }
 0x2ce   : > { %v3913_v57 = vpop.eup %3912  ;;  %v1629_v32 = vadd.f32 1.0, %v3911_v51 }
 0x2cf   : > { %v3915_v48 = vpop.eup %3914  ;;  %v1631_v63 = vadd.f32 1.0, %v3913_v57 }
 0x2d0   : > { %1816 = vadd.xlane.f32.xlu1 %v5449_v39  ;;  %v1693_v23 = vmul.f32 0.5, %v1629_v32  ;;  %v1633_v59 = vadd.f32 1.0, %v3915_v48  ;;  %v3917_v40 = vpop.eup %3916 }
 0x2d1   : > { %1942 = vadd.xlane.f32.xlu0 %v1888_v31  ;;  %v1695_v17 = vmul.f32 0.5, %v1631_v63  ;;  %v3919_v26 = vpop.eup %3918  ;;  %v5468_v31 = vld [vmem:[#allocation7] sm:$0xff]   ;;  %v1635_v5 = vadd.f32 1.0, %v3917_v40 }
 0x2d2   : > { %v5462_v30 = vmul.f32 %v1693_v23, %v5348_v37  ;;  %v1697_v10 = vmul.f32 0.5, %v1633_v59  ;;  %3516 = vmatprep.mubr.bf16.mxu1 %v5468_v31  ;;  %v1637_v51 = vadd.f32 1.0, %v3919_v26 }
 0x2d3   : > { %v5473_v37 = vmul.f32 %v1695_v17, %v5353_v34  ;;  %v1699_v50 = vmul.f32 0.5, %v1635_v5 }
 0x2d4   : > { %1944 = vadd.xlane.f32.xlu1 %v1889_v4  ;;  %v1891_v14 = vmul.f32 %v5462_v30, %v5462_v30  ;;  %v5477_v1 = vmul.f32 %v1697_v10, %v5360_v61  ;;  %v1701_v44 = vmul.f32 0.5, %v1637_v51 }
 0x2d5   : > { %1818 = vadd.xlane.f32.xlu0 %v5459_v60  ;;  %v3921_v57 = vpop.eup %3920  ;;  %v1892_v34 = vmul.f32 %v5473_v37, %v5473_v37  ;;  %v5486_v48 = vmul.f32 %v1699_v50, %v5385_v6 }
 0x2d6   : > { %v3923_v4 = vpop.eup %3922  ;;  %v1893_v32 = vmul.f32 %v5477_v1, %v5477_v1  ;;  %v1639_v61 = vadd.f32 1.0, %v3921_v57  ;;  %v5489_v18 = vmul.f32 %v1701_v44, %v5394_v13 }
 0x2d7   : > { %v1641_v2 = vadd.f32 1.0, %v3923_v4  ;;  %v1894_v59 = vmul.f32 %v5486_v48, %v5486_v48 }
 0x2d8   : > { %1820 = vadd.xlane.f32.xlu1 %v5462_v30  ;;  %v1703_v63 = vmul.f32 0.5, %v1639_v61  ;;  %v1895_v17 = vmul.f32 %v5489_v18, %v5489_v18 }
 0x2d9   : > { %1946 = vadd.xlane.f32.xlu0 %v1890_v9  ;;  %v1705_v23 = vmul.f32 0.5, %v1641_v2 }
 0x2da   : > { %v5498_v6 = vmul.f32 %v1703_v63, %v5413_v20 }
 0x2db   : > { %v5501_v13 = vmul.f32 %v1705_v23, %v5427_v62 }
 0x2dc   : > { %1948 = vadd.xlane.f32.xlu1 %v1891_v14  ;;  %v1896_v9 = vmul.f32 %v5498_v6, %v5498_v6 }
 0x2dd   : > { %1822 = vadd.xlane.f32.xlu0 %v5473_v37  ;;  %v1897_v20 = vmul.f32 %v5501_v13, %v5501_v13 }
 0x2e0   : > { %1824 = vadd.xlane.f32.xlu1 %v5477_v1 }
 0x2e1   : > { %1950 = vadd.xlane.f32.xlu0 %v1892_v34 }
 0x2e4   : > { %1952 = vadd.xlane.f32.xlu1 %v1893_v32 }
 0x2e5   : > { %1826 = vadd.xlane.f32.xlu0 %v5486_v48 }
 0x2e8   : > { %1828 = vadd.xlane.f32.xlu1 %v5489_v18 }
 0x2e9   : > { %1954 = vadd.xlane.f32.xlu0 %v1894_v59 }
 0x2ec   : > { %1956 = vadd.xlane.f32.xlu1 %v1895_v17 }
 0x2ed   : > { %1830 = vadd.xlane.f32.xlu0 %v5498_v6 }
 0x2f0   : > { %v1771_v40 = vpop.xlane.xlu0 %1770  ;;  %1832 = vadd.xlane.f32.xlu1 %v5501_v13 }
 0x2f1   : > { %v1834_v10 = vmul.f32 0.0078125, %v1771_v40  ;;  %1958 = vadd.xlane.f32.xlu0 %v1896_v9 }
 0x2f2   : > { %v1773_v26 = vpop.xlane.xlu1 %1772 }
 0x2f3   : > { %v1835_v14 = vmul.f32 0.0078125, %v1773_v26  ;;  %v2026_v51 = vmul.f32 %v1834_v10, %v1834_v10 }
 0x2f4   : > { %v1899_v5 = vpop.xlane.xlu0 %1898  ;;  %1960 = vadd.xlane.f32.xlu1 %v1897_v20 }
 0x2f5   : > { %v1962_v50 = vmul.f32 0.0078125, %v1899_v5  ;;  %v2027_v44 = vmul.f32 %v1835_v14, %v1835_v14 }
 0x2f6   : > { %v1901_v57 = vpop.xlane.xlu1 %1900 }
 0x2f7   : > { %v2058_v62 = vsub.f32 %v1962_v50, %v2026_v51  ;;  %v1963_v4 = vmul.f32 0.0078125, %v1901_v57 }
 0x2f8   : > { %v1775_v61 = vpop.xlane.xlu0 %1774 }
 0x2f9   : > { %v2090_v34 = vadd.f32 1e-05, %v2058_v62  ;;  %v2059_v32 = vsub.f32 %v1963_v4, %v2027_v44  ;;  %v1836_v63 = vmul.f32 0.0078125, %v1775_v61  ;;  %v1994_v4 = vsub.f32 %v5093_v16, %v1834_v10 }
 0x2fa   : > { %v1777_v23 = vpop.xlane.xlu1 %1776 }
 0x2fb   : > { %3924 = vrsqrt.f32 %v2090_v34  ;;  %v2091_v2 = vadd.f32 1e-05, %v2059_v32  ;;  %v1837_v59 = vmul.f32 0.0078125, %v1777_v23  ;;  %v2028_v40 = vmul.f32 %v1836_v63, %v1836_v63 }
 0x2fc   : > { %v1903_v17 = vpop.xlane.xlu0 %1902  ;;  %v1995_v34 = vsub.f32 %v5102_v21, %v1835_v14  ;;  %v1996_v21 = vsub.f32 %v5129_v12, %v1836_v63 }
 0x2fd   : > { %3926 = vrsqrt.f32 %v2091_v2  ;;  %v1964_v26 = vmul.f32 0.0078125, %v1903_v17  ;;  %v2029_v5 = vmul.f32 %v1837_v59, %v1837_v59  ;;  %v1997_v10 = vsub.f32 %v5132_v58, %v1837_v59 }
 0x2fe   : > { %v1905_v46 = vpop.xlane.xlu1 %1904 }
 0x2ff   : > { %v1965_v9 = vmul.f32 0.0078125, %v1905_v46  ;;  %v2060_v20 = vsub.f32 %v1964_v26, %v2028_v40 }
 0x300   : > { %v1779_v19 = vpop.xlane.xlu0 %1778 }
 0x301   : > { %v2061_v51 = vsub.f32 %v1965_v9, %v2029_v5  ;;  %v2092_v50 = vadd.f32 1e-05, %v2060_v20  ;;  %v1838_v62 = vmul.f32 0.0078125, %v1779_v19 }
 0x302   : > { %v1781_v32 = vpop.xlane.xlu1 %1780 }
 0x303   : > { %v2093_v57 = vadd.f32 1e-05, %v2061_v51  ;;  %3928 = vrsqrt.f32 %v2092_v50  ;;  %v1839_v2 = vmul.f32 0.0078125, %v1781_v32  ;;  %v2030_v17 = vmul.f32 %v1838_v62, %v1838_v62 }
 0x304   : > { %v1907_v23 = vpop.xlane.xlu0 %1906  ;;  %v1998_v58 = vsub.f32 %v5154_v22, %v1838_v62 }
 0x305   : > { %v3925_v44 = vpop.eup %3924  ;;  %3930 = vrsqrt.f32 %v2093_v57  ;;  %v1966_v8 = vmul.f32 0.0078125, %v1907_v23  ;;  %v2031_v20 = vmul.f32 %v1839_v2, %v1839_v2  ;;  %v1999_v59 = vsub.f32 %v5163_v38, %v1839_v2 }
 0x306   : > { %v2154_v46 = vmul.f32 %v3925_v44, %v1994_v4  ;;  %v1909_v5 = vpop.xlane.xlu1 %1908 }
 0x307   : > { %v3927_v61 = vpop.eup %3926  ;;  %v2062_v26 = vsub.f32 %v1966_v8, %v2030_v17  ;;  %v1967_v19 = vmul.f32 0.0078125, %v1909_v5 }
 0x308   : > { %v2155_v40 = vmul.f32 %v3927_v61, %v1995_v34  ;;  %v1783_v57 = vpop.xlane.xlu0 %1782 }
 0x309   : > { %v2094_v51 = vadd.f32 1e-05, %v2062_v26  ;;  %v2063_v50 = vsub.f32 %v1967_v19, %v2031_v20  ;;  %v1840_v44 = vmul.f32 0.0078125, %v1783_v57 }
 0x30a   : > { %v2219_v9 = vpack.c.bf16 %v2155_v40, %v2154_v46 }
 0x30b   : > { %3932 = vrsqrt.f32 %v2094_v51  ;;  %v2095_v14 = vadd.f32 1e-05, %v2063_v50  ;;  %v2032_v17 = vmul.f32 %v1840_v44, %v1840_v44  ;;  %v1785_v46 = vpop.xlane.xlu1 %1784 }
 0x30c   : > { %3500 = vmatprep.subr.bf16.mxu1 %v2219_v9  ;;  %v1911_v34 = vpop.xlane.xlu0 %1910  ;;  %v1841_v40 = vmul.f32 0.0078125, %v1785_v46 }
 0x30d   : > { %3501 = vmatpush3.bf16.msra.mxu1 %v2219_v9  ;;  %v3929_v16 = vpop.eup %3928  ;;  %3934 = vrsqrt.f32 %v2095_v14  ;;  %v1968_v23 = vmul.f32 0.0078125, %v1911_v34 }
 0x30e   : > { %v2156_v8 = vmul.f32 %v3929_v16, %v1996_v21  ;;  %v2033_v19 = vmul.f32 %v1841_v40, %v1841_v40 }
 0x30f   : > { %v3931_v32 = vpop.eup %3930  ;;  %v2064_v26 = vsub.f32 %v1968_v23, %v2032_v17  ;;  %v1913_v5 = vpop.xlane.xlu1 %1912 }
 0x310   : > { %v2157_v4 = vmul.f32 %v3931_v32, %v1997_v10  ;;  %v1787_v63 = vpop.xlane.xlu0 %1786  ;;  %v1969_v50 = vmul.f32 0.0078125, %v1913_v5  ;;  %v2001_v5 = vsub.f32 %v5204_v56, %v1841_v40 }
 0x311   : > { %v1842_v9 = vmul.f32 0.0078125, %v1787_v63  ;;  %v2096_v51 = vadd.f32 1e-05, %v2064_v26 }
 0x312   : > { %v2220_v61 = vpack.c.bf16 %v2157_v4, %v2156_v8  ;;  %v2065_v10 = vsub.f32 %v1969_v50, %v2033_v19 }
 0x313   : > { %v2034_v57 = vmul.f32 %v1842_v9, %v1842_v9  ;;  %v1789_v32 = vpop.xlane.xlu1 %1788  ;;  %3936 = vrsqrt.f32 %v2096_v51 }
 0x314   : > { %3502 = vmatprep.subr.bf16.mxu1 %v2220_v61  ;;  %v1915_v14 = vpop.xlane.xlu0 %1914  ;;  %v2097_v34 = vadd.f32 1e-05, %v2065_v10 }
 0x315   : > { %3503 = vmatpush3.bf16.msra.mxu1 %v2220_v61  ;;  %v3933_v12 = vpop.eup %3932  ;;  %v1970_v8 = vmul.f32 0.0078125, %v1915_v14  ;;  %v1843_v61 = vmul.f32 0.0078125, %v1789_v32 }
 0x316   : > { %v2158_v16 = vmul.f32 %v3933_v12, %v1998_v58  ;;  %3938 = vrsqrt.f32 %v2097_v34 }
 0x317   : > { %v3935_v20 = vpop.eup %3934  ;;  %v2066_v22 = vsub.f32 %v1970_v8, %v2034_v57  ;;  %v1917_v62 = vpop.xlane.xlu1 %1916  ;;  %v2035_v2 = vmul.f32 %v1843_v61, %v1843_v61 }
 0x318   : > { %v2159_v21 = vmul.f32 %v3935_v20, %v1999_v59  ;;  %v1971_v23 = vmul.f32 0.0078125, %v1917_v62  ;;  %v2000_v59 = vsub.f32 %v5188_v52, %v1840_v44  ;;  %v2002_v52 = vsub.f32 %v5217_v15, %v1842_v9 }
 0x319   : > { %v2098_v38 = vadd.f32 1e-05, %v2066_v22  ;;  %v2003_v44 = vsub.f32 %v5231_v11, %v1843_v61 }
 0x31a   : > { %v2221_v4 = vpack.c.bf16 %v2159_v21, %v2158_v16  ;;  %v2067_v17 = vsub.f32 %v1971_v23, %v2035_v2 }
 0x31b   : > { %3940 = vrsqrt.f32 %v2098_v38 }
 0x31c   : > { %3504 = vmatprep.subr.bf16.mxu1 %v2221_v4  ;;  %v2099_v46 = vadd.f32 1e-05, %v2067_v17  ;;  %v1791_v26 = vpop.xlane.xlu0 %1790 }
 0x31d   : > { %3505 = vmatpush3.bf16.msra.mxu1 %v2221_v4  ;;  %v1844_v12 = vmul.f32 0.0078125, %v1791_v26  ;;  %v3937_v63 = vpop.eup %3936  ;;  %v1793_v58 = vpop.xlane.xlu1 %1792 }
 0x31e   : > { %3942 = vrsqrt.f32 %v2099_v46  ;;  %v1845_v20 = vmul.f32 0.0078125, %v1793_v58  ;;  %v2160_v21 = vmul.f32 %v3937_v63, %v2000_v59 }
 0x31f   : > { %v2036_v50 = vmul.f32 %v1844_v12, %v1844_v12 }
 0x320   : > { %v3939_v19 = vpop.eup %3938  ;;  %v1919_v51 = vpop.xlane.xlu0 %1918  ;;  %v2037_v57 = vmul.f32 %v1845_v20, %v1845_v20 }
 0x321   : > { %v1972_v16 = vmul.f32 0.0078125, %v1919_v51  ;;  %v2161_v10 = vmul.f32 %v3939_v19, %v2001_v5  ;;  %v1921_v14 = vpop.xlane.xlu1 %1920 }
 0x322   : > { %v1973_v8 = vmul.f32 0.0078125, %v1921_v14  ;;  %v2004_v14 = vsub.f32 %v5258_v54, %v1844_v12 }
 0x323   : > { %v2068_v32 = vsub.f32 %v1972_v16, %v2036_v50  ;;  %v2222_v4 = vpack.c.bf16 %v2161_v10, %v2160_v21 }
 0x324   : > { %v1795_v34 = vpop.xlane.xlu0 %1794  ;;  %v2069_v62 = vsub.f32 %v1973_v8, %v2037_v57  ;;  %v2005_v57 = vsub.f32 %v5269_v43, %v1845_v20 }
 0x325   : > { %v3941_v22 = vpop.eup %3940  ;;  %v2100_v38 = vadd.f32 1e-05, %v2068_v32  ;;  %v1846_v2 = vmul.f32 0.0078125, %v1795_v34  ;;  %3506 = vmatprep.subr.bf16.mxu1 %v2222_v4 }
 0x326   : > { %3507 = vmatpush3.bf16.msra.mxu1 %v2222_v4  ;;  %v2101_v40 = vadd.f32 1e-05, %v2069_v62  ;;  %v2162_v26 = vmul.f32 %v3941_v22, %v2002_v52 }
 0x327   : > { %3944 = vrsqrt.f32 %v2100_v38  ;;  %v2038_v63 = vmul.f32 %v1846_v2, %v1846_v2  ;;  %v2006_v20 = vsub.f32 %v5287_v55, %v1846_v2 }
 0x328   : > { %v3943_v23 = vpop.eup %3942  ;;  %v1923_v46 = vpop.xlane.xlu0 %1922  ;;  %3946 = vrsqrt.f32 %v2101_v40 }
 0x329   : > { %v1974_v58 = vmul.f32 0.0078125, %v1923_v46  ;;  %v2163_v59 = vmul.f32 %v3943_v23, %v2003_v44 }
 0x32b   : > { %v2070_v51 = vsub.f32 %v1974_v58, %v2038_v63  ;;  %v2223_v16 = vpack.c.bf16 %v2163_v59, %v2162_v26 }
 0x32d   : > { %v2102_v15 = vadd.f32 1e-05, %v2070_v51  ;;  %3508 = vmatprep.subr.bf16.mxu1 %v2223_v16 }
 0x32e   : > { %3509 = vmatpush3.bf16.msra.mxu1 %v2223_v16 }
 0x32f   : > { %3948 = vrsqrt.f32 %v2102_v15 }
 0x330   : > { %v1797_v56 = vpop.xlane.xlu1 %1796 }
 0x331   : > { %v1847_v17 = vmul.f32 0.0078125, %v1797_v56  ;;  %v3945_v10 = vpop.eup %3944 }
 0x332   : > { %v3947_v8 = vpop.eup %3946  ;;  %v2164_v62 = vmul.f32 %v3945_v10, %v2004_v14 }
 0x333   : > { %v2039_v19 = vmul.f32 %v1847_v17, %v1847_v17  ;;  %v2165_v52 = vmul.f32 %v3947_v8, %v2005_v57  ;;  %v2007_v58 = vsub.f32 %v5296_v24, %v1847_v17 }
 0x334   : > { %v1925_v5 = vpop.xlane.xlu1 %1924 }
 0x335   : > { %v1975_v50 = vmul.f32 0.0078125, %v1925_v5  ;;  %v2224_v40 = vpack.c.bf16 %v2165_v52, %v2164_v62 }
 0x337   : > { %v2071_v9 = vsub.f32 %v1975_v50, %v2039_v19  ;;  %3510 = vmatprep.subr.bf16.mxu1 %v2224_v40 }
 0x338   : > { %v1801_v32 = vpop.xlane.xlu1 %1800  ;;  %3511 = vmatpush3.bf16.msra.mxu1 %v2224_v40 }
 0x339   : > { %v2103_v11 = vadd.f32 1e-05, %v2071_v9  ;;  %v1849_v4 = vmul.f32 0.0078125, %v1801_v32  ;;  %v3949_v54 = vpop.eup %3948 }
 0x33a   : > { %v1799_v61 = vpop.xlane.xlu0 %1798  ;;  %v2166_v16 = vmul.f32 %v3949_v54, %v2006_v20 }
 0x33b   : > { %v5519_v21 = vmul.f32 0.0078125, %v1799_v61  ;;  %3950 = vrsqrt.f32 %v2103_v11  ;;  %v2041_v23 = vmul.f32 %v1849_v4, %v1849_v4  ;;  %v2009_v40 = vsub.f32 %v5334_v45, %v1849_v4 }
 0x33c   : > { %v1929_v44 = vpop.xlane.xlu1 %1928 }
 0x33d   : > { %v2040_v22 = vmul.f32 %v5519_v21, %v5519_v21  ;;  %v1977_v46 = vmul.f32 0.0078125, %v1929_v44  ;;  %v2008_v44 = vsub.f32 %v5327_v29, %v5519_v21  ;;  %v5544_v29 = vld [vmem:[#allocation7 + $0x8] sm:$0xff]  }
 0x33e   : > { %v1927_v34 = vpop.xlane.xlu0 %1926 }
 0x33f   : > { %v1976_v38 = vmul.f32 0.0078125, %v1927_v34  ;;  %v2073_v43 = vsub.f32 %v1977_v46, %v2041_v23 }
 0x340   : > { %v1805_v59 = vpop.xlane.xlu1 %1804 }
 0x341   : > { %v2072_v56 = vsub.f32 %v1976_v38, %v2040_v22  ;;  %v2105_v19 = vadd.f32 1e-05, %v2073_v43  ;;  %v1851_v51 = vmul.f32 0.0078125, %v1805_v59 }
 0x342   : > { %v1803_v63 = vpop.xlane.xlu0 %1802 }
 0x343   : > { %v2104_v26 = vadd.f32 1e-05, %v2072_v56  ;;  %v5525_v12 = vmul.f32 0.0078125, %v1803_v63  ;;  %v2043_v14 = vmul.f32 %v1851_v51, %v1851_v51 }
 0x345   : > { %v3951_v5 = vpop.eup %3950  ;;  %3952 = vrsqrt.f32 %v2104_v26  ;;  %v2042_v9 = vmul.f32 %v5525_v12, %v5525_v12 }
 0x346   : > { %v1931_v50 = vpop.xlane.xlu0 %1930  ;;  %v2167_v15 = vmul.f32 %v3951_v5, %v2007_v58  ;;  %3954 = vrsqrt.f32 %v2105_v19  ;;  %v1933_v61 = vpop.xlane.xlu1 %1932 }
 0x347   : > { %v1978_v11 = vmul.f32 0.0078125, %v1931_v50  ;;  %v1979_v55 = vmul.f32 0.0078125, %v1933_v61  ;;  %v2011_v61 = vsub.f32 %v5366_v41, %v1851_v51 }
 0x348   : > { %v2225_v10 = vpack.c.bf16 %v2167_v15, %v2166_v16 }
 0x349   : > { %v2074_v57 = vsub.f32 %v1978_v11, %v2042_v9  ;;  %v2075_v17 = vsub.f32 %v1979_v55, %v2043_v14  ;;  %v5548_v9 = vld [vmem:[#allocation7 + $0x10] sm:$0xff]   ;;  %v2010_v11 = vsub.f32 %v5363_v49, %v5525_v12 }
 0x34a   : > { %v1807_v2 = vpop.xlane.xlu0 %1806  ;;  %3512 = vmatprep.subr.bf16.mxu1 %v2225_v10 }
 0x34b   : > { %v2106_v24 = vadd.f32 1e-05, %v2074_v57  ;;  %v5531_v32 = vmul.f32 0.0078125, %v1807_v2  ;;  %3513 = vmatpush3.bf16.msra.mxu1 %v2225_v10  ;;  %v2107_v8 = vadd.f32 1e-05, %v2075_v17 }
 0x34d   : > { %3956 = vrsqrt.f32 %v2106_v24  ;;  %v1809_v34 = vpop.xlane.xlu1 %1808  ;;  %v2044_v62 = vmul.f32 %v5531_v32, %v5531_v32 }
 0x34e   : > { %v1935_v22 = vpop.xlane.xlu0 %1934  ;;  %3958 = vrsqrt.f32 %v2107_v8  ;;  %v5535_v52 = vmul.f32 0.0078125, %v1809_v34 }
 0x34f   : > { %v3953_v38 = vpop.eup %3952  ;;  %v1980_v56 = vmul.f32 0.0078125, %v1935_v22 }
 0x350   : > { %v3955_v23 = vpop.eup %3954  ;;  %v2168_v63 = vmul.f32 %v3953_v38, %v2008_v44  ;;  %v2045_v43 = vmul.f32 %v5535_v52, %v5535_v52 }
 0x351   : > { %v2076_v46 = vsub.f32 %v1980_v56, %v2044_v62  ;;  %v1937_v26 = vpop.xlane.xlu1 %1936  ;;  %v2169_v54 = vmul.f32 %v3955_v23, %v2009_v40  ;;  %v5561_v62 = vld [vmem:[#allocation7 + $0x18] sm:$0xff]   ;;  %v5565_v23 = vld [vmem:[#allocation7 + $0x20] sm:$0xff]  }
 0x352   : > { %v1981_v58 = vmul.f32 0.0078125, %v1937_v26  ;;  %v1811_v59 = vpop.xlane.xlu0 %1810 }
 0x353   : > { %v2108_v20 = vadd.f32 1e-05, %v2076_v46  ;;  %v5542_v5 = vmul.f32 0.0078125, %v1811_v59  ;;  %v2226_v19 = vpack.c.bf16 %v2169_v54, %v2168_v63  ;;  %v2012_v54 = vsub.f32 %v5399_v28, %v5531_v32 }
 0x354   : > { %v2077_v50 = vsub.f32 %v1981_v58, %v2045_v43  ;;  %v2013_v43 = vsub.f32 %v5409_v27, %v5535_v52  ;;  %v5579_v52 = vld [vmem:[#allocation7 + $0x28] sm:$0xff]  }
 0x355   : > { %v1813_v16 = vpop.xlane.xlu1 %1812  ;;  %3514 = vmatprep.subr.bf16.mxu1 %v2226_v19  ;;  %3960 = vrsqrt.f32 %v2108_v20  ;;  %v2046_v10 = vmul.f32 %v5542_v5, %v5542_v5 }
 0x356   : > { %v2109_v21 = vadd.f32 1e-05, %v2077_v50  ;;  %v5546_v4 = vmul.f32 0.0078125, %v1813_v16  ;;  %v1939_v15 = vpop.xlane.xlu0 %1938  ;;  %3515 = vmatpush3.bf16.msra.mxu1 %v2226_v19 }
 0x357   : > { %v3957_v45 = vpop.eup %3956  ;;  %v1982_v14 = vmul.f32 0.0078125, %v1939_v15 }
 0x358   : > { %v3959_v57 = vpop.eup %3958  ;;  %3962 = vrsqrt.f32 %v2109_v21  ;;  %v2170_v24 = vmul.f32 %v3957_v45, %v2010_v11  ;;  %v2047_v8 = vmul.f32 %v5546_v4, %v5546_v4 }
 0x359   : > { %v2078_v55 = vsub.f32 %v1982_v14, %v2046_v10  ;;  %v1941_v2 = vpop.xlane.xlu1 %1940  ;;  %3517 = vmatmul.mubr.bf16.vlgmr.msra.gmra.mrb[32].mxu1 %v5544_v29  ;;  %v2171_v17 = vmul.f32 %v3959_v57, %v2011_v61  ;;  %v5583_v14 = vld [vmem:[#allocation7 + $0x30] sm:$0xff]  }
 0x35a   : > { %v1983_v34 = vmul.f32 0.0078125, %v1941_v2  ;;  %v1815_v22 = vpop.xlane.xlu0 %1814  ;;  %3520 = vmatprep.mubr.bf16.mxu1 %v5548_v9  ;;  %v2014_v2 = vsub.f32 %v5424_v7, %v5542_v5 }
 0x35b   : > { %v2110_v49 = vadd.f32 1e-05, %v2078_v55  ;;  %v5559_v41 = vmul.f32 0.0078125, %v1815_v22  ;;  %v2410_v12 = vpack.c.bf16 %v2171_v17, %v2170_v24  ;;  %v2015_v24 = vsub.f32 %v5431_v35, %v5546_v4 }
 0x35c   : > { %v2079_v51 = vsub.f32 %v1983_v34, %v2047_v8 }
 0x35d   : > { %v1817_v38 = vpop.xlane.xlu1 %1816  ;;  %3532 = vmatprep.subr.bf16.mxu1 %v2410_v12  ;;  %3964 = vrsqrt.f32 %v2110_v49  ;;  %v2048_v46 = vmul.f32 %v5559_v41, %v5559_v41 }
 0x35e   : > { %v2111_v56 = vadd.f32 1e-05, %v2079_v51  ;;  %v5563_v44 = vmul.f32 0.0078125, %v1817_v38  ;;  %v1943_v40 = vpop.xlane.xlu0 %1942  ;;  %3533 = vmatpush3.bf16.msra.mxu1 %v2410_v12 }
 0x35f   : > { %v1984_v26 = vmul.f32 0.0078125, %v1943_v40  ;;  %v3961_v63 = vpop.eup %3960 }
 0x360   : > { %3966 = vrsqrt.f32 %v2111_v56  ;;  %v2049_v19 = vmul.f32 %v5563_v44, %v5563_v44  ;;  %v2172_v45 = vmul.f32 %v3961_v63, %v2012_v54 }
 0x361   : > { %v2080_v20 = vsub.f32 %v1984_v26, %v2048_v46  ;;  %v1945_v58 = vpop.xlane.xlu1 %1944  ;;  %3521 = vmatmul.mubr.bf16.gmra.mrb[36].mxu1 %v5561_v62  ;;  %v5597_v26 = vld [vmem:[#allocation7 + $0x38] sm:$0xff]  }
 0x362   : > { %v3963_v59 = vpop.eup %3962  ;;  %v1985_v50 = vmul.f32 0.0078125, %v1945_v58  ;;  %3524 = vmatprep.mubr.bf16.mxu1 %v5565_v23  ;;  %v1819_v11 = vpop.xlane.xlu0 %1818  ;;  %v2016_v58 = vsub.f32 %v5445_v0, %v5559_v41 }
 0x363   : > { %v2112_v16 = vadd.f32 1e-05, %v2080_v20  ;;  %v2173_v21 = vmul.f32 %v3963_v59, %v2013_v43  ;;  %v5577_v28 = vmul.f32 0.0078125, %v1819_v11  ;;  %v2017_v59 = vsub.f32 %v5449_v39, %v5563_v44 }
 0x364   : > { %v2081_v15 = vsub.f32 %v1985_v50, %v2049_v19 }
 0x365   : > { %v1821_v32 = vpop.xlane.xlu1 %1820  ;;  %v2411_v27 = vpack.c.bf16 %v2173_v21, %v2172_v45  ;;  %3968 = vrsqrt.f32 %v2112_v16  ;;  %v2050_v17 = vmul.f32 %v5577_v28, %v5577_v28 }
 0x366   : > { %v2113_v61 = vadd.f32 1e-05, %v2081_v15  ;;  %v5581_v10 = vmul.f32 0.0078125, %v1821_v32  ;;  %v1947_v55 = vpop.xlane.xlu0 %1946 }
 0x367   : > { %3534 = vmatprep.subr.bf16.mxu1 %v2411_v27  ;;  %v3965_v57 = vpop.eup %3964  ;;  %v1986_v8 = vmul.f32 0.0078125, %v1947_v55 }
 0x368   : > { %3970 = vrsqrt.f32 %v2113_v61  ;;  %3535 = vmatpush3.bf16.msra.mxu1 %v2411_v27  ;;  %v2051_v49 = vmul.f32 %v5581_v10, %v5581_v10  ;;  %v2174_v38 = vmul.f32 %v3965_v57, %v2014_v2 }
 0x369   : > { %v1949_v34 = vpop.xlane.xlu1 %1948  ;;  %3525 = vmatmul.mubr.bf16.gmra.mrb[40].mxu1 %v5579_v52  ;;  %v2082_v51 = vsub.f32 %v1986_v8, %v2050_v17  ;;  %v2019_v8 = vsub.f32 %v5462_v30, %v5581_v10 }
 0x36a   : > { %v3967_v22 = vpop.eup %3966  ;;  %v1987_v12 = vmul.f32 0.0078125, %v1949_v34  ;;  %3528 = vmatprep.mubr.bf16.mxu1 %v5583_v14  ;;  %v1823_v56 = vpop.xlane.xlu0 %1822 }
 0x36b   : > { %v2175_v7 = vmul.f32 %v3967_v22, %v2015_v24  ;;  %v2114_v35 = vadd.f32 1e-05, %v2082_v51  ;;  %v5595_v4 = vmul.f32 0.0078125, %v1823_v56 }
 0x36c   : > { %v2083_v5 = vsub.f32 %v1987_v12, %v2051_v49 }
 0x36d   : > { %v1825_v40 = vpop.xlane.xlu1 %1824  ;;  %v2412_v46 = vpack.c.bf16 %v2175_v7, %v2174_v38  ;;  %3972 = vrsqrt.f32 %v2114_v35  ;;  %v2052_v19 = vmul.f32 %v5595_v4, %v5595_v4  ;;  %v2020_v10 = vsub.f32 %v5473_v37, %v5595_v4 }
 0x36e   : > { %v2115_v63 = vadd.f32 1e-05, %v2083_v5  ;;  %v5599_v54 = vmul.f32 0.0078125, %v1825_v40  ;;  %v1951_v20 = vpop.xlane.xlu0 %1950 }
 0x36f   : > { %3536 = vmatprep.subr.bf16.mxu1 %v2412_v46  ;;  %v3969_v43 = vpop.eup %3968  ;;  %v1988_v50 = vmul.f32 0.0078125, %v1951_v20 }
 0x370   : > { %3974 = vrsqrt.f32 %v2115_v63  ;;  %3537 = vmatpush3.bf16.msra.mxu1 %v2412_v46  ;;  %v2053_v21 = vmul.f32 %v5599_v54, %v5599_v54  ;;  %v2176_v32 = vmul.f32 %v3969_v43, %v2016_v58 }
 0x371   : > { %v1953_v16 = vpop.xlane.xlu1 %1952  ;;  %3529 = vmatmul.mubr.bf16.gmra.mrb[44].mxu1 %v5597_v26  ;;  %v2084_v11 = vsub.f32 %v1988_v50, %v2052_v19 }
 0x372   : > { %v3971_v45 = vpop.eup %3970  ;;  %v1989_v15 = vmul.f32 0.0078125, %v1953_v16  ;;  %3548 = vmatprep.mubr.bf16.mxu1 %v5468_v31  ;;  %v1827_v27 = vpop.xlane.xlu0 %1826  ;;  %v2018_v31 = vsub.f32 %v5459_v60, %v5577_v28 }
 0x373   : > { %v2177_v0 = vmul.f32 %v3971_v45, %v2017_v59  ;;  %v2116_v39 = vadd.f32 1e-05, %v2084_v11  ;;  %v1862_v44 = vmul.f32 0.0078125, %v1827_v27  ;;  %v2021_v59 = vsub.f32 %v5477_v1, %v5599_v54 }
 0x374   : > { %v2085_v41 = vsub.f32 %v1989_v15, %v2053_v21 }
 0x375   : > { %v1829_v61 = vpop.xlane.xlu1 %1828  ;;  %v2413_v57 = vpack.c.bf16 %v2177_v0, %v2176_v32  ;;  %3976 = vrsqrt.f32 %v2116_v39  ;;  %v2054_v34 = vmul.f32 %v1862_v44, %v1862_v44  ;;  %v2022_v1 = vsub.f32 %v5486_v48, %v1862_v44  ;;  %v3765_v48 = vld [vmem:[#allocation10 + $0x8] sm:$0xff]  }
 0x376   : > { %v2117_v55 = vadd.f32 1e-05, %v2085_v41  ;;  %v1863_v2 = vmul.f32 0.0078125, %v1829_v61  ;;  %v1955_v24 = vpop.xlane.xlu0 %1954 }
 0x377   : > { %3538 = vmatprep.subr.bf16.mxu1 %v2413_v57  ;;  %v3973_v17 = vpop.eup %3972  ;;  %v1990_v22 = vmul.f32 0.0078125, %v1955_v24 }
 0x378   : > { %3978 = vrsqrt.f32 %v2117_v55  ;;  %3539 = vmatpush3.bf16.msra.mxu1 %v2413_v57  ;;  %v2055_v51 = vmul.f32 %v1863_v2, %v1863_v2  ;;  %v2178_v5 = vmul.f32 %v3973_v17, %v2018_v31  ;;  %v2023_v4 = vsub.f32 %v5489_v18, %v1863_v2  ;;  %v3766_v18 = vld [vmem:[#allocation10 + $0x10] sm:$0xff]  }
 0x379   : > { %v1957_v49 = vpop.xlane.xlu1 %1956  ;;  %v2086_v7 = vsub.f32 %v1990_v22, %v2054_v34 }
 0x37a   : > { %v3975_v12 = vpop.eup %3974  ;;  %v1991_v38 = vmul.f32 0.0078125, %v1957_v49  ;;  %v1831_v40 = vpop.xlane.xlu0 %1830 }
 0x37b   : > { %v2179_v56 = vmul.f32 %v3975_v12, %v2019_v8  ;;  %v2118_v46 = vadd.f32 1e-05, %v2086_v7  ;;  %v1864_v63 = vmul.f32 0.0078125, %v1831_v40 }
 0x37c   : > { %v2087_v35 = vsub.f32 %v1991_v38, %v2055_v51  ;;  %v3764_v51 = vld [vmem:[#allocation10] sm:$0xff]  }
 0x37d   : > { %v1833_v43 = vpop.xlane.xlu1 %1832  ;;  %v2414_v20 = vpack.c.bf16 %v2179_v56, %v2178_v5  ;;  %3980 = vrsqrt.f32 %v2118_v46  ;;  %v2056_v19 = vmul.f32 %v1864_v63, %v1864_v63  ;;  %v2024_v31 = vsub.f32 %v5498_v6, %v1864_v63  ;;  %v3767_v6 = vld [vmem:[#allocation10 + $0x18] sm:$0xff]   ;;  %v6295_v63 = vld [vmem:[#allocation20_spill] sm:$0xff] }
 0x37e   : > { %v2119_v58 = vadd.f32 1e-05, %v2087_v35  ;;  %v1865_v60 = vmul.f32 0.0078125, %v1833_v43  ;;  %v1959_v30 = vpop.xlane.xlu0 %1958 }
 0x37f   : > { %3540 = vmatprep.subr.bf16.mxu1 %v2414_v20  ;;  %v3977_v28 = vpop.eup %3976  ;;  %v1992_v50 = vmul.f32 0.0078125, %v1959_v30 }
 0x380   : > { %3982 = vrsqrt.f32 %v2119_v58  ;;  %3541 = vmatpush3.bf16.msra.mxu1 %v2414_v20  ;;  %v2057_v21 = vmul.f32 %v1865_v60, %v1865_v60  ;;  %v2180_v32 = vmul.f32 %v3977_v28, %v2020_v10  ;;  %v2025_v8 = vsub.f32 %v5501_v13, %v1865_v60  ;;  %v3768_v13 = vld [vmem:[#allocation10 + $0x20] sm:$0xff]  }
 0x381   : > { %v1961_v16 = vpop.xlane.xlu1 %1960  ;;  %v2088_v11 = vsub.f32 %v1992_v50, %v2056_v19  ;;  %v6296_v20 = vld [vmem:[#allocation19_spill] sm:$0xff] }
 0x382   : > { %v3979_v45 = vpop.eup %3978  ;;  %v1993_v15 = vmul.f32 0.0078125, %v1961_v16 }
 0x383   : > { %v2181_v0 = vmul.f32 %v3979_v45, %v2021_v59  ;;  %v2120_v27 = vadd.f32 1e-05, %v2088_v11  ;;  %v6297_v45 = vld [vmem:[#allocation23_spill] sm:$0xff] }
 0x384   : > { %v2089_v41 = vsub.f32 %v1993_v15, %v2057_v21 }
 0x385   : > { %v2415_v39 = vpack.c.bf16 %v2181_v0, %v2180_v32  ;;  %3984 = vrsqrt.f32 %v2120_v27  ;;  %v6298_v0 = vld [vmem:[#allocation21_spill] sm:$0xff]  ;;  %v3772_v27 = vld [vmem:[#allocation11] ss:$8 sps:$4 sm:$0xff]  }
 0x386   : > { %v2121_v61 = vadd.f32 1e-05, %v2089_v41 }
 0x387   : > { %3542 = vmatprep.subr.bf16.mxu1 %v2415_v39  ;;  %v3981_v37 = vpop.eup %3980 }
 0x388   : > { %3986 = vrsqrt.f32 %v2121_v61  ;;  %3543 = vmatpush3.bf16.msra.mxu1 %v2415_v39  ;;  %v2182_v57 = vmul.f32 %v3981_v37, %v2022_v1  ;;  %v3774_v39 = vld [vmem:[#allocation11 + $0x4] ss:$8 sps:$4 sm:$0xff]  }
 0x389   : > { %v6299_v1 = vld [vmem:[#allocation24_spill] sm:$0xff]  ;;  %2971 = vmatprep.subr.bf16.mxu0 %v3774_v39 }
 0x38a   : > { %v3983_v54 = vpop.eup %3982  ;;  %2972 = vmatpush1.bf16.msra.mxu0 %v3772_v27 }
 0x38b   : > { %v2183_v55 = vmul.f32 %v3983_v54, %v2023_v4  ;;  %v3777_v54 = vld [vmem:[#allocation11 + $0x14] ss:$8 sps:$4 sm:$0xff]  }
 0x38c   : > { %2973 = vmatprep.subr.bf16.mxu0 %v3777_v54 }
 0x38d   : > { %v2416_v24 = vpack.c.bf16 %v2183_v55, %v2182_v57  ;;  %v6300_v55 = vld [vmem:[#allocation22_spill] sm:$0xff] }
 0x38f   : > { %3544 = vmatprep.subr.bf16.mxu1 %v2416_v24  ;;  %v3985_v17 = vpop.eup %3984 }
 0x390   : > { %3545 = vmatpush3.bf16.msra.mxu1 %v2416_v24  ;;  %v2184_v22 = vmul.f32 %v3985_v17, %v2024_v31  ;;  %v6301_v17 = vld [vmem:[#allocation27_spill] sm:$0xff] }
 0x392   : > { %v3987_v34 = vpop.eup %3986 }
 0x393   : > { %v2185_v49 = vmul.f32 %v3987_v34, %v2025_v8 }
 0x395   : > { %v2417_v12 = vpack.c.bf16 %v2185_v49, %v2184_v22  ;;  %v3775_v49 = vld [vmem:[#allocation11 + $0x10] ss:$8 sps:$4 sm:$0xff]  }
 0x396   : > { %2974 = vmatpush1.bf16.msra.mxu0 %v3775_v49 }
 0x397   : > { %3546 = vmatprep.subr.bf16.mxu1 %v2417_v12 }
 0x398   : > { %3547 = vmatpush3.bf16.msra.mxu1 %v2417_v12 }
 0x399   : > { %3564 = vmatprep.subr.bf16.mxu1 %v3764_v51 }
 0x39b   : > { %3549 = vmatmul.mubr.bf16.vlgmr.msra.gmra.mrb[48].mxu1 %v5544_v29  ;;  %v3769_v29 = vld [vmem:[#allocation10 + $0x28] sm:$0xff]  }
 0x39c   : > { %3552 = vmatprep.mubr.bf16.mxu1 %v5548_v9  ;;  %3565 = vmatpush3.bf16.msra.mxu1 %v3764_v51  ;;  %v3770_v9 = vld [vmem:[#allocation10 + $0x30] sm:$0xff]  }
 0x39d   : > { %3566 = vmatprep.subr.bf16.mxu1 %v3765_v48 }
 0x3a0   : > { %3567 = vmatpush3.bf16.msra.mxu1 %v3765_v48 }
 0x3a1   : > { %3568 = vmatprep.subr.bf16.mxu1 %v3766_v18 }
 0x3a3   : > { %3553 = vmatmul.mubr.bf16.gmra.mrb[52].mxu1 %v5561_v62  ;;  %v3771_v62 = vld [vmem:[#allocation10 + $0x38] sm:$0xff]  }
 0x3a4   : > { %3556 = vmatprep.mubr.bf16.mxu1 %v5565_v23  ;;  %3569 = vmatpush3.bf16.msra.mxu1 %v3766_v18  ;;  %v913_v23 = vsub.s32 0, %v5025_v42  ;;  %v3780_v18 = vld [vmem:[#allocation11 + $0x24] ss:$8 sps:$4 sm:$0xff]  }
 0x3a5   : > { %3570 = vmatprep.subr.bf16.mxu1 %v3767_v6  ;;  %2975 = vmatprep.subr.bf16.mxu0 %v3780_v18 }
 0x3a8   : > { %3571 = vmatpush3.bf16.msra.mxu1 %v3767_v6 }
 0x3a9   : > { %3572 = vmatprep.subr.bf16.mxu1 %v3768_v13 }
 0x3ab   : > { %3557 = vmatmul.mubr.bf16.gmra.mrb[56].mxu1 %v5579_v52  ;;  %v4052_v52 = vld [vmem:[%s6229_s2] sm:$0x3] }
 0x3ac   : > { %3560 = vmatprep.mubr.bf16.mxu1 %v5583_v14  ;;  %3573 = vmatpush3.bf16.msra.mxu1 %v3768_v13  ;;  %v5634_v44 = vrot.slane %v4052_v52, %v913_v23 }
 0x3ad   : > { %3574 = vmatprep.subr.bf16.mxu1 %v3769_v29 }
 0x3ae   : > { %v5638_v14 = vadd.f32 %v5033_v33, %v5634_v44  ;;  %v5648_v42 = vadd.f32 %v5036_v36, %v5634_v44  ;;  %v5652_v38 = vadd.f32 %v5049_v53, %v5634_v44  ;;  %v5664_v36 = vadd.f32 %v5079_v25, %v5634_v44 }
 0x3af   : > { %v5669_v40 = vadd.f32 %v5061_v3, %v5634_v44  ;;  %v5674_v43 = vadd.f32 %v6295_v63, %v5634_v44  ;;  %v5678_v58 = vadd.f32 %v6296_v20, %v5634_v44  ;;  %v5693_v21 = vadd.f32 %v6297_v45, %v5634_v44  ;;  %v3783_v20 = vld [vmem:[#allocation11 + $0x34] ss:$8 sps:$4 sm:$0xff]   ;;  %v3781_v45 = vld [vmem:[#allocation11 + $0x30] ss:$8 sps:$4 sm:$0xff]  }
 0x3b0   : > { %3575 = vmatpush3.bf16.msra.mxu1 %v3769_v29  ;;  %v1194_v2 = vmul.f32 %v5638_v14, %v5638_v14  ;;  %v1200_v5 = vmul.f32 %v5652_v38, %v5652_v38  ;;  %v1206_v25 = vmul.f32 %v5664_v36, %v5664_v36  ;;  %v5699_v41 = vadd.f32 %v6298_v0, %v5634_v44 }
 0x3b1   : > { %3576 = vmatprep.subr.bf16.mxu1 %v3770_v9  ;;  %v1202_v3 = vmul.f32 %v5669_v40, %v5669_v40  ;;  %v1208_v59 = vmul.f32 %v5674_v43, %v5674_v43  ;;  %v1204_v19 = vmul.f32 %v5678_v58, %v5678_v58  ;;  %v5705_v4 = vadd.f32 %v6299_v1, %v5634_v44 }
 0x3b2   : > { %v1258_v33 = vmul.f32 %v1194_v2, %v5638_v14  ;;  %v1264_v46 = vmul.f32 %v1200_v5, %v5652_v38  ;;  %v1270_v16 = vmul.f32 %v1206_v25, %v5664_v36  ;;  %v5710_v24 = vadd.f32 %v6300_v55, %v5634_v44  ;;  %v6303_v2 = vld [vmem:[#allocation26_spill] sm:$0xff] }
 0x3b3   : > { %3561 = vmatmul.mubr.bf16.gmra.mrb[60].mxu1 %v5597_v26  ;;  %v5642_v26 = vadd.f32 %v5044_v47, %v5634_v44  ;;  %v1196_v47 = vmul.f32 %v5648_v42, %v5648_v42  ;;  %v1266_v32 = vmul.f32 %v1202_v3, %v5669_v40  ;;  %v1272_v37 = vmul.f32 %v1208_v59, %v5674_v43 }
 0x3b4   : > { %3577 = vmatpush3.bf16.msra.mxu1 %v3770_v9  ;;  %v1322_v35 = vmul.f32 0.044715, %v1258_v33  ;;  %v1328_v10 = vmul.f32 0.044715, %v1264_v46  ;;  %v1268_v57 = vmul.f32 %v1204_v19, %v5678_v58  ;;  %v5714_v31 = vadd.f32 %v6301_v17, %v5634_v44  ;;  %v6302_v9 = vld [vmem:[#allocation25_spill] sm:$0xff] }
 0x3b5   : > { %3578 = vmatprep.subr.bf16.mxu1 %v3771_v62  ;;  %v1198_v7 = vmul.f32 %v5642_v26, %v5642_v26  ;;  %v1260_v53 = vmul.f32 %v1196_v47, %v5648_v42  ;;  %v1334_v34 = vmul.f32 0.044715, %v1270_v16  ;;  %v1214_v22 = vmul.f32 %v5693_v21, %v5693_v21 }
 0x3b6   : > { %v1386_v30 = vadd.f32 %v1322_v35, %v5638_v14  ;;  %v1392_v61 = vadd.f32 %v1328_v10, %v5652_v38  ;;  %v1330_v51 = vmul.f32 0.044715, %v1266_v32  ;;  %v1210_v48 = vmul.f32 %v5699_v41, %v5699_v41  ;;  %v3786_v32 = vld [vmem:[#allocation11 + $0x44] ss:$8 sps:$4 sm:$0xff]  }
 0x3b7   : > { %v1262_v56 = vmul.f32 %v1198_v7, %v5642_v26  ;;  %v1324_v28 = vmul.f32 0.044715, %v1260_v53  ;;  %v1336_v13 = vmul.f32 0.044715, %v1272_v37  ;;  %v1216_v29 = vmul.f32 %v5705_v4, %v5705_v4  ;;  %v3778_v53 = vld [vmem:[#allocation11 + $0x20] ss:$8 sps:$4 sm:$0xff]  }
 0x3b8   : > { %3579 = vmatpush3.bf16.msra.mxu1 %v3771_v62  ;;  %v1450_v15 = vmul.f32 0.7978846, %v1386_v30  ;;  %v1456_v6 = vmul.f32 0.7978846, %v1392_v61  ;;  %v5724_v62 = vadd.f32 %v6302_v9, %v5634_v44  ;;  %v1332_v23 = vmul.f32 0.044715, %v1268_v57  ;;  %2976 = vmatpush1.bf16.msra.mxu0 %v3778_v53 }
 0x3b9   : > { %v1326_v60 = vmul.f32 0.044715, %v1262_v56  ;;  %v1388_v11 = vadd.f32 %v1324_v28, %v5648_v42  ;;  %v1212_v52 = vmul.f32 %v5710_v24, %v5710_v24  ;;  %v5730_v7 = vadd.f32 %v6303_v2, %v5634_v44  ;;  %v6304_v56 = vld [vmem:[#allocation28_spill] sm:$0xff]  ;;  %2977 = vmatprep.subr.bf16.mxu0 %v3783_v20 }
 0x3ba   : > { %3988 = vtanh.f32 %v1450_v15  ;;  %v1222_v33 = vmul.f32 %v5714_v31, %v5714_v31  ;;  %v1398_v47 = vadd.f32 %v1334_v34, %v5664_v36  ;;  %v1278_v5 = vmul.f32 %v1214_v22, %v5693_v21  ;;  %v3789_v22 = vld [vmem:[#allocation11 + $0x54] ss:$8 sps:$4 sm:$0xff]  }
 0x3bb   : > { %v1390_v50 = vadd.f32 %v1326_v60, %v5642_v26  ;;  %v1452_v12 = vmul.f32 0.7978846, %v1388_v11  ;;  %v5738_v35 = vadd.f32 %v6304_v56, %v5634_v44  ;;  %v1394_v46 = vadd.f32 %v1330_v51, %v5669_v40 }
 0x3bc   : > { %v1274_v63 = vmul.f32 %v1210_v48, %v5699_v41  ;;  %v1400_v60 = vadd.f32 %v1336_v13, %v5674_v43  ;;  %v1280_v25 = vmul.f32 %v1216_v29, %v5705_v4  ;;  %v1218_v30 = vmul.f32 %v5724_v62, %v5724_v62  ;;  %2978 = vmatpush1.bf16.msra.mxu0 %v3781_v45 }
 0x3bd   : > { %v1454_v8 = vmul.f32 0.7978846, %v1390_v50  ;;  %v1396_v28 = vadd.f32 %v1332_v23, %v5678_v58  ;;  %v1276_v3 = vmul.f32 %v1212_v52, %v5710_v24  ;;  %v1220_v10 = vmul.f32 %v5730_v7, %v5730_v7  ;;  %2979 = vmatprep.subr.bf16.mxu0 %v3786_v32  ;;  %v3787_v52 = vld [vmem:[#allocation11 + $0x50] ss:$8 sps:$4 sm:$0xff]  }
 0x3be   : > { %v1286_v59 = vmul.f32 %v1222_v33, %v5714_v31  ;;  %v1462_v19 = vmul.f32 0.7978846, %v1398_v47  ;;  %v1342_v50 = vmul.f32 0.044715, %v1278_v5  ;;  %v1224_v16 = vmul.f32 %v5738_v35, %v5738_v35  ;;  %v3792_v47 = vld [vmem:[#allocation11 + $0x64] ss:$8 sps:$4 sm:$0xff]  }
 0x3bf   : > { %3990 = vtanh.f32 %v1454_v8  ;;  %v1458_v15 = vmul.f32 0.7978846, %v1394_v46  ;;  %v1338_v11 = vmul.f32 0.044715, %v1274_v63  ;;  %v1464_v0 = vmul.f32 0.7978846, %v1400_v60 }
 0x3c0   : > { %3992 = vtanh.f32 %v1452_v12  ;;  %v1344_v27 = vmul.f32 0.044715, %v1280_v25  ;;  %v1282_v39 = vmul.f32 %v1218_v30, %v5724_v62  ;;  %v1460_v37 = vmul.f32 0.7978846, %v1396_v28  ;;  %v3784_v8 = vld [vmem:[#allocation11 + $0x40] ss:$8 sps:$4 sm:$0xff]  }
 0x3c1   : > { %3994 = vtanh.f32 %v1456_v6  ;;  %v1340_v1 = vmul.f32 0.044715, %v1276_v3  ;;  %v1284_v54 = vmul.f32 %v1220_v10, %v5730_v7  ;;  %v1350_v57 = vmul.f32 0.044715, %v1286_v59  ;;  %2980 = vmatpush1.bf16.msra.mxu0 %v3784_v8  ;;  %v5767_v30 = vld [vmem:[%s6230_s3] ss:$0 sm:$0xff] }
 0x3c2   : > { %3996 = vtanh.f32 %v1462_v19  ;;  %v1406_v55 = vadd.f32 %v1342_v50, %v5693_v21  ;;  %v1288_v17 = vmul.f32 %v1224_v16, %v5738_v35  ;;  %v1402_v34 = vadd.f32 %v1338_v11, %v5699_v41  ;;  %2981 = vmatprep.subr.bf16.mxu0 %v3789_v22  ;;  %v3790_v3 = vld [vmem:[#allocation11 + $0x60] ss:$8 sps:$4 sm:$0xff]   ;;  %v5769_v50 = vld [vmem:[#allocation8 + $0x10] sm:$0xff] }
 0x3c3   : > { %3998 = vtanh.f32 %v1458_v15  ;;  %v1408_v12 = vadd.f32 %v1344_v27, %v5705_v4  ;;  %v1346_v51 = vmul.f32 0.044715, %v1282_v39  ;;  %v1404_v18 = vadd.f32 %v1340_v1, %v5710_v24 }
 0x3c4   : > { %v3989_v61 = vpop.eup %3988  ;;  %4000 = vtanh.f32 %v1464_v0  ;;  %v1348_v6 = vmul.f32 0.044715, %v1284_v54  ;;  %v1414_v13 = vadd.f32 %v1350_v57, %v5714_v31  ;;  %v1470_v9 = vmul.f32 0.7978846, %v1406_v55  ;;  %v5772_v0 = vld [vmem:[#allocation8] sm:$0xff]  ;;  %v5775_v54 = vld [vmem:[#allocation8 + $0x18] sm:$0xff] }
 0x3c5   : > { %4002 = vtanh.f32 %v1460_v37  ;;  %v1352_v23 = vmul.f32 0.044715, %v1288_v17  ;;  %v1466_v2 = vmul.f32 0.7978846, %v1402_v34  ;;  %v1472_v5 = vmul.f32 0.7978846, %v1408_v12  ;;  %2982 = vmatpush1.bf16.msra.mxu0 %v3787_v52 }
 0x3c6   : > { %v1410_v56 = vadd.f32 %v1346_v51, %v5724_v62  ;;  %v1578_v53 = vadd.f32 1.0, %v3989_v61  ;;  %v1468_v46 = vmul.f32 0.7978846, %v1404_v18  ;;  %v1412_v63 = vadd.f32 %v1348_v6, %v5730_v7  ;;  %2983 = vmatprep.subr.bf16.mxu0 %v3792_v47 }
 0x3c7   : > { %v1478_v20 = vmul.f32 0.7978846, %v1414_v13  ;;  %4004 = vtanh.f32 %v1470_v9  ;;  %v1416_v25 = vadd.f32 %v1352_v23, %v5738_v35 }
 0x3c8   : > { %4006 = vtanh.f32 %v1466_v2  ;;  %v1474_v19 = vmul.f32 0.7978846, %v1410_v56  ;;  %v1642_v45 = vmul.f32 0.5, %v1578_v53  ;;  %v1476_v11 = vmul.f32 0.7978846, %v1412_v63 }
 0x3c9   : > { %v3991_v49 = vpop.eup %3990  ;;  %4008 = vtanh.f32 %v1472_v5  ;;  %v1480_v37 = vmul.f32 0.7978846, %v1416_v25  ;;  %2984 = vmatpush1.bf16.msra.mxu0 %v3790_v3 }
 0x3ca   : > { %v3993_v48 = vpop.eup %3992  ;;  %v1582_v33 = vadd.f32 1.0, %v3991_v49  ;;  %4010 = vtanh.f32 %v1468_v46  ;;  %v5780_v49 = vld [vmem:[#allocation8 + $0x8] sm:$0xff]  ;;  %v5789_v46 = vld [vmem:[#allocation8 + $0x30] sm:$0xff] }
 0x3cb   : > { %v3995_v29 = vpop.eup %3994  ;;  %v1580_v28 = vadd.f32 1.0, %v3993_v48  ;;  %4012 = vtanh.f32 %v1478_v20  ;;  %v1706_v48 = vmul.f32 %v1642_v45, %v5638_v14 }
 0x3cc   : > { %v1584_v60 = vadd.f32 1.0, %v3995_v29  ;;  %v1646_v10 = vmul.f32 0.5, %v1582_v33  ;;  %v3997_v59 = vpop.eup %3996  ;;  %4014 = vtanh.f32 %v1474_v19  ;;  %v5795_v19 = vld [vmem:[#allocation8 + $0x38] sm:$0xff] }
 0x3cd   : > { %v3999_v15 = vpop.eup %3998  ;;  %v1644_v55 = vmul.f32 0.5, %v1580_v28  ;;  %v1590_v51 = vadd.f32 1.0, %v3997_v59  ;;  %4016 = vtanh.f32 %v1480_v37  ;;  %v5792_v28 = vld [vmem:[#allocation8 + $0x20] sm:$0xff] }
 0x3ce   : > { %v1648_v39 = vmul.f32 0.5, %v1584_v60  ;;  %v4001_v61 = vpop.eup %4000  ;;  %v1710_v8 = vmul.f32 %v1646_v10, %v5642_v26  ;;  %v1586_v13 = vadd.f32 1.0, %v3999_v15  ;;  %4018 = vtanh.f32 %v1476_v11 }
 0x3cf   : > { %v4003_v17 = vpop.eup %4002  ;;  %v1592_v23 = vadd.f32 1.0, %v4001_v61  ;;  %v1708_v2 = vmul.f32 %v1644_v55, %v5648_v42  ;;  %v1654_v14 = vmul.f32 0.5, %v1590_v51  ;;  %v5800_v61 = vld [vmem:[#allocation8 + $0x28] sm:$0xff] }
 0x3d0   : > { %v1712_v9 = vmul.f32 %v1648_v39, %v5652_v38  ;;  %v1588_v47 = vadd.f32 1.0, %v4003_v17  ;;  %v1650_v20 = vmul.f32 0.5, %v1586_v13 }
 0x3d1   : > { %v4005_v56 = vpop.eup %4004  ;;  %v1656_v3 = vmul.f32 0.5, %v1592_v23 }
 0x3d2   : > { %v4007_v38 = vpop.eup %4006  ;;  %v1652_v45 = vmul.f32 0.5, %v1588_v47  ;;  %v1714_v55 = vmul.f32 %v1650_v20, %v5669_v40 }
 0x3d3   : > { %v4009_v10 = vpop.eup %4008 }
 0x3d4   : > { %v1600_v51 = vadd.f32 1.0, %v4009_v10 }
 0x42c   : > { %v3518_v16 = vpop.f32.mrb[32].mxu1 }
 0x42d   : > { %v2380_v32 = vmul.f32 %v3518_v16, %v5767_v30  ;;  %v2309_v27 = vpop.f32.mrb[33].mxu1 }
 0x42e   : > { %v2378_v1 = vmul.f32 %v5767_v30, %v2309_v27  ;;  %v3519_v57 = vpop.f32.mrb[34].mxu1  ;;  %v1718_v27 = vmul.f32 %v1654_v14, %v5664_v36  ;;  %v1720_v36 = vmul.f32 %v1656_v3, %v5674_v43  ;;  %v6305_v43 = vld [vmem:[#allocation29_spill] sm:$0xff]  ;;  %v1664_v14 = vmul.f32 0.5, %v1600_v51 }
 0x42f   : > { %v2396_v34 = vadd.f32 %v2380_v32, %v5769_v50  ;;  %v2381_v22 = vmul.f32 %v3519_v57, %v5767_v30  ;;  %v2312_v12 = vpop.f32.mrb[35].mxu1  ;;  %v4011_v32 = vpop.eup %4010 }
 0x430   : > { %v2394_v18 = vadd.f32 %v2378_v1, %v5772_v0  ;;  %v2379_v6 = vmul.f32 %v5767_v30, %v2312_v12  ;;  %v1598_v1 = vadd.f32 1.0, %v4005_v56  ;;  %v4013_v57 = vpop.eup %4012  ;;  %v1596_v13 = vadd.f32 1.0, %v4011_v32 }
 0x431   : > { %v2549_v29 = vmul.f32 %v2396_v34, %v1710_v8  ;;  %v2397_v26 = vadd.f32 %v2381_v22, %v5775_v54  ;;  %v1594_v34 = vadd.f32 1.0, %v4007_v38 }
 0x432   : > { %v2547_v52 = vmul.f32 %v2394_v18, %v1706_v48  ;;  %v2395_v33 = vadd.f32 %v2379_v6, %v5780_v49  ;;  %v1716_v18 = vmul.f32 %v1652_v45, %v5678_v58 }
 0x433   : > { %v2550_v5 = vmul.f32 %v2397_v26, %v1712_v9  ;;  %v5809_v26 = vld [vmem:[#allocation8 + $0x50] sm:$0xff] }
 0x434   : > { %v2548_v53 = vmul.f32 %v2395_v33, %v1708_v2  ;;  %v3522_v63 = vpop.f32.mrb[36].mxu1  ;;  %v4015_v2 = vpop.eup %4014  ;;  %v5813_v33 = vadd.f32 %v6305_v43, %v5634_v44  ;;  %v6308_v43 = vld [vmem:[#allocation32_spill] sm:$0xff] }
 0x435   : > { %v2580_v60 = vpack.c.bf16 %v2550_v5, %v2549_v29  ;;  %v2384_v25 = vmul.f32 %v3522_v63, %v5767_v30  ;;  %v2325_v42 = vpop.f32.mrb[37].mxu1  ;;  %v1662_v29 = vmul.f32 0.5, %v1598_v1  ;;  %v5816_v5 = vld [vmem:[#allocation8 + $0x40] sm:$0xff]  ;;  %v1602_v1 = vadd.f32 1.0, %v4015_v2 }
 0x436   : > { %v2382_v59 = vmul.f32 %v5767_v30, %v2325_v42  ;;  %v3523_v16 = vpop.f32.mrb[38].mxu1  ;;  %v2579_v15 = vpack.c.bf16 %v2548_v53, %v2547_v52  ;;  %v1658_v52 = vmul.f32 0.5, %v1594_v34  ;;  %v4017_v53 = vpop.eup %4016  ;;  %v6306_v63 = vld [vmem:[#allocation31_spill] sm:$0xff]  ;;  %v1660_v42 = vmul.f32 0.5, %v1596_v13 }
 0x437   : > { %v2400_v11 = vadd.f32 %v2384_v25, %v5789_v46  ;;  %v2385_v39 = vmul.f32 %v3523_v16, %v5767_v30  ;;  %v2328_v37 = vpop.f32.mrb[39].mxu1  ;;  %v5820_v20 = vadd.f32 %v6306_v63, %v5634_v44  ;;  %v4019_v10 = vpop.eup %4018 }
 0x438   : > { %v2398_v17 = vadd.f32 %v2382_v59, %v5792_v28  ;;  %v2383_v8 = vmul.f32 %v5767_v30, %v2328_v37  ;;  %3580 = vmatprep.mubr.bf16.mxu1 %v2579_v15  ;;  %v1726_v59 = vmul.f32 %v1662_v29, %v5693_v21  ;;  %v5828_v15 = vld [vmem:[#allocation8 + $0x48] sm:$0xff] }
 0x439   : > { %v2553_v22 = vmul.f32 %v2400_v11, %v1718_v27  ;;  %v2401_v12 = vadd.f32 %v2385_v39, %v5795_v19  ;;  %3581 = vmatmul.mubr.bf16.vlgmr.msra.gmra.mrb[64].mxu1 %v2580_v60  ;;  %v5823_v60 = vld [vmem:[#allocation8 + $0x58] sm:$0xff]  ;;  %v1606_v27 = vadd.f32 1.0, %v4013_v57  ;;  %v1722_v11 = vmul.f32 %v1658_v52, %v5699_v41 }
 0x43a   : > { %v2551_v48 = vmul.f32 %v2398_v17, %v1714_v55  ;;  %v2399_v6 = vadd.f32 %v2383_v8, %v5800_v61  ;;  %v1728_v17 = vmul.f32 %v1664_v14, %v5705_v4  ;;  %v1608_v8 = vadd.f32 1.0, %v4017_v53  ;;  %v5855_v14 = vld [vmem:[#allocation8 + $0x78] sm:$0xff] }
 0x43b   : > { %v2554_v40 = vmul.f32 %v2401_v12, %v1720_v36  ;;  %v1604_v36 = vadd.f32 1.0, %v4019_v10  ;;  %v1226_v41 = vmul.f32 %v5813_v33, %v5813_v33  ;;  %v1670_v51 = vmul.f32 0.5, %v1606_v27  ;;  %v5861_v10 = vld [vmem:[#allocation8 + $0x68] sm:$0xff] }
 0x43c   : > { %v2552_v9 = vmul.f32 %v2399_v6, %v1716_v18  ;;  %v3526_v23 = vpop.f32.mrb[40].mxu1  ;;  %v5843_v6 = vld [vmem:[#allocation8 + $0x70] sm:$0xff]  ;;  %v1672_v52 = vmul.f32 0.5, %v1608_v8  ;;  %v6309_v8 = vld [vmem:[#allocation35_spill] sm:$0xff] }
 0x43d   : > { %v2388_v47 = vmul.f32 %v3526_v23, %v5767_v30  ;;  %v2341_v58 = vpop.f32.mrb[41].mxu1  ;;  %v2582_v56 = vpack.c.bf16 %v2554_v40, %v2553_v22  ;;  %v1724_v22 = vmul.f32 %v1660_v42, %v5710_v24  ;;  %v1666_v40 = vmul.f32 0.5, %v1602_v1 }
 0x43e   : > { %v2386_v38 = vmul.f32 %v5767_v30, %v2341_v58  ;;  %v3527_v25 = vpop.f32.mrb[42].mxu1  ;;  %v2581_v3 = vpack.c.bf16 %v2552_v9, %v2551_v48  ;;  %v6307_v48 = vld [vmem:[#allocation30_spill] sm:$0xff]  ;;  %v1230_v24 = vmul.f32 %v5820_v20, %v5820_v20  ;;  %v5848_v9 = vld [vmem:[#allocation8 + $0x60] sm:$0xff]  ;;  %v1668_v53 = vmul.f32 0.5, %v1604_v36  ;;  %v6310_v36 = vld [vmem:[#allocation33_spill] sm:$0xff] }
 0x43f   : > { %v2404_v16 = vadd.f32 %v2388_v47, %v5809_v26  ;;  %v2389_v45 = vmul.f32 %v3527_v25, %v5767_v30  ;;  %v2344_v32 = vpop.f32.mrb[43].mxu1  ;;  %v5841_v18 = vadd.f32 %v6307_v48, %v5634_v44  ;;  %v5852_v47 = vadd.f32 %v6308_v43, %v5634_v44 }
 0x440   : > { %v2402_v39 = vadd.f32 %v2386_v38, %v5816_v5  ;;  %v2387_v37 = vmul.f32 %v5767_v30, %v2344_v32  ;;  %3584 = vmatprep.mubr.bf16.mxu1 %v2581_v3  ;;  %v1290_v38 = vmul.f32 %v1226_v41, %v5813_v33  ;;  %v1734_v25 = vmul.f32 %v1670_v51, %v5714_v31 }
 0x441   : > { %v2557_v55 = vmul.f32 %v2404_v16, %v1726_v59  ;;  %v2405_v21 = vadd.f32 %v2389_v45, %v5823_v60  ;;  %3585 = vmatmul.mubr.bf16.gmra.mrb[68].mxu1 %v2582_v56  ;;  %v1228_v16 = vmul.f32 %v5841_v18, %v5841_v18  ;;  %v1730_v45 = vmul.f32 %v1666_v40, %v5724_v62  ;;  %v6312_v40 = vld [vmem:[#allocation34_spill] sm:$0xff] }
 0x442   : > { %v2555_v34 = vmul.f32 %v2402_v39, %v1722_v11  ;;  %v2403_v57 = vadd.f32 %v2387_v37, %v5828_v15  ;;  %v1294_v11 = vmul.f32 %v1230_v24, %v5820_v20  ;;  %v1736_v39 = vmul.f32 %v1672_v52, %v5738_v35 }
 0x443   : > { %v2558_v12 = vmul.f32 %v2405_v21, %v1728_v17  ;;  %v1232_v1 = vmul.f32 %v5852_v47, %v5852_v47  ;;  %v1732_v17 = vmul.f32 %v1668_v53, %v5730_v7  ;;  %v1292_v35 = vmul.f32 %v1228_v16, %v5841_v18  ;;  %v6311_v7 = vld [vmem:[#allocation36_spill] sm:$0xff] }
 0x444   : > { %v2556_v4 = vmul.f32 %v2403_v57, %v1724_v22  ;;  %v3530_v13 = vpop.f32.mrb[44].mxu1  ;;  %v1354_v57 = vmul.f32 0.044715, %v1290_v38  ;;  %v5882_v41 = vadd.f32 %v6310_v36, %v5634_v44  ;;  %v1358_v51 = vmul.f32 0.044715, %v1294_v11 }
 0x445   : > { %v2392_v29 = vmul.f32 %v3530_v13, %v5767_v30  ;;  %v2357_v23 = vpop.f32.mrb[45].mxu1  ;;  %v2584_v2 = vpack.c.bf16 %v2558_v12, %v2557_v55  ;;  %v1296_v48 = vmul.f32 %v1232_v1, %v5852_v47  ;;  %v5891_v24 = vadd.f32 %v6312_v40, %v5634_v44  ;;  %v6318_v40 = vld [vmem:[#allocation41_spill] sm:$0xff] }
 0x446   : > { %v2390_v58 = vmul.f32 %v5767_v30, %v2357_v23  ;;  %v3531_v56 = vpop.f32.mrb[46].mxu1  ;;  %v2583_v63 = vpack.c.bf16 %v2556_v4, %v2555_v34  ;;  %v5877_v34 = vadd.f32 %v6309_v8, %v5634_v44  ;;  %v5887_v4 = vadd.f32 %v6311_v7, %v5634_v44  ;;  %v6317_v8 = vld [vmem:[#allocation43_spill] sm:$0xff] }
 0x447   : > { %v2408_v42 = vadd.f32 %v2392_v29, %v5843_v6  ;;  %v2393_v3 = vmul.f32 %v3531_v56, %v5767_v30  ;;  %v2360_v59 = vpop.f32.mrb[47].mxu1  ;;  %v1418_v23 = vadd.f32 %v1354_v57, %v5813_v33  ;;  %v1356_v52 = vmul.f32 0.044715, %v1292_v35 }
 0x448   : > { %v2406_v32 = vadd.f32 %v2390_v58, %v5848_v9  ;;  %v2391_v27 = vmul.f32 %v5767_v30, %v2360_v59  ;;  %3588 = vmatprep.mubr.bf16.mxu1 %v2583_v63  ;;  %v1238_v29 = vmul.f32 %v5877_v34, %v5877_v34  ;;  %v1422_v43 = vadd.f32 %v1358_v51, %v5820_v20  ;;  %v6313_v63 = vld [vmem:[#allocation37_spill] sm:$0xff] }
 0x449   : > { %v2561_v31 = vmul.f32 %v2408_v42, %v1734_v25  ;;  %v2409_v37 = vadd.f32 %v2393_v3, %v5855_v14  ;;  %3589 = vmatmul.mubr.bf16.gmra.mrb[72].mxu1 %v2584_v2  ;;  %v1234_v2 = vmul.f32 %v5882_v41, %v5882_v41  ;;  %v1360_v58 = vmul.f32 0.044715, %v1296_v48  ;;  %v6314_v42 = vld [vmem:[#allocation39_spill] sm:$0xff] }
 0x44a   : > { %v2559_v55 = vmul.f32 %v2406_v32, %v1730_v45  ;;  %v2407_v62 = vadd.f32 %v2391_v27, %v5861_v10  ;;  %v1240_v56 = vmul.f32 %v5887_v4, %v5887_v4  ;;  %v1236_v53 = vmul.f32 %v5891_v24, %v5891_v24  ;;  %v6315_v32 = vld [vmem:[#allocation38_spill] sm:$0xff] }
 0x44b   : > { %v2562_v21 = vmul.f32 %v2409_v37, %v1736_v39  ;;  %v5905_v38 = vadd.f32 %v6313_v63, %v5634_v44  ;;  %v1302_v25 = vmul.f32 %v1238_v29, %v5877_v34  ;;  %v5910_v3 = vadd.f32 %v6314_v42, %v5634_v44  ;;  %v6316_v37 = vld [vmem:[#allocation40_spill] sm:$0xff] }
 0x44c   : > { %v2560_v22 = vmul.f32 %v2407_v62, %v1732_v17  ;;  %v1482_v59 = vmul.f32 0.7978846, %v1418_v23  ;;  %v1420_v16 = vadd.f32 %v1356_v52, %v5841_v18  ;;  %v1298_v45 = vmul.f32 %v1234_v2, %v5882_v41  ;;  %v6319_v23 = vld [vmem:[#allocation42_spill] sm:$0xff] }
 0x44d   : > { %v2586_v12 = vpack.c.bf16 %v2562_v21, %v2561_v31  ;;  %v5916_v27 = vadd.f32 %v6315_v32, %v5634_v44  ;;  %v1486_v11 = vmul.f32 0.7978846, %v1422_v43  ;;  %v1424_v31 = vadd.f32 %v1360_v58, %v5852_v47 }
 0x44e   : > { %v2585_v13 = vpack.c.bf16 %v2560_v22, %v2559_v55  ;;  %v1304_v39 = vmul.f32 %v1240_v56, %v5887_v4  ;;  %v5922_v1 = vadd.f32 %v6316_v37, %v5634_v44  ;;  %v1300_v55 = vmul.f32 %v1236_v53, %v5891_v24  ;;  %v6320_v56 = vld [vmem:[#allocation44_spill] sm:$0xff] }
 0x44f   : > { %v1242_v17 = vmul.f32 %v5905_v38, %v5905_v38  ;;  %v1366_v62 = vmul.f32 0.044715, %v1302_v25  ;;  %v1246_v21 = vmul.f32 %v5910_v3, %v5910_v3  ;;  %v5931_v22 = vadd.f32 %v6317_v8, %v5634_v44 }
 0x450   : > { %3592 = vmatprep.mubr.bf16.mxu1 %v2585_v13  ;;  %4020 = vtanh.f32 %v1482_v59  ;;  %v1484_v57 = vmul.f32 0.7978846, %v1420_v16  ;;  %v1362_v35 = vmul.f32 0.044715, %v1298_v45  ;;  %v1244_v36 = vmul.f32 %v5916_v27, %v5916_v27 }
 0x451   : > { %3593 = vmatmul.mubr.bf16.gmra.mrb[76].mxu1 %v2586_v12  ;;  %4022 = vtanh.f32 %v1486_v11  ;;  %v1488_v12 = vmul.f32 0.7978846, %v1424_v31  ;;  %v1368_v51 = vmul.f32 0.044715, %v1304_v39  ;;  %v1248_v48 = vmul.f32 %v5922_v1, %v5922_v1 }
 0x452   : > { %v1364_v7 = vmul.f32 0.044715, %v1300_v55  ;;  %v1306_v13 = vmul.f32 %v1242_v17, %v5905_v38  ;;  %v5940_v29 = vadd.f32 %v6318_v40, %v5634_v44  ;;  %v5944_v52 = vadd.f32 %v6319_v23, %v5634_v44 }
 0x453   : > { %v1430_v2 = vadd.f32 %v1366_v62, %v5877_v34  ;;  %v1310_v43 = vmul.f32 %v1246_v21, %v5910_v3  ;;  %v1254_v58 = vmul.f32 %v5931_v22, %v5931_v22  ;;  %v5952_v53 = vadd.f32 %v6320_v56, %v5634_v44 }
 0x454   : > { %4024 = vtanh.f32 %v1484_v57  ;;  %v1426_v63 = vadd.f32 %v1362_v35, %v5882_v41  ;;  %v1308_v25 = vmul.f32 %v1244_v36, %v5916_v27  ;;  %v1432_v42 = vadd.f32 %v1368_v51, %v5887_v4 }
 0x455   : > { %4026 = vtanh.f32 %v1488_v12  ;;  %v1312_v59 = vmul.f32 %v1248_v48, %v5922_v1  ;;  %v1428_v16 = vadd.f32 %v1364_v7, %v5891_v24  ;;  %v1370_v45 = vmul.f32 0.044715, %v1306_v13 }
 0x456   : > { %v1250_v32 = vmul.f32 %v5940_v29, %v5940_v29  ;;  %v1252_v44 = vmul.f32 %v5944_v52, %v5944_v52  ;;  %v1494_v11 = vmul.f32 0.7978846, %v1430_v2  ;;  %v1374_v31 = vmul.f32 0.044715, %v1310_v43 }
 0x457   : > { %v1318_v39 = vmul.f32 %v1254_v58, %v5931_v22  ;;  %v1256_v37 = vmul.f32 %v5952_v53, %v5952_v53  ;;  %v1490_v55 = vmul.f32 0.7978846, %v1426_v63  ;;  %v1372_v17 = vmul.f32 0.044715, %v1308_v25 }
 0x458   : > { %v1496_v62 = vmul.f32 0.7978846, %v1432_v42  ;;  %v1376_v21 = vmul.f32 0.044715, %v1312_v59  ;;  %v1492_v57 = vmul.f32 0.7978846, %v1428_v16  ;;  %v1434_v35 = vadd.f32 %v1370_v45, %v5905_v38 }
 0x459   : > { %v1314_v36 = vmul.f32 %v1250_v32, %v5940_v29  ;;  %v1316_v12 = vmul.f32 %v1252_v44, %v5944_v52  ;;  %4028 = vtanh.f32 %v1494_v11  ;;  %v1438_v48 = vadd.f32 %v1374_v31, %v5910_v3 }
 0x45a   : > { %v4021_v8 = vpop.eup %4020  ;;  %v1382_v7 = vmul.f32 0.044715, %v1318_v39  ;;  %v1320_v13 = vmul.f32 %v1256_v37, %v5952_v53  ;;  %4030 = vtanh.f32 %v1490_v55  ;;  %v1436_v40 = vadd.f32 %v1372_v17, %v5916_v27 }
 0x45b   : > { %v4023_v51 = vpop.eup %4022  ;;  %4032 = vtanh.f32 %v1496_v62  ;;  %v1440_v23 = vadd.f32 %v1376_v21, %v5922_v1  ;;  %v1498_v43 = vmul.f32 0.7978846, %v1434_v35  ;;  %v1378_v58 = vmul.f32 0.044715, %v1314_v36 }
 0x45c   : > { %4034 = vtanh.f32 %v1492_v57  ;;  %v1380_v56 = vmul.f32 0.044715, %v1316_v12  ;;  %v1502_v25 = vmul.f32 0.7978846, %v1438_v48  ;;  %v1446_v42 = vadd.f32 %v1382_v7, %v5931_v22 }
 0x45d   : > { %v1384_v59 = vmul.f32 0.044715, %v1320_v13  ;;  %v1500_v16 = vmul.f32 0.7978846, %v1436_v40  ;;  %v1614_v45 = vadd.f32 1.0, %v4023_v51  ;;  %v1610_v44 = vadd.f32 1.0, %v4021_v8 }
 0x45e   : > { %v4025_v2 = vpop.eup %4024  ;;  %v1504_v32 = vmul.f32 0.7978846, %v1440_v23  ;;  %4036 = vtanh.f32 %v1498_v43  ;;  %v1442_v11 = vadd.f32 %v1378_v58, %v5940_v29  ;;  %v1444_v31 = vadd.f32 %v1380_v56, %v5944_v52 }
 0x45f   : > { %v4027_v63 = vpop.eup %4026  ;;  %4038 = vtanh.f32 %v1502_v25  ;;  %v1510_v37 = vmul.f32 0.7978846, %v1446_v42  ;;  %v1448_v55 = vadd.f32 %v1384_v59, %v5952_v53  ;;  %v1612_v17 = vadd.f32 1.0, %v4025_v2 }
 0x460   : > { %v1616_v39 = vadd.f32 1.0, %v4027_v63  ;;  %4040 = vtanh.f32 %v1500_v16  ;;  %v1678_v62 = vmul.f32 0.5, %v1614_v45  ;;  %v1674_v35 = vmul.f32 0.5, %v1610_v44 }
 0x461   : > { %4042 = vtanh.f32 %v1504_v32  ;;  %v1506_v12 = vmul.f32 0.7978846, %v1442_v11  ;;  %v1508_v8 = vmul.f32 0.7978846, %v1444_v31  ;;  %v1512_v40 = vmul.f32 0.7978846, %v1448_v55 }
 0x462   : > { %v1680_v7 = vmul.f32 0.5, %v1616_v39  ;;  %4044 = vtanh.f32 %v1510_v37  ;;  %v1676_v2 = vmul.f32 0.5, %v1612_v17  ;;  %v1742_v56 = vmul.f32 %v1678_v62, %v5820_v20 }
 0x463   : > { %v4029_v21 = vpop.eup %4028  ;;  %v1738_v16 = vmul.f32 %v1674_v35, %v5813_v33  ;;  %4046 = vtanh.f32 %v1506_v12 }
 0x464   : > { %v4031_v36 = vpop.eup %4030  ;;  %v1622_v59 = vadd.f32 1.0, %v4029_v21  ;;  %v1744_v31 = vmul.f32 %v1680_v7, %v5852_v47  ;;  %4048 = vtanh.f32 %v1512_v40 }
 0x465   : > { %v4033_v13 = vpop.eup %4032  ;;  %v1618_v44 = vadd.f32 1.0, %v4031_v36  ;;  %4050 = vtanh.f32 %v1508_v8 }
 0x466   : > { %v4035_v58 = vpop.eup %4034  ;;  %v1624_v37 = vadd.f32 1.0, %v4033_v13  ;;  %v1686_v21 = vmul.f32 0.5, %v1622_v59 }
 0x467   : > { %v1620_v17 = vadd.f32 1.0, %v4035_v58  ;;  %v1682_v36 = vmul.f32 0.5, %v1618_v44 }
 0x468   : > { %v4037_v62 = vpop.eup %4036 }
 0x469   : > { %v1626_v59 = vadd.f32 1.0, %v4037_v62 }
 0x46e   : > { %v3550_v57 = vpop.f32.mrb[48].mxu1 }
 0x46f   : > { %v2517_v51 = vmul.f32 %v3550_v57, %v5767_v30  ;;  %v2452_v48 = vpop.f32.mrb[49].mxu1 }
 0x470   : > { %v2515_v23 = vmul.f32 %v5767_v30, %v2452_v48  ;;  %v3551_v43 = vpop.f32.mrb[50].mxu1  ;;  %v1688_v48 = vmul.f32 0.5, %v1624_v37 }
 0x471   : > { %v2533_v63 = vadd.f32 %v2517_v51, %v5769_v50  ;;  %v2518_v25 = vmul.f32 %v3551_v43, %v5767_v30  ;;  %v2455_v42 = vpop.f32.mrb[51].mxu1  ;;  %v1740_v50 = vmul.f32 %v1676_v2, %v5841_v18  ;;  %v1750_v43 = vmul.f32 %v1686_v21, %v5877_v34 }
 0x472   : > { %v2531_v45 = vadd.f32 %v2515_v23, %v5772_v0  ;;  %v2516_v32 = vmul.f32 %v5767_v30, %v2455_v42  ;;  %v4039_v0 = vpop.eup %4038  ;;  %v1684_v23 = vmul.f32 0.5, %v1620_v17 }
 0x473   : > { %v2565_v11 = vmul.f32 %v2533_v63, %v1742_v56  ;;  %v2534_v39 = vadd.f32 %v2518_v25, %v5775_v54  ;;  %v4041_v51 = vpop.eup %4040  ;;  %v1630_v56 = vadd.f32 1.0, %v4039_v0  ;;  %v1746_v63 = vmul.f32 %v1682_v36, %v5882_v41 }
 0x474   : > { %v2563_v20 = vmul.f32 %v2531_v45, %v1738_v16  ;;  %v2532_v55 = vadd.f32 %v2516_v32, %v5780_v49  ;;  %v4043_v18 = vpop.eup %4042  ;;  %v1752_v45 = vmul.f32 %v1688_v48, %v5887_v4  ;;  %v1748_v44 = vmul.f32 %v1684_v23, %v5891_v24 }
 0x475   : > { %v2566_v33 = vmul.f32 %v2534_v39, %v1744_v31  ;;  %v4045_v8 = vpop.eup %4044  ;;  %v1628_v31 = vadd.f32 1.0, %v4041_v51  ;;  %v1694_v39 = vmul.f32 0.5, %v1630_v56 }
 0x476   : > { %v2564_v57 = vmul.f32 %v2532_v55, %v1740_v50  ;;  %v3554_v35 = vpop.f32.mrb[52].mxu1  ;;  %v4047_v50 = vpop.eup %4046 }
 0x477   : > { %v2521_v54 = vmul.f32 %v3554_v35, %v5767_v30  ;;  %v2468_v47 = vpop.f32.mrb[53].mxu1  ;;  %v2588_v7 = vpack.c.bf16 %v2566_v33, %v2565_v11  ;;  %v1692_v0 = vmul.f32 0.5, %v1628_v31 }
 0x478   : > { %v2519_v49 = vmul.f32 %v5767_v30, %v2468_v47  ;;  %v3555_v13 = vpop.f32.mrb[54].mxu1  ;;  %v2587_v12 = vpack.c.bf16 %v2564_v57, %v2563_v20  ;;  %v1690_v20 = vmul.f32 0.5, %v1626_v59 }
 0x479   : > { %v2537_v40 = vadd.f32 %v2521_v54, %v5789_v46  ;;  %v2522_v2 = vmul.f32 %v3555_v13, %v5767_v30  ;;  %v2471_v58 = vpop.f32.mrb[55].mxu1  ;;  %v1632_v46 = vadd.f32 1.0, %v4043_v18  ;;  %v1638_v54 = vadd.f32 1.0, %v4045_v8 }
 0x47a   : > { %v2535_v25 = vadd.f32 %v2519_v49, %v5792_v28  ;;  %v2520_v42 = vmul.f32 %v5767_v30, %v2471_v58  ;;  %3596 = vmatprep.mubr.bf16.mxu1 %v2587_v12  ;;  %v1754_v47 = vmul.f32 %v1690_v20, %v5905_v38  ;;  %v1634_v18 = vadd.f32 1.0, %v4047_v50 }
 0x47b   : > { %v2569_v16 = vmul.f32 %v2537_v40, %v1750_v43  ;;  %v2538_v34 = vadd.f32 %v2522_v2, %v5795_v19  ;;  %3597 = vmatmul.mubr.bf16.gmra.mrb[80].mxu1 %v2588_v7  ;;  %v1696_v4 = vmul.f32 0.5, %v1632_v46  ;;  %v4049_v19 = vpop.eup %4048  ;;  %v1756_v12 = vmul.f32 %v1692_v0, %v5916_v27 }
 0x47c   : > { %v2567_v32 = vmul.f32 %v2535_v25, %v1746_v63  ;;  %v2536_v11 = vadd.f32 %v2520_v42, %v5800_v61  ;;  %v4051_v57 = vpop.eup %4050  ;;  %v1758_v61 = vmul.f32 %v1694_v39, %v5910_v3  ;;  %v1640_v3 = vadd.f32 1.0, %v4049_v19  ;;  %v4053_v19 = vld [vmem:[%s4646_s5 + $0x10] sm:$0xff] }
 0x47d   : > { %v2570_v41 = vmul.f32 %v2538_v34, %v1752_v45  ;;  %v1760_v13 = vmul.f32 %v1696_v4, %v5922_v1  ;;  %v1636_v40 = vadd.f32 1.0, %v4051_v57  ;;  %v1702_v2 = vmul.f32 0.5, %v1638_v54 }
 0x47e   : > { %v2568_v28 = vmul.f32 %v2536_v11, %v1748_v44  ;;  %v3558_v37 = vpop.f32.mrb[56].mxu1  ;;  %v1698_v56 = vmul.f32 0.5, %v1634_v18  ;;  %v1704_v25 = vmul.f32 0.5, %v1640_v3 }
 0x47f   : > { %v2525_v55 = vmul.f32 %v3558_v37, %v5767_v30  ;;  %v2484_v17 = vpop.f32.mrb[57].mxu1  ;;  %v2590_v62 = vpack.c.bf16 %v2570_v41, %v2569_v16  ;;  %v1700_v59 = vmul.f32 0.5, %v1636_v40  ;;  %v1766_v27 = vmul.f32 %v1702_v2, %v5931_v22 }
 0x480   : > { %v2523_v33 = vmul.f32 %v5767_v30, %v2484_v17  ;;  %v3559_v21 = vpop.f32.mrb[58].mxu1  ;;  %v2589_v24 = vpack.c.bf16 %v2568_v28, %v2567_v32  ;;  %v1762_v46 = vmul.f32 %v1698_v56, %v5940_v29  ;;  %v1768_v31 = vmul.f32 %v1704_v25, %v5952_v53 }
 0x481   : > { %v2541_v35 = vadd.f32 %v2525_v55, %v5809_v26  ;;  %v2526_v36 = vmul.f32 %v3559_v21, %v5767_v30  ;;  %v2487_v51 = vpop.f32.mrb[59].mxu1  ;;  %v1764_v22 = vmul.f32 %v1700_v59, %v5944_v52  ;;  %v4054_v21 = vld [vmem:[%s4646_s5 + $0x18] sm:$0xff] }
 0x482   : > { %v2539_v48 = vadd.f32 %v2523_v33, %v5816_v5  ;;  %v2524_v7 = vmul.f32 %v5767_v30, %v2487_v51  ;;  %3600 = vmatprep.mubr.bf16.mxu1 %v2589_v24  ;;  %v4055_v24 = vld [vmem:[%s4646_s5] sm:$0xff] }
 0x483   : > { %v2573_v49 = vmul.f32 %v2541_v35, %v1758_v61  ;;  %v2542_v23 = vadd.f32 %v2526_v36, %v5823_v60  ;;  %3601 = vmatmul.mubr.bf16.gmra.mrb[84].mxu1 %v2590_v62  ;;  %v4056_v61 = vld [vmem:[%s4646_s5 + $0x8] sm:$0xff] }
 0x484   : > { %v2571_v26 = vmul.f32 %v2539_v48, %v1754_v47  ;;  %v2540_v43 = vadd.f32 %v2524_v7, %v5828_v15 }
 0x485   : > { %v2574_v38 = vmul.f32 %v2542_v23, %v1760_v13  ;;  %v6321_v23 = vmov 0  }
 0x486   : > { %v2572_v5 = vmul.f32 %v2540_v43, %v1756_v12  ;;  %v3562_v58 = vpop.f32.mrb[60].mxu1  ;;  %v4058_v43 = vld [vmem:[%s4646_s5 + $0x38] sm:$0xff] }
 0x487   : > { %v2529_v8 = vmul.f32 %v3562_v58, %v5767_v30  ;;  %v2500_v63 = vpop.f32.mrb[61].mxu1  ;;  %v2592_v1 = vpack.c.bf16 %v2574_v38, %v2573_v49  ;;  %v4059_v38 = vld [vmem:[%s4646_s5 + $0x20] sm:$0xff] }
 0x488   : > { %v2527_v60 = vmul.f32 %v5767_v30, %v2500_v63  ;;  %v3563_v42 = vpop.f32.mrb[62].mxu1  ;;  %v2591_v16 = vpack.c.bf16 %v2572_v5, %v2571_v26  ;;  %v4057_v26 = vld [vmem:[%s4646_s5 + $0x30] sm:$0xff]  ;;  %v4060_v5 = vld [vmem:[%s4646_s5 + $0x28] sm:$0xff] }
 0x489   : > { %v2545_v15 = vadd.f32 %v2529_v8, %v5843_v6  ;;  %v2530_v45 = vmul.f32 %v3563_v42, %v5767_v30  ;;  %v2503_v34 = vpop.f32.mrb[63].mxu1 }
 0x48a   : > { %v2543_v32 = vadd.f32 %v2527_v60, %v5848_v9  ;;  %v2528_v44 = vmul.f32 %v5767_v30, %v2503_v34  ;;  %3604 = vmatprep.mubr.bf16.mxu1 %v2591_v16  ;;  %v3793_v30 = vld [vmem:[#allocation11 + $0x70] ss:$8 sps:$4 sm:$0xff]   ;;  %v3795_v9 = vld [vmem:[#allocation11 + $0x74] ss:$8 sps:$4 sm:$0xff]  }
 0x48b   : > { %v2577_v11 = vmul.f32 %v2545_v15, %v1766_v27  ;;  %v2546_v41 = vadd.f32 %v2530_v45, %v5855_v14  ;;  %3605 = vmatmul.mubr.bf16.gmra.mrb[88].mxu1 %v2592_v1  ;;  %2985 = vmatprep.subr.bf16.mxu0 %v3795_v9  ;;  %v6028_v14 = vld [vmem:[%s6234_s7] ss:$0 sm:$0xff]  ;;  %v4061_v15 = vld [vmem:[%s4646_s5 + $0x50] sm:$0xff]  ;;  %v4062_v34 = vld [vmem:[%s4646_s5 + $0x58] sm:$0xff] }
 0x48c   : > { %v2575_v39 = vmul.f32 %v2543_v32, %v1762_v46  ;;  %v2544_v6 = vadd.f32 %v2528_v44, %v5861_v10  ;;  %2986 = vmatpush1.bf16.msra.mxu0 %v3793_v30  ;;  %v4063_v32 = vld [vmem:[%s4646_s5 + $0x40] sm:$0xff] }
 0x48d   : > { %v2578_v28 = vmul.f32 %v2546_v41, %v1768_v31 }
 0x48e   : > { %v2576_v37 = vmul.f32 %v2544_v6, %v1764_v22 }
 0x48f   : > { %v2594_v20 = vpack.c.bf16 %v2578_v28, %v2577_v11  ;;  %v4064_v11 = vld [vmem:[%s4646_s5 + $0x48] sm:$0xff] }
 0x490   : > { %v2593_v29 = vpack.c.bf16 %v2576_v37, %v2575_v39 }
 0x492   : > { %3608 = vmatprep.mubr.bf16.mxu1 %v2593_v29 }
 0x493   : > { %3609 = vmatmul.mubr.bf16.gmra.mrb[92].mxu1 %v2594_v20 }
 0x50c   : > { %v3582_v10 = vpop.f32.mrb[64].mxu1 }
 0x50d   : > { %v2709_v52 = vadd.f32 %v3582_v10, %v6028_v14  ;;  %v2700_v53 = vpop.f32.mrb[65].mxu1  ;;  %v4065_v10 = vld [vmem:[%s4646_s5 + $0x70] sm:$0xff] }
 0x50e   : > { %v2701_v50 = vadd.f32 %v6028_v14, %v2700_v53  ;;  %v3583_v55 = vpop.f32.mrb[66].mxu1  ;;  %v4066_v53 = vld [vmem:[%s4646_s5 + $0x78] sm:$0xff] }
 0x50f   : > { %v2712_v17 = vadd.f32 %v3583_v55, %v6028_v14  ;;  %v2703_v4 = vpop.f32.mrb[67].mxu1  ;;  %v2829_v33 = vadd.f32 %v4053_v19, %v2709_v52  ;;  %v4067_v55 = vld [vmem:[%s4646_s5 + $0x60] sm:$0xff] }
 0x510   : > { %v2704_v62 = vadd.f32 %v6028_v14, %v2703_v4  ;;  %v2827_v57 = vadd.f32 %v4055_v24, %v2701_v50  ;;  %v4068_v4 = vld [vmem:[%s4646_s5 + $0x68] sm:$0xff] }
 0x511   : > { %v2830_v0 = vadd.f32 %v4054_v21, %v2712_v17 }
 0x512   : > { %v2828_v35 = vadd.f32 %v4056_v61, %v2704_v62 }
 0x513   : > { %v2860_v36 = vpack.c.bf16 %v2830_v0, %v2829_v33 }
 0x514   : > { %v2859_v51 = vpack.c.bf16 %v2828_v35, %v2827_v57  ;;  %v3586_v54 = vpop.f32.mrb[68].mxu1 }
 0x515   : > { %v2725_v47 = vadd.f32 %v3586_v54, %v6028_v14  ;;  %v2716_v48 = vpop.f32.mrb[69].mxu1  ;;  %v4069_v54 = vld [vmem:[%s4646_s5 + $0x90] sm:$0xff] }
 0x516   : > { %v2717_v7 = vadd.f32 %v6028_v14, %v2716_v48  ;;  %v3587_v18 = vpop.f32.mrb[70].mxu1  ;;  %3004 = vmatmul.mubr.bf16.vlgmr.msra.gmra.mrb[32].mxu0 %v2859_v51  ;;  %v4070_v48 = vld [vmem:[%s4646_s5 + $0x98] sm:$0xff] }
 0x517   : > { %v2728_v49 = vadd.f32 %v3587_v18, %v6028_v14  ;;  %v2719_v13 = vpop.f32.mrb[71].mxu1  ;;  %3013 = vmatprep.mubr.bf16.mxu0 %v6321_v23  ;;  %v2833_v12 = vadd.f32 %v4057_v26, %v2725_v47  ;;  %v4071_v18 = vld [vmem:[%s4646_s5 + $0x80] sm:$0xff] }
 0x518   : > { %v2720_v3 = vadd.f32 %v6028_v14, %v2719_v13  ;;  %v2831_v2 = vadd.f32 %v4059_v38, %v2717_v7  ;;  %v4072_v13 = vld [vmem:[%s4646_s5 + $0x88] sm:$0xff] }
 0x519   : > { %v2834_v40 = vadd.f32 %v4058_v43, %v2728_v49 }
 0x51a   : > { %v2832_v58 = vadd.f32 %v4060_v5, %v2720_v3 }
 0x51b   : > { %v2862_v56 = vpack.c.bf16 %v2834_v40, %v2833_v12 }
 0x51c   : > { %v3590_v8 = vpop.f32.mrb[72].mxu1  ;;  %v2861_v63 = vpack.c.bf16 %v2832_v58, %v2831_v2 }
 0x51d   : > { %v2741_v25 = vadd.f32 %v3590_v8, %v6028_v14  ;;  %v2732_v1 = vpop.f32.mrb[73].mxu1 }
 0x51e   : > { %v2733_v60 = vadd.f32 %v6028_v14, %v2732_v1  ;;  %v3591_v42 = vpop.f32.mrb[74].mxu1  ;;  %3014 = vmatmul.mubr.bf16.gmra.mrb[36].mxu0 %v2860_v36  ;;  %v4074_v1 = vld [vmem:[%s4646_s5 + $0xb8] sm:$0xff] }
 0x51f   : > { %v2744_v59 = vadd.f32 %v3591_v42, %v6028_v14  ;;  %v2735_v16 = vpop.f32.mrb[75].mxu1  ;;  %3023 = vmatprep.mubr.bf16.mxu0 %v6321_v23  ;;  %v2837_v45 = vadd.f32 %v4061_v15, %v2741_v25  ;;  %v4075_v42 = vld [vmem:[%s4646_s5 + $0xa0] sm:$0xff] }
 0x520   : > { %v2736_v27 = vadd.f32 %v6028_v14, %v2735_v16  ;;  %v2835_v44 = vadd.f32 %v4063_v32, %v2733_v60  ;;  %v4076_v16 = vld [vmem:[%s4646_s5 + $0xa8] sm:$0xff] }
 0x521   : > { %v2838_v46 = vadd.f32 %v4062_v34, %v2744_v59 }
 0x522   : > { %v2836_v31 = vadd.f32 %v4064_v11, %v2736_v27 }
 0x523   : > { %v2864_v41 = vpack.c.bf16 %v2838_v46, %v2837_v45 }
 0x524   : > { %v3594_v39 = vpop.f32.mrb[76].mxu1  ;;  %v2863_v22 = vpack.c.bf16 %v2836_v31, %v2835_v44 }
 0x525   : > { %v2757_v6 = vadd.f32 %v3594_v39, %v6028_v14  ;;  %v2748_v28 = vpop.f32.mrb[77].mxu1 }
 0x526   : > { %v2749_v37 = vadd.f32 %v6028_v14, %v2748_v28  ;;  %v3595_v20 = vpop.f32.mrb[78].mxu1  ;;  %3024 = vmatmul.mubr.bf16.gmra.mrb[40].mxu0 %v2861_v63  ;;  %v4073_v63 = vld [vmem:[%s4646_s5 + $0xb0] sm:$0xff]  ;;  %v4078_v28 = vld [vmem:[%s4646_s5 + $0xd8] sm:$0xff] }
 0x527   : > { %v2760_v29 = vadd.f32 %v3595_v20, %v6028_v14  ;;  %v2751_v30 = vpop.f32.mrb[79].mxu1  ;;  %3033 = vmatprep.mubr.bf16.mxu0 %v6321_v23  ;;  %v2841_v52 = vadd.f32 %v4065_v10, %v2757_v6  ;;  %v4079_v20 = vld [vmem:[%s4646_s5 + $0xc0] sm:$0xff] }
 0x528   : > { %v2752_v9 = vadd.f32 %v6028_v14, %v2751_v30  ;;  %v2839_v17 = vadd.f32 %v4067_v55, %v2749_v37  ;;  %v4080_v30 = vld [vmem:[%s4646_s5 + $0xc8] sm:$0xff] }
 0x529   : > { %v2842_v50 = vadd.f32 %v4066_v53, %v2760_v29 }
 0x52a   : > { %v2840_v62 = vadd.f32 %v4068_v4, %v2752_v9 }
 0x52b   : > { %v2866_v19 = vpack.c.bf16 %v2842_v50, %v2841_v52 }
 0x52c   : > { %v2865_v33 = vpack.c.bf16 %v2840_v62, %v2839_v17 }
 0x52e   : > { %3034 = vmatmul.mubr.bf16.gmra.mrb[44].mxu0 %v2862_v56 }
 0x52f   : > { %3043 = vmatprep.mubr.bf16.mxu0 %v6321_v23 }
 0x536   : > { %3044 = vmatmul.mubr.bf16.gmra.mrb[48].mxu0 %v2863_v22  ;;  %v4077_v22 = vld [vmem:[%s4646_s5 + $0xd0] sm:$0xff] }
 0x537   : > { %3053 = vmatprep.mubr.bf16.mxu0 %v6321_v23 }
 0x53e   : > { %3054 = vmatmul.mubr.bf16.gmra.mrb[52].mxu0 %v2864_v41 }
 0x53f   : > { %3063 = vmatprep.mubr.bf16.mxu0 %v6321_v23 }
 0x546   : > { %3064 = vmatmul.mubr.bf16.gmra.mrb[56].mxu0 %v2865_v33 }
 0x547   : > { %3073 = vmatprep.mubr.bf16.mxu0 %v6321_v23 }
 0x54e   : > { %v3598_v21 = vpop.f32.mrb[80].mxu1  ;;  %3074 = vmatmul.mubr.bf16.gmra.mrb[60].mxu0 %v2866_v19 }
 0x54f   : > { %v2773_v0 = vadd.f32 %v3598_v21, %v6028_v14  ;;  %v2764_v24 = vpop.f32.mrb[81].mxu1  ;;  %3083 = vmatprep.mubr.bf16.mxu0 %v6321_v23  ;;  %v4081_v21 = vld [vmem:[%s4646_s5 + $0xf0] sm:$0xff] }
 0x550   : > { %v2765_v57 = vadd.f32 %v6028_v14, %v2764_v24  ;;  %v3599_v61 = vpop.f32.mrb[82].mxu1  ;;  %v4082_v24 = vld [vmem:[%s4646_s5 + $0xf8] sm:$0xff] }
 0x551   : > { %v2776_v35 = vadd.f32 %v3599_v61, %v6028_v14  ;;  %v2767_v36 = vpop.f32.mrb[83].mxu1  ;;  %v2845_v47 = vadd.f32 %v4069_v54, %v2773_v0  ;;  %v4083_v61 = vld [vmem:[%s4646_s5 + $0xe0] sm:$0xff] }
 0x552   : > { %v2768_v51 = vadd.f32 %v6028_v14, %v2767_v36  ;;  %v2843_v49 = vadd.f32 %v4071_v18, %v2765_v57  ;;  %v4084_v36 = vld [vmem:[%s4646_s5 + $0xe8] sm:$0xff] }
 0x553   : > { %v2846_v7 = vadd.f32 %v4070_v48, %v2776_v35 }
 0x554   : > { %v2844_v3 = vadd.f32 %v4072_v13, %v2768_v51 }
 0x555   : > { %v2868_v26 = vpack.c.bf16 %v2846_v7, %v2845_v47 }
 0x556   : > { %v3602_v12 = vpop.f32.mrb[84].mxu1  ;;  %v2867_v43 = vpack.c.bf16 %v2844_v3, %v2843_v49 }
 0x557   : > { %v2789_v40 = vadd.f32 %v3602_v12, %v6028_v14  ;;  %v2780_v38 = vpop.f32.mrb[85].mxu1 }
 0x558   : > { %v2781_v2 = vadd.f32 %v6028_v14, %v2780_v38  ;;  %v3603_v5 = vpop.f32.mrb[86].mxu1  ;;  %3084 = vmatmul.mubr.bf16.gmra.mrb[64].mxu0 %v2867_v43 }
 0x559   : > { %v2792_v58 = vadd.f32 %v3603_v5, %v6028_v14  ;;  %v2783_v56 = vpop.f32.mrb[87].mxu1  ;;  %3093 = vmatprep.mubr.bf16.mxu0 %v6321_v23  ;;  %v2849_v25 = vadd.f32 %v4073_v63, %v2789_v40 }
 0x55a   : > { %v2784_v8 = vadd.f32 %v6028_v14, %v2783_v56  ;;  %v2847_v59 = vadd.f32 %v4075_v42, %v2781_v2 }
 0x55b   : > { %v2850_v60 = vadd.f32 %v4074_v1, %v2792_v58 }
 0x55c   : > { %v2848_v27 = vadd.f32 %v4076_v16, %v2784_v8 }
 0x55d   : > { %v2870_v15 = vpack.c.bf16 %v2850_v60, %v2849_v25 }
 0x55e   : > { %v3606_v45 = vpop.f32.mrb[88].mxu1  ;;  %v2869_v34 = vpack.c.bf16 %v2848_v27, %v2847_v59 }
 0x55f   : > { %v2805_v46 = vadd.f32 %v3606_v45, %v6028_v14  ;;  %v2796_v32 = vpop.f32.mrb[89].mxu1 }
 0x560   : > { %v2797_v44 = vadd.f32 %v6028_v14, %v2796_v32  ;;  %v3607_v11 = vpop.f32.mrb[90].mxu1  ;;  %3094 = vmatmul.mubr.bf16.gmra.mrb[68].mxu0 %v2868_v26 }
 0x561   : > { %v2808_v31 = vadd.f32 %v3607_v11, %v6028_v14  ;;  %v2799_v41 = vpop.f32.mrb[91].mxu1  ;;  %3103 = vmatprep.mubr.bf16.mxu0 %v6321_v23  ;;  %v2853_v6 = vadd.f32 %v4077_v22, %v2805_v46 }
 0x562   : > { %v2800_v39 = vadd.f32 %v6028_v14, %v2799_v41  ;;  %v2851_v29 = vadd.f32 %v4079_v20, %v2797_v44 }
 0x563   : > { %v2854_v37 = vadd.f32 %v4078_v28, %v2808_v31 }
 0x564   : > { %v2852_v9 = vadd.f32 %v4080_v30, %v2800_v39 }
 0x565   : > { %v2872_v10 = vpack.c.bf16 %v2854_v37, %v2853_v6 }
 0x566   : > { %v3610_v52 = vpop.f32.mrb[92].mxu1  ;;  %v2871_v53 = vpack.c.bf16 %v2852_v9, %v2851_v29 }
 0x567   : > { %v2821_v50 = vadd.f32 %v3610_v52, %v6028_v14  ;;  %v2812_v55 = vpop.f32.mrb[93].mxu1 }
 0x568   : > { %v2813_v17 = vadd.f32 %v6028_v14, %v2812_v55  ;;  %v3611_v4 = vpop.f32.mrb[94].mxu1  ;;  %3104 = vmatmul.mubr.bf16.gmra.mrb[72].mxu0 %v2869_v34 }
 0x569   : > { %v2824_v62 = vadd.f32 %v3611_v4, %v6028_v14  ;;  %v2815_v19 = vpop.f32.mrb[95].mxu1  ;;  %3113 = vmatprep.mubr.bf16.mxu0 %v6321_v23  ;;  %v2857_v0 = vadd.f32 %v4081_v21, %v2821_v50 }
 0x56a   : > { %v2816_v33 = vadd.f32 %v6028_v14, %v2815_v19  ;;  %v2855_v35 = vadd.f32 %v4083_v61, %v2813_v17 }
 0x56b   : > { %v2858_v57 = vadd.f32 %v4082_v24, %v2824_v62 }
 0x56c   : > { %v2856_v51 = vadd.f32 %v4084_v36, %v2816_v33 }
 0x56d   : > { %v2874_v54 = vpack.c.bf16 %v2858_v57, %v2857_v0 }
 0x56e   : > { %v2873_v47 = vpack.c.bf16 %v2856_v51, %v2855_v35 }
 0x570   : > { %3114 = vmatmul.mubr.bf16.gmra.mrb[76].mxu0 %v2870_v15 }
 0x571   : > { %3123 = vmatprep.mubr.bf16.mxu0 %v6321_v23 }
 0x578   : > { %3124 = vmatmul.mubr.bf16.gmra.mrb[80].mxu0 %v2871_v53 }
 0x579   : > { %3133 = vmatprep.mubr.bf16.mxu0 %v6321_v23 }
 0x580   : > { %3134 = vmatmul.mubr.bf16.gmra.mrb[84].mxu0 %v2872_v10 }
 0x581   : > { %3143 = vmatprep.mubr.bf16.mxu0 %v6321_v23 }
 0x588   : > { %3144 = vmatmul.mubr.bf16.gmra.mrb[88].mxu0 %v2873_v47 }
 0x589   : > { %3153 = vmatprep.mubr.bf16.mxu0 %v6321_v23 }
 0x590   : > { %3154 = vmatmul.mubr.bf16.gmra.mrb[92].mxu0 %v2874_v54 }
 0x5e9   : > { %v3005_v14 = vpop.f32.mrb[32].mxu0 }
 0x5ea   : > { %3164 = vst [vmem:[%s6110_s24] sm:$0xff] %v3005_v14  ;;  %v3007_v48 = vpop.f32.mrb[33].mxu0 }
 0x5eb   : > { %3165 = vst [vmem:[%s6110_s24 + $0x8] sm:$0xff] %v3007_v48  ;;  %v3009_v7 = vpop.f32.mrb[34].mxu0 }
 0x5ec   : > { %3166 = vst [vmem:[%s6110_s24 + $0x10] sm:$0xff] %v3009_v7  ;;  %v3011_v23 = vpop.f32.mrb[35].mxu0 }
 0x5ed   : > { %3167 = vst [vmem:[%s6110_s24 + $0x18] sm:$0xff] %v3011_v23 }
 0x5f1   : > { %v3015_v18 = vpop.f32.mrb[36].mxu0 }
 0x5f2   : > { %3168 = vst [vmem:[%s6110_s24 + $0x20] sm:$0xff] %v3015_v18  ;;  %v3017_v49 = vpop.f32.mrb[37].mxu0 }
 0x5f3   : > { %3169 = vst [vmem:[%s6110_s24 + $0x28] sm:$0xff] %v3017_v49  ;;  %v3019_v13 = vpop.f32.mrb[38].mxu0 }
 0x5f4   : > { %3170 = vst [vmem:[%s6110_s24 + $0x30] sm:$0xff] %v3019_v13  ;;  %v3021_v3 = vpop.f32.mrb[39].mxu0 }
 0x5f5   : > { %3171 = vst [vmem:[%s6110_s24 + $0x38] sm:$0xff] %v3021_v3 }
 0x5f9   : > { %v3025_v26 = vpop.f32.mrb[40].mxu0 }
 0x5fa   : > { %3172 = vst [vmem:[%s6110_s24 + $0x40] sm:$0xff] %v3025_v26  ;;  %v3027_v12 = vpop.f32.mrb[41].mxu0 }
 0x5fb   : > { %3173 = vst [vmem:[%s6110_s24 + $0x48] sm:$0xff] %v3027_v12  ;;  %v3029_v43 = vpop.f32.mrb[42].mxu0 }
 0x5fc   : > { %3174 = vst [vmem:[%s6110_s24 + $0x50] sm:$0xff] %v3029_v43  ;;  %v3031_v40 = vpop.f32.mrb[43].mxu0 }
 0x5fd   : > { %3175 = vst [vmem:[%s6110_s24 + $0x58] sm:$0xff] %v3031_v40 }
 0x601   : > { %v3035_v38 = vpop.f32.mrb[44].mxu0 }
 0x602   : > { %3176 = vst [vmem:[%s6110_s24 + $0x60] sm:$0xff] %v3035_v38  ;;  %v3037_v2 = vpop.f32.mrb[45].mxu0 }
 0x603   : > { %3177 = vst [vmem:[%s6110_s24 + $0x68] sm:$0xff] %v3037_v2  ;;  %v3039_v5 = vpop.f32.mrb[46].mxu0 }
 0x604   : > { %3178 = vst [vmem:[%s6110_s24 + $0x70] sm:$0xff] %v3039_v5  ;;  %v3041_v58 = vpop.f32.mrb[47].mxu0 }
 0x605   : > { %3179 = vst [vmem:[%s6110_s24 + $0x78] sm:$0xff] %v3041_v58 }
 0x609   : > { %v3045_v56 = vpop.f32.mrb[48].mxu0 }
 0x60a   : > { %3180 = vst [vmem:[%s6110_s24 + $0x80] sm:$0xff] %v3045_v56  ;;  %v3047_v8 = vpop.f32.mrb[49].mxu0 }
 0x60b   : > { %3181 = vst [vmem:[%s6110_s24 + $0x88] sm:$0xff] %v3047_v8  ;;  %v3049_v63 = vpop.f32.mrb[50].mxu0 }
 0x60c   : > { %3182 = vst [vmem:[%s6110_s24 + $0x90] sm:$0xff] %v3049_v63  ;;  %v3051_v25 = vpop.f32.mrb[51].mxu0 }
 0x60d   : > { %3183 = vst [vmem:[%s6110_s24 + $0x98] sm:$0xff] %v3051_v25 }
 0x611   : > { %v3055_v1 = vpop.f32.mrb[52].mxu0 }
 0x612   : > { %3184 = vst [vmem:[%s6110_s24 + $0xa0] sm:$0xff] %v3055_v1  ;;  %v3057_v60 = vpop.f32.mrb[53].mxu0 }
 0x613   : > { %3185 = vst [vmem:[%s6110_s24 + $0xa8] sm:$0xff] %v3057_v60  ;;  %v3059_v42 = vpop.f32.mrb[54].mxu0 }
 0x614   : > { %3186 = vst [vmem:[%s6110_s24 + $0xb0] sm:$0xff] %v3059_v42  ;;  %v3061_v59 = vpop.f32.mrb[55].mxu0 }
 0x615   : > { %3187 = vst [vmem:[%s6110_s24 + $0xb8] sm:$0xff] %v3061_v59 }
 0x619   : > { %v3065_v16 = vpop.f32.mrb[56].mxu0 }
 0x61a   : > { %3188 = vst [vmem:[%s6110_s24 + $0xc0] sm:$0xff] %v3065_v16  ;;  %v3067_v27 = vpop.f32.mrb[57].mxu0 }
 0x61b   : > { %3189 = vst [vmem:[%s6110_s24 + $0xc8] sm:$0xff] %v3067_v27  ;;  %v3069_v15 = vpop.f32.mrb[58].mxu0 }
 0x61c   : > { %3190 = vst [vmem:[%s6110_s24 + $0xd0] sm:$0xff] %v3069_v15  ;;  %v3071_v45 = vpop.f32.mrb[59].mxu0 }
 0x61d   : > { %3191 = vst [vmem:[%s6110_s24 + $0xd8] sm:$0xff] %v3071_v45 }
 0x621   : > { %v3075_v34 = vpop.f32.mrb[60].mxu0 }
 0x622   : > { %3192 = vst [vmem:[%s6110_s24 + $0xe0] sm:$0xff] %v3075_v34  ;;  %v3077_v46 = vpop.f32.mrb[61].mxu0 }
 0x623   : > { %3193 = vst [vmem:[%s6110_s24 + $0xe8] sm:$0xff] %v3077_v46  ;;  %v3079_v32 = vpop.f32.mrb[62].mxu0 }
 0x624   : > { %3194 = vst [vmem:[%s6110_s24 + $0xf0] sm:$0xff] %v3079_v32  ;;  %v3081_v44 = vpop.f32.mrb[63].mxu0 }
 0x625   : > { %3195 = vst [vmem:[%s6110_s24 + $0xf8] sm:$0xff] %v3081_v44 }
 0x62b   : > { %v3085_v11 = vpop.f32.mrb[64].mxu0 }
 0x62c   : > { %3196 = vst [vmem:[%s6110_s24 + $0x100] sm:$0xff] %v3085_v11  ;;  %v3087_v31 = vpop.f32.mrb[65].mxu0 }
 0x62d   : > { %3197 = vst [vmem:[%s6110_s24 + $0x108] sm:$0xff] %v3087_v31  ;;  %v3089_v41 = vpop.f32.mrb[66].mxu0 }
 0x62e   : > { %3198 = vst [vmem:[%s6110_s24 + $0x110] sm:$0xff] %v3089_v41  ;;  %v3091_v39 = vpop.f32.mrb[67].mxu0 }
 0x62f   : > { %3199 = vst [vmem:[%s6110_s24 + $0x118] sm:$0xff] %v3091_v39 }
 0x633   : > { %v3095_v22 = vpop.f32.mrb[68].mxu0 }
 0x634   : > { %3200 = vst [vmem:[%s6110_s24 + $0x120] sm:$0xff] %v3095_v22  ;;  %v3097_v6 = vpop.f32.mrb[69].mxu0 }
 0x635   : > { %3201 = vst [vmem:[%s6110_s24 + $0x128] sm:$0xff] %v3097_v6  ;;  %v3099_v28 = vpop.f32.mrb[70].mxu0 }
 0x636   : > { %3202 = vst [vmem:[%s6110_s24 + $0x130] sm:$0xff] %v3099_v28  ;;  %v3101_v37 = vpop.f32.mrb[71].mxu0 }
 0x637   : > { %3203 = vst [vmem:[%s6110_s24 + $0x138] sm:$0xff] %v3101_v37 }
 0x63b   : > { %v3105_v20 = vpop.f32.mrb[72].mxu0 }
 0x63c   : > { %3204 = vst [vmem:[%s6110_s24 + $0x140] sm:$0xff] %v3105_v20  ;;  %v3107_v29 = vpop.f32.mrb[73].mxu0 }
 0x63d   : > { %3205 = vst [vmem:[%s6110_s24 + $0x148] sm:$0xff] %v3107_v29  ;;  %v3109_v30 = vpop.f32.mrb[74].mxu0 }
 0x63e   : > { %3206 = vst [vmem:[%s6110_s24 + $0x150] sm:$0xff] %v3109_v30  ;;  %v3111_v9 = vpop.f32.mrb[75].mxu0 }
 0x63f   : > { %3207 = vst [vmem:[%s6110_s24 + $0x158] sm:$0xff] %v3111_v9 }
 0x643   : > { %v3115_v10 = vpop.f32.mrb[76].mxu0 }
 0x644   : > { %3208 = vst [vmem:[%s6110_s24 + $0x160] sm:$0xff] %v3115_v10  ;;  %v3117_v52 = vpop.f32.mrb[77].mxu0 }
 0x645   : > { %3209 = vst [vmem:[%s6110_s24 + $0x168] sm:$0xff] %v3117_v52  ;;  %v3119_v53 = vpop.f32.mrb[78].mxu0 }
 0x646   : > { %3210 = vst [vmem:[%s6110_s24 + $0x170] sm:$0xff] %v3119_v53  ;;  %v3121_v50 = vpop.f32.mrb[79].mxu0 }
 0x647   : > { %3211 = vst [vmem:[%s6110_s24 + $0x178] sm:$0xff] %v3121_v50 }
 0x64b   : > { %v3125_v55 = vpop.f32.mrb[80].mxu0 }
 0x64c   : > { %3212 = vst [vmem:[%s6110_s24 + $0x180] sm:$0xff] %v3125_v55  ;;  %v3127_v17 = vpop.f32.mrb[81].mxu0 }
 0x64d   : > { %3213 = vst [vmem:[%s6110_s24 + $0x188] sm:$0xff] %v3127_v17  ;;  %v3129_v4 = vpop.f32.mrb[82].mxu0 }
 0x64e   : > { %3214 = vst [vmem:[%s6110_s24 + $0x190] sm:$0xff] %v3129_v4  ;;  %v3131_v62 = vpop.f32.mrb[83].mxu0 }
 0x64f   : > { %3215 = vst [vmem:[%s6110_s24 + $0x198] sm:$0xff] %v3131_v62 }
 0x653   : > { %v3135_v19 = vpop.f32.mrb[84].mxu0 }
 0x654   : > { %3216 = vst [vmem:[%s6110_s24 + $0x1a0] sm:$0xff] %v3135_v19  ;;  %v3137_v33 = vpop.f32.mrb[85].mxu0 }
 0x655   : > { %3217 = vst [vmem:[%s6110_s24 + $0x1a8] sm:$0xff] %v3137_v33  ;;  %v3139_v21 = vpop.f32.mrb[86].mxu0 }
 0x656   : > { %3218 = vst [vmem:[%s6110_s24 + $0x1b0] sm:$0xff] %v3139_v21  ;;  %v3141_v0 = vpop.f32.mrb[87].mxu0 }
 0x657   : > { %3219 = vst [vmem:[%s6110_s24 + $0x1b8] sm:$0xff] %v3141_v0 }
 0x65b   : > { %v3145_v24 = vpop.f32.mrb[88].mxu0 }
 0x65c   : > { %3220 = vst [vmem:[%s6110_s24 + $0x1c0] sm:$0xff] %v3145_v24  ;;  %v3147_v57 = vpop.f32.mrb[89].mxu0 }
 0x65d   : > { %3221 = vst [vmem:[%s6110_s24 + $0x1c8] sm:$0xff] %v3147_v57  ;;  %v3149_v61 = vpop.f32.mrb[90].mxu0 }
 0x65e   : > { %3222 = vst [vmem:[%s6110_s24 + $0x1d0] sm:$0xff] %v3149_v61  ;;  %v3151_v35 = vpop.f32.mrb[91].mxu0 }
 0x65f   : > { %3223 = vst [vmem:[%s6110_s24 + $0x1d8] sm:$0xff] %v3151_v35 }
 0x663   : > { %v3155_v36 = vpop.f32.mrb[92].mxu0 }
 0x664   : > { %3224 = vst [vmem:[%s6110_s24 + $0x1e0] sm:$0xff] %v3155_v36  ;;  %v3157_v51 = vpop.f32.mrb[93].mxu0 }
 0x665   : > { %3225 = vst [vmem:[%s6110_s24 + $0x1e8] sm:$0xff] %v3157_v51  ;;  %v3159_v54 = vpop.f32.mrb[94].mxu0 }
 0x666   : > { %3226 = vst [vmem:[%s6110_s24 + $0x1f0] sm:$0xff] %v3159_v54  ;;  %v3161_v47 = vpop.f32.mrb[95].mxu0 }
 0x667   : > { %3227 = vst [vmem:[%s6110_s24 + $0x1f8] sm:$0xff] %v3161_v47 }
 0x668   : > { %4268 = shalt.err (!%p4265_p8)
}
 0x669   : > { %s4269_s19 = scalar_lea.hbm %s6178_s14, 8192  ;;  %s4273_s24 = scalar_lea.hbm %s6322_s16, 16384 }
 0x66a   : > { %p4270_p6 = scmp.ne.s32.totalorder %s6178_s14, %s4269_s19  ;;  %p4274_p0 = scmp.lt.u32.totalorder %s6178_s14, %s6322_s16 }
 0x66b   : > { %p4275_p5 = scmp.lt.u32.totalorder %s4273_s24, %s4269_s19  ;;  %p4277_p7 = scmp.lt.u32.totalorder %s4269_s19, %s6178_s14 }
 0x66c   : > { %p4271_p10 = pnand %p4270_p6, %p6323_p4 }
 0x66d   : > { %p4276_p9 = por %p4275_p5, %p4274_p0 }
 0x66e   : > { %p4272_p11 = pneg %p4271_p10 }
 0x66f   : > { %p4278_p12 = por %p4277_p7, %p4276_p9 }
 0x671   : > { %p4279_p13 = pnand %p4278_p12, %p4272_p11 }
 0x673   : > { %4282 = shalt.err (!%p4279_p13)
}
 0x674   : > { %s4347_s5 = smov 256   ;;  %s4348_s9 = smov 16  }
 0x675   : > { %3650 = dma.vmem_to_hbm [thread:$0]  (%p6323_p4), %s6180_s26, 8192, %s6178_s14, %s3229_s15, %s4347_s5, %s4347_s5, %s4348_s9  }
 0x676 PF: > { %s3258_s1 = sand.u32 1, %s4321_s30   ;;  %p6324_p1 = scmp.ne.s32.totalorder %s6260_s22, 0 }
 0x677   : > { %p6325_p3 = scmp.ge.s32.totalorder %s4333_s12, 2  ;;  %s3259_s13 = scalar_lea.sflag [#allocation4], %s3258_s1 }
 0x679   : > { %p3673_p2 = pnand %p6325_p3, %p6324_p1 }
 0x67b   : > { %4316 = dma.done.wait (!%p3673_p2), %s3259_s13, 8192  }
 0x67c   : > { %4318 = vsyncadd (!%p3673_p2), %s3259_s13, 4294959104  ;;  %p25_p8 = scmp.ge.s32.totalorder %s4566_s27, 4   ;;  %s6326_s30 = smov %s4325_s10 }
 0x67d   : > { %s6327_s10 = smov %s4329_s11  ;;  %s6328_s11 = smov %s4578_s20 }
 0x67e   : > { %s6329_s12 = smov %s4566_s27  ;;  %27 = sbr.rel (!%p25_p8) target bundleno = 12 (0xc), region = 121 }
 0x685   :  { %3264 = vsyncpa [#allocation3], 1 }
 0x686   :  { %3266 = vsyncpa [#allocation3 + $0x1], 1 }
 0x687   :  { %3267 = vsyncpa [#allocation6], 1 }
 0x688   :  { %3268 = vsyncpa [#allocation9], 1 }
 0x689   :  { %3269 = vsyncpa [#allocation12], 1 }
 0x68a   :  { %3270 = vsyncpa [#allocation4], 1 }
 0x68b   :  { %3272 = vsyncpa [#allocation4 + $0x1], 1 }

// kernel: tpu_custom_call.1
= control target key start
LH: loop header
LB: loop body
LE: loop exit
PB: predicated region body
PF: predicated region fallthrough
CT: control target
= control target key end

     0   :  { %s6227_s0 = inlined_call_operand.hbm [shape: f32[4,128,128], index: 0, kind: input, shape index: {}]   ;;  %s6228_s1 = inlined_call_operand.hbm [shape: bf16[128,256], index: 1, kind: input, shape index: {}]   ;;  %s6229_s2 = inlined_call_operand.vmem [shape: f32[1,256], index: 2, kind: input, shape index: {}]   ;;  %s6230_s3 = inlined_call_operand.vmem [shape: f32[1,128], index: 3, kind: input, shape index: {}]   ;;  %s6231_s4 = inlined_call_operand.hbm [shape: bf16[128,128], index: 4, kind: input, shape index: {}]   ;;  %s6232_s5 = inlined_call_operand.hbm [shape: f32[128,128], index: 5, kind: input, shape index: {}]   ;;  %s6233_s6 = inlined_call_operand.hbm [shape: bf16[128,128], index: 6, kind: input, shape index: {}]   ;;  %s6234_s7 = inlined_call_operand.vmem [shape: f32[1,128], index: 7, kind: input, shape index: {}]   ;;  %s6235_s8 = inlined_call_operand.hbm [shape: bf16[128,256], index: 8, kind: input, shape index: {}]   ;;  %s6236_s9 = inlined_call_operand.hbm [shape: f32[4,128,256], index: 9, kind: output, shape index: {}]  }
   0x1   :  { %6247 = sst [smem:[#allocation45_spill]] %s6228_s1 }
   0x2   :  { %6248 = sst [smem:[#allocation46_spill]] %s6232_s5 }
   0x3   :  { %6249 = sst [smem:[#allocation47_spill]] %s6236_s9 }
   0x4   :  { %14 = vsyncpa [#allocation3], 0 }
   0x5   :  { %16 = vsyncpa [#allocation3 + $0x1], 0 }
   0x6   :  { %17 = vsyncpa [#allocation6], 0 }
   0x7   :  { %18 = vsyncpa [#allocation9], 0 }
   0x8   :  { %19 = vsyncpa [#allocation12], 0 }
   0x9   :  { %20 = vsyncpa [#allocation4], 0 }
   0xa   :  { %22 = vsyncpa [#allocation4 + $0x1], 0  ;;  %s4399_s30 = smov 0   ;;  %s4401_s10 = smov 0  }
   0xb   :  { %s4403_s11 = smov 0   ;;  %s4405_s12 = smov 0  }
   0xc LB: > { %s4335_s13 = smov [#allocation5]   ;;  %s4420_s15 = sadd.s32 4294967295, %s4333_s12   ;;  %s4333_s12 = sphi %s4405_s12, %s6329_s12   ;;  %s4329_s11 = sphi %s4403_s11, %s6328_s11   ;;  %s4325_s10 = sphi %s4401_s10, %s6327_s10   ;;  %s4321_s30 = sphi %s4399_s30, %s6326_s30  }
   0xd   : > { %s265_s14 = sshll.u32 %s4335_s13, 4  ;;  %p3365_p0 = scmp.ge.s32.totalorder %s4333_s12, 1  ;;  %s4425_s14 = int_to_ptr.vmem [resolvable:$true] %s265_s14 }
   0xe   : > { %p6242_p1 = scmp.eq.s32.totalorder %s4420_s15, 0  ;;  %p253_p2 = scmp.lt.s32.totalorder %s4333_s12, 3 }
   0xf   : > { %s4336_s17 = smov [#allocation8]   ;;  %s4337_s20 = smov [#allocation7]  }
  0x10   : > { %p4427_p3 = pnand %p3365_p0, %p253_p2  ;;  %s297_s18 = sshll.u32 %s4336_s17, 4  ;;  %s4440_s18 = int_to_ptr.vmem [resolvable:$true] %s297_s18 }
  0x11   : > { %s284_s21 = sshll.u32 %s4337_s20, 4  ;;  %s6252_s1 = sld [smem:[#allocation45_spill]]  ;;  %s4442_s21 = int_to_ptr.vmem [resolvable:$true] %s284_s21 }
  0x12   : > { %s6250_s16 = scalar_select %p4427_p3, 1, 0 }
  0x13   : > { %p3652_p5 = pneg %p4427_p3 }
  0x15   : > { %p4436_p6 = pnand %p3652_p5, %p6242_p1 }
  0x17   : > { %s4085_s24 = scalar_lea.hbm %s6252_s1, 2048  ;;  %p4452_p8 = pneg %p4436_p6 }
  0x18   : > { %p4086_p7 = scmp.ne.s32.totalorder %s6252_s1, %s4085_s24  ;;  %p4092_p11 = scmp.lt.u32.totalorder %s4085_s24, %s6252_s1 }
  0x1a   : > { %p4088_p9 = pnand %p4452_p8, %p4086_p7 }
  0x1c   : > { %p4089_p10 = pneg %p4088_p9 }
  0x1e   : > { %p4094_p12 = pnand %p4092_p11, %p4089_p10 }
  0x20   : > { %4097 = shalt.err (!%p4094_p12)
}
  0x21   : > { %s4098_s13 = scalar_lea.vmem %s4425_s14, 2048  ;;  %p4106_p5 = scmp.lt.s32.totalorder %s4425_s14, %s4425_s14 }
  0x22   : > { %p4099_p13 = scmp.ne.s32.totalorder %s4425_s14, %s4098_s13  ;;  %p4107_p4 = scmp.lt.s32.totalorder %s4098_s13, %s4098_s13 }
  0x24   : > { %p4101_p0 = pnand %p4099_p13, %p4452_p8  ;;  %p4108_p7 = por %p4107_p4, %p4106_p5 }
  0x26   : > { %p4102_p2 = pneg %p4101_p0 }
  0x28   : > { %p4109_p9 = pnand %p4108_p7, %p4102_p2 }
  0x2a   : > { %4112 = shalt.err (!%p4109_p9)
}
  0x2b   : > { %s6238_s17 = smov 128   ;;  %s6240_s20 = smov 8  }
  0x2c   : > { %3655 = dma.hbm_to_vmem [thread:$0]  (!%p4436_p6), %s6252_s1, 2048, %s4425_s14, [#allocation6], %s6238_s17, %s6238_s17, %s6240_s20  }
  0x2d   : > { %s6254_s5 = sld [smem:[#allocation46_spill]] }
  0x33   : > { %s4113_s26 = scalar_lea.hbm %s6254_s5, 2048 }
  0x34   : > { %p4114_p4 = scmp.ne.s32.totalorder %s6254_s5, %s4113_s26  ;;  %p4120_p12 = scmp.lt.u32.totalorder %s4113_s26, %s6254_s5 }
  0x36   : > { %p4116_p10 = pnand %p4114_p4, %p4452_p8 }
  0x38   : > { %p4117_p11 = pneg %p4116_p10 }
  0x3a   : > { %p4122_p13 = pnand %p4120_p12, %p4117_p11 }
  0x3c   : > { %4125 = shalt.err (!%p4122_p13)
}
  0x3d   : > { %s4126_s14 = scalar_lea.vmem %s4440_s18, 2048  ;;  %p4134_p7 = scmp.lt.s32.totalorder %s4440_s18, %s4440_s18 }
  0x3e   : > { %p4127_p0 = scmp.ne.s32.totalorder %s4440_s18, %s4126_s14  ;;  %p4135_p9 = scmp.lt.s32.totalorder %s4126_s14, %s4126_s14 }
  0x40   : > { %p4129_p2 = pnand %p4127_p0, %p4452_p8  ;;  %p4136_p4 = por %p4135_p9, %p4134_p7 }
  0x42   : > { %p4130_p5 = pneg %p4129_p2 }
  0x44   : > { %p4137_p10 = pnand %p4136_p4, %p4130_p5 }
  0x46   : > { %4140 = shalt.err (!%p4137_p10)
}
  0x47   : > { %3661 = dma.hbm_to_vmem [thread:$0]  (!%p4436_p6), %s6254_s5, 2048, %s4440_s18, [#allocation9], %s6238_s17, %s6238_s17, %s6240_s20  }
  0x48   : > { %s4141_s25 = scalar_lea.hbm %s6231_s4, 1024 }
  0x49   : > { %p4142_p11 = scmp.ne.s32.totalorder %s6231_s4, %s4141_s25  ;;  %p4148_p0 = scmp.lt.u32.totalorder %s4141_s25, %s6231_s4 }
  0x4b   : > { %p4144_p12 = pnand %p4142_p11, %p4452_p8 }
  0x4d   : > { %p4145_p13 = pneg %p4144_p12 }
  0x4f   : > { %p4150_p2 = pnand %p4148_p0, %p4145_p13 }
  0x51   : > { %4153 = shalt.err (!%p4150_p2)
}
  0x52   : > { %s4154_s18 = scalar_lea.vmem %s4442_s21, 1024  ;;  %p4162_p4 = scmp.lt.s32.totalorder %s4442_s21, %s4442_s21 }
  0x53   : > { %p4155_p5 = scmp.ne.s32.totalorder %s4442_s21, %s4154_s18  ;;  %p4163_p10 = scmp.lt.s32.totalorder %s4154_s18, %s4154_s18 }
  0x55   : > { %p4157_p7 = pnand %p4155_p5, %p4452_p8  ;;  %p4164_p11 = por %p4163_p10, %p4162_p4 }
  0x57   : > { %p4158_p9 = pneg %p4157_p7 }
  0x59   : > { %p4165_p12 = pnand %p4164_p11, %p4158_p9 }
  0x5b   : > { %4168 = shalt.err (!%p4165_p12)
}
  0x5c   : > { %s4340_s14 = smov 64   ;;  %s4341_s9 = smov 4  }
  0x5d   : > { %3658 = dma.hbm_to_vmem [thread:$0]  (!%p4436_p6), %s6231_s4, 1024, %s4442_s21, [#allocation6], %s4340_s14, %s4340_s14, %s4341_s9  }
  0x5e   : > { %s4342_s24 = smov [#allocation10]   ;;  %s4343_s26 = smov [#allocation11]  }
  0x5f   : > { %s310_s25 = sshll.u32 %s4342_s24, 4  ;;  %s326_s28 = sshll.u32 %s4343_s26, 4  ;;  %s311_s25 = int_to_ptr.vmem [resolvable:$true] %s310_s25  ;;  %s327_s28 = int_to_ptr.vmem [resolvable:$true] %s326_s28 }
  0x60   : > { %s4169_s18 = scalar_lea.hbm %s6233_s6, 1024 }
  0x61   : > { %p4170_p13 = scmp.ne.s32.totalorder %s6233_s6, %s4169_s18  ;;  %p4176_p5 = scmp.lt.u32.totalorder %s4169_s18, %s6233_s6 }
  0x63   : > { %p4172_p0 = pnand %p4170_p13, %p4452_p8 }
  0x65   : > { %p4173_p2 = pneg %p4172_p0 }
  0x67   : > { %p4178_p7 = pnand %p4176_p5, %p4173_p2 }
  0x69   : > { %4181 = shalt.err (!%p4178_p7)
}
  0x6a   : > { %s4182_s21 = scalar_lea.vmem %s311_s25, 1024  ;;  %p4190_p11 = scmp.lt.s32.totalorder %s311_s25, %s311_s25 }
  0x6b   : > { %p4183_p9 = scmp.ne.s32.totalorder %s311_s25, %s4182_s21  ;;  %p4191_p12 = scmp.lt.s32.totalorder %s4182_s21, %s4182_s21 }
  0x6d   : > { %p4185_p4 = pnand %p4183_p9, %p4452_p8  ;;  %p4192_p1 = por %p4191_p12, %p4190_p11 }
  0x6f   : > { %p4186_p10 = pneg %p4185_p4 }
  0x71   : > { %p4193_p3 = pnand %p4192_p1, %p4186_p10 }
  0x73   : > { %4196 = shalt.err (!%p4193_p3)
}
  0x74   : > { %3664 = dma.hbm_to_vmem [thread:$0]  (!%p4436_p6), %s6233_s6, 1024, %s311_s25, [#allocation9], %s4340_s14, %s4340_s14, %s4341_s9  }
  0x75   : > { %s4197_s22 = scalar_lea.hbm %s6235_s8, 2048 }
  0x76   : > { %p4198_p13 = scmp.ne.s32.totalorder %s6235_s8, %s4197_s22  ;;  %p4204_p3 = scmp.lt.u32.totalorder %s4197_s22, %s6235_s8 }
  0x78   : > { %p4200_p0 = pnand %p4198_p13, %p4452_p8 }
  0x7a   : > { %p4201_p1 = pneg %p4200_p0 }
  0x7c   : > { %p4206_p2 = pnand %p4204_p3, %p4201_p1 }
  0x7e   : > { %4209 = shalt.err (!%p4206_p2)
}
  0x7f   : > { %s4210_s13 = scalar_lea.vmem %s327_s28, 2048  ;;  %p4218_p4 = scmp.lt.s32.totalorder %s327_s28, %s327_s28 }
  0x80   : > { %p4211_p5 = scmp.ne.s32.totalorder %s327_s28, %s4210_s13  ;;  %p4219_p10 = scmp.lt.s32.totalorder %s4210_s13, %s4210_s13 }
  0x82   : > { %p4213_p7 = pnand %p4211_p5, %p4452_p8  ;;  %p4220_p11 = por %p4219_p10, %p4218_p4 }
  0x84   : > { %p4214_p9 = pneg %p4213_p7 }
  0x86   : > { %p4221_p12 = pnand %p4220_p11, %p4214_p9 }
  0x88   : > { %4224 = shalt.err (!%p4221_p12)
}
  0x89   : > { %s6255_s14 = smov 8   ;;  %s6256_s9 = smov 128  }
  0x8a   : > { %3667 = dma.hbm_to_vmem [thread:$0]  (!%p4436_p6), %s6235_s8, 2048, %s327_s28, [#allocation12], %s6256_s9, %s6256_s9, %s6255_s14  }
  0x8b   : > { %s3364_s19 = sadd.s32 4294967294, %s4333_s12   ;;  %s4566_s27 = sadd.s32 1, %s4333_s12  }
  0x8c   : > { %s35_s21 = sadd.s32 1, %s4329_s11  ;;  %s32_s17 = ssub.s32 %s4333_s12, %s4566_s27 }
  0x8d   : > { %p42_p8 = scmp.ne.s32.totalorder %s4329_s11, %s4325_s10  ;;  %p33_p13 = scmp.eq.s32.totalorder %s32_s17, 0 }
  0x8e   : > { %p43_p0 = scmp.eq.s32.totalorder %s4333_s12, 0  ;;  %p48_p1 = scmp.ne.s32.totalorder %s4325_s10, %s4321_s30 }
  0x8f   : > { %p240_p3 = scmp.eq.s32.totalorder %s4420_s15, 1  ;;  %p6257_p5 = scmp.eq.s32.totalorder %s4420_s15, 0 }
  0x90   : > { %s4578_s20 = scalar_select %p33_p13, %s4329_s11, %s35_s21  }
  0x91   : > { %p44_p2 = por %p43_p0, %p42_p8  ;;  %p4582_p7 = por %p6257_p5, %p48_p1 }
  0x92   : > { %p4586_p6 = por %p240_p3, %p42_p8  ;;  %p246_p9 = scmp.eq.s32.totalorder %s3364_s19, 1 }
  0x93   : > { %p3681_p4 = scmp.lt.s32.totalorder %s4333_s12, 2  ;;  %s340_s5 = sand.u32 1, %s4329_s11  }
  0x94   : > { %s6259_s28 = scalar_select %p4586_p6, 1, 0 }
  0x95   : > { %p4592_p10 = por %p246_p9, %p48_p1  ;;  %s3372_s23 = sshll.u32 %s340_s5, 8 }
  0x96   : > { %s3441_s24 = sshll.u32 %s4333_s12, 12  ;;  %s344_s25 = scalar_lea.vmem [#allocation2], %s3372_s23 }
  0x97   : > { %s6260_s22 = scalar_select %p4592_p10, 1, 0 }
  0x98   : > { %s4600_s13 = scalar_lea.hbm %s6227_s0, %s3441_s24  ;;  %s352_s18 = sshll.u32 %s344_s25, 4  ;;  %s4606_s18 = int_to_ptr.vmem [resolvable:$true] %s352_s18 }
  0x99   : > { %p4602_p11 = pnand %p3681_p4, %p44_p2  ;;  %s4608_s21 = scalar_lea.sflag [#allocation3], %s340_s5 }
  0x9a   : > { %s4225_s17 = scalar_lea.hbm %s4600_s13, 4096  ;;  %s4230_s26 = scalar_lea.hbm %s6227_s0, 8192 }
  0x9b   : > { %p4226_p12 = scmp.ne.s32.totalorder %s4600_s13, %s4225_s17  ;;  %p4227_p8 = pneg %p4602_p11 }
  0x9c   : > { %p4231_p1 = scmp.lt.u32.totalorder %s4600_s13, %s6227_s0  ;;  %p4232_p3 = scmp.lt.u32.totalorder %s4230_s26, %s4225_s17 }
  0x9d   : > { %p4228_p13 = pnand %p4227_p8, %p4226_p12  ;;  %p4234_p5 = scmp.lt.u32.totalorder %s4225_s17, %s4600_s13 }
  0x9e   : > { %p4233_p2 = por %p4232_p3, %p4231_p1 }
  0x9f   : > { %p4229_p0 = pneg %p4228_p13 }
  0xa0   : > { %p4235_p9 = por %p4234_p5, %p4233_p2 }
  0xa2   : > { %p4236_p4 = pnand %p4235_p9, %p4229_p0 }
  0xa4   : > { %4239 = shalt.err (!%p4236_p4)
}
  0xa5   : > { %s4240_s5 = scalar_lea.vmem %s4606_s18, 4096  ;;  %s4344_s23 = smov [#allocation2]  }
  0xa6   : > { %p4241_p12 = scmp.ne.s32.totalorder %s4606_s18, %s4240_s5  ;;  %s4245_s24 = sshll.u32 %s4344_s23, 4  ;;  %s4246_s24 = int_to_ptr.vmem [resolvable:$false] %s4245_s24 }
  0xa7   : > { %s4247_s29 = scalar_lea.vmem %s4246_s24, 8192  ;;  %p4248_p6 = scmp.lt.s32.totalorder %s4606_s18, %s4246_s24 }
  0xa8   : > { %p4243_p13 = pnand %p4241_p12, %p4227_p8  ;;  %p4249_p1 = scmp.lt.s32.totalorder %s4247_s29, %s4240_s5 }
  0xaa   : > { %p4244_p10 = pneg %p4243_p13  ;;  %p4250_p3 = por %p4249_p1, %p4248_p6 }
  0xac   : > { %p4251_p2 = pnand %p4250_p3, %p4244_p10 }
  0xae   : > { %4254 = shalt.err (!%p4251_p2)
}
  0xaf   : > { %3671 = dma.hbm_to_vmem [thread:$0]  (!%p4602_p11), %s4600_s13, 4096, %s4606_s18, %s4608_s21, %s6256_s9, %s6256_s9, %s6255_s14  }
  0xb0   : > { %p6262_p8 = scmp.ne.s32.totalorder %s6250_s16, 0 }
  0xb2   : > { %364 = sbr.rel (%p6262_p8) target bundleno = 1654 (0x676), region = 56 }
  0xb9   : > { %s4642_s17 = sand.u32 1, %s4325_s10  }
  0xba   : > { %s3377_s26 = sshll.u32 %s4642_s17, 8  ;;  %s367_s25 = scalar_lea.sflag [#allocation3], %s4642_s17 }
  0xbb   : > { %s4646_s5 = scalar_lea.vmem [#allocation2], %s3377_s26 }
  0xbc   : > { %4300 = dma.done.wait (%p4582_p7), %s367_s25, 4096  }
  0xbd   : > { %4302 = vsyncadd (%p4582_p7), %s367_s25, 4294963200  ;;  %p6263_p6 = scmp.eq.s32.totalorder %s4420_s15, 0 }
  0xbf   : > { %4304 = dma.done.wait (%p6263_p6), [#allocation6], 3072   ;;  %p6264_p10 = pmov %p6263_p6 }
  0xc0   : > { %p6265_p11 = pmov %p6263_p6 }
  0xc1   : > { %4306 = vsyncadd (%p6264_p10), [#allocation6], 4294964224 }
  0xc2   : > { %4308 = dma.done.wait (%p6265_p11), [#allocation9], 3072   ;;  %p6266_p0 = pmov %p6263_p6 }
  0xc4   : > { %4310 = vsyncadd (%p6266_p0), [#allocation9], 4294964224  ;;  %p6267_p5 = pmov %p6266_p0 }
  0xc5   : > { %p6268_p9 = pmov %p6266_p0 }
  0xc6   : > { %4312 = dma.done.wait (%p6267_p5), [#allocation12], 2048  }
  0xc7   : > { %4314 = vsyncadd (%p6268_p9), [#allocation12], 4294965248  ;;  %v4665_v0 = vld [vmem:[%s4646_s5] sm:$0xff]  ;;  %v4668_v1 = vld [vmem:[%s4646_s5 + $0x8] sm:$0xff]  ;;  %v6245_v39 = vmov 0   ;;  %s3383_s23 = sshll.u32 %s4642_s17, 9 }
  0xc8   : > { %460 = vadd.xlane.f32.xlu0 %v4665_v0  ;;  %v557_v2 = vmul.f32 %v4665_v0, %v4665_v0  ;;  %v558_v3 = vmul.f32 %v4668_v1, %v4668_v1  ;;  %v4677_v4 = vld [vmem:[%s4646_s5 + $0x10] sm:$0xff]  ;;  %v4680_v5 = vld [vmem:[%s4646_s5 + $0x18] sm:$0xff]  ;;  %v3732_v8 = vld [vmem:[#allocation5 + $0x4] ss:$8 sps:$4 sm:$0xff]   ;;  %1033 = vmatprep.mubr.bf16.mxu0 %v6245_v39  ;;  %s6110_s24 = scalar_lea.vmem [#allocation13], %s3383_s23  ;;  %s3443_s29 = sshll.u32 %s4420_s15, 13 }
  0xc9   : > { %v559_v6 = vmul.f32 %v4677_v4, %v4677_v4  ;;  %v560_v7 = vmul.f32 %v4680_v5, %v4680_v5  ;;  %v3734_v9 = vld [vmem:[#allocation5] ss:$8 sps:$4 sm:$0xff]   ;;  %v3735_v11 = vld [vmem:[#allocation5 + $0x14] ss:$8 sps:$4 sm:$0xff]   ;;  %1001 = vmatprep.subr.bf16.mxu0 %v3732_v8  ;;  %v3737_v12 = vld [vmem:[#allocation5 + $0x10] ss:$8 sps:$4 sm:$0xff]   ;;  %3612 = vmatprep.subr.bf16.mxu1 %v3732_v8 }
  0xca   : > { %589 = vadd.xlane.f32.xlu1 %v557_v2  ;;  %v4689_v10 = vld [vmem:[%s4646_s5 + $0x20] sm:$0xff]  ;;  %v4692_v13 = vld [vmem:[%s4646_s5 + $0x28] sm:$0xff]  ;;  %1002 = vmatpush1.bf16.msra.mxu0 %v3734_v9  ;;  %v4701_v18 = vld [vmem:[%s4646_s5 + $0x30] sm:$0xff]  ;;  %s3243_s26 = sshll.u32 %s6110_s24, 4  ;;  %s6322_s16 = sld [smem:[#allocation47_spill]]  ;;  %s6180_s26 = int_to_ptr.vmem [resolvable:$true] %s3243_s26 }
  0xcb   : > { %1003 = vmatprep.subr.bf16.mxu0 %v3735_v11  ;;  %v3738_v14 = vld [vmem:[#allocation5 + $0x24] ss:$8 sps:$4 sm:$0xff]   ;;  %3620 = vmatpush1.bf16.msra.mxu1 %v3734_v9  ;;  %v561_v15 = vmul.f32 %v4689_v10, %v4689_v10  ;;  %v3740_v16 = vld [vmem:[#allocation5 + $0x20] ss:$8 sps:$4 sm:$0xff]   ;;  %v562_v17 = vmul.f32 %v4692_v13, %v4692_v13  ;;  %v3741_v19 = vld [vmem:[#allocation5 + $0x34] ss:$8 sps:$4 sm:$0xff]   ;;  %v563_v23 = vmul.f32 %v4701_v18, %v4701_v18 }
  0xcc   : > { %462 = vadd.xlane.f32.xlu0 %v4668_v1  ;;  %3613 = vmatprep.subr.bf16.mxu1 %v3735_v11  ;;  %v3743_v20 = vld [vmem:[#allocation5 + $0x30] ss:$8 sps:$4 sm:$0xff]   ;;  %v3744_v22 = vld [vmem:[#allocation5 + $0x44] ss:$8 sps:$4 sm:$0xff]   ;;  %v3746_v24 = vld [vmem:[#allocation5 + $0x40] ss:$8 sps:$4 sm:$0xff]  }
  0xcd   : > { %v4704_v21 = vld [vmem:[%s4646_s5 + $0x38] sm:$0xff]  ;;  %v4713_v26 = vld [vmem:[%s4646_s5 + $0x40] sm:$0xff]  ;;  %v4716_v29 = vld [vmem:[%s4646_s5 + $0x48] sm:$0xff]  ;;  %1113 = vmatprep.mubr.bf16.mxu1 %v6245_v39  ;;  %s3229_s15 = scalar_lea.sflag [#allocation4], %s4642_s17  ;;  %s4255_s9 = scalar_lea.vmem %s6180_s26, 8192 }
  0xce   : > { %591 = vadd.xlane.f32.xlu1 %v558_v3  ;;  %1004 = vmatpush1.bf16.msra.mxu0 %v3737_v12  ;;  %v564_v25 = vmul.f32 %v4704_v21, %v4704_v21  ;;  %v3747_v27 = vld [vmem:[#allocation5 + $0x54] ss:$8 sps:$4 sm:$0xff]   ;;  %v3749_v28 = vld [vmem:[#allocation5 + $0x50] ss:$8 sps:$4 sm:$0xff]   ;;  %v565_v30 = vmul.f32 %v4713_v26, %v4713_v26  ;;  %v3750_v31 = vld [vmem:[#allocation5 + $0x64] ss:$8 sps:$4 sm:$0xff]   ;;  %v566_v33 = vmul.f32 %v4716_v29, %v4716_v29  ;;  %p4256_p7 = scmp.ne.s32.totalorder %s6180_s26, %s4255_s9 }
  0xcf   : > { %1005 = vmatprep.subr.bf16.mxu0 %v3738_v14  ;;  %3621 = vmatpush1.bf16.msra.mxu1 %v3737_v12  ;;  %v3752_v32 = vld [vmem:[#allocation5 + $0x60] ss:$8 sps:$4 sm:$0xff]   ;;  %v3753_v34 = vld [vmem:[#allocation5 + $0x74] ss:$8 sps:$4 sm:$0xff]   ;;  %v3755_v36 = vld [vmem:[#allocation5 + $0x70] ss:$8 sps:$4 sm:$0xff]  }
  0xd0   : > { %464 = vadd.xlane.f32.xlu0 %v4677_v4  ;;  %3614 = vmatprep.subr.bf16.mxu1 %v3738_v14  ;;  %v4725_v35 = vld [vmem:[%s4646_s5 + $0x50] sm:$0xff]  ;;  %v4728_v37 = vld [vmem:[%s4646_s5 + $0x58] sm:$0xff]  ;;  %v4739_v41 = vld [vmem:[%s4646_s5 + $0x60] sm:$0xff]  ;;  %s6178_s14 = scalar_lea.hbm %s6322_s16, %s3443_s29  ;;  %p6323_p4 = scmp.ne.s32.totalorder %s6259_s28, 0 }
  0xd1   : > { %v567_v38 = vmul.f32 %v4725_v35, %v4725_v35  ;;  %v568_v40 = vmul.f32 %v4728_v37, %v4728_v37  ;;  %v4742_v42 = vld [vmem:[%s4646_s5 + $0x68] sm:$0xff]  ;;  %v569_v43 = vmul.f32 %v4739_v41, %v4739_v41  ;;  %v4751_v45 = vld [vmem:[%s4646_s5 + $0x70] sm:$0xff]  ;;  %v4754_v46 = vld [vmem:[%s4646_s5 + $0x78] sm:$0xff]  ;;  %s4346_s1 = smov [#allocation13]  }
  0xd2   : > { %466 = vadd.xlane.f32.xlu1 %v4680_v5  ;;  %1006 = vmatpush1.bf16.msra.mxu0 %v3740_v16  ;;  %v570_v44 = vmul.f32 %v4742_v42, %v4742_v42  ;;  %v571_v47 = vmul.f32 %v4751_v45, %v4751_v45  ;;  %v572_v48 = vmul.f32 %v4754_v46, %v4754_v46  ;;  %v4763_v49 = vld [vmem:[%s4646_s5 + $0x80] sm:$0xff]  ;;  %v4766_v50 = vld [vmem:[%s4646_s5 + $0x88] sm:$0xff]  ;;  %v4775_v53 = vld [vmem:[%s4646_s5 + $0x90] sm:$0xff]  ;;  %p4257_p12 = pnand %p4256_p7, %p6323_p4  ;;  %s4259_s13 = sshll.u32 %s4346_s1, 4  ;;  %s4260_s13 = int_to_ptr.vmem [resolvable:$false] %s4259_s13 }
  0xd3   : > { %1007 = vmatprep.subr.bf16.mxu0 %v3741_v19  ;;  %3622 = vmatpush1.bf16.msra.mxu1 %v3740_v16  ;;  %v573_v51 = vmul.f32 %v4763_v49, %v4763_v49  ;;  %v574_v52 = vmul.f32 %v4766_v50, %v4766_v50  ;;  %v4778_v54 = vld [vmem:[%s4646_s5 + $0x98] sm:$0xff]  ;;  %v575_v55 = vmul.f32 %v4775_v53, %v4775_v53  ;;  %v4787_v57 = vld [vmem:[%s4646_s5 + $0xa0] sm:$0xff]  ;;  %v4790_v58 = vld [vmem:[%s4646_s5 + $0xa8] sm:$0xff]  ;;  %s4261_s18 = scalar_lea.vmem %s4260_s13, 16384  ;;  %p4262_p1 = scmp.lt.s32.totalorder %s6180_s26, %s4260_s13 }
  0xd4   : > { %593 = vadd.xlane.f32.xlu0 %v559_v6  ;;  %3615 = vmatprep.subr.bf16.mxu1 %v3741_v19  ;;  %v576_v56 = vmul.f32 %v4778_v54, %v4778_v54  ;;  %v577_v59 = vmul.f32 %v4787_v57, %v4787_v57  ;;  %v578_v60 = vmul.f32 %v4790_v58, %v4790_v58  ;;  %v4799_v61 = vld [vmem:[%s4646_s5 + $0xb0] sm:$0xff]  ;;  %v4802_v62 = vld [vmem:[%s4646_s5 + $0xb8] sm:$0xff]  ;;  %v4811_v3 = vld [vmem:[%s4646_s5 + $0xc0] sm:$0xff]  ;;  %p4258_p13 = pneg %p4257_p12  ;;  %p4263_p3 = scmp.lt.s32.totalorder %s4261_s18, %s4255_s9 }
  0xd5   : > { %v579_v63 = vmul.f32 %v4799_v61, %v4799_v61  ;;  %v580_v2 = vmul.f32 %v4802_v62, %v4802_v62  ;;  %v4814_v6 = vld [vmem:[%s4646_s5 + $0xc8] sm:$0xff]  ;;  %v4823_v9 = vld [vmem:[%s4646_s5 + $0xd0] sm:$0xff]  ;;  %v4826_v11 = vld [vmem:[%s4646_s5 + $0xd8] sm:$0xff] }
  0xd6   : > { %595 = vadd.xlane.f32.xlu1 %v560_v7  ;;  %1008 = vmatpush1.bf16.msra.mxu0 %v3743_v20  ;;  %v581_v7 = vmul.f32 %v4811_v3, %v4811_v3  ;;  %v582_v8 = vmul.f32 %v4814_v6, %v4814_v6  ;;  %v583_v12 = vmul.f32 %v4823_v9, %v4823_v9  ;;  %v4838_v16 = vld [vmem:[%s4646_s5 + $0xe8] sm:$0xff]  ;;  %p4264_p2 = por %p4263_p3, %p4262_p1 }
  0xd7   : > { %1009 = vmatprep.subr.bf16.mxu0 %v3744_v22  ;;  %3623 = vmatpush1.bf16.msra.mxu1 %v3743_v20  ;;  %v584_v14 = vmul.f32 %v4826_v11, %v4826_v11  ;;  %v586_v19 = vmul.f32 %v4838_v16, %v4838_v16  ;;  %v4847_v20 = vld [vmem:[%s4646_s5 + $0xf0] sm:$0xff] }
  0xd8   : > { %468 = vadd.xlane.f32.xlu0 %v4689_v10  ;;  %3616 = vmatprep.subr.bf16.mxu1 %v3744_v22  ;;  %v4850_v22 = vld [vmem:[%s4646_s5 + $0xf8] sm:$0xff]  ;;  %p4265_p8 = pnand %p4264_p2, %p4258_p13 }
  0xda   : > { %470 = vadd.xlane.f32.xlu1 %v4692_v13  ;;  %1010 = vmatpush1.bf16.msra.mxu0 %v3746_v24 }
  0xdb   : > { %1011 = vmatprep.subr.bf16.mxu0 %v3747_v27  ;;  %3624 = vmatpush1.bf16.msra.mxu1 %v3746_v24  ;;  %v588_v24 = vmul.f32 %v4850_v22, %v4850_v22 }
  0xdc   : > { %597 = vadd.xlane.f32.xlu0 %v561_v15  ;;  %3617 = vmatprep.subr.bf16.mxu1 %v3747_v27  ;;  %v4835_v15 = vld [vmem:[%s4646_s5 + $0xe0] sm:$0xff] }
  0xde   : > { %599 = vadd.xlane.f32.xlu1 %v562_v17  ;;  %1012 = vmatpush1.bf16.msra.mxu0 %v3749_v28  ;;  %v585_v17 = vmul.f32 %v4835_v15, %v4835_v15 }
  0xdf   : > { %1013 = vmatprep.subr.bf16.mxu0 %v3750_v31  ;;  %3625 = vmatpush1.bf16.msra.mxu1 %v3749_v28 }
  0xe0   : > { %472 = vadd.xlane.f32.xlu0 %v4701_v18  ;;  %3618 = vmatprep.subr.bf16.mxu1 %v3750_v31 }
  0xe2   : > { %474 = vadd.xlane.f32.xlu1 %v4704_v21  ;;  %1014 = vmatpush1.bf16.msra.mxu0 %v3752_v32 }
  0xe3   : > { %1015 = vmatprep.subr.bf16.mxu0 %v3753_v34  ;;  %3626 = vmatpush1.bf16.msra.mxu1 %v3752_v32 }
  0xe4   : > { %601 = vadd.xlane.f32.xlu0 %v563_v23  ;;  %3619 = vmatprep.subr.bf16.mxu1 %v3753_v34  ;;  %v587_v23 = vmul.f32 %v4847_v20, %v4847_v20 }
  0xe6   : > { %603 = vadd.xlane.f32.xlu1 %v564_v25  ;;  %1016 = vmatpush1.bf16.msra.mxu0 %v3755_v36 }
  0xe7   : > { %3627 = vmatpush1.bf16.msra.mxu1 %v3755_v36 }
  0xe8   : > { %476 = vadd.xlane.f32.xlu0 %v4713_v26 }
  0xea   : > { %478 = vadd.xlane.f32.xlu1 %v4716_v29 }
  0xec   : > { %605 = vadd.xlane.f32.xlu0 %v565_v30 }
  0xee   : > { %607 = vadd.xlane.f32.xlu1 %v566_v33 }
  0xf0   : > { %480 = vadd.xlane.f32.xlu0 %v4725_v35 }
  0xf2   : > { %482 = vadd.xlane.f32.xlu1 %v4728_v37 }
  0xf4   : > { %609 = vadd.xlane.f32.xlu0 %v567_v38 }
  0xf6   : > { %611 = vadd.xlane.f32.xlu1 %v568_v40 }
  0xf8   : > { %484 = vadd.xlane.f32.xlu0 %v4739_v41 }
  0xfa   : > { %486 = vadd.xlane.f32.xlu1 %v4742_v42 }
  0xfc   : > { %613 = vadd.xlane.f32.xlu0 %v569_v43 }
  0xfe   : > { %615 = vadd.xlane.f32.xlu1 %v570_v44 }
 0x100   : > { %488 = vadd.xlane.f32.xlu0 %v4751_v45 }
 0x102   : > { %490 = vadd.xlane.f32.xlu1 %v4754_v46 }
 0x104   : > { %617 = vadd.xlane.f32.xlu0 %v571_v47 }
 0x106   : > { %619 = vadd.xlane.f32.xlu1 %v572_v48 }
 0x108   : > { %492 = vadd.xlane.f32.xlu0 %v4763_v49 }
 0x10a   : > { %494 = vadd.xlane.f32.xlu1 %v4766_v50 }
 0x10c   : > { %621 = vadd.xlane.f32.xlu0 %v573_v51 }
 0x10e   : > { %623 = vadd.xlane.f32.xlu1 %v574_v52 }
 0x110   : > { %496 = vadd.xlane.f32.xlu0 %v4775_v53 }
 0x112   : > { %498 = vadd.xlane.f32.xlu1 %v4778_v54 }
 0x114   : > { %625 = vadd.xlane.f32.xlu0 %v575_v55 }
 0x116   : > { %627 = vadd.xlane.f32.xlu1 %v576_v56 }
 0x118   : > { %500 = vadd.xlane.f32.xlu0 %v4787_v57 }
 0x11a   : > { %502 = vadd.xlane.f32.xlu1 %v4790_v58 }
 0x11c   : > { %629 = vadd.xlane.f32.xlu0 %v577_v59 }
 0x11e   : > { %631 = vadd.xlane.f32.xlu1 %v578_v60 }
 0x120   : > { %504 = vadd.xlane.f32.xlu0 %v4799_v61 }
 0x122   : > { %506 = vadd.xlane.f32.xlu1 %v4802_v62 }
 0x124   : > { %633 = vadd.xlane.f32.xlu0 %v579_v63 }
 0x126   : > { %635 = vadd.xlane.f32.xlu1 %v580_v2 }
 0x128   : > { %508 = vadd.xlane.f32.xlu0 %v4811_v3 }
 0x12a   : > { %510 = vadd.xlane.f32.xlu1 %v4814_v6 }
 0x12c   : > { %637 = vadd.xlane.f32.xlu0 %v581_v7 }
 0x12e   : > { %639 = vadd.xlane.f32.xlu1 %v582_v8 }
 0x130   : > { %512 = vadd.xlane.f32.xlu0 %v4823_v9 }
 0x132   : > { %514 = vadd.xlane.f32.xlu1 %v4826_v11 }
 0x134   : > { %641 = vadd.xlane.f32.xlu0 %v583_v12 }
 0x136   : > { %643 = vadd.xlane.f32.xlu1 %v584_v14 }
 0x138   : > { %516 = vadd.xlane.f32.xlu0 %v4835_v15 }
 0x13a   : > { %518 = vadd.xlane.f32.xlu1 %v4838_v16 }
 0x13c   : > { %645 = vadd.xlane.f32.xlu0 %v585_v17 }
 0x13e   : > { %647 = vadd.xlane.f32.xlu1 %v586_v19 }
 0x140   : > { %520 = vadd.xlane.f32.xlu0 %v4847_v20 }
 0x142   : > { %522 = vadd.xlane.f32.xlu1 %v4850_v22 }
 0x144   : > { %649 = vadd.xlane.f32.xlu0 %v587_v23 }
 0x146   : > { %651 = vadd.xlane.f32.xlu1 %v588_v24 }
 0x155   : > { %v461_v25 = vpop.xlane.xlu0 %460 }
 0x156   : > { %v525_v27 = vmul.f32 0.0078125, %v461_v25 }
 0x157   : > { %v590_v28 = vpop.xlane.xlu1 %589 }
 0x158   : > { %v717_v30 = vmul.f32 %v525_v27, %v525_v27  ;;  %v653_v31 = vmul.f32 0.0078125, %v590_v28 }
 0x159   : > { %v463_v32 = vpop.xlane.xlu0 %462 }
 0x15a   : > { %v749_v33 = vsub.f32 %v653_v31, %v717_v30  ;;  %v526_v34 = vmul.f32 0.0078125, %v463_v32 }
 0x15b   : > { %v592_v36 = vpop.xlane.xlu1 %591 }
 0x15c   : > { %v781_v38 = vadd.f32 1e-05, %v749_v33  ;;  %v718_v40 = vmul.f32 %v526_v34, %v526_v34  ;;  %v654_v43 = vmul.f32 0.0078125, %v592_v36  ;;  %v685_v33 = vsub.f32 %v4665_v0, %v525_v27 }
 0x15d   : > { %v465_v44 = vpop.xlane.xlu0 %464  ;;  %v686_v36 = vsub.f32 %v4668_v1, %v526_v34 }
 0x15e   : > { %v750_v47 = vsub.f32 %v654_v43, %v718_v40  ;;  %v527_v48 = vmul.f32 0.0078125, %v465_v44  ;;  %3796 = vrsqrt.f32 %v781_v38 }
 0x15f   : > { %v467_v51 = vpop.xlane.xlu1 %466 }
 0x160   : > { %v782_v52 = vadd.f32 1e-05, %v750_v47  ;;  %v719_v55 = vmul.f32 %v527_v48, %v527_v48  ;;  %v528_v56 = vmul.f32 0.0078125, %v467_v51 }
 0x161   : > { %v594_v59 = vpop.xlane.xlu0 %593 }
 0x162   : > { %3798 = vrsqrt.f32 %v782_v52  ;;  %v655_v60 = vmul.f32 0.0078125, %v594_v59  ;;  %v720_v2 = vmul.f32 %v528_v56, %v528_v56 }
 0x163   : > { %v596_v63 = vpop.xlane.xlu1 %595 }
 0x164   : > { %v751_v7 = vsub.f32 %v655_v60, %v719_v55  ;;  %v656_v8 = vmul.f32 0.0078125, %v596_v63 }
 0x165   : > { %v469_v12 = vpop.xlane.xlu0 %468 }
 0x166   : > { %v783_v14 = vadd.f32 1e-05, %v751_v7  ;;  %v752_v17 = vsub.f32 %v656_v8, %v720_v2  ;;  %v4858_v19 = vmul.f32 0.0078125, %v469_v12 }
 0x167   : > { %v471_v23 = vpop.xlane.xlu1 %470 }
 0x168   : > { %3800 = vrsqrt.f32 %v783_v14  ;;  %v784_v24 = vadd.f32 1e-05, %v752_v17  ;;  %v721_v25 = vmul.f32 %v4858_v19, %v4858_v19  ;;  %v4862_v28 = vmul.f32 0.0078125, %v471_v23  ;;  %v3797_v31 = vpop.eup %3796 }
 0x169   : > { %v598_v30 = vpop.xlane.xlu0 %597  ;;  %v845_v52 = vmul.f32 %v3797_v31, %v685_v33  ;;  %v687_v14 = vsub.f32 %v4677_v4, %v527_v48  ;;  %v688_v17 = vsub.f32 %v4680_v5, %v528_v56 }
 0x16a   : > { %3802 = vrsqrt.f32 %v784_v24  ;;  %v657_v32 = vmul.f32 0.0078125, %v598_v30  ;;  %v722_v43 = vmul.f32 %v4862_v28, %v4862_v28 }
 0x16b   : > { %v600_v38 = vpop.xlane.xlu1 %599 }
 0x16c   : > { %v3799_v40 = vpop.eup %3798  ;;  %v753_v44 = vsub.f32 %v657_v32, %v721_v25  ;;  %v658_v47 = vmul.f32 0.0078125, %v600_v38 }
 0x16d   : > { %v473_v51 = vpop.xlane.xlu0 %472  ;;  %v846_v55 = vmul.f32 %v3799_v40, %v686_v36 }
 0x16e   : > { %v785_v59 = vadd.f32 1e-05, %v753_v44  ;;  %v754_v60 = vsub.f32 %v658_v47, %v722_v43  ;;  %v4868_v63 = vmul.f32 0.0078125, %v473_v51 }
 0x16f   : > { %v475_v2 = vpop.xlane.xlu1 %474  ;;  %v877_v7 = vpack.c.bf16 %v846_v55, %v845_v52  ;;  %v689_v55 = vsub.f32 %v4689_v10, %v4858_v19 }
 0x170   : > { %3804 = vrsqrt.f32 %v785_v59  ;;  %v786_v0 = vadd.f32 1e-05, %v754_v60  ;;  %v723_v1 = vmul.f32 %v4868_v63, %v4868_v63  ;;  %v4872_v27 = vmul.f32 0.0078125, %v475_v2 }
 0x171   : > { %v602_v34 = vpop.xlane.xlu0 %601  ;;  %1034 = vmatmul.mubr.bf16.vlgmr.msra.gmra.mrb[0].mxu0 %v877_v7  ;;  %v690_v59 = vsub.f32 %v4692_v13, %v4862_v28 }
 0x172   : > { %v3801_v8 = vpop.eup %3800  ;;  %3806 = vrsqrt.f32 %v786_v0  ;;  %v659_v12 = vmul.f32 0.0078125, %v602_v34  ;;  %1043 = vmatprep.mubr.bf16.mxu0 %v6245_v39  ;;  %v724_v25 = vmul.f32 %v4872_v27, %v4872_v27 }
 0x173   : > { %v604_v23 = vpop.xlane.xlu1 %603  ;;  %v847_v33 = vmul.f32 %v3801_v8, %v687_v14 }
 0x174   : > { %v3803_v24 = vpop.eup %3802  ;;  %v755_v30 = vsub.f32 %v659_v12, %v723_v1  ;;  %v660_v31 = vmul.f32 0.0078125, %v604_v23 }
 0x175   : > { %v477_v32 = vpop.xlane.xlu0 %476  ;;  %v848_v36 = vmul.f32 %v3803_v24, %v688_v17 }
 0x176   : > { %v787_v38 = vadd.f32 1e-05, %v755_v30  ;;  %v756_v40 = vsub.f32 %v660_v31, %v724_v25  ;;  %v4879_v43 = vmul.f32 0.0078125, %v477_v32  ;;  %v691_v32 = vsub.f32 %v4701_v18, %v4868_v63 }
 0x177   : > { %v479_v44 = vpop.xlane.xlu1 %478  ;;  %v878_v47 = vpack.c.bf16 %v848_v36, %v847_v33  ;;  %v692_v33 = vsub.f32 %v4704_v21, %v4872_v27 }
 0x178   : > { %3808 = vrsqrt.f32 %v787_v38  ;;  %v788_v4 = vadd.f32 1e-05, %v756_v40  ;;  %v725_v5 = vmul.f32 %v4879_v43, %v4879_v43  ;;  %v4883_v48 = vmul.f32 0.0078125, %v479_v44 }
 0x179   : > { %v606_v56 = vpop.xlane.xlu0 %605  ;;  %1044 = vmatmul.mubr.bf16.gmra.mrb[4].mxu0 %v878_v47 }
 0x17a   : > { %v3805_v51 = vpop.eup %3804  ;;  %3810 = vrsqrt.f32 %v788_v4  ;;  %v661_v52 = vmul.f32 0.0078125, %v606_v56  ;;  %1053 = vmatprep.mubr.bf16.mxu0 %v6245_v39  ;;  %v726_v7 = vmul.f32 %v4883_v48, %v4883_v48 }
 0x17b   : > { %v608_v60 = vpop.xlane.xlu1 %607  ;;  %v849_v8 = vmul.f32 %v3805_v51, %v689_v55 }
 0x17c   : > { %v3807_v2 = vpop.eup %3806  ;;  %v757_v0 = vsub.f32 %v661_v52, %v725_v5  ;;  %v662_v1 = vmul.f32 0.0078125, %v608_v60 }
 0x17d   : > { %v481_v34 = vpop.xlane.xlu0 %480  ;;  %v850_v12 = vmul.f32 %v3807_v2, %v690_v59 }
 0x17e   : > { %v789_v14 = vadd.f32 1e-05, %v757_v0  ;;  %v758_v17 = vsub.f32 %v662_v1, %v726_v7  ;;  %v4892_v23 = vmul.f32 0.0078125, %v481_v34  ;;  %v693_v0 = vsub.f32 %v4713_v26, %v4879_v43 }
 0x17f   : > { %v483_v24 = vpop.xlane.xlu1 %482  ;;  %v879_v25 = vpack.c.bf16 %v850_v12, %v849_v8  ;;  %v694_v1 = vsub.f32 %v4716_v29, %v4883_v48 }
 0x180   : > { %3812 = vrsqrt.f32 %v789_v14  ;;  %v790_v10 = vadd.f32 1e-05, %v758_v17  ;;  %v727_v13 = vmul.f32 %v4892_v23, %v4892_v23  ;;  %v4896_v19 = vmul.f32 0.0078125, %v483_v24 }
 0x181   : > { %v610_v28 = vpop.xlane.xlu0 %609  ;;  %1054 = vmatmul.mubr.bf16.gmra.mrb[8].mxu0 %v879_v25 }
 0x182   : > { %v3809_v30 = vpop.eup %3808  ;;  %3814 = vrsqrt.f32 %v790_v10  ;;  %v663_v31 = vmul.f32 0.0078125, %v610_v28  ;;  %1063 = vmatprep.mubr.bf16.mxu0 %v6245_v39  ;;  %v728_v40 = vmul.f32 %v4896_v19, %v4896_v19 }
 0x183   : > { %v612_v36 = vpop.xlane.xlu1 %611  ;;  %v851_v5 = vmul.f32 %v3809_v30, %v691_v32 }
 0x184   : > { %v3811_v38 = vpop.eup %3810  ;;  %v759_v44 = vsub.f32 %v663_v31, %v727_v13  ;;  %v664_v47 = vmul.f32 0.0078125, %v612_v36 }
 0x185   : > { %v485_v4 = vpop.xlane.xlu0 %484  ;;  %v852_v56 = vmul.f32 %v3811_v38, %v692_v33  ;;  %v695_v38 = vsub.f32 %v4725_v35, %v4892_v23 }
 0x186   : > { %v791_v51 = vadd.f32 1e-05, %v759_v44  ;;  %v760_v52 = vsub.f32 %v664_v47, %v728_v40  ;;  %v4905_v55 = vmul.f32 0.0078125, %v485_v4  ;;  %v696_v40 = vsub.f32 %v4728_v37, %v4896_v19 }
 0x187   : > { %v487_v59 = vpop.xlane.xlu1 %486  ;;  %v880_v60 = vpack.c.bf16 %v852_v56, %v851_v5 }
 0x188   : > { %3816 = vrsqrt.f32 %v791_v51  ;;  %v792_v18 = vadd.f32 1e-05, %v760_v52  ;;  %v729_v21 = vmul.f32 %v4905_v55, %v4905_v55  ;;  %v4909_v63 = vmul.f32 0.0078125, %v487_v59 }
 0x189   : > { %v614_v27 = vpop.xlane.xlu0 %613  ;;  %1064 = vmatmul.mubr.bf16.gmra.mrb[12].mxu0 %v880_v60 }
 0x18a   : > { %v3813_v2 = vpop.eup %3812  ;;  %3818 = vrsqrt.f32 %v792_v18  ;;  %v665_v7 = vmul.f32 0.0078125, %v614_v27  ;;  %1073 = vmatprep.mubr.bf16.mxu0 %v6245_v39  ;;  %v730_v12 = vmul.f32 %v4909_v63, %v4909_v63 }
 0x18b   : > { %v616_v34 = vpop.xlane.xlu1 %615  ;;  %v853_v25 = vmul.f32 %v3813_v2, %v693_v0 }
 0x18c   : > { %v3815_v8 = vpop.eup %3814  ;;  %v761_v14 = vsub.f32 %v665_v7, %v729_v21  ;;  %v666_v17 = vmul.f32 0.0078125, %v616_v34  ;;  %v698_v34 = vsub.f32 %v4742_v42, %v4909_v63 }
 0x18d   : > { %v489_v24 = vpop.xlane.xlu0 %488  ;;  %v854_v10 = vmul.f32 %v3815_v8, %v694_v1  ;;  %v697_v1 = vsub.f32 %v4739_v41, %v4905_v55 }
 0x18e   : > { %v793_v13 = vadd.f32 1e-05, %v761_v14  ;;  %v762_v28 = vsub.f32 %v666_v17, %v730_v12  ;;  %v4918_v30 = vmul.f32 0.0078125, %v489_v24 }
 0x18f   : > { %v491_v31 = vpop.xlane.xlu1 %490  ;;  %v881_v32 = vpack.c.bf16 %v854_v10, %v853_v25 }
 0x190   : > { %3820 = vrsqrt.f32 %v793_v13  ;;  %v794_v26 = vadd.f32 1e-05, %v762_v28  ;;  %v731_v29 = vmul.f32 %v4918_v30, %v4918_v30  ;;  %v4922_v43 = vmul.f32 0.0078125, %v491_v31 }
 0x191   : > { %v618_v48 = vpop.xlane.xlu0 %617  ;;  %1074 = vmatmul.mubr.bf16.gmra.mrb[16].mxu0 %v881_v32 }
 0x192   : > { %v3817_v33 = vpop.eup %3816  ;;  %3822 = vrsqrt.f32 %v794_v26  ;;  %v667_v36 = vmul.f32 0.0078125, %v618_v48  ;;  %1083 = vmatprep.mubr.bf16.mxu0 %v6245_v39  ;;  %v732_v4 = vmul.f32 %v4922_v43, %v4922_v43 }
 0x193   : > { %v620_v44 = vpop.xlane.xlu1 %619  ;;  %v855_v52 = vmul.f32 %v3817_v33, %v695_v38  ;;  %v700_v38 = vsub.f32 %v4754_v46, %v4922_v43 }
 0x194   : > { %v3819_v47 = vpop.eup %3818  ;;  %v763_v5 = vsub.f32 %v667_v36, %v731_v29  ;;  %v668_v56 = vmul.f32 0.0078125, %v620_v44  ;;  %v699_v36 = vsub.f32 %v4751_v45, %v4918_v30 }
 0x195   : > { %v493_v51 = vpop.xlane.xlu0 %492  ;;  %v856_v59 = vmul.f32 %v3819_v47, %v696_v40 }
 0x196   : > { %v795_v60 = vadd.f32 1e-05, %v763_v5  ;;  %v764_v18 = vsub.f32 %v668_v56, %v732_v4  ;;  %v4931_v21 = vmul.f32 0.0078125, %v493_v51 }
 0x197   : > { %v495_v27 = vpop.xlane.xlu1 %494  ;;  %v882_v2 = vpack.c.bf16 %v856_v59, %v855_v52 }
 0x198   : > { %3824 = vrsqrt.f32 %v795_v60  ;;  %v796_v35 = vadd.f32 1e-05, %v764_v18  ;;  %v733_v37 = vmul.f32 %v4931_v21, %v4931_v21  ;;  %v4935_v23 = vmul.f32 0.0078125, %v495_v27 }
 0x199   : > { %v622_v19 = vpop.xlane.xlu0 %621  ;;  %1084 = vmatmul.mubr.bf16.gmra.mrb[20].mxu0 %v882_v2 }
 0x19a   : > { %v3821_v7 = vpop.eup %3820  ;;  %3826 = vrsqrt.f32 %v796_v35  ;;  %v669_v0 = vmul.f32 0.0078125, %v622_v19  ;;  %1093 = vmatprep.mubr.bf16.mxu0 %v6245_v39  ;;  %v734_v14 = vmul.f32 %v4935_v23, %v4935_v23  ;;  %v701_v19 = vsub.f32 %v4763_v49, %v4931_v21 }
 0x19b   : > { %v624_v8 = vpop.xlane.xlu1 %623  ;;  %v857_v10 = vmul.f32 %v3821_v7, %v697_v1  ;;  %v702_v7 = vsub.f32 %v4766_v50, %v4935_v23 }
 0x19c   : > { %v3823_v12 = vpop.eup %3822  ;;  %v765_v17 = vsub.f32 %v669_v0, %v733_v37  ;;  %v670_v24 = vmul.f32 0.0078125, %v624_v8 }
 0x19d   : > { %v497_v25 = vpop.xlane.xlu0 %496  ;;  %v858_v13 = vmul.f32 %v3823_v12, %v698_v34 }
 0x19e   : > { %v797_v28 = vadd.f32 1e-05, %v765_v17  ;;  %v766_v31 = vsub.f32 %v670_v24, %v734_v14  ;;  %v4944_v32 = vmul.f32 0.0078125, %v497_v25 }
 0x19f   : > { %v499_v26 = vpop.xlane.xlu1 %498  ;;  %v883_v29 = vpack.c.bf16 %v858_v13, %v857_v10 }
 0x1a0   : > { %3828 = vrsqrt.f32 %v797_v28  ;;  %v798_v41 = vadd.f32 1e-05, %v766_v31  ;;  %v735_v42 = vmul.f32 %v4944_v32, %v4944_v32  ;;  %v4948_v55 = vmul.f32 0.0078125, %v499_v26 }
 0x1a1   : > { %v626_v63 = vpop.xlane.xlu0 %625  ;;  %1094 = vmatmul.mubr.bf16.gmra.mrb[24].mxu0 %v883_v29 }
 0x1a2   : > { %v3825_v48 = vpop.eup %3824  ;;  %3830 = vrsqrt.f32 %v798_v41  ;;  %v671_v33 = vmul.f32 0.0078125, %v626_v63  ;;  %1103 = vmatprep.mubr.bf16.mxu0 %v6245_v39  ;;  %v736_v47 = vmul.f32 %v4948_v55, %v4948_v55  ;;  %v703_v41 = vsub.f32 %v4775_v53, %v4944_v32 }
 0x1a3   : > { %v628_v40 = vpop.xlane.xlu1 %627  ;;  %v859_v51 = vmul.f32 %v3825_v48, %v699_v36 }
 0x1a4   : > { %v3827_v44 = vpop.eup %3826  ;;  %v767_v4 = vsub.f32 %v671_v33, %v735_v42  ;;  %v672_v5 = vmul.f32 0.0078125, %v628_v40  ;;  %v704_v42 = vsub.f32 %v4778_v54, %v4948_v55 }
 0x1a5   : > { %v501_v56 = vpop.xlane.xlu0 %500  ;;  %v860_v52 = vmul.f32 %v3827_v44, %v700_v38 }
 0x1a6   : > { %v799_v59 = vadd.f32 1e-05, %v767_v4  ;;  %v768_v60 = vsub.f32 %v672_v5, %v736_v47  ;;  %v4957_v18 = vmul.f32 0.0078125, %v501_v56 }
 0x1a7   : > { %v503_v27 = vpop.xlane.xlu1 %502  ;;  %v884_v2 = vpack.c.bf16 %v860_v52, %v859_v51 }
 0x1a8   : > { %3832 = vrsqrt.f32 %v799_v59  ;;  %v800_v45 = vadd.f32 1e-05, %v768_v60  ;;  %v737_v46 = vmul.f32 %v4957_v18, %v4957_v18  ;;  %v4961_v30 = vmul.f32 0.0078125, %v503_v27 }
 0x1a9   : > { %v630_v43 = vpop.xlane.xlu0 %629  ;;  %1104 = vmatmul.mubr.bf16.gmra.mrb[28].mxu0 %v884_v2  ;;  %v705_v27 = vsub.f32 %v4787_v57, %v4957_v18 }
 0x1aa   : > { %v3829_v35 = vpop.eup %3828  ;;  %3834 = vrsqrt.f32 %v800_v45  ;;  %v673_v37 = vmul.f32 0.0078125, %v630_v43  ;;  %3003 = vmatprep.mubr.bf16.mxu0 %v6245_v39  ;;  %v738_v34 = vmul.f32 %v4961_v30, %v4961_v30  ;;  %v706_v2 = vsub.f32 %v4790_v58, %v4961_v30 }
 0x1ab   : > { %v632_v0 = vpop.xlane.xlu1 %631  ;;  %v861_v17 = vmul.f32 %v3829_v35, %v701_v19 }
 0x1ac   : > { %v3831_v1 = vpop.eup %3830  ;;  %v769_v8 = vsub.f32 %v673_v37, %v737_v46  ;;  %v674_v12 = vmul.f32 0.0078125, %v632_v0 }
 0x1ad   : > { %v505_v14 = vpop.xlane.xlu0 %504  ;;  %v862_v24 = vmul.f32 %v3831_v1, %v702_v7 }
 0x1ae   : > { %v801_v25 = vadd.f32 1e-05, %v769_v8  ;;  %v770_v10 = vsub.f32 %v674_v12, %v738_v34  ;;  %v4970_v13 = vmul.f32 0.0078125, %v505_v14 }
 0x1af   : > { %v507_v28 = vpop.xlane.xlu1 %506  ;;  %v885_v31 = vpack.c.bf16 %v862_v24, %v861_v17 }
 0x1b0   : > { %3836 = vrsqrt.f32 %v801_v25  ;;  %v802_v49 = vadd.f32 1e-05, %v770_v10  ;;  %v739_v50 = vmul.f32 %v4970_v13, %v4970_v13  ;;  %v4974_v21 = vmul.f32 0.0078125, %v507_v28 }
 0x1b1   : > { %v634_v23 = vpop.xlane.xlu0 %633  ;;  %1114 = vmatmul.mubr.bf16.vlgmr.msra.gmra.mrb[0].mxu1 %v885_v31  ;;  %v707_v25 = vsub.f32 %v4799_v61, %v4970_v13 }
 0x1b2   : > { %v3833_v26 = vpop.eup %3832  ;;  %3838 = vrsqrt.f32 %v802_v49  ;;  %v675_v29 = vmul.f32 0.0078125, %v634_v23  ;;  %1123 = vmatprep.mubr.bf16.mxu1 %v6245_v39  ;;  %v740_v33 = vmul.f32 %v4974_v21, %v4974_v21  ;;  %v708_v10 = vsub.f32 %v4802_v62, %v4974_v21 }
 0x1b3   : > { %v636_v63 = vpop.xlane.xlu1 %635  ;;  %v863_v44 = vmul.f32 %v3833_v26, %v703_v41 }
 0x1b4   : > { %v3835_v48 = vpop.eup %3834  ;;  %v771_v36 = vsub.f32 %v675_v29, %v739_v50  ;;  %v676_v38 = vmul.f32 0.0078125, %v636_v63 }
 0x1b5   : > { %v509_v40 = vpop.xlane.xlu0 %508  ;;  %v864_v47 = vmul.f32 %v3835_v48, %v704_v42 }
 0x1b6   : > { %v803_v4 = vadd.f32 1e-05, %v771_v36  ;;  %v772_v5 = vsub.f32 %v676_v38, %v740_v33  ;;  %v4983_v56 = vmul.f32 0.0078125, %v509_v40 }
 0x1b7   : > { %v511_v51 = vpop.xlane.xlu1 %510  ;;  %v886_v52 = vpack.c.bf16 %v864_v47, %v863_v44 }
 0x1b8   : > { %3840 = vrsqrt.f32 %v803_v4  ;;  %v804_v53 = vadd.f32 1e-05, %v772_v5  ;;  %v741_v54 = vmul.f32 %v4983_v56, %v4983_v56  ;;  %v4987_v32 = vmul.f32 0.0078125, %v511_v51 }
 0x1b9   : > { %v638_v55 = vpop.xlane.xlu0 %637  ;;  %1124 = vmatmul.mubr.bf16.gmra.mrb[4].mxu1 %v886_v52  ;;  %v709_v44 = vsub.f32 %v4811_v3, %v4983_v56 }
 0x1ba   : > { %v3837_v59 = vpop.eup %3836  ;;  %3842 = vrsqrt.f32 %v804_v53  ;;  %v677_v60 = vmul.f32 0.0078125, %v638_v55  ;;  %1133 = vmatprep.mubr.bf16.mxu1 %v6245_v39  ;;  %v742_v43 = vmul.f32 %v4987_v32, %v4987_v32  ;;  %v710_v47 = vsub.f32 %v4814_v6, %v4987_v32 }
 0x1bb   : > { %v640_v45 = vpop.xlane.xlu1 %639  ;;  %v865_v7 = vmul.f32 %v3837_v59, %v705_v27 }
 0x1bc   : > { %v3839_v46 = vpop.eup %3838  ;;  %v773_v35 = vsub.f32 %v677_v60, %v741_v54  ;;  %v678_v37 = vmul.f32 0.0078125, %v640_v45 }
 0x1bd   : > { %v513_v19 = vpop.xlane.xlu0 %512  ;;  %v866_v0 = vmul.f32 %v3839_v46, %v706_v2 }
 0x1be   : > { %v805_v1 = vadd.f32 1e-05, %v773_v35  ;;  %v774_v34 = vsub.f32 %v678_v37, %v742_v43  ;;  %v4996_v8 = vmul.f32 0.0078125, %v513_v19 }
 0x1bf   : > { %v515_v12 = vpop.xlane.xlu1 %514  ;;  %v887_v14 = vpack.c.bf16 %v866_v0, %v865_v7 }
 0x1c0   : > { %3844 = vrsqrt.f32 %v805_v1  ;;  %v806_v57 = vadd.f32 1e-05, %v774_v34  ;;  %v743_v58 = vmul.f32 %v4996_v8, %v4996_v8  ;;  %v5000_v18 = vmul.f32 0.0078125, %v515_v12 }
 0x1c1   : > { %v642_v30 = vpop.xlane.xlu0 %641  ;;  %1134 = vmatmul.mubr.bf16.gmra.mrb[8].mxu1 %v887_v14  ;;  %v711_v37 = vsub.f32 %v4823_v9, %v4996_v8 }
 0x1c2   : > { %v3841_v17 = vpop.eup %3840  ;;  %3846 = vrsqrt.f32 %v806_v57  ;;  %v679_v24 = vmul.f32 0.0078125, %v642_v30  ;;  %1143 = vmatprep.mubr.bf16.mxu1 %v6245_v39  ;;  %v744_v49 = vmul.f32 %v5000_v18, %v5000_v18  ;;  %v712_v19 = vsub.f32 %v4826_v11, %v5000_v18 }
 0x1c3   : > { %v644_v28 = vpop.xlane.xlu1 %643  ;;  %v867_v29 = vmul.f32 %v3841_v17, %v707_v25 }
 0x1c4   : > { %v3843_v31 = vpop.eup %3842  ;;  %v775_v50 = vsub.f32 %v679_v24, %v743_v58  ;;  %v680_v23 = vmul.f32 0.0078125, %v644_v28 }
 0x1c5   : > { %v517_v26 = vpop.xlane.xlu0 %516  ;;  %v868_v41 = vmul.f32 %v3843_v31, %v708_v10 }
 0x1c6   : > { %v807_v42 = vadd.f32 1e-05, %v775_v50  ;;  %v776_v63 = vsub.f32 %v680_v23, %v744_v49  ;;  %v553_v48 = vmul.f32 0.0078125, %v517_v26 }
 0x1c7   : > { %v519_v33 = vpop.xlane.xlu1 %518  ;;  %v888_v36 = vpack.c.bf16 %v868_v41, %v867_v29 }
 0x1c8   : > { %3848 = vrsqrt.f32 %v807_v42  ;;  %v808_v61 = vadd.f32 1e-05, %v776_v63  ;;  %v745_v13 = vmul.f32 %v553_v48, %v553_v48  ;;  %v554_v38 = vmul.f32 0.0078125, %v519_v33  ;;  %v909_v63 = vld [vmem:[%s6229_s2] sm:$0x3] }
 0x1c9   : > { %v646_v62 = vpop.xlane.xlu0 %645  ;;  %1144 = vmatmul.mubr.bf16.gmra.mrb[12].mxu1 %v888_v36  ;;  %v713_v9 = vsub.f32 %v4835_v15, %v553_v48  ;;  %v911_v15 = vlaneseq }
 0x1ca   : > { %v3845_v21 = vpop.eup %3844  ;;  %3850 = vrsqrt.f32 %v808_v61  ;;  %v681_v40 = vmul.f32 0.0078125, %v646_v62  ;;  %1153 = vmatprep.mubr.bf16.mxu1 %v6245_v39  ;;  %v746_v51 = vmul.f32 %v554_v38, %v554_v38  ;;  %v714_v11 = vsub.f32 %v4838_v16, %v554_v38 }
 0x1cb   : > { %v648_v4 = vpop.xlane.xlu1 %647  ;;  %v869_v55 = vmul.f32 %v3845_v21, %v709_v44  ;;  %v5025_v42 = vshrl.u32 %v911_v15, 7 }
 0x1cc   : > { %v3847_v5 = vpop.eup %3846  ;;  %v777_v52 = vsub.f32 %v681_v40, %v745_v13  ;;  %v682_v53 = vmul.f32 0.0078125, %v648_v4 }
 0x1cd   : > { %v521_v54 = vpop.xlane.xlu0 %520  ;;  %v870_v59 = vmul.f32 %v3847_v5, %v710_v47  ;;  %v917_v16 = vsub.s32 1, %v5025_v42 }
 0x1ce   : > { %v809_v60 = vadd.f32 1e-05, %v777_v52  ;;  %v778_v27 = vsub.f32 %v682_v53, %v746_v51  ;;  %v555_v2 = vmul.f32 0.0078125, %v521_v54 }
 0x1cf   : > { %v523_v45 = vpop.xlane.xlu1 %522  ;;  %v889_v46 = vpack.c.bf16 %v870_v59, %v869_v55  ;;  %v5031_v48 = vrot.slane %v909_v63, %v917_v16 }
 0x1d0   : > { %3852 = vrsqrt.f32 %v809_v60  ;;  %v810_v43 = vadd.f32 1e-05, %v778_v27  ;;  %v747_v35 = vmul.f32 %v555_v2, %v555_v2  ;;  %v556_v3 = vmul.f32 0.0078125, %v523_v45 }
 0x1d1   : > { %v650_v56 = vpop.xlane.xlu0 %649  ;;  %1154 = vmatmul.mubr.bf16.gmra.mrb[16].mxu1 %v889_v46  ;;  %v715_v49 = vsub.f32 %v4847_v20, %v555_v2 }
 0x1d2   : > { %v3849_v6 = vpop.eup %3848  ;;  %3854 = vrsqrt.f32 %v810_v43  ;;  %v683_v32 = vmul.f32 0.0078125, %v650_v56  ;;  %1163 = vmatprep.mubr.bf16.mxu1 %v6245_v39  ;;  %v748_v1 = vmul.f32 %v556_v3, %v556_v3  ;;  %v716_v50 = vsub.f32 %v4850_v22, %v556_v3 }
 0x1d3   : > { %v652_v7 = vpop.xlane.xlu1 %651  ;;  %v871_v14 = vmul.f32 %v3849_v6, %v711_v37 }
 0x1d4   : > { %v3851_v0 = vpop.eup %3850  ;;  %v779_v34 = vsub.f32 %v683_v32, %v747_v35  ;;  %v684_v12 = vmul.f32 0.0078125, %v652_v7 }
 0x1d5   : > { %v872_v57 = vmul.f32 %v3851_v0, %v712_v19 }
 0x1d6   : > { %v811_v58 = vadd.f32 1e-05, %v779_v34  ;;  %v780_v30 = vsub.f32 %v684_v12, %v748_v1 }
 0x1d7   : > { %v890_v17 = vpack.c.bf16 %v872_v57, %v871_v14 }
 0x1d8   : > { %3856 = vrsqrt.f32 %v811_v58  ;;  %v812_v24 = vadd.f32 1e-05, %v780_v30 }
 0x1d9   : > { %1164 = vmatmul.mubr.bf16.gmra.mrb[20].mxu1 %v890_v17 }
 0x1da   : > { %v3853_v25 = vpop.eup %3852  ;;  %3858 = vrsqrt.f32 %v812_v24  ;;  %1173 = vmatprep.mubr.bf16.mxu1 %v6245_v39 }
 0x1db   : > { %v873_v18 = vmul.f32 %v3853_v25, %v713_v9 }
 0x1dc   : > { %v3855_v8 = vpop.eup %3854 }
 0x1dd   : > { %v874_v10 = vmul.f32 %v3855_v8, %v714_v11 }
 0x1df   : > { %v891_v28 = vpack.c.bf16 %v874_v10, %v873_v18 }
 0x1e1   : > { %1174 = vmatmul.mubr.bf16.gmra.mrb[24].mxu1 %v891_v28 }
 0x1e2   : > { %v3857_v31 = vpop.eup %3856  ;;  %1183 = vmatprep.mubr.bf16.mxu1 %v6245_v39 }
 0x1e3   : > { %v875_v26 = vmul.f32 %v3857_v31, %v715_v49 }
 0x1e4   : > { %v3859_v23 = vpop.eup %3858 }
 0x1e5   : > { %v876_v29 = vmul.f32 %v3859_v23, %v716_v50 }
 0x1e7   : > { %v892_v41 = vpack.c.bf16 %v876_v29, %v875_v26 }
 0x1e9   : > { %1184 = vmatmul.mubr.bf16.gmra.mrb[28].mxu1 %v892_v41 }
 0x244   : > { %v5033_v33 = vpop.f32.mrb[0].mxu0 }
 0x245   : > { %v1037_v20 = vpop.f32.mrb[1].mxu0 }
 0x246   : > { %v1038_v22 = vadd.f32 %v1037_v20, %v5031_v48  ;;  %v5036_v36 = vpop.f32.mrb[2].mxu0 }
 0x247   : > { %v1041_v61 = vpop.f32.mrb[3].mxu0 }
 0x248   : > { %v1195_v13 = vmul.f32 %v1038_v22, %v1038_v22  ;;  %v5039_v38 = vadd.f32 %v1041_v61, %v5031_v48 }
 0x24a   : > { %v1259_v62 = vmul.f32 %v1195_v13, %v1038_v22  ;;  %v1197_v21 = vmul.f32 %v5039_v38, %v5039_v38 }
 0x24c   : > { %v1323_v40 = vmul.f32 0.044715, %v1259_v62  ;;  %v1261_v44 = vmul.f32 %v1197_v21, %v5039_v38  ;;  %v5044_v47 = vpop.f32.mrb[4].mxu0 }
 0x24d   : > { %v1047_v4 = vpop.f32.mrb[5].mxu0 }
 0x24e   : > { %v1387_v5 = vadd.f32 %v1323_v40, %v1038_v22  ;;  %v1325_v51 = vmul.f32 0.044715, %v1261_v44  ;;  %v5047_v52 = vadd.f32 %v1047_v4, %v5031_v48  ;;  %v5049_v53 = vpop.f32.mrb[6].mxu0 }
 0x24f   : > { %v1051_v54 = vpop.f32.mrb[7].mxu0 }
 0x250   : > { %v1451_v55 = vmul.f32 0.7978846, %v1387_v5  ;;  %v1389_v59 = vadd.f32 %v1325_v51, %v5039_v38  ;;  %v1199_v60 = vmul.f32 %v5047_v52, %v5047_v52  ;;  %v5055_v27 = vadd.f32 %v1051_v54, %v5031_v48 }
 0x252   : > { %v1453_v2 = vmul.f32 0.7978846, %v1389_v59  ;;  %v1263_v45 = vmul.f32 %v1199_v60, %v5047_v52  ;;  %v1201_v46 = vmul.f32 %v5055_v27, %v5055_v27  ;;  %3860 = vtanh.f32 %v1451_v55 }
 0x254   : > { %v1327_v43 = vmul.f32 0.044715, %v1263_v45  ;;  %v1265_v35 = vmul.f32 %v1201_v46, %v5055_v27  ;;  %v5061_v3 = vpop.f32.mrb[8].mxu0  ;;  %3862 = vtanh.f32 %v1453_v2 }
 0x255   : > { %v1057_v56 = vpop.f32.mrb[9].mxu0 }
 0x256   : > { %v1391_v6 = vadd.f32 %v1327_v43, %v5047_v52  ;;  %v1329_v32 = vmul.f32 0.044715, %v1265_v35  ;;  %v5065_v37 = vadd.f32 %v1057_v56, %v5031_v48  ;;  %v5067_v19 = vpop.f32.mrb[10].mxu0 }
 0x257   : > { %6269 = vst [vmem:[#allocation19_spill] sm:$0xff] %v5067_v19  ;;  %v1061_v7 = vpop.f32.mrb[11].mxu0 }
 0x258   : > { %v1393_v0 = vadd.f32 %v1329_v32, %v5055_v27  ;;  %v1203_v1 = vmul.f32 %v5065_v37, %v5065_v37  ;;  %v5073_v34 = vadd.f32 %v1061_v7, %v5031_v48  ;;  %v1455_v12 = vmul.f32 0.7978846, %v1391_v6 }
 0x25a   : > { %v1267_v14 = vmul.f32 %v1203_v1, %v5065_v37  ;;  %v1205_v57 = vmul.f32 %v5073_v34, %v5073_v34  ;;  %v1457_v58 = vmul.f32 0.7978846, %v1393_v0  ;;  %3864 = vtanh.f32 %v1455_v12 }
 0x25c   : > { %v3861_v30 = vpop.eup %3860  ;;  %v1331_v17 = vmul.f32 0.044715, %v1267_v14  ;;  %v1269_v24 = vmul.f32 %v1205_v57, %v5073_v34  ;;  %v5079_v25 = vpop.f32.mrb[12].mxu0  ;;  %3866 = vtanh.f32 %v1457_v58 }
 0x25d   : > { %v1067_v9 = vpop.f32.mrb[13].mxu0  ;;  %v1579_v18 = vadd.f32 1.0, %v3861_v30 }
 0x25e   : > { %v5082_v11 = vadd.f32 %v1067_v9, %v5031_v48  ;;  %v5084_v8 = vpop.f32.mrb[14].mxu0  ;;  %v1395_v10 = vadd.f32 %v1331_v17, %v5065_v37  ;;  %v3863_v31 = vpop.eup %3862  ;;  %v1333_v49 = vmul.f32 0.044715, %v1269_v24 }
 0x25f   : > { %6270 = vst [vmem:[#allocation20_spill] sm:$0xff] %v5084_v8  ;;  %v1071_v28 = vpop.f32.mrb[15].mxu0  ;;  %v1643_v23 = vmul.f32 0.5, %v1579_v18  ;;  %v1581_v29 = vadd.f32 1.0, %v3863_v31 }
 0x260   : > { %v1207_v50 = vmul.f32 %v5082_v11, %v5082_v11  ;;  %v1459_v26 = vmul.f32 0.7978846, %v1395_v10  ;;  %v1397_v41 = vadd.f32 %v1333_v49, %v5073_v34  ;;  %v5091_v15 = vadd.f32 %v1071_v28, %v5031_v48 }
 0x261   : > { %v5093_v16 = vmul.f32 %v1643_v23, %v1038_v22  ;;  %v1645_v61 = vmul.f32 0.5, %v1581_v29 }
 0x262   : > { %v1271_v20 = vmul.f32 %v1207_v50, %v5082_v11  ;;  %3868 = vtanh.f32 %v1459_v26  ;;  %v1461_v4 = vmul.f32 0.7978846, %v1397_v41  ;;  %v1209_v5 = vmul.f32 %v5091_v15, %v5091_v15 }
 0x263   : > { %1770 = vadd.xlane.f32.xlu0 %v5093_v16  ;;  %v5102_v21 = vmul.f32 %v1645_v61, %v5039_v38  ;;  %v1866_v51 = vmul.f32 %v5093_v16, %v5093_v16 }
 0x264   : > { %v5095_v63 = vpop.f32.mrb[16].mxu0  ;;  %v3865_v22 = vpop.eup %3864  ;;  %v1335_v55 = vmul.f32 0.044715, %v1271_v20  ;;  %v1273_v45 = vmul.f32 %v1209_v5, %v5091_v15  ;;  %3870 = vtanh.f32 %v1461_v4 }
 0x265   : > { %6271 = vst [vmem:[#allocation21_spill] sm:$0xff] %v5095_v63  ;;  %v1077_v13 = vpop.f32.mrb[17].mxu0  ;;  %1772 = vadd.xlane.f32.xlu1 %v5102_v21  ;;  %v1867_v60 = vmul.f32 %v5102_v21, %v5102_v21  ;;  %v1583_v2 = vadd.f32 1.0, %v3865_v22 }
 0x266   : > { %v5099_v62 = vpop.f32.mrb[18].mxu0  ;;  %v5105_v40 = vadd.f32 %v1077_v13, %v5031_v48  ;;  %v3867_v54 = vpop.eup %3866  ;;  %v1399_v35 = vadd.f32 %v1335_v55, %v5082_v11  ;;  %v1337_v57 = vmul.f32 0.044715, %v1273_v45 }
 0x267   : > { %6272 = vst [vmem:[#allocation22_spill] sm:$0xff] %v5099_v62  ;;  %v1081_v44 = vpop.f32.mrb[19].mxu0  ;;  %1898 = vadd.xlane.f32.xlu0 %v1866_v51  ;;  %v1585_v43 = vadd.f32 1.0, %v3867_v54  ;;  %v1647_v56 = vmul.f32 0.5, %v1583_v2 }
 0x268   : > { %v1211_v38 = vmul.f32 %v5105_v40, %v5105_v40  ;;  %v5115_v59 = vadd.f32 %v1081_v44, %v5031_v48  ;;  %v1463_v17 = vmul.f32 0.7978846, %v1399_v35 }
 0x269   : > { %1900 = vadd.xlane.f32.xlu1 %v1867_v60  ;;  %v1649_v32 = vmul.f32 0.5, %v1585_v43  ;;  %v5129_v12 = vmul.f32 %v1647_v56, %v5047_v52  ;;  %v1401_v52 = vadd.f32 %v1337_v57, %v5091_v15 }
 0x26a   : > { %v1275_v0 = vmul.f32 %v1211_v38, %v5105_v40  ;;  %v1213_v1 = vmul.f32 %v5115_v59, %v5115_v59  ;;  %3872 = vtanh.f32 %v1463_v17 }
 0x26b   : > { %v5132_v58 = vmul.f32 %v1649_v32, %v5055_v27  ;;  %1774 = vadd.xlane.f32.xlu0 %v5129_v12  ;;  %v1868_v18 = vmul.f32 %v5129_v12, %v5129_v12  ;;  %v1465_v44 = vmul.f32 0.7978846, %v1401_v52 }
 0x26c   : > { %v5120_v46 = vpop.f32.mrb[20].mxu0  ;;  %v3869_v30 = vpop.eup %3868  ;;  %v1339_v24 = vmul.f32 0.044715, %v1275_v0  ;;  %v1277_v9 = vmul.f32 %v1213_v1, %v5115_v59 }
 0x26d   : > { %6273 = vst [vmem:[#allocation23_spill] sm:$0xff] %v5120_v46  ;;  %v1087_v6 = vpop.f32.mrb[21].mxu0  ;;  %1776 = vadd.xlane.f32.xlu1 %v5132_v58  ;;  %v1869_v10 = vmul.f32 %v5132_v58, %v5132_v58  ;;  %v1587_v28 = vadd.f32 1.0, %v3869_v30  ;;  %3874 = vtanh.f32 %v1465_v44 }
 0x26e   : > { %v5123_v7 = vpop.f32.mrb[22].mxu0  ;;  %v5145_v31 = vadd.f32 %v1087_v6, %v5031_v48  ;;  %v3871_v50 = vpop.eup %3870  ;;  %v1403_v29 = vadd.f32 %v1339_v24, %v5105_v40  ;;  %v1341_v41 = vmul.f32 0.044715, %v1277_v9 }
 0x26f   : > { %6274 = vst [vmem:[#allocation24_spill] sm:$0xff] %v5123_v7  ;;  %v1091_v14 = vpop.f32.mrb[23].mxu0  ;;  %1902 = vadd.xlane.f32.xlu0 %v1868_v18  ;;  %v1651_v23 = vmul.f32 0.5, %v1587_v28  ;;  %v1589_v61 = vadd.f32 1.0, %v3871_v50 }
 0x270   : > { %v5151_v20 = vadd.f32 %v1091_v14, %v5031_v48  ;;  %v1215_v4 = vmul.f32 %v5145_v31, %v5145_v31  ;;  %v1467_v51 = vmul.f32 0.7978846, %v1403_v29  ;;  %v1405_v54 = vadd.f32 %v1341_v41, %v5115_v59 }
 0x271   : > { %1904 = vadd.xlane.f32.xlu1 %v1869_v10  ;;  %v5154_v22 = vmul.f32 %v1651_v23, %v5065_v37  ;;  %v1653_v5 = vmul.f32 0.5, %v1589_v61 }
 0x272   : > { %v1217_v55 = vmul.f32 %v5151_v20, %v5151_v20  ;;  %v1279_v45 = vmul.f32 %v1215_v4, %v5145_v31  ;;  %v1469_v6 = vmul.f32 0.7978846, %v1405_v54  ;;  %3876 = vtanh.f32 %v1467_v51 }
 0x273   : > { %1778 = vadd.xlane.f32.xlu0 %v5154_v22  ;;  %v5163_v38 = vmul.f32 %v1653_v5, %v5073_v34  ;;  %v1870_v37 = vmul.f32 %v5154_v22, %v5154_v22 }
 0x274   : > { %v5142_v27 = vpop.f32.mrb[24].mxu0  ;;  %v3873_v56 = vpop.eup %3872  ;;  %v1281_v32 = vmul.f32 %v1217_v55, %v5151_v20  ;;  %v1343_v30 = vmul.f32 0.044715, %v1279_v45  ;;  %3878 = vtanh.f32 %v1469_v6 }
 0x275   : > { %6275 = vst [vmem:[#allocation25_spill] sm:$0xff] %v5142_v27  ;;  %v1097_v49 = vpop.f32.mrb[25].mxu0  ;;  %1780 = vadd.xlane.f32.xlu1 %v5163_v38  ;;  %v1871_v0 = vmul.f32 %v5163_v38, %v5163_v38  ;;  %v1591_v57 = vadd.f32 1.0, %v3873_v56 }
 0x276   : > { %v5147_v26 = vpop.f32.mrb[26].mxu0  ;;  %v5166_v60 = vadd.f32 %v1097_v49, %v5031_v48  ;;  %v1345_v9 = vmul.f32 0.044715, %v1281_v32  ;;  %v1407_v28 = vadd.f32 %v1343_v30, %v5145_v31 }
 0x277   : > { %6276 = vst [vmem:[#allocation26_spill] sm:$0xff] %v5147_v26  ;;  %v1101_v13 = vpop.f32.mrb[27].mxu0  ;;  %1906 = vadd.xlane.f32.xlu0 %v1870_v37  ;;  %v1655_v24 = vmul.f32 0.5, %v1591_v57  ;;  %v3875_v49 = vpop.eup %3874 }
 0x278   : > { %v5175_v35 = vadd.f32 %v1101_v13, %v5031_v48  ;;  %v1219_v14 = vmul.f32 %v5166_v60, %v5166_v60  ;;  %v1409_v29 = vadd.f32 %v1345_v9, %v5151_v20  ;;  %v1593_v41 = vadd.f32 1.0, %v3875_v49 }
 0x279   : > { %1908 = vadd.xlane.f32.xlu1 %v1871_v0  ;;  %v5188_v52 = vmul.f32 %v1655_v24, %v5082_v11  ;;  %v1471_v51 = vmul.f32 0.7978846, %v1407_v28 }
 0x27a   : > { %v1221_v17 = vmul.f32 %v5175_v35, %v5175_v35  ;;  %v1283_v18 = vmul.f32 %v1219_v14, %v5166_v60  ;;  %v1657_v54 = vmul.f32 0.5, %v1593_v41  ;;  %v1473_v45 = vmul.f32 0.7978846, %v1409_v29 }
 0x27b   : > { %1782 = vadd.xlane.f32.xlu0 %v5188_v52  ;;  %v1872_v44 = vmul.f32 %v5188_v52, %v5188_v52  ;;  %3880 = vtanh.f32 %v1471_v51 }
 0x27c   : > { %v5170_v2 = vpop.f32.mrb[28].mxu0  ;;  %v1285_v50 = vmul.f32 %v1221_v17, %v5175_v35  ;;  %v1347_v11 = vmul.f32 0.044715, %v1283_v18  ;;  %v3877_v5 = vpop.eup %3876  ;;  %v5204_v56 = vmul.f32 %v1657_v54, %v5091_v15  ;;  %3882 = vtanh.f32 %v1473_v45 }
 0x27d   : > { %6277 = vst [vmem:[#allocation27_spill] sm:$0xff] %v5170_v2  ;;  %v1107_v43 = vpop.f32.mrb[29].mxu0  ;;  %v1595_v37 = vadd.f32 1.0, %v3877_v5 }
 0x27e   : > { %v5177_v34 = vpop.f32.mrb[30].mxu0  ;;  %v5197_v61 = vadd.f32 %v1107_v43, %v5031_v48  ;;  %v1349_v55 = vmul.f32 0.044715, %v1285_v50  ;;  %v1411_v32 = vadd.f32 %v1347_v11, %v5166_v60  ;;  %v3879_v57 = vpop.eup %3878  ;;  %1784 = vadd.xlane.f32.xlu1 %v5204_v56  ;;  %v1873_v28 = vmul.f32 %v5204_v56, %v5204_v56 }
 0x27f   : > { %6278 = vst [vmem:[#allocation28_spill] sm:$0xff] %v5177_v34  ;;  %v1111_v1 = vpop.f32.mrb[31].mxu0  ;;  %1910 = vadd.xlane.f32.xlu0 %v1872_v44  ;;  %v1659_v0 = vmul.f32 0.5, %v1595_v37  ;;  %v1597_v24 = vadd.f32 1.0, %v3879_v57 }
 0x280   : > { %v1223_v43 = vmul.f32 %v5197_v61, %v5197_v61  ;;  %v5209_v6 = vadd.f32 %v1111_v1, %v5031_v48  ;;  %v1413_v17 = vadd.f32 %v1349_v55, %v5175_v35  ;;  %v1475_v50 = vmul.f32 0.7978846, %v1411_v32 }
 0x281   : > { %v5217_v15 = vmul.f32 %v1659_v0, %v5105_v40  ;;  %v1661_v29 = vmul.f32 0.5, %v1597_v24 }
 0x282   : > { %v1287_v1 = vmul.f32 %v1223_v43, %v5197_v61  ;;  %v1225_v18 = vmul.f32 %v5209_v6, %v5209_v6  ;;  %1912 = vadd.xlane.f32.xlu1 %v1873_v28  ;;  %v1477_v41 = vmul.f32 0.7978846, %v1413_v17  ;;  %3884 = vtanh.f32 %v1475_v50 }
 0x283   : > { %1786 = vadd.xlane.f32.xlu0 %v5217_v15  ;;  %v5231_v11 = vmul.f32 %v1661_v29, %v5115_v59  ;;  %v1874_v44 = vmul.f32 %v5217_v15, %v5217_v15 }
 0x284   : > { %v5190_v10 = vpop.f32.mrb[0].mxu1  ;;  %v1351_v51 = vmul.f32 0.044715, %v1287_v1  ;;  %v1289_v54 = vmul.f32 %v1225_v18, %v5209_v6  ;;  %3886 = vtanh.f32 %v1477_v41 }
 0x285   : > { %6279 = vst [vmem:[#allocation29_spill] sm:$0xff] %v5190_v10  ;;  %v1117_v23 = vpop.f32.mrb[1].mxu1  ;;  %v1875_v0 = vmul.f32 %v5231_v11, %v5231_v11 }
 0x286   : > { %v5199_v13 = vpop.f32.mrb[2].mxu1  ;;  %v5228_v40 = vadd.f32 %v1117_v23, %v5031_v48  ;;  %1788 = vadd.xlane.f32.xlu1 %v5231_v11  ;;  %v1415_v43 = vadd.f32 %v1351_v51, %v5197_v61  ;;  %v1353_v32 = vmul.f32 0.044715, %v1289_v54 }
 0x287   : > { %6280 = vst [vmem:[#allocation30_spill] sm:$0xff] %v5199_v13  ;;  %v1121_v4 = vpop.f32.mrb[3].mxu1  ;;  %1914 = vadd.xlane.f32.xlu0 %v1874_v44 }
 0x288   : > { %v5236_v5 = vadd.f32 %v1121_v4, %v5031_v48  ;;  %v1227_v55 = vmul.f32 %v5228_v40, %v5228_v40  ;;  %v3881_v4 = vpop.eup %3880  ;;  %v1479_v41 = vmul.f32 0.7978846, %v1415_v43  ;;  %v1417_v44 = vadd.f32 %v1353_v32, %v5209_v6 }
 0x289   : > { %v1599_v24 = vadd.f32 1.0, %v3881_v4  ;;  %v3883_v18 = vpop.eup %3882 }
 0x28a   : > { %v1229_v37 = vmul.f32 %v5236_v5, %v5236_v5  ;;  %v1291_v17 = vmul.f32 %v1227_v55, %v5228_v40  ;;  %1916 = vadd.xlane.f32.xlu1 %v1875_v0  ;;  %v1601_v29 = vadd.f32 1.0, %v3883_v18  ;;  %3888 = vtanh.f32 %v1479_v41 }
 0x28b   : > { %v1663_v50 = vmul.f32 0.5, %v1599_v24 }
 0x28c   : > { %v5212_v14 = vpop.f32.mrb[4].mxu1  ;;  %v1293_v28 = vmul.f32 %v1229_v37, %v5236_v5  ;;  %v1355_v51 = vmul.f32 0.044715, %v1291_v17  ;;  %v1665_v39 = vmul.f32 0.5, %v1601_v29  ;;  %v3885_v37 = vpop.eup %3884 }
 0x28d   : > { %6281 = vst [vmem:[#allocation31_spill] sm:$0xff] %v5212_v14  ;;  %v1127_v30 = vpop.f32.mrb[5].mxu1  ;;  %v5258_v54 = vmul.f32 %v1663_v50, %v5145_v31  ;;  %v1481_v31 = vmul.f32 0.7978846, %v1417_v44  ;;  %v1603_v17 = vadd.f32 1.0, %v3885_v37 }
 0x28e   : > { %v5219_v9 = vpop.f32.mrb[6].mxu1  ;;  %v5253_v1 = vadd.f32 %v1127_v30, %v5031_v48  ;;  %v1357_v24 = vmul.f32 0.044715, %v1293_v28  ;;  %v5269_v43 = vmul.f32 %v1665_v39, %v5151_v20  ;;  %v3887_v50 = vpop.eup %3886  ;;  %v1419_v29 = vadd.f32 %v1355_v51, %v5228_v40 }
 0x28f   : > { %6282 = vst [vmem:[#allocation32_spill] sm:$0xff] %v5219_v9  ;;  %v1131_v49 = vpop.f32.mrb[7].mxu1  ;;  %1790 = vadd.xlane.f32.xlu0 %v5258_v54  ;;  %v1876_v28 = vmul.f32 %v5258_v54, %v5258_v54  ;;  %v1667_v20 = vmul.f32 0.5, %v1603_v17  ;;  %3890 = vtanh.f32 %v1481_v31 }
 0x290   : > { %v1231_v55 = vmul.f32 %v5253_v1, %v5253_v1  ;;  %v5265_v30 = vadd.f32 %v1131_v49, %v5031_v48  ;;  %1792 = vadd.xlane.f32.xlu1 %v5269_v43  ;;  %v1421_v37 = vadd.f32 %v1357_v24, %v5236_v5  ;;  %v1877_v51 = vmul.f32 %v5269_v43, %v5269_v43 }
 0x291   : > { %v1483_v41 = vmul.f32 0.7978846, %v1419_v29 }
 0x292   : > { %v1295_v49 = vmul.f32 %v1231_v55, %v5253_v1  ;;  %v1233_v39 = vmul.f32 %v5265_v30, %v5265_v30  ;;  %v5287_v55 = vmul.f32 %v1667_v20, %v5166_v60  ;;  %v1485_v20 = vmul.f32 0.7978846, %v1421_v37 }
 0x293   : > { %1918 = vadd.xlane.f32.xlu0 %v1876_v28  ;;  %3892 = vtanh.f32 %v1483_v41 }
 0x294   : > { %v5241_v23 = vpop.f32.mrb[8].mxu1  ;;  %1920 = vadd.xlane.f32.xlu1 %v1877_v51  ;;  %3894 = vtanh.f32 %v1485_v20 }
 0x295   : > { %6283 = vst [vmem:[#allocation33_spill] sm:$0xff] %v5241_v23  ;;  %v1137_v59 = vpop.f32.mrb[9].mxu1 }
 0x296   : > { %v5246_v45 = vpop.f32.mrb[10].mxu1  ;;  %v5281_v44 = vadd.f32 %v1137_v59, %v5031_v48  ;;  %v1359_v59 = vmul.f32 0.044715, %v1295_v49 }
 0x297   : > { %6284 = vst [vmem:[#allocation34_spill] sm:$0xff] %v5246_v45  ;;  %v1141_v57 = vpop.f32.mrb[11].mxu1  ;;  %v1605_v45 = vadd.f32 1.0, %v3887_v50  ;;  %v1297_v50 = vmul.f32 %v1233_v39, %v5265_v30  ;;  %1794 = vadd.xlane.f32.xlu0 %v5287_v55  ;;  %v3889_v39 = vpop.eup %3888 }
 0x298   : > { %v5290_v23 = vadd.f32 %v1141_v57, %v5031_v48  ;;  %v1235_v28 = vmul.f32 %v5281_v44, %v5281_v44  ;;  %v1878_v57 = vmul.f32 %v5287_v55, %v5287_v55 }
 0x29a   : > { %v1237_v29 = vmul.f32 %v5290_v23, %v5290_v23  ;;  %v1299_v49 = vmul.f32 %v1235_v28, %v5281_v44 }
 0x29b   : > { %1922 = vadd.xlane.f32.xlu0 %v1878_v57 }
 0x29c   : > { %v5262_v4 = vpop.f32.mrb[12].mxu1  ;;  %v1363_v57 = vmul.f32 0.044715, %v1299_v49 }
 0x29d   : > { %6285 = vst [vmem:[#allocation35_spill] sm:$0xff] %v5262_v4  ;;  %v1147_v0 = vpop.f32.mrb[13].mxu1 }
 0x29e   : > { %v5271_v32 = vpop.f32.mrb[14].mxu1  ;;  %v5313_v51 = vadd.f32 %v1147_v0, %v5031_v48 }
 0x29f   : > { %6286 = vst [vmem:[#allocation36_spill] sm:$0xff] %v5271_v32  ;;  %v1151_v18 = vpop.f32.mrb[15].mxu1  ;;  %v1669_v32 = vmul.f32 0.5, %v1605_v45 }
 0x2a0   : > { %v5317_v4 = vadd.f32 %v1151_v18, %v5031_v48  ;;  %v1239_v0 = vmul.f32 %v5313_v51, %v5313_v51 }
 0x2a1   : > { %v5296_v24 = vmul.f32 %v1669_v32, %v5175_v35  ;;  %v1423_v35 = vadd.f32 %v1359_v59, %v5253_v1  ;;  %v1361_v32 = vmul.f32 0.044715, %v1297_v50  ;;  %v3891_v50 = vpop.eup %3890 }
 0x2a2   : > { %v1609_v14 = vadd.f32 1.0, %v3891_v50  ;;  %v1303_v49 = vmul.f32 %v1239_v0, %v5313_v51  ;;  %v3893_v50 = vpop.eup %3892 }
 0x2a3   : > { %1796 = vadd.xlane.f32.xlu1 %v5296_v24  ;;  %v1879_v37 = vmul.f32 %v5296_v24, %v5296_v24  ;;  %v1487_v41 = vmul.f32 0.7978846, %v1423_v35  ;;  %v1425_v28 = vadd.f32 %v1361_v32, %v5265_v30  ;;  %v1241_v35 = vmul.f32 %v5317_v4, %v5317_v4 }
 0x2a4   : > { %v5292_v17 = vpop.f32.mrb[16].mxu1  ;;  %v1427_v32 = vadd.f32 %v1363_v57, %v5281_v44 }
 0x2a5   : > { %6287 = vst [vmem:[#allocation37_spill] sm:$0xff] %v5292_v17  ;;  %v1157_v60 = vpop.f32.mrb[17].mxu1  ;;  %v1301_v17 = vmul.f32 %v1237_v29, %v5290_v23  ;;  %3896 = vtanh.f32 %v1487_v41  ;;  %v1611_v41 = vadd.f32 1.0, %v3893_v50 }
 0x2a6   : > { %v5301_v45 = vpop.f32.mrb[18].mxu1 }
 0x2a7   : > { %6288 = vst [vmem:[#allocation38_spill] sm:$0xff] %v5301_v45  ;;  %v1161_v31 = vpop.f32.mrb[19].mxu1  ;;  %v1607_v45 = vadd.f32 1.0, %v3889_v39  ;;  %1924 = vadd.xlane.f32.xlu1 %v1879_v37  ;;  %v1365_v39 = vmul.f32 0.044715, %v1301_v17  ;;  %v1673_v37 = vmul.f32 0.5, %v1609_v14  ;;  %v5340_v14 = vadd.f32 %v1157_v60, %v5031_v48 }
 0x2a8   : > { %v1367_v60 = vmul.f32 0.044715, %v1303_v49 }
 0x2a9   : > { %v1671_v9 = vmul.f32 0.5, %v1607_v45  ;;  %v5334_v45 = vmul.f32 %v1673_v37, %v5209_v6  ;;  %v1429_v17 = vadd.f32 %v1365_v39, %v5290_v23  ;;  %v1491_v6 = vmul.f32 0.7978846, %v1427_v32 }
 0x2aa   : > { %v5348_v37 = vadd.f32 %v1161_v31, %v5031_v48  ;;  %v1675_v39 = vmul.f32 0.5, %v1611_v41  ;;  %v1243_v32 = vmul.f32 %v5340_v14, %v5340_v14 }
 0x2ab   : > { %v5327_v29 = vmul.f32 %v1671_v9, %v5197_v61  ;;  %v3895_v9 = vpop.eup %3894  ;;  %1800 = vadd.xlane.f32.xlu1 %v5334_v45  ;;  %v1881_v10 = vmul.f32 %v5334_v45, %v5334_v45 }
 0x2ac   : > { %v5319_v59 = vpop.f32.mrb[20].mxu1  ;;  %v1613_v0 = vadd.f32 1.0, %v3895_v9  ;;  %v5363_v49 = vmul.f32 %v1675_v39, %v5228_v40 }
 0x2ad   : > { %6289 = vst [vmem:[#allocation39_spill] sm:$0xff] %v5319_v59  ;;  %v1167_v13 = vpop.f32.mrb[21].mxu1  ;;  %v1489_v59 = vmul.f32 0.7978846, %v1425_v28  ;;  %1798 = vadd.xlane.f32.xlu0 %v5327_v29  ;;  %v1880_v61 = vmul.f32 %v5327_v29, %v5327_v29  ;;  %v1305_v28 = vmul.f32 %v1241_v35, %v5317_v4 }
 0x2ae   : > { %v5324_v20 = vpop.f32.mrb[22].mxu1  ;;  %v5353_v34 = vadd.f32 %v1167_v13, %v5031_v48  ;;  %v1677_v50 = vmul.f32 0.5, %v1613_v0  ;;  %v1245_v13 = vmul.f32 %v5348_v37, %v5348_v37  ;;  %v1431_v0 = vadd.f32 %v1367_v60, %v5313_v51 }
 0x2af   : > { %6290 = vst [vmem:[#allocation40_spill] sm:$0xff] %v5324_v20  ;;  %v1171_v18 = vpop.f32.mrb[23].mxu1  ;;  %3898 = vtanh.f32 %v1489_v59  ;;  %v1493_v59 = vmul.f32 0.7978846, %v1429_v17  ;;  %v1369_v9 = vmul.f32 0.044715, %v1305_v28  ;;  %1928 = vadd.xlane.f32.xlu1 %v1881_v10  ;;  %v3897_v17 = vpop.eup %3896  ;;  %v1307_v10 = vmul.f32 %v1243_v32, %v5340_v14 }
 0x2b0   : > { %v5366_v41 = vmul.f32 %v1677_v50, %v5236_v5  ;;  %3900 = vtanh.f32 %v1491_v6  ;;  %v1882_v28 = vmul.f32 %v5363_v49, %v5363_v49  ;;  %v1615_v60 = vadd.f32 1.0, %v3897_v17 }
 0x2b1   : > { %1926 = vadd.xlane.f32.xlu0 %v1880_v61  ;;  %v5360_v61 = vadd.f32 %v1171_v18, %v5031_v48  ;;  %v1247_v18 = vmul.f32 %v5353_v34, %v5353_v34  ;;  %v1433_v5 = vadd.f32 %v1369_v9, %v5317_v4  ;;  %3902 = vtanh.f32 %v1493_v59 }
 0x2b2   : > { %v1309_v50 = vmul.f32 %v1245_v13, %v5348_v37  ;;  %v1495_v32 = vmul.f32 0.7978846, %v1431_v0  ;;  %v1679_v9 = vmul.f32 0.5, %v1615_v60  ;;  %v1371_v2 = vmul.f32 0.044715, %v1307_v10 }
 0x2b3   : > { %v1249_v40 = vmul.f32 %v5360_v61, %v5360_v61  ;;  %1804 = vadd.xlane.f32.xlu1 %v5366_v41  ;;  %v1497_v0 = vmul.f32 0.7978846, %v1433_v5 }
 0x2b4   : > { %v5345_v57 = vpop.f32.mrb[24].mxu1  ;;  %3904 = vtanh.f32 %v1495_v32 }
 0x2b5   : > { %6291 = vst [vmem:[#allocation41_spill] sm:$0xff] %v5345_v57  ;;  %v1177_v20 = vpop.f32.mrb[25].mxu1  ;;  %1802 = vadd.xlane.f32.xlu0 %v5363_v49  ;;  %v1311_v57 = vmul.f32 %v1247_v18, %v5353_v34  ;;  %v1313_v59 = vmul.f32 %v1249_v40, %v5360_v61  ;;  %3906 = vtanh.f32 %v1497_v0 }
 0x2b6   : > { %v5355_v35 = vpop.f32.mrb[26].mxu1  ;;  %v5385_v6 = vadd.f32 %v1177_v20, %v5031_v48 }
 0x2b7   : > { %6292 = vst [vmem:[#allocation42_spill] sm:$0xff] %v5355_v35  ;;  %v1181_v31 = vpop.f32.mrb[27].mxu1  ;;  %v1883_v35 = vmul.f32 %v5366_v41, %v5366_v41  ;;  %v1375_v62 = vmul.f32 0.044715, %v1311_v57 }
 0x2b8   : > { %v1251_v17 = vmul.f32 %v5385_v6, %v5385_v6  ;;  %v5394_v13 = vadd.f32 %v1181_v31, %v5031_v48  ;;  %v1435_v31 = vadd.f32 %v1371_v2, %v5340_v14 }
 0x2b9   : > { %1930 = vadd.xlane.f32.xlu0 %v1882_v28  ;;  %v3899_v27 = vpop.eup %3898  ;;  %1932 = vadd.xlane.f32.xlu1 %v1883_v35  ;;  %v5399_v28 = vmul.f32 %v1679_v9, %v5253_v1  ;;  %v1377_v35 = vmul.f32 0.044715, %v1313_v59  ;;  %v1439_v59 = vadd.f32 %v1375_v62, %v5353_v34 }
 0x2ba   : > { %v1617_v60 = vadd.f32 1.0, %v3899_v27  ;;  %v1253_v10 = vmul.f32 %v5394_v13, %v5394_v13  ;;  %v1315_v1 = vmul.f32 %v1251_v17, %v5385_v6  ;;  %v3901_v9 = vpop.eup %3900  ;;  %v1499_v17 = vmul.f32 0.7978846, %v1435_v31 }
 0x2bb   : > { %v1884_v5 = vmul.f32 %v5399_v28, %v5399_v28  ;;  %v1619_v32 = vadd.f32 1.0, %v3901_v9  ;;  %v3903_v2 = vpop.eup %3902  ;;  %v1503_v31 = vmul.f32 0.7978846, %v1439_v59 }
 0x2bc   : > { %v5381_v39 = vpop.f32.mrb[28].mxu1  ;;  %v1681_v40 = vmul.f32 0.5, %v1617_v60  ;;  %v1441_v60 = vadd.f32 %v1377_v35, %v5360_v61  ;;  %3908 = vtanh.f32 %v1499_v17 }
 0x2bd   : > { %6293 = vst [vmem:[#allocation43_spill] sm:$0xff] %v5381_v39  ;;  %v1187_v26 = vpop.f32.mrb[29].mxu1  ;;  %v1373_v39 = vmul.f32 0.044715, %v1309_v50  ;;  %1806 = vadd.xlane.f32.xlu0 %v5399_v28  ;;  %v1317_v50 = vmul.f32 %v1253_v10, %v5394_v13  ;;  %v1379_v10 = vmul.f32 0.044715, %v1315_v1 }
 0x2be   : > { %v5396_v20 = vpop.f32.mrb[30].mxu1  ;;  %v5409_v27 = vmul.f32 %v1681_v40, %v5265_v30  ;;  %v1683_v30 = vmul.f32 0.5, %v1619_v32  ;;  %v1621_v40 = vadd.f32 1.0, %v3903_v2 }
 0x2bf   : > { %6294 = vst [vmem:[#allocation44_spill] sm:$0xff] %v5396_v20  ;;  %v1191_v18 = vpop.f32.mrb[31].mxu1  ;;  %v5413_v20 = vadd.f32 %v1187_v26, %v5031_v48  ;;  %v1437_v57 = vadd.f32 %v1373_v39, %v5348_v37  ;;  %v1381_v26 = vmul.f32 0.044715, %v1317_v50  ;;  %v3905_v50 = vpop.eup %3904 }
 0x2c0   : > { %1808 = vadd.xlane.f32.xlu1 %v5409_v27  ;;  %v1885_v0 = vmul.f32 %v5409_v27, %v5409_v27  ;;  %v5424_v7 = vmul.f32 %v1683_v30, %v5281_v44  ;;  %v1685_v63 = vmul.f32 0.5, %v1621_v40  ;;  %v5427_v62 = vadd.f32 %v1191_v18, %v5031_v48 }
 0x2c1   : > { %1934 = vadd.xlane.f32.xlu0 %v1884_v5  ;;  %v1255_v39 = vmul.f32 %v5413_v20, %v5413_v20  ;;  %v1501_v9 = vmul.f32 0.7978846, %v1437_v57  ;;  %v1505_v5 = vmul.f32 0.7978846, %v1441_v60  ;;  %v1443_v57 = vadd.f32 %v1379_v10, %v5385_v6 }
 0x2c2   : > { %v5431_v35 = vmul.f32 %v1685_v63, %v5290_v23  ;;  %v1257_v1 = vmul.f32 %v5427_v62, %v5427_v62  ;;  %v1445_v44 = vadd.f32 %v1381_v26, %v5394_v13  ;;  %v1886_v48 = vmul.f32 %v5424_v7, %v5424_v7  ;;  %v3907_v63 = vpop.eup %3906 }
 0x2c3   : > { %v1319_v32 = vmul.f32 %v1255_v39, %v5413_v20  ;;  %v1623_v18 = vadd.f32 1.0, %v3905_v50  ;;  %3910 = vtanh.f32 %v1501_v9  ;;  %v1625_v59 = vadd.f32 1.0, %v3907_v63 }
 0x2c4   : > { %1936 = vadd.xlane.f32.xlu1 %v1885_v0  ;;  %v1321_v2 = vmul.f32 %v1257_v1, %v5427_v62  ;;  %3912 = vtanh.f32 %v1503_v31  ;;  %v1507_v60 = vmul.f32 0.7978846, %v1443_v57  ;;  %v1887_v30 = vmul.f32 %v5431_v35, %v5431_v35 }
 0x2c5   : > { %1810 = vadd.xlane.f32.xlu0 %v5424_v7  ;;  %v1687_v23 = vmul.f32 0.5, %v1623_v18  ;;  %3914 = vtanh.f32 %v1505_v5  ;;  %v1383_v17 = vmul.f32 0.044715, %v1319_v32  ;;  %v1509_v40 = vmul.f32 0.7978846, %v1445_v44 }
 0x2c6   : > { %v1689_v10 = vmul.f32 0.5, %v1625_v59  ;;  %v1385_v26 = vmul.f32 0.044715, %v1321_v2  ;;  %3916 = vtanh.f32 %v1507_v60  ;;  %v3909_v1 = vpop.eup %3908 }
 0x2c7   : > { %v5445_v0 = vmul.f32 %v1687_v23, %v5313_v51  ;;  %v1447_v9 = vadd.f32 %v1383_v17, %v5413_v20  ;;  %3918 = vtanh.f32 %v1509_v40  ;;  %v1627_v50 = vadd.f32 1.0, %v3909_v1 }
 0x2c8   : > { %1812 = vadd.xlane.f32.xlu1 %v5431_v35  ;;  %v5449_v39 = vmul.f32 %v1689_v10, %v5317_v4  ;;  %v1449_v5 = vadd.f32 %v1385_v26, %v5427_v62 }
 0x2c9   : > { %1938 = vadd.xlane.f32.xlu0 %v1886_v48  ;;  %v1888_v31 = vmul.f32 %v5445_v0, %v5445_v0  ;;  %v1511_v44 = vmul.f32 0.7978846, %v1447_v9  ;;  %v1691_v2 = vmul.f32 0.5, %v1627_v50 }
 0x2ca   : > { %v1889_v4 = vmul.f32 %v5449_v39, %v5449_v39  ;;  %v1513_v18 = vmul.f32 0.7978846, %v1449_v5 }
 0x2cb   : > { %v5459_v60 = vmul.f32 %v1691_v2, %v5340_v14  ;;  %3920 = vtanh.f32 %v1511_v44 }
 0x2cc   : > { %1940 = vadd.xlane.f32.xlu1 %v1887_v30  ;;  %3922 = vtanh.f32 %v1513_v18 }
 0x2cd   : > { %1814 = vadd.xlane.f32.xlu0 %v5445_v0  ;;  %v3911_v51 = vpop.eup %3910  ;;  %v1890_v9 = vmul.f32 %v5459_v60, %v5459_v60 }
 0x2ce   : > { %v3913_v57 = vpop.eup %3912  ;;  %v1629_v32 = vadd.f32 1.0, %v3911_v51 }
 0x2cf   : > { %v3915_v48 = vpop.eup %3914  ;;  %v1631_v63 = vadd.f32 1.0, %v3913_v57 }
 0x2d0   : > { %1816 = vadd.xlane.f32.xlu1 %v5449_v39  ;;  %v1693_v23 = vmul.f32 0.5, %v1629_v32  ;;  %v1633_v59 = vadd.f32 1.0, %v3915_v48  ;;  %v3917_v40 = vpop.eup %3916 }
 0x2d1   : > { %1942 = vadd.xlane.f32.xlu0 %v1888_v31  ;;  %v1695_v17 = vmul.f32 0.5, %v1631_v63  ;;  %v3919_v26 = vpop.eup %3918  ;;  %v5468_v31 = vld [vmem:[#allocation7] sm:$0xff]   ;;  %v1635_v5 = vadd.f32 1.0, %v3917_v40 }
 0x2d2   : > { %v5462_v30 = vmul.f32 %v1693_v23, %v5348_v37  ;;  %v1697_v10 = vmul.f32 0.5, %v1633_v59  ;;  %3516 = vmatprep.mubr.bf16.mxu1 %v5468_v31  ;;  %v1637_v51 = vadd.f32 1.0, %v3919_v26 }
 0x2d3   : > { %v5473_v37 = vmul.f32 %v1695_v17, %v5353_v34  ;;  %v1699_v50 = vmul.f32 0.5, %v1635_v5 }
 0x2d4   : > { %1944 = vadd.xlane.f32.xlu1 %v1889_v4  ;;  %v1891_v14 = vmul.f32 %v5462_v30, %v5462_v30  ;;  %v5477_v1 = vmul.f32 %v1697_v10, %v5360_v61  ;;  %v1701_v44 = vmul.f32 0.5, %v1637_v51 }
 0x2d5   : > { %1818 = vadd.xlane.f32.xlu0 %v5459_v60  ;;  %v3921_v57 = vpop.eup %3920  ;;  %v1892_v34 = vmul.f32 %v5473_v37, %v5473_v37  ;;  %v5486_v48 = vmul.f32 %v1699_v50, %v5385_v6 }
 0x2d6   : > { %v3923_v4 = vpop.eup %3922  ;;  %v1893_v32 = vmul.f32 %v5477_v1, %v5477_v1  ;;  %v1639_v61 = vadd.f32 1.0, %v3921_v57  ;;  %v5489_v18 = vmul.f32 %v1701_v44, %v5394_v13 }
 0x2d7   : > { %v1641_v2 = vadd.f32 1.0, %v3923_v4  ;;  %v1894_v59 = vmul.f32 %v5486_v48, %v5486_v48 }
 0x2d8   : > { %1820 = vadd.xlane.f32.xlu1 %v5462_v30  ;;  %v1703_v63 = vmul.f32 0.5, %v1639_v61  ;;  %v1895_v17 = vmul.f32 %v5489_v18, %v5489_v18 }
 0x2d9   : > { %1946 = vadd.xlane.f32.xlu0 %v1890_v9  ;;  %v1705_v23 = vmul.f32 0.5, %v1641_v2 }
 0x2da   : > { %v5498_v6 = vmul.f32 %v1703_v63, %v5413_v20 }
 0x2db   : > { %v5501_v13 = vmul.f32 %v1705_v23, %v5427_v62 }
 0x2dc   : > { %1948 = vadd.xlane.f32.xlu1 %v1891_v14  ;;  %v1896_v9 = vmul.f32 %v5498_v6, %v5498_v6 }
 0x2dd   : > { %1822 = vadd.xlane.f32.xlu0 %v5473_v37  ;;  %v1897_v20 = vmul.f32 %v5501_v13, %v5501_v13 }
 0x2e0   : > { %1824 = vadd.xlane.f32.xlu1 %v5477_v1 }
 0x2e1   : > { %1950 = vadd.xlane.f32.xlu0 %v1892_v34 }
 0x2e4   : > { %1952 = vadd.xlane.f32.xlu1 %v1893_v32 }
 0x2e5   : > { %1826 = vadd.xlane.f32.xlu0 %v5486_v48 }
 0x2e8   : > { %1828 = vadd.xlane.f32.xlu1 %v5489_v18 }
 0x2e9   : > { %1954 = vadd.xlane.f32.xlu0 %v1894_v59 }
 0x2ec   : > { %1956 = vadd.xlane.f32.xlu1 %v1895_v17 }
 0x2ed   : > { %1830 = vadd.xlane.f32.xlu0 %v5498_v6 }
 0x2f0   : > { %v1771_v40 = vpop.xlane.xlu0 %1770  ;;  %1832 = vadd.xlane.f32.xlu1 %v5501_v13 }
 0x2f1   : > { %v1834_v10 = vmul.f32 0.0078125, %v1771_v40  ;;  %1958 = vadd.xlane.f32.xlu0 %v1896_v9 }
 0x2f2   : > { %v1773_v26 = vpop.xlane.xlu1 %1772 }
 0x2f3   : > { %v1835_v14 = vmul.f32 0.0078125, %v1773_v26  ;;  %v2026_v51 = vmul.f32 %v1834_v10, %v1834_v10 }
 0x2f4   : > { %v1899_v5 = vpop.xlane.xlu0 %1898  ;;  %1960 = vadd.xlane.f32.xlu1 %v1897_v20 }
 0x2f5   : > { %v1962_v50 = vmul.f32 0.0078125, %v1899_v5  ;;  %v2027_v44 = vmul.f32 %v1835_v14, %v1835_v14 }
 0x2f6   : > { %v1901_v57 = vpop.xlane.xlu1 %1900 }
 0x2f7   : > { %v2058_v62 = vsub.f32 %v1962_v50, %v2026_v51  ;;  %v1963_v4 = vmul.f32 0.0078125, %v1901_v57 }
 0x2f8   : > { %v1775_v61 = vpop.xlane.xlu0 %1774 }
 0x2f9   : > { %v2090_v34 = vadd.f32 1e-05, %v2058_v62  ;;  %v2059_v32 = vsub.f32 %v1963_v4, %v2027_v44  ;;  %v1836_v63 = vmul.f32 0.0078125, %v1775_v61  ;;  %v1994_v4 = vsub.f32 %v5093_v16, %v1834_v10 }
 0x2fa   : > { %v1777_v23 = vpop.xlane.xlu1 %1776 }
 0x2fb   : > { %3924 = vrsqrt.f32 %v2090_v34  ;;  %v2091_v2 = vadd.f32 1e-05, %v2059_v32  ;;  %v1837_v59 = vmul.f32 0.0078125, %v1777_v23  ;;  %v2028_v40 = vmul.f32 %v1836_v63, %v1836_v63 }
 0x2fc   : > { %v1903_v17 = vpop.xlane.xlu0 %1902  ;;  %v1995_v34 = vsub.f32 %v5102_v21, %v1835_v14  ;;  %v1996_v21 = vsub.f32 %v5129_v12, %v1836_v63 }
 0x2fd   : > { %3926 = vrsqrt.f32 %v2091_v2  ;;  %v1964_v26 = vmul.f32 0.0078125, %v1903_v17  ;;  %v2029_v5 = vmul.f32 %v1837_v59, %v1837_v59  ;;  %v1997_v10 = vsub.f32 %v5132_v58, %v1837_v59 }
 0x2fe   : > { %v1905_v46 = vpop.xlane.xlu1 %1904 }
 0x2ff   : > { %v1965_v9 = vmul.f32 0.0078125, %v1905_v46  ;;  %v2060_v20 = vsub.f32 %v1964_v26, %v2028_v40 }
 0x300   : > { %v1779_v19 = vpop.xlane.xlu0 %1778 }
 0x301   : > { %v2061_v51 = vsub.f32 %v1965_v9, %v2029_v5  ;;  %v2092_v50 = vadd.f32 1e-05, %v2060_v20  ;;  %v1838_v62 = vmul.f32 0.0078125, %v1779_v19 }
 0x302   : > { %v1781_v32 = vpop.xlane.xlu1 %1780 }
 0x303   : > { %v2093_v57 = vadd.f32 1e-05, %v2061_v51  ;;  %3928 = vrsqrt.f32 %v2092_v50  ;;  %v1839_v2 = vmul.f32 0.0078125, %v1781_v32  ;;  %v2030_v17 = vmul.f32 %v1838_v62, %v1838_v62 }
 0x304   : > { %v1907_v23 = vpop.xlane.xlu0 %1906  ;;  %v1998_v58 = vsub.f32 %v5154_v22, %v1838_v62 }
 0x305   : > { %v3925_v44 = vpop.eup %3924  ;;  %3930 = vrsqrt.f32 %v2093_v57  ;;  %v1966_v8 = vmul.f32 0.0078125, %v1907_v23  ;;  %v2031_v20 = vmul.f32 %v1839_v2, %v1839_v2  ;;  %v1999_v59 = vsub.f32 %v5163_v38, %v1839_v2 }
 0x306   : > { %v2154_v46 = vmul.f32 %v3925_v44, %v1994_v4  ;;  %v1909_v5 = vpop.xlane.xlu1 %1908 }
 0x307   : > { %v3927_v61 = vpop.eup %3926  ;;  %v2062_v26 = vsub.f32 %v1966_v8, %v2030_v17  ;;  %v1967_v19 = vmul.f32 0.0078125, %v1909_v5 }
 0x308   : > { %v2155_v40 = vmul.f32 %v3927_v61, %v1995_v34  ;;  %v1783_v57 = vpop.xlane.xlu0 %1782 }
 0x309   : > { %v2094_v51 = vadd.f32 1e-05, %v2062_v26  ;;  %v2063_v50 = vsub.f32 %v1967_v19, %v2031_v20  ;;  %v1840_v44 = vmul.f32 0.0078125, %v1783_v57 }
 0x30a   : > { %v2219_v9 = vpack.c.bf16 %v2155_v40, %v2154_v46 }
 0x30b   : > { %3932 = vrsqrt.f32 %v2094_v51  ;;  %v2095_v14 = vadd.f32 1e-05, %v2063_v50  ;;  %v2032_v17 = vmul.f32 %v1840_v44, %v1840_v44  ;;  %v1785_v46 = vpop.xlane.xlu1 %1784 }
 0x30c   : > { %3500 = vmatprep.subr.bf16.mxu1 %v2219_v9  ;;  %v1911_v34 = vpop.xlane.xlu0 %1910  ;;  %v1841_v40 = vmul.f32 0.0078125, %v1785_v46 }
 0x30d   : > { %3501 = vmatpush3.bf16.msra.mxu1 %v2219_v9  ;;  %v3929_v16 = vpop.eup %3928  ;;  %3934 = vrsqrt.f32 %v2095_v14  ;;  %v1968_v23 = vmul.f32 0.0078125, %v1911_v34 }
 0x30e   : > { %v2156_v8 = vmul.f32 %v3929_v16, %v1996_v21  ;;  %v2033_v19 = vmul.f32 %v1841_v40, %v1841_v40 }
 0x30f   : > { %v3931_v32 = vpop.eup %3930  ;;  %v2064_v26 = vsub.f32 %v1968_v23, %v2032_v17  ;;  %v1913_v5 = vpop.xlane.xlu1 %1912 }
 0x310   : > { %v2157_v4 = vmul.f32 %v3931_v32, %v1997_v10  ;;  %v1787_v63 = vpop.xlane.xlu0 %1786  ;;  %v1969_v50 = vmul.f32 0.0078125, %v1913_v5  ;;  %v2001_v5 = vsub.f32 %v5204_v56, %v1841_v40 }
 0x311   : > { %v1842_v9 = vmul.f32 0.0078125, %v1787_v63  ;;  %v2096_v51 = vadd.f32 1e-05, %v2064_v26 }
 0x312   : > { %v2220_v61 = vpack.c.bf16 %v2157_v4, %v2156_v8  ;;  %v2065_v10 = vsub.f32 %v1969_v50, %v2033_v19 }
 0x313   : > { %v2034_v57 = vmul.f32 %v1842_v9, %v1842_v9  ;;  %v1789_v32 = vpop.xlane.xlu1 %1788  ;;  %3936 = vrsqrt.f32 %v2096_v51 }
 0x314   : > { %3502 = vmatprep.subr.bf16.mxu1 %v2220_v61  ;;  %v1915_v14 = vpop.xlane.xlu0 %1914  ;;  %v2097_v34 = vadd.f32 1e-05, %v2065_v10 }
 0x315   : > { %3503 = vmatpush3.bf16.msra.mxu1 %v2220_v61  ;;  %v3933_v12 = vpop.eup %3932  ;;  %v1970_v8 = vmul.f32 0.0078125, %v1915_v14  ;;  %v1843_v61 = vmul.f32 0.0078125, %v1789_v32 }
 0x316   : > { %v2158_v16 = vmul.f32 %v3933_v12, %v1998_v58  ;;  %3938 = vrsqrt.f32 %v2097_v34 }
 0x317   : > { %v3935_v20 = vpop.eup %3934  ;;  %v2066_v22 = vsub.f32 %v1970_v8, %v2034_v57  ;;  %v1917_v62 = vpop.xlane.xlu1 %1916  ;;  %v2035_v2 = vmul.f32 %v1843_v61, %v1843_v61 }
 0x318   : > { %v2159_v21 = vmul.f32 %v3935_v20, %v1999_v59  ;;  %v1971_v23 = vmul.f32 0.0078125, %v1917_v62  ;;  %v2000_v59 = vsub.f32 %v5188_v52, %v1840_v44  ;;  %v2002_v52 = vsub.f32 %v5217_v15, %v1842_v9 }
 0x319   : > { %v2098_v38 = vadd.f32 1e-05, %v2066_v22  ;;  %v2003_v44 = vsub.f32 %v5231_v11, %v1843_v61 }
 0x31a   : > { %v2221_v4 = vpack.c.bf16 %v2159_v21, %v2158_v16  ;;  %v2067_v17 = vsub.f32 %v1971_v23, %v2035_v2 }
 0x31b   : > { %3940 = vrsqrt.f32 %v2098_v38 }
 0x31c   : > { %3504 = vmatprep.subr.bf16.mxu1 %v2221_v4  ;;  %v2099_v46 = vadd.f32 1e-05, %v2067_v17  ;;  %v1791_v26 = vpop.xlane.xlu0 %1790 }
 0x31d   : > { %3505 = vmatpush3.bf16.msra.mxu1 %v2221_v4  ;;  %v1844_v12 = vmul.f32 0.0078125, %v1791_v26  ;;  %v3937_v63 = vpop.eup %3936  ;;  %v1793_v58 = vpop.xlane.xlu1 %1792 }
 0x31e   : > { %3942 = vrsqrt.f32 %v2099_v46  ;;  %v1845_v20 = vmul.f32 0.0078125, %v1793_v58  ;;  %v2160_v21 = vmul.f32 %v3937_v63, %v2000_v59 }
 0x31f   : > { %v2036_v50 = vmul.f32 %v1844_v12, %v1844_v12 }
 0x320   : > { %v3939_v19 = vpop.eup %3938  ;;  %v1919_v51 = vpop.xlane.xlu0 %1918  ;;  %v2037_v57 = vmul.f32 %v1845_v20, %v1845_v20 }
 0x321   : > { %v1972_v16 = vmul.f32 0.0078125, %v1919_v51  ;;  %v2161_v10 = vmul.f32 %v3939_v19, %v2001_v5  ;;  %v1921_v14 = vpop.xlane.xlu1 %1920 }
 0x322   : > { %v1973_v8 = vmul.f32 0.0078125, %v1921_v14  ;;  %v2004_v14 = vsub.f32 %v5258_v54, %v1844_v12 }
 0x323   : > { %v2068_v32 = vsub.f32 %v1972_v16, %v2036_v50  ;;  %v2222_v4 = vpack.c.bf16 %v2161_v10, %v2160_v21 }
 0x324   : > { %v1795_v34 = vpop.xlane.xlu0 %1794  ;;  %v2069_v62 = vsub.f32 %v1973_v8, %v2037_v57  ;;  %v2005_v57 = vsub.f32 %v5269_v43, %v1845_v20 }
 0x325   : > { %v3941_v22 = vpop.eup %3940  ;;  %v2100_v38 = vadd.f32 1e-05, %v2068_v32  ;;  %v1846_v2 = vmul.f32 0.0078125, %v1795_v34  ;;  %3506 = vmatprep.subr.bf16.mxu1 %v2222_v4 }
 0x326   : > { %3507 = vmatpush3.bf16.msra.mxu1 %v2222_v4  ;;  %v2101_v40 = vadd.f32 1e-05, %v2069_v62  ;;  %v2162_v26 = vmul.f32 %v3941_v22, %v2002_v52 }
 0x327   : > { %3944 = vrsqrt.f32 %v2100_v38  ;;  %v2038_v63 = vmul.f32 %v1846_v2, %v1846_v2  ;;  %v2006_v20 = vsub.f32 %v5287_v55, %v1846_v2 }
 0x328   : > { %v3943_v23 = vpop.eup %3942  ;;  %v1923_v46 = vpop.xlane.xlu0 %1922  ;;  %3946 = vrsqrt.f32 %v2101_v40 }
 0x329   : > { %v1974_v58 = vmul.f32 0.0078125, %v1923_v46  ;;  %v2163_v59 = vmul.f32 %v3943_v23, %v2003_v44 }
 0x32b   : > { %v2070_v51 = vsub.f32 %v1974_v58, %v2038_v63  ;;  %v2223_v16 = vpack.c.bf16 %v2163_v59, %v2162_v26 }
 0x32d   : > { %v2102_v15 = vadd.f32 1e-05, %v2070_v51  ;;  %3508 = vmatprep.subr.bf16.mxu1 %v2223_v16 }
 0x32e   : > { %3509 = vmatpush3.bf16.msra.mxu1 %v2223_v16 }
 0x32f   : > { %3948 = vrsqrt.f32 %v2102_v15 }
 0x330   : > { %v1797_v56 = vpop.xlane.xlu1 %1796 }
 0x331   : > { %v1847_v17 = vmul.f32 0.0078125, %v1797_v56  ;;  %v3945_v10 = vpop.eup %3944 }
 0x332   : > { %v3947_v8 = vpop.eup %3946  ;;  %v2164_v62 = vmul.f32 %v3945_v10, %v2004_v14 }
 0x333   : > { %v2039_v19 = vmul.f32 %v1847_v17, %v1847_v17  ;;  %v2165_v52 = vmul.f32 %v3947_v8, %v2005_v57  ;;  %v2007_v58 = vsub.f32 %v5296_v24, %v1847_v17 }
 0x334   : > { %v1925_v5 = vpop.xlane.xlu1 %1924 }
 0x335   : > { %v1975_v50 = vmul.f32 0.0078125, %v1925_v5  ;;  %v2224_v40 = vpack.c.bf16 %v2165_v52, %v2164_v62 }
 0x337   : > { %v2071_v9 = vsub.f32 %v1975_v50, %v2039_v19  ;;  %3510 = vmatprep.subr.bf16.mxu1 %v2224_v40 }
 0x338   : > { %v1801_v32 = vpop.xlane.xlu1 %1800  ;;  %3511 = vmatpush3.bf16.msra.mxu1 %v2224_v40 }
 0x339   : > { %v2103_v11 = vadd.f32 1e-05, %v2071_v9  ;;  %v1849_v4 = vmul.f32 0.0078125, %v1801_v32  ;;  %v3949_v54 = vpop.eup %3948 }
 0x33a   : > { %v1799_v61 = vpop.xlane.xlu0 %1798  ;;  %v2166_v16 = vmul.f32 %v3949_v54, %v2006_v20 }
 0x33b   : > { %v5519_v21 = vmul.f32 0.0078125, %v1799_v61  ;;  %3950 = vrsqrt.f32 %v2103_v11  ;;  %v2041_v23 = vmul.f32 %v1849_v4, %v1849_v4  ;;  %v2009_v40 = vsub.f32 %v5334_v45, %v1849_v4 }
 0x33c   : > { %v1929_v44 = vpop.xlane.xlu1 %1928 }
 0x33d   : > { %v2040_v22 = vmul.f32 %v5519_v21, %v5519_v21  ;;  %v1977_v46 = vmul.f32 0.0078125, %v1929_v44  ;;  %v2008_v44 = vsub.f32 %v5327_v29, %v5519_v21  ;;  %v5544_v29 = vld [vmem:[#allocation7 + $0x8] sm:$0xff]  }
 0x33e   : > { %v1927_v34 = vpop.xlane.xlu0 %1926 }
 0x33f   : > { %v1976_v38 = vmul.f32 0.0078125, %v1927_v34  ;;  %v2073_v43 = vsub.f32 %v1977_v46, %v2041_v23 }
 0x340   : > { %v1805_v59 = vpop.xlane.xlu1 %1804 }
 0x341   : > { %v2072_v56 = vsub.f32 %v1976_v38, %v2040_v22  ;;  %v2105_v19 = vadd.f32 1e-05, %v2073_v43  ;;  %v1851_v51 = vmul.f32 0.0078125, %v1805_v59 }
 0x342   : > { %v1803_v63 = vpop.xlane.xlu0 %1802 }
 0x343   : > { %v2104_v26 = vadd.f32 1e-05, %v2072_v56  ;;  %v5525_v12 = vmul.f32 0.0078125, %v1803_v63  ;;  %v2043_v14 = vmul.f32 %v1851_v51, %v1851_v51 }
 0x345   : > { %v3951_v5 = vpop.eup %3950  ;;  %3952 = vrsqrt.f32 %v2104_v26  ;;  %v2042_v9 = vmul.f32 %v5525_v12, %v5525_v12 }
 0x346   : > { %v1931_v50 = vpop.xlane.xlu0 %1930  ;;  %v2167_v15 = vmul.f32 %v3951_v5, %v2007_v58  ;;  %3954 = vrsqrt.f32 %v2105_v19  ;;  %v1933_v61 = vpop.xlane.xlu1 %1932 }
 0x347   : > { %v1978_v11 = vmul.f32 0.0078125, %v1931_v50  ;;  %v1979_v55 = vmul.f32 0.0078125, %v1933_v61  ;;  %v2011_v61 = vsub.f32 %v5366_v41, %v1851_v51 }
 0x348   : > { %v2225_v10 = vpack.c.bf16 %v2167_v15, %v2166_v16 }
 0x349   : > { %v2074_v57 = vsub.f32 %v1978_v11, %v2042_v9  ;;  %v2075_v17 = vsub.f32 %v1979_v55, %v2043_v14  ;;  %v5548_v9 = vld [vmem:[#allocation7 + $0x10] sm:$0xff]   ;;  %v2010_v11 = vsub.f32 %v5363_v49, %v5525_v12 }
 0x34a   : > { %v1807_v2 = vpop.xlane.xlu0 %1806  ;;  %3512 = vmatprep.subr.bf16.mxu1 %v2225_v10 }
 0x34b   : > { %v2106_v24 = vadd.f32 1e-05, %v2074_v57  ;;  %v5531_v32 = vmul.f32 0.0078125, %v1807_v2  ;;  %3513 = vmatpush3.bf16.msra.mxu1 %v2225_v10  ;;  %v2107_v8 = vadd.f32 1e-05, %v2075_v17 }
 0x34d   : > { %3956 = vrsqrt.f32 %v2106_v24  ;;  %v1809_v34 = vpop.xlane.xlu1 %1808  ;;  %v2044_v62 = vmul.f32 %v5531_v32, %v5531_v32 }
 0x34e   : > { %v1935_v22 = vpop.xlane.xlu0 %1934  ;;  %3958 = vrsqrt.f32 %v2107_v8  ;;  %v5535_v52 = vmul.f32 0.0078125, %v1809_v34 }
 0x34f   : > { %v3953_v38 = vpop.eup %3952  ;;  %v1980_v56 = vmul.f32 0.0078125, %v1935_v22 }
 0x350   : > { %v3955_v23 = vpop.eup %3954  ;;  %v2168_v63 = vmul.f32 %v3953_v38, %v2008_v44  ;;  %v2045_v43 = vmul.f32 %v5535_v52, %v5535_v52 }
 0x351   : > { %v2076_v46 = vsub.f32 %v1980_v56, %v2044_v62  ;;  %v1937_v26 = vpop.xlane.xlu1 %1936  ;;  %v2169_v54 = vmul.f32 %v3955_v23, %v2009_v40  ;;  %v5561_v62 = vld [vmem:[#allocation7 + $0x18] sm:$0xff]   ;;  %v5565_v23 = vld [vmem:[#allocation7 + $0x20] sm:$0xff]  }
 0x352   : > { %v1981_v58 = vmul.f32 0.0078125, %v1937_v26  ;;  %v1811_v59 = vpop.xlane.xlu0 %1810 }
 0x353   : > { %v2108_v20 = vadd.f32 1e-05, %v2076_v46  ;;  %v5542_v5 = vmul.f32 0.0078125, %v1811_v59  ;;  %v2226_v19 = vpack.c.bf16 %v2169_v54, %v2168_v63  ;;  %v2012_v54 = vsub.f32 %v5399_v28, %v5531_v32 }
 0x354   : > { %v2077_v50 = vsub.f32 %v1981_v58, %v2045_v43  ;;  %v2013_v43 = vsub.f32 %v5409_v27, %v5535_v52  ;;  %v5579_v52 = vld [vmem:[#allocation7 + $0x28] sm:$0xff]  }
 0x355   : > { %v1813_v16 = vpop.xlane.xlu1 %1812  ;;  %3514 = vmatprep.subr.bf16.mxu1 %v2226_v19  ;;  %3960 = vrsqrt.f32 %v2108_v20  ;;  %v2046_v10 = vmul.f32 %v5542_v5, %v5542_v5 }
 0x356   : > { %v2109_v21 = vadd.f32 1e-05, %v2077_v50  ;;  %v5546_v4 = vmul.f32 0.0078125, %v1813_v16  ;;  %v1939_v15 = vpop.xlane.xlu0 %1938  ;;  %3515 = vmatpush3.bf16.msra.mxu1 %v2226_v19 }
 0x357   : > { %v3957_v45 = vpop.eup %3956  ;;  %v1982_v14 = vmul.f32 0.0078125, %v1939_v15 }
 0x358   : > { %v3959_v57 = vpop.eup %3958  ;;  %3962 = vrsqrt.f32 %v2109_v21  ;;  %v2170_v24 = vmul.f32 %v3957_v45, %v2010_v11  ;;  %v2047_v8 = vmul.f32 %v5546_v4, %v5546_v4 }
 0x359   : > { %v2078_v55 = vsub.f32 %v1982_v14, %v2046_v10  ;;  %v1941_v2 = vpop.xlane.xlu1 %1940  ;;  %3517 = vmatmul.mubr.bf16.vlgmr.msra.gmra.mrb[32].mxu1 %v5544_v29  ;;  %v2171_v17 = vmul.f32 %v3959_v57, %v2011_v61  ;;  %v5583_v14 = vld [vmem:[#allocation7 + $0x30] sm:$0xff]  }
 0x35a   : > { %v1983_v34 = vmul.f32 0.0078125, %v1941_v2  ;;  %v1815_v22 = vpop.xlane.xlu0 %1814  ;;  %3520 = vmatprep.mubr.bf16.mxu1 %v5548_v9  ;;  %v2014_v2 = vsub.f32 %v5424_v7, %v5542_v5 }
 0x35b   : > { %v2110_v49 = vadd.f32 1e-05, %v2078_v55  ;;  %v5559_v41 = vmul.f32 0.0078125, %v1815_v22  ;;  %v2410_v12 = vpack.c.bf16 %v2171_v17, %v2170_v24  ;;  %v2015_v24 = vsub.f32 %v5431_v35, %v5546_v4 }
 0x35c   : > { %v2079_v51 = vsub.f32 %v1983_v34, %v2047_v8 }
 0x35d   : > { %v1817_v38 = vpop.xlane.xlu1 %1816  ;;  %3532 = vmatprep.subr.bf16.mxu1 %v2410_v12  ;;  %3964 = vrsqrt.f32 %v2110_v49  ;;  %v2048_v46 = vmul.f32 %v5559_v41, %v5559_v41 }
 0x35e   : > { %v2111_v56 = vadd.f32 1e-05, %v2079_v51  ;;  %v5563_v44 = vmul.f32 0.0078125, %v1817_v38  ;;  %v1943_v40 = vpop.xlane.xlu0 %1942  ;;  %3533 = vmatpush3.bf16.msra.mxu1 %v2410_v12 }
 0x35f   : > { %v1984_v26 = vmul.f32 0.0078125, %v1943_v40  ;;  %v3961_v63 = vpop.eup %3960 }
 0x360   : > { %3966 = vrsqrt.f32 %v2111_v56  ;;  %v2049_v19 = vmul.f32 %v5563_v44, %v5563_v44  ;;  %v2172_v45 = vmul.f32 %v3961_v63, %v2012_v54 }
 0x361   : > { %v2080_v20 = vsub.f32 %v1984_v26, %v2048_v46  ;;  %v1945_v58 = vpop.xlane.xlu1 %1944  ;;  %3521 = vmatmul.mubr.bf16.gmra.mrb[36].mxu1 %v5561_v62  ;;  %v5597_v26 = vld [vmem:[#allocation7 + $0x38] sm:$0xff]  }
 0x362   : > { %v3963_v59 = vpop.eup %3962  ;;  %v1985_v50 = vmul.f32 0.0078125, %v1945_v58  ;;  %3524 = vmatprep.mubr.bf16.mxu1 %v5565_v23  ;;  %v1819_v11 = vpop.xlane.xlu0 %1818  ;;  %v2016_v58 = vsub.f32 %v5445_v0, %v5559_v41 }
 0x363   : > { %v2112_v16 = vadd.f32 1e-05, %v2080_v20  ;;  %v2173_v21 = vmul.f32 %v3963_v59, %v2013_v43  ;;  %v5577_v28 = vmul.f32 0.0078125, %v1819_v11  ;;  %v2017_v59 = vsub.f32 %v5449_v39, %v5563_v44 }
 0x364   : > { %v2081_v15 = vsub.f32 %v1985_v50, %v2049_v19 }
 0x365   : > { %v1821_v32 = vpop.xlane.xlu1 %1820  ;;  %v2411_v27 = vpack.c.bf16 %v2173_v21, %v2172_v45  ;;  %3968 = vrsqrt.f32 %v2112_v16  ;;  %v2050_v17 = vmul.f32 %v5577_v28, %v5577_v28 }
 0x366   : > { %v2113_v61 = vadd.f32 1e-05, %v2081_v15  ;;  %v5581_v10 = vmul.f32 0.0078125, %v1821_v32  ;;  %v1947_v55 = vpop.xlane.xlu0 %1946 }
 0x367   : > { %3534 = vmatprep.subr.bf16.mxu1 %v2411_v27  ;;  %v3965_v57 = vpop.eup %3964  ;;  %v1986_v8 = vmul.f32 0.0078125, %v1947_v55 }
 0x368   : > { %3970 = vrsqrt.f32 %v2113_v61  ;;  %3535 = vmatpush3.bf16.msra.mxu1 %v2411_v27  ;;  %v2051_v49 = vmul.f32 %v5581_v10, %v5581_v10  ;;  %v2174_v38 = vmul.f32 %v3965_v57, %v2014_v2 }
 0x369   : > { %v1949_v34 = vpop.xlane.xlu1 %1948  ;;  %3525 = vmatmul.mubr.bf16.gmra.mrb[40].mxu1 %v5579_v52  ;;  %v2082_v51 = vsub.f32 %v1986_v8, %v2050_v17  ;;  %v2019_v8 = vsub.f32 %v5462_v30, %v5581_v10 }
 0x36a   : > { %v3967_v22 = vpop.eup %3966  ;;  %v1987_v12 = vmul.f32 0.0078125, %v1949_v34  ;;  %3528 = vmatprep.mubr.bf16.mxu1 %v5583_v14  ;;  %v1823_v56 = vpop.xlane.xlu0 %1822 }
 0x36b   : > { %v2175_v7 = vmul.f32 %v3967_v22, %v2015_v24  ;;  %v2114_v35 = vadd.f32 1e-05, %v2082_v51  ;;  %v5595_v4 = vmul.f32 0.0078125, %v1823_v56 }
 0x36c   : > { %v2083_v5 = vsub.f32 %v1987_v12, %v2051_v49 }
 0x36d   : > { %v1825_v40 = vpop.xlane.xlu1 %1824  ;;  %v2412_v46 = vpack.c.bf16 %v2175_v7, %v2174_v38  ;;  %3972 = vrsqrt.f32 %v2114_v35  ;;  %v2052_v19 = vmul.f32 %v5595_v4, %v5595_v4  ;;  %v2020_v10 = vsub.f32 %v5473_v37, %v5595_v4 }
 0x36e   : > { %v2115_v63 = vadd.f32 1e-05, %v2083_v5  ;;  %v5599_v54 = vmul.f32 0.0078125, %v1825_v40  ;;  %v1951_v20 = vpop.xlane.xlu0 %1950 }
 0x36f   : > { %3536 = vmatprep.subr.bf16.mxu1 %v2412_v46  ;;  %v3969_v43 = vpop.eup %3968  ;;  %v1988_v50 = vmul.f32 0.0078125, %v1951_v20 }
 0x370   : > { %3974 = vrsqrt.f32 %v2115_v63  ;;  %3537 = vmatpush3.bf16.msra.mxu1 %v2412_v46  ;;  %v2053_v21 = vmul.f32 %v5599_v54, %v5599_v54  ;;  %v2176_v32 = vmul.f32 %v3969_v43, %v2016_v58 }
 0x371   : > { %v1953_v16 = vpop.xlane.xlu1 %1952  ;;  %3529 = vmatmul.mubr.bf16.gmra.mrb[44].mxu1 %v5597_v26  ;;  %v2084_v11 = vsub.f32 %v1988_v50, %v2052_v19 }
 0x372   : > { %v3971_v45 = vpop.eup %3970  ;;  %v1989_v15 = vmul.f32 0.0078125, %v1953_v16  ;;  %3548 = vmatprep.mubr.bf16.mxu1 %v5468_v31  ;;  %v1827_v27 = vpop.xlane.xlu0 %1826  ;;  %v2018_v31 = vsub.f32 %v5459_v60, %v5577_v28 }
 0x373   : > { %v2177_v0 = vmul.f32 %v3971_v45, %v2017_v59  ;;  %v2116_v39 = vadd.f32 1e-05, %v2084_v11  ;;  %v1862_v44 = vmul.f32 0.0078125, %v1827_v27  ;;  %v2021_v59 = vsub.f32 %v5477_v1, %v5599_v54 }
 0x374   : > { %v2085_v41 = vsub.f32 %v1989_v15, %v2053_v21 }
 0x375   : > { %v1829_v61 = vpop.xlane.xlu1 %1828  ;;  %v2413_v57 = vpack.c.bf16 %v2177_v0, %v2176_v32  ;;  %3976 = vrsqrt.f32 %v2116_v39  ;;  %v2054_v34 = vmul.f32 %v1862_v44, %v1862_v44  ;;  %v2022_v1 = vsub.f32 %v5486_v48, %v1862_v44  ;;  %v3765_v48 = vld [vmem:[#allocation10 + $0x8] sm:$0xff]  }
 0x376   : > { %v2117_v55 = vadd.f32 1e-05, %v2085_v41  ;;  %v1863_v2 = vmul.f32 0.0078125, %v1829_v61  ;;  %v1955_v24 = vpop.xlane.xlu0 %1954 }
 0x377   : > { %3538 = vmatprep.subr.bf16.mxu1 %v2413_v57  ;;  %v3973_v17 = vpop.eup %3972  ;;  %v1990_v22 = vmul.f32 0.0078125, %v1955_v24 }
 0x378   : > { %3978 = vrsqrt.f32 %v2117_v55  ;;  %3539 = vmatpush3.bf16.msra.mxu1 %v2413_v57  ;;  %v2055_v51 = vmul.f32 %v1863_v2, %v1863_v2  ;;  %v2178_v5 = vmul.f32 %v3973_v17, %v2018_v31  ;;  %v2023_v4 = vsub.f32 %v5489_v18, %v1863_v2  ;;  %v3766_v18 = vld [vmem:[#allocation10 + $0x10] sm:$0xff]  }
 0x379   : > { %v1957_v49 = vpop.xlane.xlu1 %1956  ;;  %v2086_v7 = vsub.f32 %v1990_v22, %v2054_v34 }
 0x37a   : > { %v3975_v12 = vpop.eup %3974  ;;  %v1991_v38 = vmul.f32 0.0078125, %v1957_v49  ;;  %v1831_v40 = vpop.xlane.xlu0 %1830 }
 0x37b   : > { %v2179_v56 = vmul.f32 %v3975_v12, %v2019_v8  ;;  %v2118_v46 = vadd.f32 1e-05, %v2086_v7  ;;  %v1864_v63 = vmul.f32 0.0078125, %v1831_v40 }
 0x37c   : > { %v2087_v35 = vsub.f32 %v1991_v38, %v2055_v51  ;;  %v3764_v51 = vld [vmem:[#allocation10] sm:$0xff]  }
 0x37d   : > { %v1833_v43 = vpop.xlane.xlu1 %1832  ;;  %v2414_v20 = vpack.c.bf16 %v2179_v56, %v2178_v5  ;;  %3980 = vrsqrt.f32 %v2118_v46  ;;  %v2056_v19 = vmul.f32 %v1864_v63, %v1864_v63  ;;  %v2024_v31 = vsub.f32 %v5498_v6, %v1864_v63  ;;  %v3767_v6 = vld [vmem:[#allocation10 + $0x18] sm:$0xff]   ;;  %v6295_v63 = vld [vmem:[#allocation20_spill] sm:$0xff] }
 0x37e   : > { %v2119_v58 = vadd.f32 1e-05, %v2087_v35  ;;  %v1865_v60 = vmul.f32 0.0078125, %v1833_v43  ;;  %v1959_v30 = vpop.xlane.xlu0 %1958 }
 0x37f   : > { %3540 = vmatprep.subr.bf16.mxu1 %v2414_v20  ;;  %v3977_v28 = vpop.eup %3976  ;;  %v1992_v50 = vmul.f32 0.0078125, %v1959_v30 }
 0x380   : > { %3982 = vrsqrt.f32 %v2119_v58  ;;  %3541 = vmatpush3.bf16.msra.mxu1 %v2414_v20  ;;  %v2057_v21 = vmul.f32 %v1865_v60, %v1865_v60  ;;  %v2180_v32 = vmul.f32 %v3977_v28, %v2020_v10  ;;  %v2025_v8 = vsub.f32 %v5501_v13, %v1865_v60  ;;  %v3768_v13 = vld [vmem:[#allocation10 + $0x20] sm:$0xff]  }
 0x381   : > { %v1961_v16 = vpop.xlane.xlu1 %1960  ;;  %v2088_v11 = vsub.f32 %v1992_v50, %v2056_v19  ;;  %v6296_v20 = vld [vmem:[#allocation19_spill] sm:$0xff] }
 0x382   : > { %v3979_v45 = vpop.eup %3978  ;;  %v1993_v15 = vmul.f32 0.0078125, %v1961_v16 }
 0x383   : > { %v2181_v0 = vmul.f32 %v3979_v45, %v2021_v59  ;;  %v2120_v27 = vadd.f32 1e-05, %v2088_v11  ;;  %v6297_v45 = vld [vmem:[#allocation23_spill] sm:$0xff] }
 0x384   : > { %v2089_v41 = vsub.f32 %v1993_v15, %v2057_v21 }
 0x385   : > { %v2415_v39 = vpack.c.bf16 %v2181_v0, %v2180_v32  ;;  %3984 = vrsqrt.f32 %v2120_v27  ;;  %v6298_v0 = vld [vmem:[#allocation21_spill] sm:$0xff]  ;;  %v3772_v27 = vld [vmem:[#allocation11] ss:$8 sps:$4 sm:$0xff]  }
 0x386   : > { %v2121_v61 = vadd.f32 1e-05, %v2089_v41 }
 0x387   : > { %3542 = vmatprep.subr.bf16.mxu1 %v2415_v39  ;;  %v3981_v37 = vpop.eup %3980 }
 0x388   : > { %3986 = vrsqrt.f32 %v2121_v61  ;;  %3543 = vmatpush3.bf16.msra.mxu1 %v2415_v39  ;;  %v2182_v57 = vmul.f32 %v3981_v37, %v2022_v1  ;;  %v3774_v39 = vld [vmem:[#allocation11 + $0x4] ss:$8 sps:$4 sm:$0xff]  }
 0x389   : > { %v6299_v1 = vld [vmem:[#allocation24_spill] sm:$0xff]  ;;  %2971 = vmatprep.subr.bf16.mxu0 %v3774_v39 }
 0x38a   : > { %v3983_v54 = vpop.eup %3982  ;;  %2972 = vmatpush1.bf16.msra.mxu0 %v3772_v27 }
 0x38b   : > { %v2183_v55 = vmul.f32 %v3983_v54, %v2023_v4  ;;  %v3777_v54 = vld [vmem:[#allocation11 + $0x14] ss:$8 sps:$4 sm:$0xff]  }
 0x38c   : > { %2973 = vmatprep.subr.bf16.mxu0 %v3777_v54 }
 0x38d   : > { %v2416_v24 = vpack.c.bf16 %v2183_v55, %v2182_v57  ;;  %v6300_v55 = vld [vmem:[#allocation22_spill] sm:$0xff] }
 0x38f   : > { %3544 = vmatprep.subr.bf16.mxu1 %v2416_v24  ;;  %v3985_v17 = vpop.eup %3984 }
 0x390   : > { %3545 = vmatpush3.bf16.msra.mxu1 %v2416_v24  ;;  %v2184_v22 = vmul.f32 %v3985_v17, %v2024_v31  ;;  %v6301_v17 = vld [vmem:[#allocation27_spill] sm:$0xff] }
 0x392   : > { %v3987_v34 = vpop.eup %3986 }
 0x393   : > { %v2185_v49 = vmul.f32 %v3987_v34, %v2025_v8 }
 0x395   : > { %v2417_v12 = vpack.c.bf16 %v2185_v49, %v2184_v22  ;;  %v3775_v49 = vld [vmem:[#allocation11 + $0x10] ss:$8 sps:$4 sm:$0xff]  }
 0x396   : > { %2974 = vmatpush1.bf16.msra.mxu0 %v3775_v49 }
 0x397   : > { %3546 = vmatprep.subr.bf16.mxu1 %v2417_v12 }
 0x398   : > { %3547 = vmatpush3.bf16.msra.mxu1 %v2417_v12 }
 0x399   : > { %3564 = vmatprep.subr.bf16.mxu1 %v3764_v51 }
 0x39b   : > { %3549 = vmatmul.mubr.bf16.vlgmr.msra.gmra.mrb[48].mxu1 %v5544_v29  ;;  %v3769_v29 = vld [vmem:[#allocation10 + $0x28] sm:$0xff]  }
 0x39c   : > { %3552 = vmatprep.mubr.bf16.mxu1 %v5548_v9  ;;  %3565 = vmatpush3.bf16.msra.mxu1 %v3764_v51  ;;  %v3770_v9 = vld [vmem:[#allocation10 + $0x30] sm:$0xff]  }
 0x39d   : > { %3566 = vmatprep.subr.bf16.mxu1 %v3765_v48 }
 0x3a0   : > { %3567 = vmatpush3.bf16.msra.mxu1 %v3765_v48 }
 0x3a1   : > { %3568 = vmatprep.subr.bf16.mxu1 %v3766_v18 }
 0x3a3   : > { %3553 = vmatmul.mubr.bf16.gmra.mrb[52].mxu1 %v5561_v62  ;;  %v3771_v62 = vld [vmem:[#allocation10 + $0x38] sm:$0xff]  }
 0x3a4   : > { %3556 = vmatprep.mubr.bf16.mxu1 %v5565_v23  ;;  %3569 = vmatpush3.bf16.msra.mxu1 %v3766_v18  ;;  %v913_v23 = vsub.s32 0, %v5025_v42  ;;  %v3780_v18 = vld [vmem:[#allocation11 + $0x24] ss:$8 sps:$4 sm:$0xff]  }
 0x3a5   : > { %3570 = vmatprep.subr.bf16.mxu1 %v3767_v6  ;;  %2975 = vmatprep.subr.bf16.mxu0 %v3780_v18 }
 0x3a8   : > { %3571 = vmatpush3.bf16.msra.mxu1 %v3767_v6 }
 0x3a9   : > { %3572 = vmatprep.subr.bf16.mxu1 %v3768_v13 }
 0x3ab   : > { %3557 = vmatmul.mubr.bf16.gmra.mrb[56].mxu1 %v5579_v52  ;;  %v4052_v52 = vld [vmem:[%s6229_s2] sm:$0x3] }
 0x3ac   : > { %3560 = vmatprep.mubr.bf16.mxu1 %v5583_v14  ;;  %3573 = vmatpush3.bf16.msra.mxu1 %v3768_v13  ;;  %v5634_v44 = vrot.slane %v4052_v52, %v913_v23 }
 0x3ad   : > { %3574 = vmatprep.subr.bf16.mxu1 %v3769_v29 }
 0x3ae   : > { %v5638_v14 = vadd.f32 %v5033_v33, %v5634_v44  ;;  %v5648_v42 = vadd.f32 %v5036_v36, %v5634_v44  ;;  %v5652_v38 = vadd.f32 %v5049_v53, %v5634_v44  ;;  %v5664_v36 = vadd.f32 %v5079_v25, %v5634_v44 }
 0x3af   : > { %v5669_v40 = vadd.f32 %v5061_v3, %v5634_v44  ;;  %v5674_v43 = vadd.f32 %v6295_v63, %v5634_v44  ;;  %v5678_v58 = vadd.f32 %v6296_v20, %v5634_v44  ;;  %v5693_v21 = vadd.f32 %v6297_v45, %v5634_v44  ;;  %v3783_v20 = vld [vmem:[#allocation11 + $0x34] ss:$8 sps:$4 sm:$0xff]   ;;  %v3781_v45 = vld [vmem:[#allocation11 + $0x30] ss:$8 sps:$4 sm:$0xff]  }
 0x3b0   : > { %3575 = vmatpush3.bf16.msra.mxu1 %v3769_v29  ;;  %v1194_v2 = vmul.f32 %v5638_v14, %v5638_v14  ;;  %v1200_v5 = vmul.f32 %v5652_v38, %v5652_v38  ;;  %v1206_v25 = vmul.f32 %v5664_v36, %v5664_v36  ;;  %v5699_v41 = vadd.f32 %v6298_v0, %v5634_v44 }
 0x3b1   : > { %3576 = vmatprep.subr.bf16.mxu1 %v3770_v9  ;;  %v1202_v3 = vmul.f32 %v5669_v40, %v5669_v40  ;;  %v1208_v59 = vmul.f32 %v5674_v43, %v5674_v43  ;;  %v1204_v19 = vmul.f32 %v5678_v58, %v5678_v58  ;;  %v5705_v4 = vadd.f32 %v6299_v1, %v5634_v44 }
 0x3b2   : > { %v1258_v33 = vmul.f32 %v1194_v2, %v5638_v14  ;;  %v1264_v46 = vmul.f32 %v1200_v5, %v5652_v38  ;;  %v1270_v16 = vmul.f32 %v1206_v25, %v5664_v36  ;;  %v5710_v24 = vadd.f32 %v6300_v55, %v5634_v44  ;;  %v6303_v2 = vld [vmem:[#allocation26_spill] sm:$0xff] }
 0x3b3   : > { %3561 = vmatmul.mubr.bf16.gmra.mrb[60].mxu1 %v5597_v26  ;;  %v5642_v26 = vadd.f32 %v5044_v47, %v5634_v44  ;;  %v1196_v47 = vmul.f32 %v5648_v42, %v5648_v42  ;;  %v1266_v32 = vmul.f32 %v1202_v3, %v5669_v40  ;;  %v1272_v37 = vmul.f32 %v1208_v59, %v5674_v43 }
 0x3b4   : > { %3577 = vmatpush3.bf16.msra.mxu1 %v3770_v9  ;;  %v1322_v35 = vmul.f32 0.044715, %v1258_v33  ;;  %v1328_v10 = vmul.f32 0.044715, %v1264_v46  ;;  %v1268_v57 = vmul.f32 %v1204_v19, %v5678_v58  ;;  %v5714_v31 = vadd.f32 %v6301_v17, %v5634_v44  ;;  %v6302_v9 = vld [vmem:[#allocation25_spill] sm:$0xff] }
 0x3b5   : > { %3578 = vmatprep.subr.bf16.mxu1 %v3771_v62  ;;  %v1198_v7 = vmul.f32 %v5642_v26, %v5642_v26  ;;  %v1260_v53 = vmul.f32 %v1196_v47, %v5648_v42  ;;  %v1334_v34 = vmul.f32 0.044715, %v1270_v16  ;;  %v1214_v22 = vmul.f32 %v5693_v21, %v5693_v21 }
 0x3b6   : > { %v1386_v30 = vadd.f32 %v1322_v35, %v5638_v14  ;;  %v1392_v61 = vadd.f32 %v1328_v10, %v5652_v38  ;;  %v1330_v51 = vmul.f32 0.044715, %v1266_v32  ;;  %v1210_v48 = vmul.f32 %v5699_v41, %v5699_v41  ;;  %v3786_v32 = vld [vmem:[#allocation11 + $0x44] ss:$8 sps:$4 sm:$0xff]  }
 0x3b7   : > { %v1262_v56 = vmul.f32 %v1198_v7, %v5642_v26  ;;  %v1324_v28 = vmul.f32 0.044715, %v1260_v53  ;;  %v1336_v13 = vmul.f32 0.044715, %v1272_v37  ;;  %v1216_v29 = vmul.f32 %v5705_v4, %v5705_v4  ;;  %v3778_v53 = vld [vmem:[#allocation11 + $0x20] ss:$8 sps:$4 sm:$0xff]  }
 0x3b8   : > { %3579 = vmatpush3.bf16.msra.mxu1 %v3771_v62  ;;  %v1450_v15 = vmul.f32 0.7978846, %v1386_v30  ;;  %v1456_v6 = vmul.f32 0.7978846, %v1392_v61  ;;  %v5724_v62 = vadd.f32 %v6302_v9, %v5634_v44  ;;  %v1332_v23 = vmul.f32 0.044715, %v1268_v57  ;;  %2976 = vmatpush1.bf16.msra.mxu0 %v3778_v53 }
 0x3b9   : > { %v1326_v60 = vmul.f32 0.044715, %v1262_v56  ;;  %v1388_v11 = vadd.f32 %v1324_v28, %v5648_v42  ;;  %v1212_v52 = vmul.f32 %v5710_v24, %v5710_v24  ;;  %v5730_v7 = vadd.f32 %v6303_v2, %v5634_v44  ;;  %v6304_v56 = vld [vmem:[#allocation28_spill] sm:$0xff]  ;;  %2977 = vmatprep.subr.bf16.mxu0 %v3783_v20 }
 0x3ba   : > { %3988 = vtanh.f32 %v1450_v15  ;;  %v1222_v33 = vmul.f32 %v5714_v31, %v5714_v31  ;;  %v1398_v47 = vadd.f32 %v1334_v34, %v5664_v36  ;;  %v1278_v5 = vmul.f32 %v1214_v22, %v5693_v21  ;;  %v3789_v22 = vld [vmem:[#allocation11 + $0x54] ss:$8 sps:$4 sm:$0xff]  }
 0x3bb   : > { %v1390_v50 = vadd.f32 %v1326_v60, %v5642_v26  ;;  %v1452_v12 = vmul.f32 0.7978846, %v1388_v11  ;;  %v5738_v35 = vadd.f32 %v6304_v56, %v5634_v44  ;;  %v1394_v46 = vadd.f32 %v1330_v51, %v5669_v40 }
 0x3bc   : > { %v1274_v63 = vmul.f32 %v1210_v48, %v5699_v41  ;;  %v1400_v60 = vadd.f32 %v1336_v13, %v5674_v43  ;;  %v1280_v25 = vmul.f32 %v1216_v29, %v5705_v4  ;;  %v1218_v30 = vmul.f32 %v5724_v62, %v5724_v62  ;;  %2978 = vmatpush1.bf16.msra.mxu0 %v3781_v45 }
 0x3bd   : > { %v1454_v8 = vmul.f32 0.7978846, %v1390_v50  ;;  %v1396_v28 = vadd.f32 %v1332_v23, %v5678_v58  ;;  %v1276_v3 = vmul.f32 %v1212_v52, %v5710_v24  ;;  %v1220_v10 = vmul.f32 %v5730_v7, %v5730_v7  ;;  %2979 = vmatprep.subr.bf16.mxu0 %v3786_v32  ;;  %v3787_v52 = vld [vmem:[#allocation11 + $0x50] ss:$8 sps:$4 sm:$0xff]  }
 0x3be   : > { %v1286_v59 = vmul.f32 %v1222_v33, %v5714_v31  ;;  %v1462_v19 = vmul.f32 0.7978846, %v1398_v47  ;;  %v1342_v50 = vmul.f32 0.044715, %v1278_v5  ;;  %v1224_v16 = vmul.f32 %v5738_v35, %v5738_v35  ;;  %v3792_v47 = vld [vmem:[#allocation11 + $0x64] ss:$8 sps:$4 sm:$0xff]  }
 0x3bf   : > { %3990 = vtanh.f32 %v1454_v8  ;;  %v1458_v15 = vmul.f32 0.7978846, %v1394_v46  ;;  %v1338_v11 = vmul.f32 0.044715, %v1274_v63  ;;  %v1464_v0 = vmul.f32 0.7978846, %v1400_v60 }
 0x3c0   : > { %3992 = vtanh.f32 %v1452_v12  ;;  %v1344_v27 = vmul.f32 0.044715, %v1280_v25  ;;  %v1282_v39 = vmul.f32 %v1218_v30, %v5724_v62  ;;  %v1460_v37 = vmul.f32 0.7978846, %v1396_v28  ;;  %v3784_v8 = vld [vmem:[#allocation11 + $0x40] ss:$8 sps:$4 sm:$0xff]  }
 0x3c1   : > { %3994 = vtanh.f32 %v1456_v6  ;;  %v1340_v1 = vmul.f32 0.044715, %v1276_v3  ;;  %v1284_v54 = vmul.f32 %v1220_v10, %v5730_v7  ;;  %v1350_v57 = vmul.f32 0.044715, %v1286_v59  ;;  %2980 = vmatpush1.bf16.msra.mxu0 %v3784_v8  ;;  %v5767_v30 = vld [vmem:[%s6230_s3] ss:$0 sm:$0xff] }
 0x3c2   : > { %3996 = vtanh.f32 %v1462_v19  ;;  %v1406_v55 = vadd.f32 %v1342_v50, %v5693_v21  ;;  %v1288_v17 = vmul.f32 %v1224_v16, %v5738_v35  ;;  %v1402_v34 = vadd.f32 %v1338_v11, %v5699_v41  ;;  %2981 = vmatprep.subr.bf16.mxu0 %v3789_v22  ;;  %v3790_v3 = vld [vmem:[#allocation11 + $0x60] ss:$8 sps:$4 sm:$0xff]   ;;  %v5769_v50 = vld [vmem:[#allocation8 + $0x10] sm:$0xff] }
 0x3c3   : > { %3998 = vtanh.f32 %v1458_v15  ;;  %v1408_v12 = vadd.f32 %v1344_v27, %v5705_v4  ;;  %v1346_v51 = vmul.f32 0.044715, %v1282_v39  ;;  %v1404_v18 = vadd.f32 %v1340_v1, %v5710_v24 }
 0x3c4   : > { %v3989_v61 = vpop.eup %3988  ;;  %4000 = vtanh.f32 %v1464_v0  ;;  %v1348_v6 = vmul.f32 0.044715, %v1284_v54  ;;  %v1414_v13 = vadd.f32 %v1350_v57, %v5714_v31  ;;  %v1470_v9 = vmul.f32 0.7978846, %v1406_v55  ;;  %v5772_v0 = vld [vmem:[#allocation8] sm:$0xff]  ;;  %v5775_v54 = vld [vmem:[#allocation8 + $0x18] sm:$0xff] }
 0x3c5   : > { %4002 = vtanh.f32 %v1460_v37  ;;  %v1352_v23 = vmul.f32 0.044715, %v1288_v17  ;;  %v1466_v2 = vmul.f32 0.7978846, %v1402_v34  ;;  %v1472_v5 = vmul.f32 0.7978846, %v1408_v12  ;;  %2982 = vmatpush1.bf16.msra.mxu0 %v3787_v52 }
 0x3c6   : > { %v1410_v56 = vadd.f32 %v1346_v51, %v5724_v62  ;;  %v1578_v53 = vadd.f32 1.0, %v3989_v61  ;;  %v1468_v46 = vmul.f32 0.7978846, %v1404_v18  ;;  %v1412_v63 = vadd.f32 %v1348_v6, %v5730_v7  ;;  %2983 = vmatprep.subr.bf16.mxu0 %v3792_v47 }
 0x3c7   : > { %v1478_v20 = vmul.f32 0.7978846, %v1414_v13  ;;  %4004 = vtanh.f32 %v1470_v9  ;;  %v1416_v25 = vadd.f32 %v1352_v23, %v5738_v35 }
 0x3c8   : > { %4006 = vtanh.f32 %v1466_v2  ;;  %v1474_v19 = vmul.f32 0.7978846, %v1410_v56  ;;  %v1642_v45 = vmul.f32 0.5, %v1578_v53  ;;  %v1476_v11 = vmul.f32 0.7978846, %v1412_v63 }
 0x3c9   : > { %v3991_v49 = vpop.eup %3990  ;;  %4008 = vtanh.f32 %v1472_v5  ;;  %v1480_v37 = vmul.f32 0.7978846, %v1416_v25  ;;  %2984 = vmatpush1.bf16.msra.mxu0 %v3790_v3 }
 0x3ca   : > { %v3993_v48 = vpop.eup %3992  ;;  %v1582_v33 = vadd.f32 1.0, %v3991_v49  ;;  %4010 = vtanh.f32 %v1468_v46  ;;  %v5780_v49 = vld [vmem:[#allocation8 + $0x8] sm:$0xff]  ;;  %v5789_v46 = vld [vmem:[#allocation8 + $0x30] sm:$0xff] }
 0x3cb   : > { %v3995_v29 = vpop.eup %3994  ;;  %v1580_v28 = vadd.f32 1.0, %v3993_v48  ;;  %4012 = vtanh.f32 %v1478_v20  ;;  %v1706_v48 = vmul.f32 %v1642_v45, %v5638_v14 }
 0x3cc   : > { %v1584_v60 = vadd.f32 1.0, %v3995_v29  ;;  %v1646_v10 = vmul.f32 0.5, %v1582_v33  ;;  %v3997_v59 = vpop.eup %3996  ;;  %4014 = vtanh.f32 %v1474_v19  ;;  %v5795_v19 = vld [vmem:[#allocation8 + $0x38] sm:$0xff] }
 0x3cd   : > { %v3999_v15 = vpop.eup %3998  ;;  %v1644_v55 = vmul.f32 0.5, %v1580_v28  ;;  %v1590_v51 = vadd.f32 1.0, %v3997_v59  ;;  %4016 = vtanh.f32 %v1480_v37  ;;  %v5792_v28 = vld [vmem:[#allocation8 + $0x20] sm:$0xff] }
 0x3ce   : > { %v1648_v39 = vmul.f32 0.5, %v1584_v60  ;;  %v4001_v61 = vpop.eup %4000  ;;  %v1710_v8 = vmul.f32 %v1646_v10, %v5642_v26  ;;  %v1586_v13 = vadd.f32 1.0, %v3999_v15  ;;  %4018 = vtanh.f32 %v1476_v11 }
 0x3cf   : > { %v4003_v17 = vpop.eup %4002  ;;  %v1592_v23 = vadd.f32 1.0, %v4001_v61  ;;  %v1708_v2 = vmul.f32 %v1644_v55, %v5648_v42  ;;  %v1654_v14 = vmul.f32 0.5, %v1590_v51  ;;  %v5800_v61 = vld [vmem:[#allocation8 + $0x28] sm:$0xff] }
 0x3d0   : > { %v1712_v9 = vmul.f32 %v1648_v39, %v5652_v38  ;;  %v1588_v47 = vadd.f32 1.0, %v4003_v17  ;;  %v1650_v20 = vmul.f32 0.5, %v1586_v13 }
 0x3d1   : > { %v4005_v56 = vpop.eup %4004  ;;  %v1656_v3 = vmul.f32 0.5, %v1592_v23 }
 0x3d2   : > { %v4007_v38 = vpop.eup %4006  ;;  %v1652_v45 = vmul.f32 0.5, %v1588_v47  ;;  %v1714_v55 = vmul.f32 %v1650_v20, %v5669_v40 }
 0x3d3   : > { %v4009_v10 = vpop.eup %4008 }
 0x3d4   : > { %v1600_v51 = vadd.f32 1.0, %v4009_v10 }
 0x42c   : > { %v3518_v16 = vpop.f32.mrb[32].mxu1 }
 0x42d   : > { %v2380_v32 = vmul.f32 %v3518_v16, %v5767_v30  ;;  %v2309_v27 = vpop.f32.mrb[33].mxu1 }
 0x42e   : > { %v2378_v1 = vmul.f32 %v5767_v30, %v2309_v27  ;;  %v3519_v57 = vpop.f32.mrb[34].mxu1  ;;  %v1718_v27 = vmul.f32 %v1654_v14, %v5664_v36  ;;  %v1720_v36 = vmul.f32 %v1656_v3, %v5674_v43  ;;  %v6305_v43 = vld [vmem:[#allocation29_spill] sm:$0xff]  ;;  %v1664_v14 = vmul.f32 0.5, %v1600_v51 }
 0x42f   : > { %v2396_v34 = vadd.f32 %v2380_v32, %v5769_v50  ;;  %v2381_v22 = vmul.f32 %v3519_v57, %v5767_v30  ;;  %v2312_v12 = vpop.f32.mrb[35].mxu1  ;;  %v4011_v32 = vpop.eup %4010 }
 0x430   : > { %v2394_v18 = vadd.f32 %v2378_v1, %v5772_v0  ;;  %v2379_v6 = vmul.f32 %v5767_v30, %v2312_v12  ;;  %v1598_v1 = vadd.f32 1.0, %v4005_v56  ;;  %v4013_v57 = vpop.eup %4012  ;;  %v1596_v13 = vadd.f32 1.0, %v4011_v32 }
 0x431   : > { %v2549_v29 = vmul.f32 %v2396_v34, %v1710_v8  ;;  %v2397_v26 = vadd.f32 %v2381_v22, %v5775_v54  ;;  %v1594_v34 = vadd.f32 1.0, %v4007_v38 }
 0x432   : > { %v2547_v52 = vmul.f32 %v2394_v18, %v1706_v48  ;;  %v2395_v33 = vadd.f32 %v2379_v6, %v5780_v49  ;;  %v1716_v18 = vmul.f32 %v1652_v45, %v5678_v58 }
 0x433   : > { %v2550_v5 = vmul.f32 %v2397_v26, %v1712_v9  ;;  %v5809_v26 = vld [vmem:[#allocation8 + $0x50] sm:$0xff] }
 0x434   : > { %v2548_v53 = vmul.f32 %v2395_v33, %v1708_v2  ;;  %v3522_v63 = vpop.f32.mrb[36].mxu1  ;;  %v4015_v2 = vpop.eup %4014  ;;  %v5813_v33 = vadd.f32 %v6305_v43, %v5634_v44  ;;  %v6308_v43 = vld [vmem:[#allocation32_spill] sm:$0xff] }
 0x435   : > { %v2580_v60 = vpack.c.bf16 %v2550_v5, %v2549_v29  ;;  %v2384_v25 = vmul.f32 %v3522_v63, %v5767_v30  ;;  %v2325_v42 = vpop.f32.mrb[37].mxu1  ;;  %v1662_v29 = vmul.f32 0.5, %v1598_v1  ;;  %v5816_v5 = vld [vmem:[#allocation8 + $0x40] sm:$0xff]  ;;  %v1602_v1 = vadd.f32 1.0, %v4015_v2 }
 0x436   : > { %v2382_v59 = vmul.f32 %v5767_v30, %v2325_v42  ;;  %v3523_v16 = vpop.f32.mrb[38].mxu1  ;;  %v2579_v15 = vpack.c.bf16 %v2548_v53, %v2547_v52  ;;  %v1658_v52 = vmul.f32 0.5, %v1594_v34  ;;  %v4017_v53 = vpop.eup %4016  ;;  %v6306_v63 = vld [vmem:[#allocation31_spill] sm:$0xff]  ;;  %v1660_v42 = vmul.f32 0.5, %v1596_v13 }
 0x437   : > { %v2400_v11 = vadd.f32 %v2384_v25, %v5789_v46  ;;  %v2385_v39 = vmul.f32 %v3523_v16, %v5767_v30  ;;  %v2328_v37 = vpop.f32.mrb[39].mxu1  ;;  %v5820_v20 = vadd.f32 %v6306_v63, %v5634_v44  ;;  %v4019_v10 = vpop.eup %4018 }
 0x438   : > { %v2398_v17 = vadd.f32 %v2382_v59, %v5792_v28  ;;  %v2383_v8 = vmul.f32 %v5767_v30, %v2328_v37  ;;  %3580 = vmatprep.mubr.bf16.mxu1 %v2579_v15  ;;  %v1726_v59 = vmul.f32 %v1662_v29, %v5693_v21  ;;  %v5828_v15 = vld [vmem:[#allocation8 + $0x48] sm:$0xff] }
 0x439   : > { %v2553_v22 = vmul.f32 %v2400_v11, %v1718_v27  ;;  %v2401_v12 = vadd.f32 %v2385_v39, %v5795_v19  ;;  %3581 = vmatmul.mubr.bf16.vlgmr.msra.gmra.mrb[64].mxu1 %v2580_v60  ;;  %v5823_v60 = vld [vmem:[#allocation8 + $0x58] sm:$0xff]  ;;  %v1606_v27 = vadd.f32 1.0, %v4013_v57  ;;  %v1722_v11 = vmul.f32 %v1658_v52, %v5699_v41 }
 0x43a   : > { %v2551_v48 = vmul.f32 %v2398_v17, %v1714_v55  ;;  %v2399_v6 = vadd.f32 %v2383_v8, %v5800_v61  ;;  %v1728_v17 = vmul.f32 %v1664_v14, %v5705_v4  ;;  %v1608_v8 = vadd.f32 1.0, %v4017_v53  ;;  %v5855_v14 = vld [vmem:[#allocation8 + $0x78] sm:$0xff] }
 0x43b   : > { %v2554_v40 = vmul.f32 %v2401_v12, %v1720_v36  ;;  %v1604_v36 = vadd.f32 1.0, %v4019_v10  ;;  %v1226_v41 = vmul.f32 %v5813_v33, %v5813_v33  ;;  %v1670_v51 = vmul.f32 0.5, %v1606_v27  ;;  %v5861_v10 = vld [vmem:[#allocation8 + $0x68] sm:$0xff] }
 0x43c   : > { %v2552_v9 = vmul.f32 %v2399_v6, %v1716_v18  ;;  %v3526_v23 = vpop.f32.mrb[40].mxu1  ;;  %v5843_v6 = vld [vmem:[#allocation8 + $0x70] sm:$0xff]  ;;  %v1672_v52 = vmul.f32 0.5, %v1608_v8  ;;  %v6309_v8 = vld [vmem:[#allocation35_spill] sm:$0xff] }
 0x43d   : > { %v2388_v47 = vmul.f32 %v3526_v23, %v5767_v30  ;;  %v2341_v58 = vpop.f32.mrb[41].mxu1  ;;  %v2582_v56 = vpack.c.bf16 %v2554_v40, %v2553_v22  ;;  %v1724_v22 = vmul.f32 %v1660_v42, %v5710_v24  ;;  %v1666_v40 = vmul.f32 0.5, %v1602_v1 }
 0x43e   : > { %v2386_v38 = vmul.f32 %v5767_v30, %v2341_v58  ;;  %v3527_v25 = vpop.f32.mrb[42].mxu1  ;;  %v2581_v3 = vpack.c.bf16 %v2552_v9, %v2551_v48  ;;  %v6307_v48 = vld [vmem:[#allocation30_spill] sm:$0xff]  ;;  %v1230_v24 = vmul.f32 %v5820_v20, %v5820_v20  ;;  %v5848_v9 = vld [vmem:[#allocation8 + $0x60] sm:$0xff]  ;;  %v1668_v53 = vmul.f32 0.5, %v1604_v36  ;;  %v6310_v36 = vld [vmem:[#allocation33_spill] sm:$0xff] }
 0x43f   : > { %v2404_v16 = vadd.f32 %v2388_v47, %v5809_v26  ;;  %v2389_v45 = vmul.f32 %v3527_v25, %v5767_v30  ;;  %v2344_v32 = vpop.f32.mrb[43].mxu1  ;;  %v5841_v18 = vadd.f32 %v6307_v48, %v5634_v44  ;;  %v5852_v47 = vadd.f32 %v6308_v43, %v5634_v44 }
 0x440   : > { %v2402_v39 = vadd.f32 %v2386_v38, %v5816_v5  ;;  %v2387_v37 = vmul.f32 %v5767_v30, %v2344_v32  ;;  %3584 = vmatprep.mubr.bf16.mxu1 %v2581_v3  ;;  %v1290_v38 = vmul.f32 %v1226_v41, %v5813_v33  ;;  %v1734_v25 = vmul.f32 %v1670_v51, %v5714_v31 }
 0x441   : > { %v2557_v55 = vmul.f32 %v2404_v16, %v1726_v59  ;;  %v2405_v21 = vadd.f32 %v2389_v45, %v5823_v60  ;;  %3585 = vmatmul.mubr.bf16.gmra.mrb[68].mxu1 %v2582_v56  ;;  %v1228_v16 = vmul.f32 %v5841_v18, %v5841_v18  ;;  %v1730_v45 = vmul.f32 %v1666_v40, %v5724_v62  ;;  %v6312_v40 = vld [vmem:[#allocation34_spill] sm:$0xff] }
 0x442   : > { %v2555_v34 = vmul.f32 %v2402_v39, %v1722_v11  ;;  %v2403_v57 = vadd.f32 %v2387_v37, %v5828_v15  ;;  %v1294_v11 = vmul.f32 %v1230_v24, %v5820_v20  ;;  %v1736_v39 = vmul.f32 %v1672_v52, %v5738_v35 }
 0x443   : > { %v2558_v12 = vmul.f32 %v2405_v21, %v1728_v17  ;;  %v1232_v1 = vmul.f32 %v5852_v47, %v5852_v47  ;;  %v1732_v17 = vmul.f32 %v1668_v53, %v5730_v7  ;;  %v1292_v35 = vmul.f32 %v1228_v16, %v5841_v18  ;;  %v6311_v7 = vld [vmem:[#allocation36_spill] sm:$0xff] }
 0x444   : > { %v2556_v4 = vmul.f32 %v2403_v57, %v1724_v22  ;;  %v3530_v13 = vpop.f32.mrb[44].mxu1  ;;  %v1354_v57 = vmul.f32 0.044715, %v1290_v38  ;;  %v5882_v41 = vadd.f32 %v6310_v36, %v5634_v44  ;;  %v1358_v51 = vmul.f32 0.044715, %v1294_v11 }
 0x445   : > { %v2392_v29 = vmul.f32 %v3530_v13, %v5767_v30  ;;  %v2357_v23 = vpop.f32.mrb[45].mxu1  ;;  %v2584_v2 = vpack.c.bf16 %v2558_v12, %v2557_v55  ;;  %v1296_v48 = vmul.f32 %v1232_v1, %v5852_v47  ;;  %v5891_v24 = vadd.f32 %v6312_v40, %v5634_v44  ;;  %v6318_v40 = vld [vmem:[#allocation41_spill] sm:$0xff] }
 0x446   : > { %v2390_v58 = vmul.f32 %v5767_v30, %v2357_v23  ;;  %v3531_v56 = vpop.f32.mrb[46].mxu1  ;;  %v2583_v63 = vpack.c.bf16 %v2556_v4, %v2555_v34  ;;  %v5877_v34 = vadd.f32 %v6309_v8, %v5634_v44  ;;  %v5887_v4 = vadd.f32 %v6311_v7, %v5634_v44  ;;  %v6317_v8 = vld [vmem:[#allocation43_spill] sm:$0xff] }
 0x447   : > { %v2408_v42 = vadd.f32 %v2392_v29, %v5843_v6  ;;  %v2393_v3 = vmul.f32 %v3531_v56, %v5767_v30  ;;  %v2360_v59 = vpop.f32.mrb[47].mxu1  ;;  %v1418_v23 = vadd.f32 %v1354_v57, %v5813_v33  ;;  %v1356_v52 = vmul.f32 0.044715, %v1292_v35 }
 0x448   : > { %v2406_v32 = vadd.f32 %v2390_v58, %v5848_v9  ;;  %v2391_v27 = vmul.f32 %v5767_v30, %v2360_v59  ;;  %3588 = vmatprep.mubr.bf16.mxu1 %v2583_v63  ;;  %v1238_v29 = vmul.f32 %v5877_v34, %v5877_v34  ;;  %v1422_v43 = vadd.f32 %v1358_v51, %v5820_v20  ;;  %v6313_v63 = vld [vmem:[#allocation37_spill] sm:$0xff] }
 0x449   : > { %v2561_v31 = vmul.f32 %v2408_v42, %v1734_v25  ;;  %v2409_v37 = vadd.f32 %v2393_v3, %v5855_v14  ;;  %3589 = vmatmul.mubr.bf16.gmra.mrb[72].mxu1 %v2584_v2  ;;  %v1234_v2 = vmul.f32 %v5882_v41, %v5882_v41  ;;  %v1360_v58 = vmul.f32 0.044715, %v1296_v48  ;;  %v6314_v42 = vld [vmem:[#allocation39_spill] sm:$0xff] }
 0x44a   : > { %v2559_v55 = vmul.f32 %v2406_v32, %v1730_v45  ;;  %v2407_v62 = vadd.f32 %v2391_v27, %v5861_v10  ;;  %v1240_v56 = vmul.f32 %v5887_v4, %v5887_v4  ;;  %v1236_v53 = vmul.f32 %v5891_v24, %v5891_v24  ;;  %v6315_v32 = vld [vmem:[#allocation38_spill] sm:$0xff] }
 0x44b   : > { %v2562_v21 = vmul.f32 %v2409_v37, %v1736_v39  ;;  %v5905_v38 = vadd.f32 %v6313_v63, %v5634_v44  ;;  %v1302_v25 = vmul.f32 %v1238_v29, %v5877_v34  ;;  %v5910_v3 = vadd.f32 %v6314_v42, %v5634_v44  ;;  %v6316_v37 = vld [vmem:[#allocation40_spill] sm:$0xff] }
 0x44c   : > { %v2560_v22 = vmul.f32 %v2407_v62, %v1732_v17  ;;  %v1482_v59 = vmul.f32 0.7978846, %v1418_v23  ;;  %v1420_v16 = vadd.f32 %v1356_v52, %v5841_v18  ;;  %v1298_v45 = vmul.f32 %v1234_v2, %v5882_v41  ;;  %v6319_v23 = vld [vmem:[#allocation42_spill] sm:$0xff] }
 0x44d   : > { %v2586_v12 = vpack.c.bf16 %v2562_v21, %v2561_v31  ;;  %v5916_v27 = vadd.f32 %v6315_v32, %v5634_v44  ;;  %v1486_v11 = vmul.f32 0.7978846, %v1422_v43  ;;  %v1424_v31 = vadd.f32 %v1360_v58, %v5852_v47 }
 0x44e   : > { %v2585_v13 = vpack.c.bf16 %v2560_v22, %v2559_v55  ;;  %v1304_v39 = vmul.f32 %v1240_v56, %v5887_v4  ;;  %v5922_v1 = vadd.f32 %v6316_v37, %v5634_v44  ;;  %v1300_v55 = vmul.f32 %v1236_v53, %v5891_v24  ;;  %v6320_v56 = vld [vmem:[#allocation44_spill] sm:$0xff] }
 0x44f   : > { %v1242_v17 = vmul.f32 %v5905_v38, %v5905_v38  ;;  %v1366_v62 = vmul.f32 0.044715, %v1302_v25  ;;  %v1246_v21 = vmul.f32 %v5910_v3, %v5910_v3  ;;  %v5931_v22 = vadd.f32 %v6317_v8, %v5634_v44 }
 0x450   : > { %3592 = vmatprep.mubr.bf16.mxu1 %v2585_v13  ;;  %4020 = vtanh.f32 %v1482_v59  ;;  %v1484_v57 = vmul.f32 0.7978846, %v1420_v16  ;;  %v1362_v35 = vmul.f32 0.044715, %v1298_v45  ;;  %v1244_v36 = vmul.f32 %v5916_v27, %v5916_v27 }
 0x451   : > { %3593 = vmatmul.mubr.bf16.gmra.mrb[76].mxu1 %v2586_v12  ;;  %4022 = vtanh.f32 %v1486_v11  ;;  %v1488_v12 = vmul.f32 0.7978846, %v1424_v31  ;;  %v1368_v51 = vmul.f32 0.044715, %v1304_v39  ;;  %v1248_v48 = vmul.f32 %v5922_v1, %v5922_v1 }
 0x452   : > { %v1364_v7 = vmul.f32 0.044715, %v1300_v55  ;;  %v1306_v13 = vmul.f32 %v1242_v17, %v5905_v38  ;;  %v5940_v29 = vadd.f32 %v6318_v40, %v5634_v44  ;;  %v5944_v52 = vadd.f32 %v6319_v23, %v5634_v44 }
 0x453   : > { %v1430_v2 = vadd.f32 %v1366_v62, %v5877_v34  ;;  %v1310_v43 = vmul.f32 %v1246_v21, %v5910_v3  ;;  %v1254_v58 = vmul.f32 %v5931_v22, %v5931_v22  ;;  %v5952_v53 = vadd.f32 %v6320_v56, %v5634_v44 }
 0x454   : > { %4024 = vtanh.f32 %v1484_v57  ;;  %v1426_v63 = vadd.f32 %v1362_v35, %v5882_v41  ;;  %v1308_v25 = vmul.f32 %v1244_v36, %v5916_v27  ;;  %v1432_v42 = vadd.f32 %v1368_v51, %v5887_v4 }
 0x455   : > { %4026 = vtanh.f32 %v1488_v12  ;;  %v1312_v59 = vmul.f32 %v1248_v48, %v5922_v1  ;;  %v1428_v16 = vadd.f32 %v1364_v7, %v5891_v24  ;;  %v1370_v45 = vmul.f32 0.044715, %v1306_v13 }
 0x456   : > { %v1250_v32 = vmul.f32 %v5940_v29, %v5940_v29  ;;  %v1252_v44 = vmul.f32 %v5944_v52, %v5944_v52  ;;  %v1494_v11 = vmul.f32 0.7978846, %v1430_v2  ;;  %v1374_v31 = vmul.f32 0.044715, %v1310_v43 }
 0x457   : > { %v1318_v39 = vmul.f32 %v1254_v58, %v5931_v22  ;;  %v1256_v37 = vmul.f32 %v5952_v53, %v5952_v53  ;;  %v1490_v55 = vmul.f32 0.7978846, %v1426_v63  ;;  %v1372_v17 = vmul.f32 0.044715, %v1308_v25 }
 0x458   : > { %v1496_v62 = vmul.f32 0.7978846, %v1432_v42  ;;  %v1376_v21 = vmul.f32 0.044715, %v1312_v59  ;;  %v1492_v57 = vmul.f32 0.7978846, %v1428_v16  ;;  %v1434_v35 = vadd.f32 %v1370_v45, %v5905_v38 }
 0x459   : > { %v1314_v36 = vmul.f32 %v1250_v32, %v5940_v29  ;;  %v1316_v12 = vmul.f32 %v1252_v44, %v5944_v52  ;;  %4028 = vtanh.f32 %v1494_v11  ;;  %v1438_v48 = vadd.f32 %v1374_v31, %v5910_v3 }
 0x45a   : > { %v4021_v8 = vpop.eup %4020  ;;  %v1382_v7 = vmul.f32 0.044715, %v1318_v39  ;;  %v1320_v13 = vmul.f32 %v1256_v37, %v5952_v53  ;;  %4030 = vtanh.f32 %v1490_v55  ;;  %v1436_v40 = vadd.f32 %v1372_v17, %v5916_v27 }
 0x45b   : > { %v4023_v51 = vpop.eup %4022  ;;  %4032 = vtanh.f32 %v1496_v62  ;;  %v1440_v23 = vadd.f32 %v1376_v21, %v5922_v1  ;;  %v1498_v43 = vmul.f32 0.7978846, %v1434_v35  ;;  %v1378_v58 = vmul.f32 0.044715, %v1314_v36 }
 0x45c   : > { %4034 = vtanh.f32 %v1492_v57  ;;  %v1380_v56 = vmul.f32 0.044715, %v1316_v12  ;;  %v1502_v25 = vmul.f32 0.7978846, %v1438_v48  ;;  %v1446_v42 = vadd.f32 %v1382_v7, %v5931_v22 }
 0x45d   : > { %v1384_v59 = vmul.f32 0.044715, %v1320_v13  ;;  %v1500_v16 = vmul.f32 0.7978846, %v1436_v40  ;;  %v1614_v45 = vadd.f32 1.0, %v4023_v51  ;;  %v1610_v44 = vadd.f32 1.0, %v4021_v8 }
 0x45e   : > { %v4025_v2 = vpop.eup %4024  ;;  %v1504_v32 = vmul.f32 0.7978846, %v1440_v23  ;;  %4036 = vtanh.f32 %v1498_v43  ;;  %v1442_v11 = vadd.f32 %v1378_v58, %v5940_v29  ;;  %v1444_v31 = vadd.f32 %v1380_v56, %v5944_v52 }
 0x45f   : > { %v4027_v63 = vpop.eup %4026  ;;  %4038 = vtanh.f32 %v1502_v25  ;;  %v1510_v37 = vmul.f32 0.7978846, %v1446_v42  ;;  %v1448_v55 = vadd.f32 %v1384_v59, %v5952_v53  ;;  %v1612_v17 = vadd.f32 1.0, %v4025_v2 }
 0x460   : > { %v1616_v39 = vadd.f32 1.0, %v4027_v63  ;;  %4040 = vtanh.f32 %v1500_v16  ;;  %v1678_v62 = vmul.f32 0.5, %v1614_v45  ;;  %v1674_v35 = vmul.f32 0.5, %v1610_v44 }
 0x461   : > { %4042 = vtanh.f32 %v1504_v32  ;;  %v1506_v12 = vmul.f32 0.7978846, %v1442_v11  ;;  %v1508_v8 = vmul.f32 0.7978846, %v1444_v31  ;;  %v1512_v40 = vmul.f32 0.7978846, %v1448_v55 }
 0x462   : > { %v1680_v7 = vmul.f32 0.5, %v1616_v39  ;;  %4044 = vtanh.f32 %v1510_v37  ;;  %v1676_v2 = vmul.f32 0.5, %v1612_v17  ;;  %v1742_v56 = vmul.f32 %v1678_v62, %v5820_v20 }
 0x463   : > { %v4029_v21 = vpop.eup %4028  ;;  %v1738_v16 = vmul.f32 %v1674_v35, %v5813_v33  ;;  %4046 = vtanh.f32 %v1506_v12 }
 0x464   : > { %v4031_v36 = vpop.eup %4030  ;;  %v1622_v59 = vadd.f32 1.0, %v4029_v21  ;;  %v1744_v31 = vmul.f32 %v1680_v7, %v5852_v47  ;;  %4048 = vtanh.f32 %v1512_v40 }
 0x465   : > { %v4033_v13 = vpop.eup %4032  ;;  %v1618_v44 = vadd.f32 1.0, %v4031_v36  ;;  %4050 = vtanh.f32 %v1508_v8 }
 0x466   : > { %v4035_v58 = vpop.eup %4034  ;;  %v1624_v37 = vadd.f32 1.0, %v4033_v13  ;;  %v1686_v21 = vmul.f32 0.5, %v1622_v59 }
 0x467   : > { %v1620_v17 = vadd.f32 1.0, %v4035_v58  ;;  %v1682_v36 = vmul.f32 0.5, %v1618_v44 }
 0x468   : > { %v4037_v62 = vpop.eup %4036 }
 0x469   : > { %v1626_v59 = vadd.f32 1.0, %v4037_v62 }
 0x46e   : > { %v3550_v57 = vpop.f32.mrb[48].mxu1 }
 0x46f   : > { %v2517_v51 = vmul.f32 %v3550_v57, %v5767_v30  ;;  %v2452_v48 = vpop.f32.mrb[49].mxu1 }
 0x470   : > { %v2515_v23 = vmul.f32 %v5767_v30, %v2452_v48  ;;  %v3551_v43 = vpop.f32.mrb[50].mxu1  ;;  %v1688_v48 = vmul.f32 0.5, %v1624_v37 }
 0x471   : > { %v2533_v63 = vadd.f32 %v2517_v51, %v5769_v50  ;;  %v2518_v25 = vmul.f32 %v3551_v43, %v5767_v30  ;;  %v2455_v42 = vpop.f32.mrb[51].mxu1  ;;  %v1740_v50 = vmul.f32 %v1676_v2, %v5841_v18  ;;  %v1750_v43 = vmul.f32 %v1686_v21, %v5877_v34 }
 0x472   : > { %v2531_v45 = vadd.f32 %v2515_v23, %v5772_v0  ;;  %v2516_v32 = vmul.f32 %v5767_v30, %v2455_v42  ;;  %v4039_v0 = vpop.eup %4038  ;;  %v1684_v23 = vmul.f32 0.5, %v1620_v17 }
 0x473   : > { %v2565_v11 = vmul.f32 %v2533_v63, %v1742_v56  ;;  %v2534_v39 = vadd.f32 %v2518_v25, %v5775_v54  ;;  %v4041_v51 = vpop.eup %4040  ;;  %v1630_v56 = vadd.f32 1.0, %v4039_v0  ;;  %v1746_v63 = vmul.f32 %v1682_v36, %v5882_v41 }
 0x474   : > { %v2563_v20 = vmul.f32 %v2531_v45, %v1738_v16  ;;  %v2532_v55 = vadd.f32 %v2516_v32, %v5780_v49  ;;  %v4043_v18 = vpop.eup %4042  ;;  %v1752_v45 = vmul.f32 %v1688_v48, %v5887_v4  ;;  %v1748_v44 = vmul.f32 %v1684_v23, %v5891_v24 }
 0x475   : > { %v2566_v33 = vmul.f32 %v2534_v39, %v1744_v31  ;;  %v4045_v8 = vpop.eup %4044  ;;  %v1628_v31 = vadd.f32 1.0, %v4041_v51  ;;  %v1694_v39 = vmul.f32 0.5, %v1630_v56 }
 0x476   : > { %v2564_v57 = vmul.f32 %v2532_v55, %v1740_v50  ;;  %v3554_v35 = vpop.f32.mrb[52].mxu1  ;;  %v4047_v50 = vpop.eup %4046 }
 0x477   : > { %v2521_v54 = vmul.f32 %v3554_v35, %v5767_v30  ;;  %v2468_v47 = vpop.f32.mrb[53].mxu1  ;;  %v2588_v7 = vpack.c.bf16 %v2566_v33, %v2565_v11  ;;  %v1692_v0 = vmul.f32 0.5, %v1628_v31 }
 0x478   : > { %v2519_v49 = vmul.f32 %v5767_v30, %v2468_v47  ;;  %v3555_v13 = vpop.f32.mrb[54].mxu1  ;;  %v2587_v12 = vpack.c.bf16 %v2564_v57, %v2563_v20  ;;  %v1690_v20 = vmul.f32 0.5, %v1626_v59 }
 0x479   : > { %v2537_v40 = vadd.f32 %v2521_v54, %v5789_v46  ;;  %v2522_v2 = vmul.f32 %v3555_v13, %v5767_v30  ;;  %v2471_v58 = vpop.f32.mrb[55].mxu1  ;;  %v1632_v46 = vadd.f32 1.0, %v4043_v18  ;;  %v1638_v54 = vadd.f32 1.0, %v4045_v8 }
 0x47a   : > { %v2535_v25 = vadd.f32 %v2519_v49, %v5792_v28  ;;  %v2520_v42 = vmul.f32 %v5767_v30, %v2471_v58  ;;  %3596 = vmatprep.mubr.bf16.mxu1 %v2587_v12  ;;  %v1754_v47 = vmul.f32 %v1690_v20, %v5905_v38  ;;  %v1634_v18 = vadd.f32 1.0, %v4047_v50 }
 0x47b   : > { %v2569_v16 = vmul.f32 %v2537_v40, %v1750_v43  ;;  %v2538_v34 = vadd.f32 %v2522_v2, %v5795_v19  ;;  %3597 = vmatmul.mubr.bf16.gmra.mrb[80].mxu1 %v2588_v7  ;;  %v1696_v4 = vmul.f32 0.5, %v1632_v46  ;;  %v4049_v19 = vpop.eup %4048  ;;  %v1756_v12 = vmul.f32 %v1692_v0, %v5916_v27 }
 0x47c   : > { %v2567_v32 = vmul.f32 %v2535_v25, %v1746_v63  ;;  %v2536_v11 = vadd.f32 %v2520_v42, %v5800_v61  ;;  %v4051_v57 = vpop.eup %4050  ;;  %v1758_v61 = vmul.f32 %v1694_v39, %v5910_v3  ;;  %v1640_v3 = vadd.f32 1.0, %v4049_v19  ;;  %v4053_v19 = vld [vmem:[%s4646_s5 + $0x10] sm:$0xff] }
 0x47d   : > { %v2570_v41 = vmul.f32 %v2538_v34, %v1752_v45  ;;  %v1760_v13 = vmul.f32 %v1696_v4, %v5922_v1  ;;  %v1636_v40 = vadd.f32 1.0, %v4051_v57  ;;  %v1702_v2 = vmul.f32 0.5, %v1638_v54 }
 0x47e   : > { %v2568_v28 = vmul.f32 %v2536_v11, %v1748_v44  ;;  %v3558_v37 = vpop.f32.mrb[56].mxu1  ;;  %v1698_v56 = vmul.f32 0.5, %v1634_v18  ;;  %v1704_v25 = vmul.f32 0.5, %v1640_v3 }
 0x47f   : > { %v2525_v55 = vmul.f32 %v3558_v37, %v5767_v30  ;;  %v2484_v17 = vpop.f32.mrb[57].mxu1  ;;  %v2590_v62 = vpack.c.bf16 %v2570_v41, %v2569_v16  ;;  %v1700_v59 = vmul.f32 0.5, %v1636_v40  ;;  %v1766_v27 = vmul.f32 %v1702_v2, %v5931_v22 }
 0x480   : > { %v2523_v33 = vmul.f32 %v5767_v30, %v2484_v17  ;;  %v3559_v21 = vpop.f32.mrb[58].mxu1  ;;  %v2589_v24 = vpack.c.bf16 %v2568_v28, %v2567_v32  ;;  %v1762_v46 = vmul.f32 %v1698_v56, %v5940_v29  ;;  %v1768_v31 = vmul.f32 %v1704_v25, %v5952_v53 }
 0x481   : > { %v2541_v35 = vadd.f32 %v2525_v55, %v5809_v26  ;;  %v2526_v36 = vmul.f32 %v3559_v21, %v5767_v30  ;;  %v2487_v51 = vpop.f32.mrb[59].mxu1  ;;  %v1764_v22 = vmul.f32 %v1700_v59, %v5944_v52  ;;  %v4054_v21 = vld [vmem:[%s4646_s5 + $0x18] sm:$0xff] }
 0x482   : > { %v2539_v48 = vadd.f32 %v2523_v33, %v5816_v5  ;;  %v2524_v7 = vmul.f32 %v5767_v30, %v2487_v51  ;;  %3600 = vmatprep.mubr.bf16.mxu1 %v2589_v24  ;;  %v4055_v24 = vld [vmem:[%s4646_s5] sm:$0xff] }
 0x483   : > { %v2573_v49 = vmul.f32 %v2541_v35, %v1758_v61  ;;  %v2542_v23 = vadd.f32 %v2526_v36, %v5823_v60  ;;  %3601 = vmatmul.mubr.bf16.gmra.mrb[84].mxu1 %v2590_v62  ;;  %v4056_v61 = vld [vmem:[%s4646_s5 + $0x8] sm:$0xff] }
 0x484   : > { %v2571_v26 = vmul.f32 %v2539_v48, %v1754_v47  ;;  %v2540_v43 = vadd.f32 %v2524_v7, %v5828_v15 }
 0x485   : > { %v2574_v38 = vmul.f32 %v2542_v23, %v1760_v13  ;;  %v6321_v23 = vmov 0  }
 0x486   : > { %v2572_v5 = vmul.f32 %v2540_v43, %v1756_v12  ;;  %v3562_v58 = vpop.f32.mrb[60].mxu1  ;;  %v4058_v43 = vld [vmem:[%s4646_s5 + $0x38] sm:$0xff] }
 0x487   : > { %v2529_v8 = vmul.f32 %v3562_v58, %v5767_v30  ;;  %v2500_v63 = vpop.f32.mrb[61].mxu1  ;;  %v2592_v1 = vpack.c.bf16 %v2574_v38, %v2573_v49  ;;  %v4059_v38 = vld [vmem:[%s4646_s5 + $0x20] sm:$0xff] }
 0x488   : > { %v2527_v60 = vmul.f32 %v5767_v30, %v2500_v63  ;;  %v3563_v42 = vpop.f32.mrb[62].mxu1  ;;  %v2591_v16 = vpack.c.bf16 %v2572_v5, %v2571_v26  ;;  %v4057_v26 = vld [vmem:[%s4646_s5 + $0x30] sm:$0xff]  ;;  %v4060_v5 = vld [vmem:[%s4646_s5 + $0x28] sm:$0xff] }
 0x489   : > { %v2545_v15 = vadd.f32 %v2529_v8, %v5843_v6  ;;  %v2530_v45 = vmul.f32 %v3563_v42, %v5767_v30  ;;  %v2503_v34 = vpop.f32.mrb[63].mxu1 }
 0x48a   : > { %v2543_v32 = vadd.f32 %v2527_v60, %v5848_v9  ;;  %v2528_v44 = vmul.f32 %v5767_v30, %v2503_v34  ;;  %3604 = vmatprep.mubr.bf16.mxu1 %v2591_v16  ;;  %v3793_v30 = vld [vmem:[#allocation11 + $0x70] ss:$8 sps:$4 sm:$0xff]   ;;  %v3795_v9 = vld [vmem:[#allocation11 + $0x74] ss:$8 sps:$4 sm:$0xff]  }
 0x48b   : > { %v2577_v11 = vmul.f32 %v2545_v15, %v1766_v27  ;;  %v2546_v41 = vadd.f32 %v2530_v45, %v5855_v14  ;;  %3605 = vmatmul.mubr.bf16.gmra.mrb[88].mxu1 %v2592_v1  ;;  %2985 = vmatprep.subr.bf16.mxu0 %v3795_v9  ;;  %v6028_v14 = vld [vmem:[%s6234_s7] ss:$0 sm:$0xff]  ;;  %v4061_v15 = vld [vmem:[%s4646_s5 + $0x50] sm:$0xff]  ;;  %v4062_v34 = vld [vmem:[%s4646_s5 + $0x58] sm:$0xff] }
 0x48c   : > { %v2575_v39 = vmul.f32 %v2543_v32, %v1762_v46  ;;  %v2544_v6 = vadd.f32 %v2528_v44, %v5861_v10  ;;  %2986 = vmatpush1.bf16.msra.mxu0 %v3793_v30  ;;  %v4063_v32 = vld [vmem:[%s4646_s5 + $0x40] sm:$0xff] }
 0x48d   : > { %v2578_v28 = vmul.f32 %v2546_v41, %v1768_v31 }
 0x48e   : > { %v2576_v37 = vmul.f32 %v2544_v6, %v1764_v22 }
 0x48f   : > { %v2594_v20 = vpack.c.bf16 %v2578_v28, %v2577_v11  ;;  %v4064_v11 = vld [vmem:[%s4646_s5 + $0x48] sm:$0xff] }
 0x490   : > { %v2593_v29 = vpack.c.bf16 %v2576_v37, %v2575_v39 }
 0x492   : > { %3608 = vmatprep.mubr.bf16.mxu1 %v2593_v29 }
 0x493   : > { %3609 = vmatmul.mubr.bf16.gmra.mrb[92].mxu1 %v2594_v20 }
 0x50c   : > { %v3582_v10 = vpop.f32.mrb[64].mxu1 }
 0x50d   : > { %v2709_v52 = vadd.f32 %v3582_v10, %v6028_v14  ;;  %v2700_v53 = vpop.f32.mrb[65].mxu1  ;;  %v4065_v10 = vld [vmem:[%s4646_s5 + $0x70] sm:$0xff] }
 0x50e   : > { %v2701_v50 = vadd.f32 %v6028_v14, %v2700_v53  ;;  %v3583_v55 = vpop.f32.mrb[66].mxu1  ;;  %v4066_v53 = vld [vmem:[%s4646_s5 + $0x78] sm:$0xff] }
 0x50f   : > { %v2712_v17 = vadd.f32 %v3583_v55, %v6028_v14  ;;  %v2703_v4 = vpop.f32.mrb[67].mxu1  ;;  %v2829_v33 = vadd.f32 %v4053_v19, %v2709_v52  ;;  %v4067_v55 = vld [vmem:[%s4646_s5 + $0x60] sm:$0xff] }
 0x510   : > { %v2704_v62 = vadd.f32 %v6028_v14, %v2703_v4  ;;  %v2827_v57 = vadd.f32 %v4055_v24, %v2701_v50  ;;  %v4068_v4 = vld [vmem:[%s4646_s5 + $0x68] sm:$0xff] }
 0x511   : > { %v2830_v0 = vadd.f32 %v4054_v21, %v2712_v17 }
 0x512   : > { %v2828_v35 = vadd.f32 %v4056_v61, %v2704_v62 }
 0x513   : > { %v2860_v36 = vpack.c.bf16 %v2830_v0, %v2829_v33 }
 0x514   : > { %v2859_v51 = vpack.c.bf16 %v2828_v35, %v2827_v57  ;;  %v3586_v54 = vpop.f32.mrb[68].mxu1 }
 0x515   : > { %v2725_v47 = vadd.f32 %v3586_v54, %v6028_v14  ;;  %v2716_v48 = vpop.f32.mrb[69].mxu1  ;;  %v4069_v54 = vld [vmem:[%s4646_s5 + $0x90] sm:$0xff] }
 0x516   : > { %v2717_v7 = vadd.f32 %v6028_v14, %v2716_v48  ;;  %v3587_v18 = vpop.f32.mrb[70].mxu1  ;;  %3004 = vmatmul.mubr.bf16.vlgmr.msra.gmra.mrb[32].mxu0 %v2859_v51  ;;  %v4070_v48 = vld [vmem:[%s4646_s5 + $0x98] sm:$0xff] }
 0x517   : > { %v2728_v49 = vadd.f32 %v3587_v18, %v6028_v14  ;;  %v2719_v13 = vpop.f32.mrb[71].mxu1  ;;  %3013 = vmatprep.mubr.bf16.mxu0 %v6321_v23  ;;  %v2833_v12 = vadd.f32 %v4057_v26, %v2725_v47  ;;  %v4071_v18 = vld [vmem:[%s4646_s5 + $0x80] sm:$0xff] }
 0x518   : > { %v2720_v3 = vadd.f32 %v6028_v14, %v2719_v13  ;;  %v2831_v2 = vadd.f32 %v4059_v38, %v2717_v7  ;;  %v4072_v13 = vld [vmem:[%s4646_s5 + $0x88] sm:$0xff] }
 0x519   : > { %v2834_v40 = vadd.f32 %v4058_v43, %v2728_v49 }
 0x51a   : > { %v2832_v58 = vadd.f32 %v4060_v5, %v2720_v3 }
 0x51b   : > { %v2862_v56 = vpack.c.bf16 %v2834_v40, %v2833_v12 }
 0x51c   : > { %v3590_v8 = vpop.f32.mrb[72].mxu1  ;;  %v2861_v63 = vpack.c.bf16 %v2832_v58, %v2831_v2 }
 0x51d   : > { %v2741_v25 = vadd.f32 %v3590_v8, %v6028_v14  ;;  %v2732_v1 = vpop.f32.mrb[73].mxu1 }
 0x51e   : > { %v2733_v60 = vadd.f32 %v6028_v14, %v2732_v1  ;;  %v3591_v42 = vpop.f32.mrb[74].mxu1  ;;  %3014 = vmatmul.mubr.bf16.gmra.mrb[36].mxu0 %v2860_v36  ;;  %v4074_v1 = vld [vmem:[%s4646_s5 + $0xb8] sm:$0xff] }
 0x51f   : > { %v2744_v59 = vadd.f32 %v3591_v42, %v6028_v14  ;;  %v2735_v16 = vpop.f32.mrb[75].mxu1  ;;  %3023 = vmatprep.mubr.bf16.mxu0 %v6321_v23  ;;  %v2837_v45 = vadd.f32 %v4061_v15, %v2741_v25  ;;  %v4075_v42 = vld [vmem:[%s4646_s5 + $0xa0] sm:$0xff] }
 0x520   : > { %v2736_v27 = vadd.f32 %v6028_v14, %v2735_v16  ;;  %v2835_v44 = vadd.f32 %v4063_v32, %v2733_v60  ;;  %v4076_v16 = vld [vmem:[%s4646_s5 + $0xa8] sm:$0xff] }
 0x521   : > { %v2838_v46 = vadd.f32 %v4062_v34, %v2744_v59 }
 0x522   : > { %v2836_v31 = vadd.f32 %v4064_v11, %v2736_v27 }
 0x523   : > { %v2864_v41 = vpack.c.bf16 %v2838_v46, %v2837_v45 }
 0x524   : > { %v3594_v39 = vpop.f32.mrb[76].mxu1  ;;  %v2863_v22 = vpack.c.bf16 %v2836_v31, %v2835_v44 }
 0x525   : > { %v2757_v6 = vadd.f32 %v3594_v39, %v6028_v14  ;;  %v2748_v28 = vpop.f32.mrb[77].mxu1 }
 0x526   : > { %v2749_v37 = vadd.f32 %v6028_v14, %v2748_v28  ;;  %v3595_v20 = vpop.f32.mrb[78].mxu1  ;;  %3024 = vmatmul.mubr.bf16.gmra.mrb[40].mxu0 %v2861_v63  ;;  %v4073_v63 = vld [vmem:[%s4646_s5 + $0xb0] sm:$0xff]  ;;  %v4078_v28 = vld [vmem:[%s4646_s5 + $0xd8] sm:$0xff] }
 0x527   : > { %v2760_v29 = vadd.f32 %v3595_v20, %v6028_v14  ;;  %v2751_v30 = vpop.f32.mrb[79].mxu1  ;;  %3033 = vmatprep.mubr.bf16.mxu0 %v6321_v23  ;;  %v2841_v52 = vadd.f32 %v4065_v10, %v2757_v6  ;;  %v4079_v20 = vld [vmem:[%s4646_s5 + $0xc0] sm:$0xff] }
 0x528   : > { %v2752_v9 = vadd.f32 %v6028_v14, %v2751_v30  ;;  %v2839_v17 = vadd.f32 %v4067_v55, %v2749_v37  ;;  %v4080_v30 = vld [vmem:[%s4646_s5 + $0xc8] sm:$0xff] }
 0x529   : > { %v2842_v50 = vadd.f32 %v4066_v53, %v2760_v29 }
 0x52a   : > { %v2840_v62 = vadd.f32 %v4068_v4, %v2752_v9 }
 0x52b   : > { %v2866_v19 = vpack.c.bf16 %v2842_v50, %v2841_v52 }
 0x52c   : > { %v2865_v33 = vpack.c.bf16 %v2840_v62, %v2839_v17 }
 0x52e   : > { %3034 = vmatmul.mubr.bf16.gmra.mrb[44].mxu0 %v2862_v56 }
 0x52f   : > { %3043 = vmatprep.mubr.bf16.mxu0 %v6321_v23 }
 0x536   : > { %3044 = vmatmul.mubr.bf16.gmra.mrb[48].mxu0 %v2863_v22  ;;  %v4077_v22 = vld [vmem:[%s4646_s5 + $0xd0] sm:$0xff] }
 0x537   : > { %3053 = vmatprep.mubr.bf16.mxu0 %v6321_v23 }
 0x53e   : > { %3054 = vmatmul.mubr.bf16.gmra.mrb[52].mxu0 %v2864_v41 }
 0x53f   : > { %3063 = vmatprep.mubr.bf16.mxu0 %v6321_v23 }
 0x546   : > { %3064 = vmatmul.mubr.bf16.gmra.mrb[56].mxu0 %v2865_v33 }
 0x547   : > { %3073 = vmatprep.mubr.bf16.mxu0 %v6321_v23 }
 0x54e   : > { %v3598_v21 = vpop.f32.mrb[80].mxu1  ;;  %3074 = vmatmul.mubr.bf16.gmra.mrb[60].mxu0 %v2866_v19 }
 0x54f   : > { %v2773_v0 = vadd.f32 %v3598_v21, %v6028_v14  ;;  %v2764_v24 = vpop.f32.mrb[81].mxu1  ;;  %3083 = vmatprep.mubr.bf16.mxu0 %v6321_v23  ;;  %v4081_v21 = vld [vmem:[%s4646_s5 + $0xf0] sm:$0xff] }
 0x550   : > { %v2765_v57 = vadd.f32 %v6028_v14, %v2764_v24  ;;  %v3599_v61 = vpop.f32.mrb[82].mxu1  ;;  %v4082_v24 = vld [vmem:[%s4646_s5 + $0xf8] sm:$0xff] }
 0x551   : > { %v2776_v35 = vadd.f32 %v3599_v61, %v6028_v14  ;;  %v2767_v36 = vpop.f32.mrb[83].mxu1  ;;  %v2845_v47 = vadd.f32 %v4069_v54, %v2773_v0  ;;  %v4083_v61 = vld [vmem:[%s4646_s5 + $0xe0] sm:$0xff] }
 0x552   : > { %v2768_v51 = vadd.f32 %v6028_v14, %v2767_v36  ;;  %v2843_v49 = vadd.f32 %v4071_v18, %v2765_v57  ;;  %v4084_v36 = vld [vmem:[%s4646_s5 + $0xe8] sm:$0xff] }
 0x553   : > { %v2846_v7 = vadd.f32 %v4070_v48, %v2776_v35 }
 0x554   : > { %v2844_v3 = vadd.f32 %v4072_v13, %v2768_v51 }
 0x555   : > { %v2868_v26 = vpack.c.bf16 %v2846_v7, %v2845_v47 }
 0x556   : > { %v3602_v12 = vpop.f32.mrb[84].mxu1  ;;  %v2867_v43 = vpack.c.bf16 %v2844_v3, %v2843_v49 }
 0x557   : > { %v2789_v40 = vadd.f32 %v3602_v12, %v6028_v14  ;;  %v2780_v38 = vpop.f32.mrb[85].mxu1 }
 0x558   : > { %v2781_v2 = vadd.f32 %v6028_v14, %v2780_v38  ;;  %v3603_v5 = vpop.f32.mrb[86].mxu1  ;;  %3084 = vmatmul.mubr.bf16.gmra.mrb[64].mxu0 %v2867_v43 }
 0x559   : > { %v2792_v58 = vadd.f32 %v3603_v5, %v6028_v14  ;;  %v2783_v56 = vpop.f32.mrb[87].mxu1  ;;  %3093 = vmatprep.mubr.bf16.mxu0 %v6321_v23  ;;  %v2849_v25 = vadd.f32 %v4073_v63, %v2789_v40 }
 0x55a   : > { %v2784_v8 = vadd.f32 %v6028_v14, %v2783_v56  ;;  %v2847_v59 = vadd.f32 %v4075_v42, %v2781_v2 }
 0x55b   : > { %v2850_v60 = vadd.f32 %v4074_v1, %v2792_v58 }
 0x55c   : > { %v2848_v27 = vadd.f32 %v4076_v16, %v2784_v8 }
 0x55d   : > { %v2870_v15 = vpack.c.bf16 %v2850_v60, %v2849_v25 }
 0x55e   : > { %v3606_v45 = vpop.f32.mrb[88].mxu1  ;;  %v2869_v34 = vpack.c.bf16 %v2848_v27, %v2847_v59 }
 0x55f   : > { %v2805_v46 = vadd.f32 %v3606_v45, %v6028_v14  ;;  %v2796_v32 = vpop.f32.mrb[89].mxu1 }
 0x560   : > { %v2797_v44 = vadd.f32 %v6028_v14, %v2796_v32  ;;  %v3607_v11 = vpop.f32.mrb[90].mxu1  ;;  %3094 = vmatmul.mubr.bf16.gmra.mrb[68].mxu0 %v2868_v26 }
 0x561   : > { %v2808_v31 = vadd.f32 %v3607_v11, %v6028_v14  ;;  %v2799_v41 = vpop.f32.mrb[91].mxu1  ;;  %3103 = vmatprep.mubr.bf16.mxu0 %v6321_v23  ;;  %v2853_v6 = vadd.f32 %v4077_v22, %v2805_v46 }
 0x562   : > { %v2800_v39 = vadd.f32 %v6028_v14, %v2799_v41  ;;  %v2851_v29 = vadd.f32 %v4079_v20, %v2797_v44 }
 0x563   : > { %v2854_v37 = vadd.f32 %v4078_v28, %v2808_v31 }
 0x564   : > { %v2852_v9 = vadd.f32 %v4080_v30, %v2800_v39 }
 0x565   : > { %v2872_v10 = vpack.c.bf16 %v2854_v37, %v2853_v6 }
 0x566   : > { %v3610_v52 = vpop.f32.mrb[92].mxu1  ;;  %v2871_v53 = vpack.c.bf16 %v2852_v9, %v2851_v29 }
 0x567   : > { %v2821_v50 = vadd.f32 %v3610_v52, %v6028_v14  ;;  %v2812_v55 = vpop.f32.mrb[93].mxu1 }
 0x568   : > { %v2813_v17 = vadd.f32 %v6028_v14, %v2812_v55  ;;  %v3611_v4 = vpop.f32.mrb[94].mxu1  ;;  %3104 = vmatmul.mubr.bf16.gmra.mrb[72].mxu0 %v2869_v34 }
 0x569   : > { %v2824_v62 = vadd.f32 %v3611_v4, %v6028_v14  ;;  %v2815_v19 = vpop.f32.mrb[95].mxu1  ;;  %3113 = vmatprep.mubr.bf16.mxu0 %v6321_v23  ;;  %v2857_v0 = vadd.f32 %v4081_v21, %v2821_v50 }
 0x56a   : > { %v2816_v33 = vadd.f32 %v6028_v14, %v2815_v19  ;;  %v2855_v35 = vadd.f32 %v4083_v61, %v2813_v17 }
 0x56b   : > { %v2858_v57 = vadd.f32 %v4082_v24, %v2824_v62 }
 0x56c   : > { %v2856_v51 = vadd.f32 %v4084_v36, %v2816_v33 }
 0x56d   : > { %v2874_v54 = vpack.c.bf16 %v2858_v57, %v2857_v0 }
 0x56e   : > { %v2873_v47 = vpack.c.bf16 %v2856_v51, %v2855_v35 }
 0x570   : > { %3114 = vmatmul.mubr.bf16.gmra.mrb[76].mxu0 %v2870_v15 }
 0x571   : > { %3123 = vmatprep.mubr.bf16.mxu0 %v6321_v23 }
 0x578   : > { %3124 = vmatmul.mubr.bf16.gmra.mrb[80].mxu0 %v2871_v53 }
 0x579   : > { %3133 = vmatprep.mubr.bf16.mxu0 %v6321_v23 }
 0x580   : > { %3134 = vmatmul.mubr.bf16.gmra.mrb[84].mxu0 %v2872_v10 }
 0x581   : > { %3143 = vmatprep.mubr.bf16.mxu0 %v6321_v23 }
 0x588   : > { %3144 = vmatmul.mubr.bf16.gmra.mrb[88].mxu0 %v2873_v47 }
 0x589   : > { %3153 = vmatprep.mubr.bf16.mxu0 %v6321_v23 }
 0x590   : > { %3154 = vmatmul.mubr.bf16.gmra.mrb[92].mxu0 %v2874_v54 }
 0x5e9   : > { %v3005_v14 = vpop.f32.mrb[32].mxu0 }
 0x5ea   : > { %3164 = vst [vmem:[%s6110_s24] sm:$0xff] %v3005_v14  ;;  %v3007_v48 = vpop.f32.mrb[33].mxu0 }
 0x5eb   : > { %3165 = vst [vmem:[%s6110_s24 + $0x8] sm:$0xff] %v3007_v48  ;;  %v3009_v7 = vpop.f32.mrb[34].mxu0 }
 0x5ec   : > { %3166 = vst [vmem:[%s6110_s24 + $0x10] sm:$0xff] %v3009_v7  ;;  %v3011_v23 = vpop.f32.mrb[35].mxu0 }
 0x5ed   : > { %3167 = vst [vmem:[%s6110_s24 + $0x18] sm:$0xff] %v3011_v23 }
 0x5f1   : > { %v3015_v18 = vpop.f32.mrb[36].mxu0 }
 0x5f2   : > { %3168 = vst [vmem:[%s6110_s24 + $0x20] sm:$0xff] %v3015_v18  ;;  %v3017_v49 = vpop.f32.mrb[37].mxu0 }
 0x5f3   : > { %3169 = vst [vmem:[%s6110_s24 + $0x28] sm:$0xff] %v3017_v49  ;;  %v3019_v13 = vpop.f32.mrb[38].mxu0 }
 0x5f4   : > { %3170 = vst [vmem:[%s6110_s24 + $0x30] sm:$0xff] %v3019_v13  ;;  %v3021_v3 = vpop.f32.mrb[39].mxu0 }
 0x5f5   : > { %3171 = vst [vmem:[%s6110_s24 + $0x38] sm:$0xff] %v3021_v3 }
 0x5f9   : > { %v3025_v26 = vpop.f32.mrb[40].mxu0 }
 0x5fa   : > { %3172 = vst [vmem:[%s6110_s24 + $0x40] sm:$0xff] %v3025_v26  ;;  %v3027_v12 = vpop.f32.mrb[41].mxu0 }
 0x5fb   : > { %3173 = vst [vmem:[%s6110_s24 + $0x48] sm:$0xff] %v3027_v12  ;;  %v3029_v43 = vpop.f32.mrb[42].mxu0 }
 0x5fc   : > { %3174 = vst [vmem:[%s6110_s24 + $0x50] sm:$0xff] %v3029_v43  ;;  %v3031_v40 = vpop.f32.mrb[43].mxu0 }
 0x5fd   : > { %3175 = vst [vmem:[%s6110_s24 + $0x58] sm:$0xff] %v3031_v40 }
 0x601   : > { %v3035_v38 = vpop.f32.mrb[44].mxu0 }
 0x602   : > { %3176 = vst [vmem:[%s6110_s24 + $0x60] sm:$0xff] %v3035_v38  ;;  %v3037_v2 = vpop.f32.mrb[45].mxu0 }
 0x603   : > { %3177 = vst [vmem:[%s6110_s24 + $0x68] sm:$0xff] %v3037_v2  ;;  %v3039_v5 = vpop.f32.mrb[46].mxu0 }
 0x604   : > { %3178 = vst [vmem:[%s6110_s24 + $0x70] sm:$0xff] %v3039_v5  ;;  %v3041_v58 = vpop.f32.mrb[47].mxu0 }
 0x605   : > { %3179 = vst [vmem:[%s6110_s24 + $0x78] sm:$0xff] %v3041_v58 }
 0x609   : > { %v3045_v56 = vpop.f32.mrb[48].mxu0 }
 0x60a   : > { %3180 = vst [vmem:[%s6110_s24 + $0x80] sm:$0xff] %v3045_v56  ;;  %v3047_v8 = vpop.f32.mrb[49].mxu0 }
 0x60b   : > { %3181 = vst [vmem:[%s6110_s24 + $0x88] sm:$0xff] %v3047_v8  ;;  %v3049_v63 = vpop.f32.mrb[50].mxu0 }
 0x60c   : > { %3182 = vst [vmem:[%s6110_s24 + $0x90] sm:$0xff] %v3049_v63  ;;  %v3051_v25 = vpop.f32.mrb[51].mxu0 }
 0x60d   : > { %3183 = vst [vmem:[%s6110_s24 + $0x98] sm:$0xff] %v3051_v25 }
 0x611   : > { %v3055_v1 = vpop.f32.mrb[52].mxu0 }
 0x612   : > { %3184 = vst [vmem:[%s6110_s24 + $0xa0] sm:$0xff] %v3055_v1  ;;  %v3057_v60 = vpop.f32.mrb[53].mxu0 }
 0x613   : > { %3185 = vst [vmem:[%s6110_s24 + $0xa8] sm:$0xff] %v3057_v60  ;;  %v3059_v42 = vpop.f32.mrb[54].mxu0 }
 0x614   : > { %3186 = vst [vmem:[%s6110_s24 + $0xb0] sm:$0xff] %v3059_v42  ;;  %v3061_v59 = vpop.f32.mrb[55].mxu0 }
 0x615   : > { %3187 = vst [vmem:[%s6110_s24 + $0xb8] sm:$0xff] %v3061_v59 }
 0x619   : > { %v3065_v16 = vpop.f32.mrb[56].mxu0 }
 0x61a   : > { %3188 = vst [vmem:[%s6110_s24 + $0xc0] sm:$0xff] %v3065_v16  ;;  %v3067_v27 = vpop.f32.mrb[57].mxu0 }
 0x61b   : > { %3189 = vst [vmem:[%s6110_s24 + $0xc8] sm:$0xff] %v3067_v27  ;;  %v3069_v15 = vpop.f32.mrb[58].mxu0 }
 0x61c   : > { %3190 = vst [vmem:[%s6110_s24 + $0xd0] sm:$0xff] %v3069_v15  ;;  %v3071_v45 = vpop.f32.mrb[59].mxu0 }
 0x61d   : > { %3191 = vst [vmem:[%s6110_s24 + $0xd8] sm:$0xff] %v3071_v45 }
 0x621   : > { %v3075_v34 = vpop.f32.mrb[60].mxu0 }
 0x622   : > { %3192 = vst [vmem:[%s6110_s24 + $0xe0] sm:$0xff] %v3075_v34  ;;  %v3077_v46 = vpop.f32.mrb[61].mxu0 }
 0x623   : > { %3193 = vst [vmem:[%s6110_s24 + $0xe8] sm:$0xff] %v3077_v46  ;;  %v3079_v32 = vpop.f32.mrb[62].mxu0 }
 0x624   : > { %3194 = vst [vmem:[%s6110_s24 + $0xf0] sm:$0xff] %v3079_v32  ;;  %v3081_v44 = vpop.f32.mrb[63].mxu0 }
 0x625   : > { %3195 = vst [vmem:[%s6110_s24 + $0xf8] sm:$0xff] %v3081_v44 }
 0x62b   : > { %v3085_v11 = vpop.f32.mrb[64].mxu0 }
 0x62c   : > { %3196 = vst [vmem:[%s6110_s24 + $0x100] sm:$0xff] %v3085_v11  ;;  %v3087_v31 = vpop.f32.mrb[65].mxu0 }
 0x62d   : > { %3197 = vst [vmem:[%s6110_s24 + $0x108] sm:$0xff] %v3087_v31  ;;  %v3089_v41 = vpop.f32.mrb[66].mxu0 }
 0x62e   : > { %3198 = vst [vmem:[%s6110_s24 + $0x110] sm:$0xff] %v3089_v41  ;;  %v3091_v39 = vpop.f32.mrb[67].mxu0 }
 0x62f   : > { %3199 = vst [vmem:[%s6110_s24 + $0x118] sm:$0xff] %v3091_v39 }
 0x633   : > { %v3095_v22 = vpop.f32.mrb[68].mxu0 }
 0x634   : > { %3200 = vst [vmem:[%s6110_s24 + $0x120] sm:$0xff] %v3095_v22  ;;  %v3097_v6 = vpop.f32.mrb[69].mxu0 }
 0x635   : > { %3201 = vst [vmem:[%s6110_s24 + $0x128] sm:$0xff] %v3097_v6  ;;  %v3099_v28 = vpop.f32.mrb[70].mxu0 }
 0x636   : > { %3202 = vst [vmem:[%s6110_s24 + $0x130] sm:$0xff] %v3099_v28  ;;  %v3101_v37 = vpop.f32.mrb[71].mxu0 }
 0x637   : > { %3203 = vst [vmem:[%s6110_s24 + $0x138] sm:$0xff] %v3101_v37 }
 0x63b   : > { %v3105_v20 = vpop.f32.mrb[72].mxu0 }
 0x63c   : > { %3204 = vst [vmem:[%s6110_s24 + $0x140] sm:$0xff] %v3105_v20  ;;  %v3107_v29 = vpop.f32.mrb[73].mxu0 }
 0x63d   : > { %3205 = vst [vmem:[%s6110_s24 + $0x148] sm:$0xff] %v3107_v29  ;;  %v3109_v30 = vpop.f32.mrb[74].mxu0 }
 0x63e   : > { %3206 = vst [vmem:[%s6110_s24 + $0x150] sm:$0xff] %v3109_v30  ;;  %v3111_v9 = vpop.f32.mrb[75].mxu0 }
 0x63f   : > { %3207 = vst [vmem:[%s6110_s24 + $0x158] sm:$0xff] %v3111_v9 }
 0x643   : > { %v3115_v10 = vpop.f32.mrb[76].mxu0 }
 0x644   : > { %3208 = vst [vmem:[%s6110_s24 + $0x160] sm:$0xff] %v3115_v10  ;;  %v3117_v52 = vpop.f32.mrb[77].mxu0 }
 0x645   : > { %3209 = vst [vmem:[%s6110_s24 + $0x168] sm:$0xff] %v3117_v52  ;;  %v3119_v53 = vpop.f32.mrb[78].mxu0 }
 0x646   : > { %3210 = vst [vmem:[%s6110_s24 + $0x170] sm:$0xff] %v3119_v53  ;;  %v3121_v50 = vpop.f32.mrb[79].mxu0 }
 0x647   : > { %3211 = vst [vmem:[%s6110_s24 + $0x178] sm:$0xff] %v3121_v50 }
 0x64b   : > { %v3125_v55 = vpop.f32.mrb[80].mxu0 }
 0x64c   : > { %3212 = vst [vmem:[%s6110_s24 + $0x180] sm:$0xff] %v3125_v55  ;;  %v3127_v17 = vpop.f32.mrb[81].mxu0 }
 0x64d   : > { %3213 = vst [vmem:[%s6110_s24 + $0x188] sm:$0xff] %v3127_v17  ;;  %v3129_v4 = vpop.f32.mrb[82].mxu0 }
 0x64e   : > { %3214 = vst [vmem:[%s6110_s24 + $0x190] sm:$0xff] %v3129_v4  ;;  %v3131_v62 = vpop.f32.mrb[83].mxu0 }
 0x64f   : > { %3215 = vst [vmem:[%s6110_s24 + $0x198] sm:$0xff] %v3131_v62 }
 0x653   : > { %v3135_v19 = vpop.f32.mrb[84].mxu0 }
 0x654   : > { %3216 = vst [vmem:[%s6110_s24 + $0x1a0] sm:$0xff] %v3135_v19  ;;  %v3137_v33 = vpop.f32.mrb[85].mxu0 }
 0x655   : > { %3217 = vst [vmem:[%s6110_s24 + $0x1a8] sm:$0xff] %v3137_v33  ;;  %v3139_v21 = vpop.f32.mrb[86].mxu0 }
 0x656   : > { %3218 = vst [vmem:[%s6110_s24 + $0x1b0] sm:$0xff] %v3139_v21  ;;  %v3141_v0 = vpop.f32.mrb[87].mxu0 }
 0x657   : > { %3219 = vst [vmem:[%s6110_s24 + $0x1b8] sm:$0xff] %v3141_v0 }
 0x65b   : > { %v3145_v24 = vpop.f32.mrb[88].mxu0 }
 0x65c   : > { %3220 = vst [vmem:[%s6110_s24 + $0x1c0] sm:$0xff] %v3145_v24  ;;  %v3147_v57 = vpop.f32.mrb[89].mxu0 }
 0x65d   : > { %3221 = vst [vmem:[%s6110_s24 + $0x1c8] sm:$0xff] %v3147_v57  ;;  %v3149_v61 = vpop.f32.mrb[90].mxu0 }
 0x65e   : > { %3222 = vst [vmem:[%s6110_s24 + $0x1d0] sm:$0xff] %v3149_v61  ;;  %v3151_v35 = vpop.f32.mrb[91].mxu0 }
 0x65f   : > { %3223 = vst [vmem:[%s6110_s24 + $0x1d8] sm:$0xff] %v3151_v35 }
 0x663   : > { %v3155_v36 = vpop.f32.mrb[92].mxu0 }
 0x664   : > { %3224 = vst [vmem:[%s6110_s24 + $0x1e0] sm:$0xff] %v3155_v36  ;;  %v3157_v51 = vpop.f32.mrb[93].mxu0 }
 0x665   : > { %3225 = vst [vmem:[%s6110_s24 + $0x1e8] sm:$0xff] %v3157_v51  ;;  %v3159_v54 = vpop.f32.mrb[94].mxu0 }
 0x666   : > { %3226 = vst [vmem:[%s6110_s24 + $0x1f0] sm:$0xff] %v3159_v54  ;;  %v3161_v47 = vpop.f32.mrb[95].mxu0 }
 0x667   : > { %3227 = vst [vmem:[%s6110_s24 + $0x1f8] sm:$0xff] %v3161_v47 }
 0x668   : > { %4268 = shalt.err (!%p4265_p8)
}
 0x669   : > { %s4269_s19 = scalar_lea.hbm %s6178_s14, 8192  ;;  %s4273_s24 = scalar_lea.hbm %s6322_s16, 16384 }
 0x66a   : > { %p4270_p6 = scmp.ne.s32.totalorder %s6178_s14, %s4269_s19  ;;  %p4274_p0 = scmp.lt.u32.totalorder %s6178_s14, %s6322_s16 }
 0x66b   : > { %p4275_p5 = scmp.lt.u32.totalorder %s4273_s24, %s4269_s19  ;;  %p4277_p7 = scmp.lt.u32.totalorder %s4269_s19, %s6178_s14 }
 0x66c   : > { %p4271_p10 = pnand %p4270_p6, %p6323_p4 }
 0x66d   : > { %p4276_p9 = por %p4275_p5, %p4274_p0 }
 0x66e   : > { %p4272_p11 = pneg %p4271_p10 }
 0x66f   : > { %p4278_p12 = por %p4277_p7, %p4276_p9 }
 0x671   : > { %p4279_p13 = pnand %p4278_p12, %p4272_p11 }
 0x673   : > { %4282 = shalt.err (!%p4279_p13)
}
 0x674   : > { %s4347_s5 = smov 256   ;;  %s4348_s9 = smov 16  }
 0x675   : > { %3650 = dma.vmem_to_hbm [thread:$0]  (%p6323_p4), %s6180_s26, 8192, %s6178_s14, %s3229_s15, %s4347_s5, %s4347_s5, %s4348_s9  }
 0x676 PF: > { %s3258_s1 = sand.u32 1, %s4321_s30   ;;  %p6324_p1 = scmp.ne.s32.totalorder %s6260_s22, 0 }
 0x677   : > { %p6325_p3 = scmp.ge.s32.totalorder %s4333_s12, 2  ;;  %s3259_s13 = scalar_lea.sflag [#allocation4], %s3258_s1 }
 0x679   : > { %p3673_p2 = pnand %p6325_p3, %p6324_p1 }
 0x67b   : > { %4316 = dma.done.wait (!%p3673_p2), %s3259_s13, 8192  }
 0x67c   : > { %4318 = vsyncadd (!%p3673_p2), %s3259_s13, 4294959104  ;;  %p25_p8 = scmp.ge.s32.totalorder %s4566_s27, 4   ;;  %s6326_s30 = smov %s4325_s10 }
 0x67d   : > { %s6327_s10 = smov %s4329_s11  ;;  %s6328_s11 = smov %s4578_s20 }
 0x67e   : > { %s6329_s12 = smov %s4566_s27  ;;  %27 = sbr.rel (!%p25_p8) target bundleno = 12 (0xc), region = 121 }
 0x685   :  { %3264 = vsyncpa [#allocation3], 1 }
 0x686   :  { %3266 = vsyncpa [#allocation3 + $0x1], 1 }
 0x687   :  { %3267 = vsyncpa [#allocation6], 1 }
 0x688   :  { %3268 = vsyncpa [#allocation9], 1 }
 0x689   :  { %3269 = vsyncpa [#allocation12], 1 }
 0x68a   :  { %3270 = vsyncpa [#allocation4], 1 }
 0x68b   :  { %3272 = vsyncpa [#allocation4 + $0x1], 1 }

</bundles_post_ra>
